<compile_context>
chip_gen: v7x
topology: tpu7x:2x2x1
jax: 0.10.0
libtpu: 0.0.40
codegen_flags: <defaults>
</compile_context>

<pallas_src>
import functools

import jax
import jax.numpy as jnp
from jax.experimental import pallas as pl
from jax.experimental.pallas import tpu as pltpu


def _pick_vmem_limit_bytes():
    """Per-generation scoped-VMEM budget: 96 MiB on v5e/v6e (128 MiB physical),
    48 MiB on v7x (64 MiB physical per TensorCore) or if the query fails."""
    try:
        cap = int(pltpu.get_tpu_info().vmem_capacity_bytes)
        if cap >= 96 * 1024 * 1024:
            return 96 * 1024 * 1024
    except Exception:
        pass
    return 48 * 1024 * 1024


VMEM_LIMIT_BYTES = _pick_vmem_limit_bytes()
ROW_TARGET = 512     # pooled output rows per grid step (review: 512-1024)


def _pick_h2_block(n_h2, wcols, row_target=ROW_TARGET):
    """Pick B2 = h-pair rows per block.  B2 divides n_h2, the block's pooled-row
    count B2*wcols is sublane-aligned (multiple of 8) unless it is the full extent,
    stays <= row_target when possible, and we split at least once so both v7x
    TensorCores get row work."""
    best = None
    for b2 in range(1, n_h2 + 1):
        if n_h2 % b2:
            continue
        rows = b2 * wcols
        if rows % 8 != 0 and b2 != n_h2:
            continue
        if rows <= row_target:
            best = b2
    if best is None:
        best = n_h2
    if best == n_h2 and n_h2 % 2 == 0 and ((n_h2 // 2) * wcols) % 8 == 0:
        best = n_h2 // 2            # give the two TensorCores disjoint row blocks
    return best


# ----------------------------------------------------------------------------
# Fused stage 0+1:
#   relu(bn_in(conv_in(x))) -> maxpool2x2 -> relu(bn0(conv0(.)))
# conv_in (3->64) runs on the VPU with two RGB pixels packed per lane row and a
# block-diagonal (6, 128) folded weight (output lanes = [pixA 64ch | pixB 64ch]),
# so the w-pair pool max is a lane-half max and the h-pair max a leading-dim max.
# conv0 (64->64, folded BN0) is a single bf16 MXU matmul on the pooled tile.
# ----------------------------------------------------------------------------
def _stage01_kernel(x_ref, wi_ref, bi_ref, w0_ref, b0_ref, o_ref):
    # x_ref : (B2, 2, WH, 6) f32   raw input, w-pair of RGB pixels per lane row
    # wi_ref: (6, 128) f32         block-diag folded conv_in/bn_in weight
    # bi_ref: (1, 128) f32
    # w0_ref: (64, 64) bf16        folded conv0/bn0 weight
    # b0_ref: (1, 64) f32
    # o_ref : (B2*WH, 64) bf16
    xb = x_ref[...]
    wi = wi_ref[...]
    a = (xb[..., 0:1] * wi[0:1, :] + xb[..., 1:2] * wi[1:2, :] +
         xb[..., 2:3] * wi[2:3, :] + xb[..., 3:4] * wi[3:4, :] +
         xb[..., 4:5] * wi[4:5, :] + xb[..., 5:6] * wi[5:6, :] + bi_ref[...])
    a = jnp.maximum(a, 0.0)                               # relu(bn_in(conv_in(x)))
    hm = jnp.maximum(a[:, 0], a[:, 1])                    # (B2, WH, 128) h-pair max
    pooled = jnp.maximum(hm[..., :64], hm[..., 64:])      # (B2, WH, 64)  w-pair max
    p2 = pooled.reshape(-1, 64).astype(jnp.bfloat16)      # layout-free collapse
    acc = jnp.dot(p2, w0_ref[...], preferred_element_type=jnp.float32)
    o_ref[...] = jnp.maximum(acc + b0_ref[...], 0.0).astype(o_ref.dtype)


def stage01_fused(x_nhwc, n, h, w, w_in, b_in, w0, b0):
    hh, wh = h // 2, w // 2
    n_h2 = n * hh
    x4 = x_nhwc.reshape(n_h2, 2, wh, 6)                   # free row-major reshape
    b2 = _pick_h2_block(n_h2, wh)
    tile_rows = b2 * wh
    rows_out = n_h2 * wh
    return pl.pallas_call(
        _stage01_kernel,
        out_shape=jax.ShapeDtypeStruct((rows_out, 64), jnp.bfloat16),
        grid_spec=pltpu.PrefetchScalarGridSpec(
            num_scalar_prefetch=0,
            grid=(n_h2 // b2,),
            in_specs=[
                pl.BlockSpec((b2, 2, wh, 6), lambda i: (i, 0, 0, 0)),
                pl.BlockSpec((6, 128), lambda i: (0, 0)),
                pl.BlockSpec((1, 128), lambda i: (0, 0)),
                pl.BlockSpec((64, 64), lambda i: (0, 0)),
                pl.BlockSpec((1, 64), lambda i: (0, 0)),
            ],
            out_specs=pl.BlockSpec((tile_rows, 64), lambda i: (i, 0)),
        ),
        compiler_params=pltpu.CompilerParams(
            dimension_semantics=("parallel",),
            vmem_limit_bytes=VMEM_LIMIT_BYTES),
    )(x4, w_in, b_in, w0, b0)


# ----------------------------------------------------------------------------
# Fused maxpool2x2 + 1x1 conv (folded BN) + ReLU, M(row)-tiled.
# One grid axis over row blocks ("parallel" -> megacore split over rows); the whole
# (cin, cout) weight (<= 1 MiB for conv1..conv3) stays VMEM-resident via a constant
# index map.  No scratch, no scatter loop: pooled tile is fed directly to the MXU.
# ----------------------------------------------------------------------------
def _pool_conv_kernel(x_ref, w_ref, b_ref, o_ref, *, cin):
    xb = x_ref[...]                                       # (B2, 2, WH, 2*cin) bf16
    hm = jnp.maximum(xb[:, 0], xb[:, 1])                  # h-pair max
    pooled = jnp.maximum(hm[..., :cin], hm[..., cin:])    # w-pair max -> (B2, WH, cin)
    p2 = pooled.reshape(-1, cin)                          # layout-free collapse
    acc = jnp.dot(p2, w_ref[...], preferred_element_type=jnp.float32)
    o_ref[...] = jnp.maximum(acc + b_ref[...], 0.0).astype(o_ref.dtype)


def pool_conv_bn_relu(x_flat, n, h, w, cin, w_mat, bias):
    hh, wh = h // 2, w // 2
    n_h2 = n * hh
    cout = w_mat.shape[1]
    x4 = x_flat.reshape(n_h2, 2, wh, 2 * cin)             # free row-major reshape
    b2 = _pick_h2_block(n_h2, wh)
    tile_rows = b2 * wh
    rows_out = n_h2 * wh
    kernel = functools.partial(_pool_conv_kernel, cin=cin)
    return pl.pallas_call(
        kernel,
        out_shape=jax.ShapeDtypeStruct((rows_out, cout), jnp.bfloat16),
        grid_spec=pltpu.PrefetchScalarGridSpec(
            num_scalar_prefetch=0,
            grid=(n_h2 // b2,),
            in_specs=[
                pl.BlockSpec((b2, 2, wh, 2 * cin), lambda i: (i, 0, 0, 0)),
                pl.BlockSpec((cin, cout), lambda i: (0, 0)),
                pl.BlockSpec((1, cout), lambda i: (0, 0)),
            ],
            out_specs=pl.BlockSpec((tile_rows, cout), lambda i: (i, 0)),
        ),
        compiler_params=pltpu.CompilerParams(
            dimension_semantics=("parallel",),
            vmem_limit_bytes=VMEM_LIMIT_BYTES),
    )(x4, w_mat, bias)


# ----------------------------------------------------------------------------
# Tail: maxpool2x2 + conv4(+BN4) + ReLU + global average pool + fc, fused and
# blocked over cout chunks (tn=512) so conv4/fc weight DMA is double-buffered.
# fc contracts over cout, so partial logits are accumulated across chunks in the
# resident f32 output block; the pooled tile is computed once (pl.when, chunk 0).
# ----------------------------------------------------------------------------
def _tail_kernel(x_ref, w_ref, b_ref, fcw_ref, fcb_ref, o_ref, p_ref, *,
                 cin, n, spatial):
    j = pl.program_id(0)

    @pl.when(j == 0)
    def _():
        xb = x_ref[...]                                    # (n*hh, 2, wh, 2*cin)
        hm = jnp.maximum(xb[:, 0], xb[:, 1])
        pooled = jnp.maximum(hm[..., :cin], hm[..., cin:])
        p_ref[...] = pooled.reshape(n * spatial, cin)

    h1 = jnp.dot(p_ref[...], w_ref[...], preferred_element_type=jnp.float32)
    h1 = jnp.maximum(h1 + b_ref[...], 0.0)                 # relu(bn4(conv4)) chunk
    feat = jnp.mean(h1.reshape(n, spatial, h1.shape[-1]), axis=1)   # avgpool(1,1)
    part = jnp.dot(feat.astype(jnp.bfloat16), fcw_ref[...],
                   preferred_element_type=jnp.float32)     # fc partial (n, ncls_pad)

    @pl.when(j == 0)
    def _():
        o_ref[...] = part + fcb_ref[...]

    @pl.when(j > 0)
    def _():
        o_ref[...] = o_ref[...] + part


def tail_pool_conv_avg_fc(x_flat, n, h, w, cin, w_mat, bias, fc_w, fc_b):
    hh, wh = h // 2, w // 2
    spatial = hh * wh
    cout = w_mat.shape[1]
    ncls_pad = fc_w.shape[1]
    tn = 512 if cout % 512 == 0 else cout
    x4 = x_flat.reshape(n * hh, 2, wh, 2 * cin)
    kernel = functools.partial(_tail_kernel, cin=cin, n=n, spatial=spatial)
    return pl.pallas_call(
        kernel,
        out_shape=jax.ShapeDtypeStruct((n, ncls_pad), jnp.float32),
        grid_spec=pltpu.PrefetchScalarGridSpec(
            num_scalar_prefetch=0,
            grid=(cout // tn,),
            in_specs=[
                pl.BlockSpec((n * hh, 2, wh, 2 * cin), lambda j: (0, 0, 0, 0)),
                pl.BlockSpec((cin, tn), lambda j: (0, j)),
                pl.BlockSpec((1, tn), lambda j: (0, j)),
                pl.BlockSpec((tn, ncls_pad), lambda j: (j, 0)),
                pl.BlockSpec((1, ncls_pad), lambda j: (0, 0)),
            ],
            out_specs=pl.BlockSpec((n, ncls_pad), lambda j: (0, 0)),
            scratch_shapes=[pltpu.VMEM((n * spatial, cin), jnp.bfloat16)],
        ),
        compiler_params=pltpu.CompilerParams(
            dimension_semantics=("arbitrary",),
            vmem_limit_bytes=VMEM_LIMIT_BYTES),
    )(x4, w_mat, bias, fc_w, fc_b)


# ----------------------------------------------------------------------------
# Parameter construction (deterministic, mirrors SAN.__init__ shapes).
# BatchNorm (eval mode) folded into conv weights/biases.
# ----------------------------------------------------------------------------
def _init_conv_bn(key, cin, cout):
    kw, kg, kb, km, kv = jax.random.split(key, 5)
    w = jax.random.normal(kw, (cin, cout), jnp.float32) * (2.0 / cin) ** 0.5
    gamma = 1.0 + 0.1 * jax.random.normal(kg, (cout,), jnp.float32)
    beta = 0.1 * jax.random.normal(kb, (cout,), jnp.float32)
    running_mean = 0.1 * jax.random.normal(km, (cout,), jnp.float32)
    running_var = 1.0 + 0.1 * jax.random.uniform(kv, (cout,), jnp.float32)
    eps = 1e-5
    scale = gamma / jnp.sqrt(running_var + eps)
    bias = beta - running_mean * scale
    return {"w": w * scale[None, :], "bias": bias.reshape(1, cout)}


def init_san_params(key, num_classes):
    keys = jax.random.split(key, 8)
    s_in = _init_conv_bn(keys[0], 3, 64)       # conv_in / bn_in
    s0 = _init_conv_bn(keys[1], 64, 64)        # conv0   / bn0
    chans = [(64, 256), (256, 512), (512, 1024), (1024, 2048)]   # conv1..conv4
    stages = [_init_conv_bn(keys[2 + i], cin, cout) for i, (cin, cout) in enumerate(chans)]

    # conv_in: pack two RGB pixels per lane row -> block-diagonal (6, 128) f32 weight.
    w_in = jnp.zeros((6, 128), jnp.float32)
    w_in = w_in.at[0:3, 0:64].set(s_in["w"]).at[3:6, 64:128].set(s_in["w"])
    b_in = jnp.concatenate([s_in["bias"], s_in["bias"]], axis=1)

    stage_params = [{"w": s["w"].astype(jnp.bfloat16), "bias": s["bias"]}
                    for s in stages]

    kfw, kfb = jax.random.split(keys[6], 2)
    fc_w = jax.random.normal(kfw, (2048, num_classes), jnp.float32) * (1.0 / 2048) ** 0.5
    fc_b = 0.01 * jax.random.normal(kfb, (num_classes,), jnp.float32)
    ncls_pad = ((num_classes + 127) // 128) * 128            # lane-dense fc output
    fc_w_pad = jnp.zeros((2048, ncls_pad), jnp.float32).at[:, :num_classes].set(fc_w)
    fc_b_pad = jnp.zeros((1, ncls_pad), jnp.float32).at[0, :num_classes].set(fc_b)

    return {"w_in": w_in, "b_in": b_in,
            "w0": s0["w"].astype(jnp.bfloat16), "b0": s0["bias"],
            "stages": stage_params,
            "fc_w": fc_w_pad.astype(jnp.bfloat16), "fc_b": fc_b_pad}


# ----------------------------------------------------------------------------
# Forward pass (matches SAN.forward with layers=[0]*5, i.e. identity SAM layers)
# ----------------------------------------------------------------------------
def san_forward(x_nchw, params, *, num_classes):
    n, cin_img, h, w = x_nchw.shape
    assert cin_img == 3 and h % 32 == 0 and w % 32 == 0
    x = jnp.transpose(x_nchw, (0, 2, 3, 1)).astype(jnp.float32)       # NCHW -> NHWC

    # relu(bn_in(conv_in(x))) -> pool -> relu(bn0(conv0(.)))  [fused, row-tiled]
    act = stage01_fused(x, n, h, w, params["w_in"], params["b_in"],
                        params["w0"], params["b0"])
    cur_h, cur_w, cur_c = h // 2, w // 2, 64

    # relu(bnK(convK(pool(x)))) for K=1..3 (layerK = identity), fused + row-tiled
    for k in range(3):
        p = params["stages"][k]
        act = pool_conv_bn_relu(act, n, cur_h, cur_w, cur_c, p["w"], p["bias"])
        cur_h, cur_w, cur_c = cur_h // 2, cur_w // 2, p["w"].shape[1]

    # tail: pool + conv4/bn4/relu + avgpool(1,1) + flatten + fc, cout-blocked
    p = params["stages"][3]
    logits_pad = tail_pool_conv_avg_fc(act, n, cur_h, cur_w, cur_c,
                                       p["w"], p["bias"],
                                       params["fc_w"], params["fc_b"])
    return logits_pad[:, :num_classes]


if __name__ == "__main__":
    key = jax.random.PRNGKey(0)
    k_x, k_p = jax.random.split(key)

    N, H, W = 2, 32, 32            # 5 maxpools: 32 -> 16 -> 8 -> 4 -> 2 -> 1
    num_classes = 10
    x = jax.random.normal(k_x, (N, 3, H, W), jnp.float32)
    params = init_san_params(k_p, num_classes)

    fwd = jax.jit(functools.partial(san_forward, num_classes=num_classes))
    logits = fwd(x, params)
    jax.block_until_ready(logits)
    assert logits.shape == (N, num_classes)
    assert bool(jnp.all(jnp.isfinite(logits)))
    print("KERNEL_OK")
</pallas_src>

<mosaic_0001>
module attributes {stable_mosaic.version = 11 : i64} {
  func.func @_stage01_kernel(%arg0: i32, %arg1: memref<16x2x16x6xf32, #tpu.memory_space<vmem>>, %arg2: memref<6x128xf32, #tpu.memory_space<vmem>>, %arg3: memref<1x128xf32, #tpu.memory_space<vmem>>, %arg4: memref<64x64xbf16, #tpu.memory_space<vmem>>, %arg5: memref<1x64xf32, #tpu.memory_space<vmem>>, %arg6: memref<256x64xbf16, #tpu.memory_space<vmem>>) attributes {dimension_semantics = [#tpu.dimension_semantics<parallel>], iteration_bounds = array<i64: 2>, scalar_prefetch = 0 : i64, scratch_operands = 0 : i64, tpu.core_type = #tpu.core_type<tc>, window_params = [{transform_indices = @transform_0, window_bounds = array<i64: 16, 2, 16, 6>}, {pipeline_mode = #tpu.pipeline_mode<synchronous>, transform_indices = @transform_1, window_bounds = array<i64: 6, 128>}, {pipeline_mode = #tpu.pipeline_mode<synchronous>, transform_indices = @transform_2, window_bounds = array<i64: 1, 128>}, {pipeline_mode = #tpu.pipeline_mode<synchronous>, transform_indices = @transform_3, window_bounds = array<i64: 64, 64>}, {pipeline_mode = #tpu.pipeline_mode<synchronous>, transform_indices = @transform_4, window_bounds = array<i64: 1, 64>}, {transform_indices = @transform_5, window_bounds = array<i64: 256, 64>}]} {
    %c0 = arith.constant 0 : index
    %c0_0 = arith.constant 0 : index
    %c0_1 = arith.constant 0 : index
    %c0_2 = arith.constant 0 : index
    %0 = vector.load %arg1[%c0, %c0_0, %c0_1, %c0_2] : memref<16x2x16x6xf32, #tpu.memory_space<vmem>>, vector<16x2x16x6xf32>
    %c0_3 = arith.constant 0 : index
    %c0_4 = arith.constant 0 : index
    %1 = vector.load %arg2[%c0_3, %c0_4] : memref<6x128xf32, #tpu.memory_space<vmem>>, vector<6x128xf32>
    %2 = vector.extract_strided_slice %0 {offsets = [0, 0, 0, 0], sizes = [16, 2, 16, 1], strides = [1, 1, 1, 1]} : vector<16x2x16x6xf32> to vector<16x2x16x1xf32>
    %3 = vector.extract_strided_slice %1 {offsets = [0, 0], sizes = [1, 128], strides = [1, 1]} : vector<6x128xf32> to vector<1x128xf32>
    %4 = vector.shape_cast %3 : vector<1x128xf32> to vector<1x1x1x128xf32>
    %5 = vector.broadcast %2 : vector<16x2x16x1xf32> to vector<16x2x16x128xf32>
    %6 = vector.broadcast %4 : vector<1x1x1x128xf32> to vector<16x2x16x128xf32>
    %7 = arith.mulf %5, %6 : vector<16x2x16x128xf32>
    %8 = vector.extract_strided_slice %0 {offsets = [0, 0, 0, 1], sizes = [16, 2, 16, 1], strides = [1, 1, 1, 1]} : vector<16x2x16x6xf32> to vector<16x2x16x1xf32>
    %9 = vector.extract_strided_slice %1 {offsets = [1, 0], sizes = [1, 128], strides = [1, 1]} : vector<6x128xf32> to vector<1x128xf32>
    %10 = vector.shape_cast %9 : vector<1x128xf32> to vector<1x1x1x128xf32>
    %11 = vector.broadcast %8 : vector<16x2x16x1xf32> to vector<16x2x16x128xf32>
    %12 = vector.broadcast %10 : vector<1x1x1x128xf32> to vector<16x2x16x128xf32>
    %13 = arith.mulf %11, %12 : vector<16x2x16x128xf32>
    %14 = arith.addf %7, %13 : vector<16x2x16x128xf32>
    %15 = vector.extract_strided_slice %0 {offsets = [0, 0, 0, 2], sizes = [16, 2, 16, 1], strides = [1, 1, 1, 1]} : vector<16x2x16x6xf32> to vector<16x2x16x1xf32>
    %16 = vector.extract_strided_slice %1 {offsets = [2, 0], sizes = [1, 128], strides = [1, 1]} : vector<6x128xf32> to vector<1x128xf32>
    %17 = vector.shape_cast %16 : vector<1x128xf32> to vector<1x1x1x128xf32>
    %18 = vector.broadcast %15 : vector<16x2x16x1xf32> to vector<16x2x16x128xf32>
    %19 = vector.broadcast %17 : vector<1x1x1x128xf32> to vector<16x2x16x128xf32>
    %20 = arith.mulf %18, %19 : vector<16x2x16x128xf32>
    %21 = arith.addf %14, %20 : vector<16x2x16x128xf32>
    %22 = vector.extract_strided_slice %0 {offsets = [0, 0, 0, 3], sizes = [16, 2, 16, 1], strides = [1, 1, 1, 1]} : vector<16x2x16x6xf32> to vector<16x2x16x1xf32>
    %23 = vector.extract_strided_slice %1 {offsets = [3, 0], sizes = [1, 128], strides = [1, 1]} : vector<6x128xf32> to vector<1x128xf32>
    %24 = vector.shape_cast %23 : vector<1x128xf32> to vector<1x1x1x128xf32>
    %25 = vector.broadcast %22 : vector<16x2x16x1xf32> to vector<16x2x16x128xf32>
    %26 = vector.broadcast %24 : vector<1x1x1x128xf32> to vector<16x2x16x128xf32>
    %27 = arith.mulf %25, %26 : vector<16x2x16x128xf32>
    %28 = arith.addf %21, %27 : vector<16x2x16x128xf32>
    %29 = vector.extract_strided_slice %0 {offsets = [0, 0, 0, 4], sizes = [16, 2, 16, 1], strides = [1, 1, 1, 1]} : vector<16x2x16x6xf32> to vector<16x2x16x1xf32>
    %30 = vector.extract_strided_slice %1 {offsets = [4, 0], sizes = [1, 128], strides = [1, 1]} : vector<6x128xf32> to vector<1x128xf32>
    %31 = vector.shape_cast %30 : vector<1x128xf32> to vector<1x1x1x128xf32>
    %32 = vector.broadcast %29 : vector<16x2x16x1xf32> to vector<16x2x16x128xf32>
    %33 = vector.broadcast %31 : vector<1x1x1x128xf32> to vector<16x2x16x128xf32>
    %34 = arith.mulf %32, %33 : vector<16x2x16x128xf32>
    %35 = arith.addf %28, %34 : vector<16x2x16x128xf32>
    %36 = vector.extract_strided_slice %0 {offsets = [0, 0, 0, 5], sizes = [16, 2, 16, 1], strides = [1, 1, 1, 1]} : vector<16x2x16x6xf32> to vector<16x2x16x1xf32>
    %37 = vector.extract_strided_slice %1 {offsets = [5, 0], sizes = [1, 128], strides = [1, 1]} : vector<6x128xf32> to vector<1x128xf32>
    %38 = vector.shape_cast %37 : vector<1x128xf32> to vector<1x1x1x128xf32>
    %39 = vector.broadcast %36 : vector<16x2x16x1xf32> to vector<16x2x16x128xf32>
    %40 = vector.broadcast %38 : vector<1x1x1x128xf32> to vector<16x2x16x128xf32>
    %41 = arith.mulf %39, %40 : vector<16x2x16x128xf32>
    %42 = arith.addf %35, %41 : vector<16x2x16x128xf32>
    %c0_5 = arith.constant 0 : index
    %c0_6 = arith.constant 0 : index
    %43 = vector.load %arg3[%c0_5, %c0_6] : memref<1x128xf32, #tpu.memory_space<vmem>>, vector<1x128xf32>
    %44 = vector.shape_cast %43 : vector<1x128xf32> to vector<1x1x1x128xf32>
    %45 = vector.broadcast %44 : vector<1x1x1x128xf32> to vector<16x2x16x128xf32>
    %46 = arith.addf %42, %45 : vector<16x2x16x128xf32>
    %cst = arith.constant 0.000000e+00 : f32
    %47 = vector.broadcast %cst : f32 to vector<16x2x16x128xf32>
    %48 = arith.maximumf %46, %47 : vector<16x2x16x128xf32>
    %49 = vector.extract_strided_slice %48 {offsets = [0, 0, 0, 0], sizes = [16, 1, 16, 128], strides = [1, 1, 1, 1]} : vector<16x2x16x128xf32> to vector<16x1x16x128xf32>
    %50 = vector.shape_cast %49 : vector<16x1x16x128xf32> to vector<16x16x128xf32>
    %51 = vector.extract_strided_slice %48 {offsets = [0, 1, 0, 0], sizes = [16, 1, 16, 128], strides = [1, 1, 1, 1]} : vector<16x2x16x128xf32> to vector<16x1x16x128xf32>
    %52 = vector.shape_cast %51 : vector<16x1x16x128xf32> to vector<16x16x128xf32>
    %53 = arith.maximumf %50, %52 : vector<16x16x128xf32>
    %54 = vector.extract_strided_slice %53 {offsets = [0, 0, 0], sizes = [16, 16, 64], strides = [1, 1, 1]} : vector<16x16x128xf32> to vector<16x16x64xf32>
    %55 = vector.extract_strided_slice %53 {offsets = [0, 0, 64], sizes = [16, 16, 64], strides = [1, 1, 1]} : vector<16x16x128xf32> to vector<16x16x64xf32>
    %56 = arith.maximumf %54, %55 : vector<16x16x64xf32>
    %57 = vector.shape_cast %56 : vector<16x16x64xf32> to vector<256x64xf32>
    %58 = arith.truncf %57 : vector<256x64xf32> to vector<256x64xbf16>
    %c0_7 = arith.constant 0 : index
    %c0_8 = arith.constant 0 : index
    %59 = vector.load %arg4[%c0_7, %c0_8] : memref<64x64xbf16, #tpu.memory_space<vmem>>, vector<64x64xbf16>
    %cst_9 = arith.constant dense<0.000000e+00> : vector<256x64xf32>
    %60 = tpu.matmul %58, %59, %cst_9 {dimension_numbers = #tpu.dot_dimension_numbers<[1], [0], [0], [1], [0, 0, 1, 1], [], []>} : vector<256x64xbf16>, vector<64x64xbf16>, vector<256x64xf32> -> vector<256x64xf32>
    %c0_10 = arith.constant 0 : index
    %c0_11 = arith.constant 0 : index
    %61 = vector.load %arg5[%c0_10, %c0_11] : memref<1x64xf32, #tpu.memory_space<vmem>>, vector<1x64xf32>
    %62 = vector.broadcast %61 : vector<1x64xf32> to vector<256x64xf32>
    %63 = arith.addf %60, %62 : vector<256x64xf32>
    %cst_12 = arith.constant 0.000000e+00 : f32
    %64 = vector.broadcast %cst_12 : f32 to vector<256x64xf32>
    %65 = arith.maximumf %63, %64 : vector<256x64xf32>
    %66 = arith.truncf %65 : vector<256x64xf32> to vector<256x64xbf16>
    %c0_13 = arith.constant 0 : index
    %c0_14 = arith.constant 0 : index
    %67 = vector.load %arg6[%c0_13, %c0_14] : memref<256x64xbf16, #tpu.memory_space<vmem>>, vector<256x64xbf16>
    tpu.vector_store %arg6[%c0_13, %c0_14], %66 {strides = array<i32>} : memref<256x64xbf16, #tpu.memory_space<vmem>>, vector<256x64xbf16>,
    return
  }
  func.func @transform_0(%arg0: i32) -> (i32, i32, i32, i32) {
    %c0_i32 = arith.constant 0 : i32
    %c0_i32_0 = arith.constant 0 : i32
    %c0_i32_1 = arith.constant 0 : i32
    %c0_i32_2 = arith.constant 0 : i32
    return %arg0, %c0_i32, %c0_i32_0, %c0_i32_1 : i32, i32, i32, i32
  }
  func.func @transform_1(%arg0: i32) -> (i32, i32) {
    %c0_i32 = arith.constant 0 : i32
    %c0_i32_0 = arith.constant 0 : i32
    %c0_i32_1 = arith.constant 0 : i32
    return %c0_i32, %c0_i32_0 : i32, i32
  }
  func.func @transform_2(%arg0: i32) -> (i32, i32) {
    %c0_i32 = arith.constant 0 : i32
    %c0_i32_0 = arith.constant 0 : i32
    %c0_i32_1 = arith.constant 0 : i32
    return %c0_i32, %c0_i32_0 : i32, i32
  }
  func.func @transform_3(%arg0: i32) -> (i32, i32) {
    %c0_i32 = arith.constant 0 : i32
    %c0_i32_0 = arith.constant 0 : i32
    %c0_i32_1 = arith.constant 0 : i32
    return %c0_i32, %c0_i32_0 : i32, i32
  }
  func.func @transform_4(%arg0: i32) -> (i32, i32) {
    %c0_i32 = arith.constant 0 : i32
    %c0_i32_0 = arith.constant 0 : i32
    %c0_i32_1 = arith.constant 0 : i32
    return %c0_i32, %c0_i32_0 : i32, i32
  }
  func.func @transform_5(%arg0: i32) -> (i32, i32) {
    %c0_i32 = arith.constant 0 : i32
    %c0_i32_0 = arith.constant 0 : i32
    return %arg0, %c0_i32 : i32, i32
  }
}

module attributes {stable_mosaic.version = 11 : i64} {
  func.func @_pool_conv_kernel(%arg0: i32, %arg1: memref<8x2x8x128xbf16, #tpu.memory_space<vmem>>, %arg2: memref<64x256xbf16, #tpu.memory_space<vmem>>, %arg3: memref<1x256xf32, #tpu.memory_space<vmem>>, %arg4: memref<64x256xbf16, #tpu.memory_space<vmem>>) attributes {dimension_semantics = [#tpu.dimension_semantics<parallel>], iteration_bounds = array<i64: 2>, scalar_prefetch = 0 : i64, scratch_operands = 0 : i64, tpu.core_type = #tpu.core_type<tc>, window_params = [{transform_indices = @transform_0, window_bounds = array<i64: 8, 2, 8, 128>}, {pipeline_mode = #tpu.pipeline_mode<synchronous>, transform_indices = @transform_1, window_bounds = array<i64: 64, 256>}, {pipeline_mode = #tpu.pipeline_mode<synchronous>, transform_indices = @transform_2, window_bounds = array<i64: 1, 256>}, {transform_indices = @transform_3, window_bounds = array<i64: 64, 256>}]} {
    %c0 = arith.constant 0 : index
    %c0_0 = arith.constant 0 : index
    %c0_1 = arith.constant 0 : index
    %c0_2 = arith.constant 0 : index
    %0 = vector.load %arg1[%c0, %c0_0, %c0_1, %c0_2] : memref<8x2x8x128xbf16, #tpu.memory_space<vmem>>, vector<8x2x8x128xbf16>
    %1 = vector.extract_strided_slice %0 {offsets = [0, 0, 0, 0], sizes = [8, 1, 8, 128], strides = [1, 1, 1, 1]} : vector<8x2x8x128xbf16> to vector<8x1x8x128xbf16>
    %2 = vector.shape_cast %1 : vector<8x1x8x128xbf16> to vector<8x8x128xbf16>
    %3 = vector.extract_strided_slice %0 {offsets = [0, 1, 0, 0], sizes = [8, 1, 8, 128], strides = [1, 1, 1, 1]} : vector<8x2x8x128xbf16> to vector<8x1x8x128xbf16>
    %4 = vector.shape_cast %3 : vector<8x1x8x128xbf16> to vector<8x8x128xbf16>
    %5 = arith.maximumf %2, %4 : vector<8x8x128xbf16>
    %6 = vector.extract_strided_slice %5 {offsets = [0, 0, 0], sizes = [8, 8, 64], strides = [1, 1, 1]} : vector<8x8x128xbf16> to vector<8x8x64xbf16>
    %7 = vector.extract_strided_slice %5 {offsets = [0, 0, 64], sizes = [8, 8, 64], strides = [1, 1, 1]} : vector<8x8x128xbf16> to vector<8x8x64xbf16>
    %8 = arith.maximumf %6, %7 : vector<8x8x64xbf16>
    %9 = vector.shape_cast %8 : vector<8x8x64xbf16> to vector<64x64xbf16>
    %c0_3 = arith.constant 0 : index
    %c0_4 = arith.constant 0 : index
    %10 = vector.load %arg2[%c0_3, %c0_4] : memref<64x256xbf16, #tpu.memory_space<vmem>>, vector<64x256xbf16>
    %cst = arith.constant dense<0.000000e+00> : vector<64x256xf32>
    %11 = tpu.matmul %9, %10, %cst {dimension_numbers = #tpu.dot_dimension_numbers<[1], [0], [0], [1], [0, 0, 1, 1], [], []>} : vector<64x64xbf16>, vector<64x256xbf16>, vector<64x256xf32> -> vector<64x256xf32>
    %c0_5 = arith.constant 0 : index
    %c0_6 = arith.constant 0 : index
    %12 = vector.load %arg3[%c0_5, %c0_6] : memref<1x256xf32, #tpu.memory_space<vmem>>, vector<1x256xf32>
    %13 = vector.broadcast %12 : vector<1x256xf32> to vector<64x256xf32>
    %14 = arith.addf %11, %13 : vector<64x256xf32>
    %cst_7 = arith.constant 0.000000e+00 : f32
    %15 = vector.broadcast %cst_7 : f32 to vector<64x256xf32>
    %16 = arith.maximumf %14, %15 : vector<64x256xf32>
    %17 = arith.truncf %16 : vector<64x256xf32> to vector<64x256xbf16>
    %c0_8 = arith.constant 0 : index
    %c0_9 = arith.constant 0 : index
    %18 = vector.load %arg4[%c0_8, %c0_9] : memref<64x256xbf16, #tpu.memory_space<vmem>>, vector<64x256xbf16>
    tpu.vector_store %arg4[%c0_8, %c0_9], %17 {strides = array<i32>} : memref<64x256xbf16, #tpu.memory_space<vmem>>, vector<64x256xbf16>,
    return
  }
  func.func @transform_0(%arg0: i32) -> (i32, i32, i32, i32) {
    %c0_i32 = arith.constant 0 : i32
    %c0_i32_0 = arith.constant 0 : i32
    %c0_i32_1 = arith.constant 0 : i32
    %c0_i32_2 = arith.constant 0 : i32
    return %arg0, %c0_i32, %c0_i32_0, %c0_i32_1 : i32, i32, i32, i32
  }
  func.func @transform_1(%arg0: i32) -> (i32, i32) {
    %c0_i32 = arith.constant 0 : i32
    %c0_i32_0 = arith.constant 0 : i32
    %c0_i32_1 = arith.constant 0 : i32
    return %c0_i32, %c0_i32_0 : i32, i32
  }
  func.func @transform_2(%arg0: i32) -> (i32, i32) {
    %c0_i32 = arith.constant 0 : i32
    %c0_i32_0 = arith.constant 0 : i32
    %c0_i32_1 = arith.constant 0 : i32
    return %c0_i32, %c0_i32_0 : i32, i32
  }
  func.func @transform_3(%arg0: i32) -> (i32, i32) {
    %c0_i32 = arith.constant 0 : i32
    %c0_i32_0 = arith.constant 0 : i32
    return %arg0, %c0_i32 : i32, i32
  }
}

module attributes {stable_mosaic.version = 11 : i64} {
  func.func @_pool_conv_kernel(%arg0: i32, %arg1: memref<4x2x4x512xbf16, #tpu.memory_space<vmem>>, %arg2: memref<256x512xbf16, #tpu.memory_space<vmem>>, %arg3: memref<1x512xf32, #tpu.memory_space<vmem>>, %arg4: memref<16x512xbf16, #tpu.memory_space<vmem>>) attributes {dimension_semantics = [#tpu.dimension_semantics<parallel>], iteration_bounds = array<i64: 2>, scalar_prefetch = 0 : i64, scratch_operands = 0 : i64, tpu.core_type = #tpu.core_type<tc>, window_params = [{transform_indices = @transform_0, window_bounds = array<i64: 4, 2, 4, 512>}, {pipeline_mode = #tpu.pipeline_mode<synchronous>, transform_indices = @transform_1, window_bounds = array<i64: 256, 512>}, {pipeline_mode = #tpu.pipeline_mode<synchronous>, transform_indices = @transform_2, window_bounds = array<i64: 1, 512>}, {transform_indices = @transform_3, window_bounds = array<i64: 16, 512>}]} {
    %c0 = arith.constant 0 : index
    %c0_0 = arith.constant 0 : index
    %c0_1 = arith.constant 0 : index
    %c0_2 = arith.constant 0 : index
    %0 = vector.load %arg1[%c0, %c0_0, %c0_1, %c0_2] : memref<4x2x4x512xbf16, #tpu.memory_space<vmem>>, vector<4x2x4x512xbf16>
    %1 = vector.extract_strided_slice %0 {offsets = [0, 0, 0, 0], sizes = [4, 1, 4, 512], strides = [1, 1, 1, 1]} : vector<4x2x4x512xbf16> to vector<4x1x4x512xbf16>
    %2 = vector.shape_cast %1 : vector<4x1x4x512xbf16> to vector<4x4x512xbf16>
    %3 = vector.extract_strided_slice %0 {offsets = [0, 1, 0, 0], sizes = [4, 1, 4, 512], strides = [1, 1, 1, 1]} : vector<4x2x4x512xbf16> to vector<4x1x4x512xbf16>
    %4 = vector.shape_cast %3 : vector<4x1x4x512xbf16> to vector<4x4x512xbf16>
    %5 = arith.maximumf %2, %4 : vector<4x4x512xbf16>
    %6 = vector.extract_strided_slice %5 {offsets = [0, 0, 0], sizes = [4, 4, 256], strides = [1, 1, 1]} : vector<4x4x512xbf16> to vector<4x4x256xbf16>
    %7 = vector.extract_strided_slice %5 {offsets = [0, 0, 256], sizes = [4, 4, 256], strides = [1, 1, 1]} : vector<4x4x512xbf16> to vector<4x4x256xbf16>
    %8 = arith.maximumf %6, %7 : vector<4x4x256xbf16>
    %9 = vector.shape_cast %8 : vector<4x4x256xbf16> to vector<16x256xbf16>
    %c0_3 = arith.constant 0 : index
    %c0_4 = arith.constant 0 : index
    %10 = vector.load %arg2[%c0_3, %c0_4] : memref<256x512xbf16, #tpu.memory_space<vmem>>, vector<256x512xbf16>
    %cst = arith.constant dense<0.000000e+00> : vector<16x512xf32>
    %11 = tpu.matmul %9, %10, %cst {dimension_numbers = #tpu.dot_dimension_numbers<[1], [0], [0], [1], [0, 0, 1, 1], [], []>} : vector<16x256xbf16>, vector<256x512xbf16>, vector<16x512xf32> -> vector<16x512xf32>
    %c0_5 = arith.constant 0 : index
    %c0_6 = arith.constant 0 : index
    %12 = vector.load %arg3[%c0_5, %c0_6] : memref<1x512xf32, #tpu.memory_space<vmem>>, vector<1x512xf32>
    %13 = vector.broadcast %12 : vector<1x512xf32> to vector<16x512xf32>
    %14 = arith.addf %11, %13 : vector<16x512xf32>
    %cst_7 = arith.constant 0.000000e+00 : f32
    %15 = vector.broadcast %cst_7 : f32 to vector<16x512xf32>
    %16 = arith.maximumf %14, %15 : vector<16x512xf32>
    %17 = arith.truncf %16 : vector<16x512xf32> to vector<16x512xbf16>
    %c0_8 = arith.constant 0 : index
    %c0_9 = arith.constant 0 : index
    %18 = vector.load %arg4[%c0_8, %c0_9] : memref<16x512xbf16, #tpu.memory_space<vmem>>, vector<16x512xbf16>
    tpu.vector_store %arg4[%c0_8, %c0_9], %17 {strides = array<i32>} : memref<16x512xbf16, #tpu.memory_space<vmem>>, vector<16x512xbf16>,
    return
  }
  func.func @transform_0(%arg0: i32) -> (i32, i32, i32, i32) {
    %c0_i32 = arith.constant 0 : i32
    %c0_i32_0 = arith.constant 0 : i32
    %c0_i32_1 = arith.constant 0 : i32
    %c0_i32_2 = arith.constant 0 : i32
    return %arg0, %c0_i32, %c0_i32_0, %c0_i32_1 : i32, i32, i32, i32
  }
  func.func @transform_1(%arg0: i32) -> (i32, i32) {
    %c0_i32 = arith.constant 0 : i32
    %c0_i32_0 = arith.constant 0 : i32
    %c0_i32_1 = arith.constant 0 : i32
    return %c0_i32, %c0_i32_0 : i32, i32
  }
  func.func @transform_2(%arg0: i32) -> (i32, i32) {
    %c0_i32 = arith.constant 0 : i32
    %c0_i32_0 = arith.constant 0 : i32
    %c0_i32_1 = arith.constant 0 : i32
    return %c0_i32, %c0_i32_0 : i32, i32
  }
  func.func @transform_3(%arg0: i32) -> (i32, i32) {
    %c0_i32 = arith.constant 0 : i32
    %c0_i32_0 = arith.constant 0 : i32
    return %arg0, %c0_i32 : i32, i32
  }
}

module attributes {stable_mosaic.version = 11 : i64} {
  func.func @_pool_conv_kernel(%arg0: i32, %arg1: memref<4x2x2x1024xbf16, #tpu.memory_space<vmem>>, %arg2: memref<512x1024xbf16, #tpu.memory_space<vmem>>, %arg3: memref<1x1024xf32, #tpu.memory_space<vmem>>, %arg4: memref<8x1024xbf16, #tpu.memory_space<vmem>>) attributes {dimension_semantics = [#tpu.dimension_semantics<parallel>], iteration_bounds = array<i64: 1>, scalar_prefetch = 0 : i64, scratch_operands = 0 : i64, tpu.core_type = #tpu.core_type<tc>, window_params = [{transform_indices = @transform_0, window_bounds = array<i64: 4, 2, 2, 1024>}, {pipeline_mode = #tpu.pipeline_mode<synchronous>, transform_indices = @transform_1, window_bounds = array<i64: 512, 1024>}, {pipeline_mode = #tpu.pipeline_mode<synchronous>, transform_indices = @transform_2, window_bounds = array<i64: 1, 1024>}, {transform_indices = @transform_3, window_bounds = array<i64: 8, 1024>}]} {
    %c0 = arith.constant 0 : index
    %c0_0 = arith.constant 0 : index
    %c0_1 = arith.constant 0 : index
    %c0_2 = arith.constant 0 : index
    %0 = vector.load %arg1[%c0, %c0_0, %c0_1, %c0_2] : memref<4x2x2x1024xbf16, #tpu.memory_space<vmem>>, vector<4x2x2x1024xbf16>
    %1 = vector.extract_strided_slice %0 {offsets = [0, 0, 0, 0], sizes = [4, 1, 2, 1024], strides = [1, 1, 1, 1]} : vector<4x2x2x1024xbf16> to vector<4x1x2x1024xbf16>
    %2 = vector.shape_cast %1 : vector<4x1x2x1024xbf16> to vector<4x2x1024xbf16>
    %3 = vector.extract_strided_slice %0 {offsets = [0, 1, 0, 0], sizes = [4, 1, 2, 1024], strides = [1, 1, 1, 1]} : vector<4x2x2x1024xbf16> to vector<4x1x2x1024xbf16>
    %4 = vector.shape_cast %3 : vector<4x1x2x1024xbf16> to vector<4x2x1024xbf16>
    %5 = arith.maximumf %2, %4 : vector<4x2x1024xbf16>
    %6 = vector.extract_strided_slice %5 {offsets = [0, 0, 0], sizes = [4, 2, 512], strides = [1, 1, 1]} : vector<4x2x1024xbf16> to vector<4x2x512xbf16>
    %7 = vector.extract_strided_slice %5 {offsets = [0, 0, 512], sizes = [4, 2, 512], strides = [1, 1, 1]} : vector<4x2x1024xbf16> to vector<4x2x512xbf16>
    %8 = arith.maximumf %6, %7 : vector<4x2x512xbf16>
    %9 = vector.shape_cast %8 : vector<4x2x512xbf16> to vector<8x512xbf16>
    %c0_3 = arith.constant 0 : index
    %c0_4 = arith.constant 0 : index
    %10 = vector.load %arg2[%c0_3, %c0_4] : memref<512x1024xbf16, #tpu.memory_space<vmem>>, vector<512x1024xbf16>
    %cst = arith.constant dense<0.000000e+00> : vector<8x1024xf32>
    %11 = tpu.matmul %9, %10, %cst {dimension_numbers = #tpu.dot_dimension_numbers<[1], [0], [0], [1], [0, 0, 1, 1], [], []>} : vector<8x512xbf16>, vector<512x1024xbf16>, vector<8x1024xf32> -> vector<8x1024xf32>
    %c0_5 = arith.constant 0 : index
    %c0_6 = arith.constant 0 : index
    %12 = vector.load %arg3[%c0_5, %c0_6] : memref<1x1024xf32, #tpu.memory_space<vmem>>, vector<1x1024xf32>
    %13 = vector.broadcast %12 : vector<1x1024xf32> to vector<8x1024xf32>
    %14 = arith.addf %11, %13 : vector<8x1024xf32>
    %cst_7 = arith.constant 0.000000e+00 : f32
    %15 = vector.broadcast %cst_7 : f32 to vector<8x1024xf32>
    %16 = arith.maximumf %14, %15 : vector<8x1024xf32>
    %17 = arith.truncf %16 : vector<8x1024xf32> to vector<8x1024xbf16>
    %c0_8 = arith.constant 0 : index
    %c0_9 = arith.constant 0 : index
    %18 = vector.load %arg4[%c0_8, %c0_9] : memref<8x1024xbf16, #tpu.memory_space<vmem>>, vector<8x1024xbf16>
    tpu.vector_store %arg4[%c0_8, %c0_9], %17 {strides = array<i32>} : memref<8x1024xbf16, #tpu.memory_space<vmem>>, vector<8x1024xbf16>,
    return
  }
  func.func @transform_0(%arg0: i32) -> (i32, i32, i32, i32) {
    %c0_i32 = arith.constant 0 : i32
    %c0_i32_0 = arith.constant 0 : i32
    %c0_i32_1 = arith.constant 0 : i32
    %c0_i32_2 = arith.constant 0 : i32
    return %arg0, %c0_i32, %c0_i32_0, %c0_i32_1 : i32, i32, i32, i32
  }
  func.func @transform_1(%arg0: i32) -> (i32, i32) {
    %c0_i32 = arith.constant 0 : i32
    %c0_i32_0 = arith.constant 0 : i32
    %c0_i32_1 = arith.constant 0 : i32
    return %c0_i32, %c0_i32_0 : i32, i32
  }
  func.func @transform_2(%arg0: i32) -> (i32, i32) {
    %c0_i32 = arith.constant 0 : i32
    %c0_i32_0 = arith.constant 0 : i32
    %c0_i32_1 = arith.constant 0 : i32
    return %c0_i32, %c0_i32_0 : i32, i32
  }
  func.func @transform_3(%arg0: i32) -> (i32, i32) {
    %c0_i32 = arith.constant 0 : i32
    %c0_i32_0 = arith.constant 0 : i32
    return %arg0, %c0_i32 : i32, i32
  }
}

module attributes {stable_mosaic.version = 11 : i64} {
  func.func @_tail_kernel(%arg0: i32, %arg1: memref<2x2x1x2048xbf16, #tpu.memory_space<vmem>>, %arg2: memref<1024x512xbf16, #tpu.memory_space<vmem>>, %arg3: memref<1x512xf32, #tpu.memory_space<vmem>>, %arg4: memref<512x128xbf16, #tpu.memory_space<vmem>>, %arg5: memref<1x128xf32, #tpu.memory_space<vmem>>, %arg6: memref<2x128xf32, #tpu.memory_space<vmem>>, %arg7: memref<2x1024xbf16, #tpu.memory_space<vmem>>) attributes {dimension_semantics = [#tpu.dimension_semantics<arbitrary>], iteration_bounds = array<i64: 4>, scalar_prefetch = 0 : i64, scratch_operands = 1 : i64, tpu.core_type = #tpu.core_type<tc>, window_params = [{pipeline_mode = #tpu.pipeline_mode<synchronous>, transform_indices = @transform_0, window_bounds = array<i64: 2, 2, 1, 2048>}, {transform_indices = @transform_1, window_bounds = array<i64: 1024, 512>}, {transform_indices = @transform_2, window_bounds = array<i64: 1, 512>}, {transform_indices = @transform_3, window_bounds = array<i64: 512, 128>}, {pipeline_mode = #tpu.pipeline_mode<synchronous>, transform_indices = @transform_4, window_bounds = array<i64: 1, 128>}, {pipeline_mode = #tpu.pipeline_mode<synchronous>, transform_indices = @transform_5, window_bounds = array<i64: 2, 128>}]} {
    %c0_i32 = arith.constant 0 : i32
    %0 = arith.cmpi eq, %arg0, %c0_i32 : i32
    %1 = arith.extui %0 : i1 to i32
    %c0_i32_0 = arith.constant 0 : i32
    %2 = arith.cmpi ne, %1, %c0_i32_0 : i32
    scf.if %2 {
      %c0_16 = arith.constant 0 : index
      %c0_17 = arith.constant 0 : index
      %c0_18 = arith.constant 0 : index
      %c0_19 = arith.constant 0 : index
      %24 = vector.load %arg1[%c0_16, %c0_17, %c0_18, %c0_19] : memref<2x2x1x2048xbf16, #tpu.memory_space<vmem>>, vector<2x2x1x2048xbf16>
      %25 = vector.extract_strided_slice %24 {offsets = [0, 0, 0, 0], sizes = [2, 1, 1, 2048], strides = [1, 1, 1, 1]} : vector<2x2x1x2048xbf16> to vector<2x1x1x2048xbf16>
      %26 = vector.shape_cast %25 : vector<2x1x1x2048xbf16> to vector<2x1x2048xbf16>
      %27 = vector.extract_strided_slice %24 {offsets = [0, 1, 0, 0], sizes = [2, 1, 1, 2048], strides = [1, 1, 1, 1]} : vector<2x2x1x2048xbf16> to vector<2x1x1x2048xbf16>
      %28 = vector.shape_cast %27 : vector<2x1x1x2048xbf16> to vector<2x1x2048xbf16>
      %29 = arith.maximumf %26, %28 : vector<2x1x2048xbf16>
      %30 = vector.extract_strided_slice %29 {offsets = [0, 0, 0], sizes = [2, 1, 1024], strides = [1, 1, 1]} : vector<2x1x2048xbf16> to vector<2x1x1024xbf16>
      %31 = vector.extract_strided_slice %29 {offsets = [0, 0, 1024], sizes = [2, 1, 1024], strides = [1, 1, 1]} : vector<2x1x2048xbf16> to vector<2x1x1024xbf16>
      %32 = arith.maximumf %30, %31 : vector<2x1x1024xbf16>
      %33 = vector.shape_cast %32 : vector<2x1x1024xbf16> to vector<2x1024xbf16>
      %c0_20 = arith.constant 0 : index
      %c0_21 = arith.constant 0 : index
      %34 = vector.load %arg7[%c0_20, %c0_21] : memref<2x1024xbf16, #tpu.memory_space<vmem>>, vector<2x1024xbf16>
      tpu.vector_store %arg7[%c0_20, %c0_21], %33 {strides = array<i32>} : memref<2x1024xbf16, #tpu.memory_space<vmem>>, vector<2x1024xbf16>,
    } else {
    }
    %c0 = arith.constant 0 : index
    %c0_1 = arith.constant 0 : index
    %3 = vector.load %arg7[%c0, %c0_1] : memref<2x1024xbf16, #tpu.memory_space<vmem>>, vector<2x1024xbf16>
    %c0_2 = arith.constant 0 : index
    %c0_3 = arith.constant 0 : index
    %4 = vector.load %arg2[%c0_2, %c0_3] : memref<1024x512xbf16, #tpu.memory_space<vmem>>, vector<1024x512xbf16>
    %cst = arith.constant dense<0.000000e+00> : vector<2x512xf32>
    %5 = tpu.matmul %3, %4, %cst {dimension_numbers = #tpu.dot_dimension_numbers<[1], [0], [0], [1], [0, 0, 1, 1], [], []>} : vector<2x1024xbf16>, vector<1024x512xbf16>, vector<2x512xf32> -> vector<2x512xf32>
    %c0_4 = arith.constant 0 : index
    %c0_5 = arith.constant 0 : index
    %6 = vector.load %arg3[%c0_4, %c0_5] : memref<1x512xf32, #tpu.memory_space<vmem>>, vector<1x512xf32>
    %7 = vector.broadcast %6 : vector<1x512xf32> to vector<2x512xf32>
    %8 = arith.addf %5, %7 : vector<2x512xf32>
    %cst_6 = arith.constant 0.000000e+00 : f32
    %9 = vector.broadcast %cst_6 : f32 to vector<2x512xf32>
    %10 = arith.maximumf %8, %9 : vector<2x512xf32>
    %11 = vector.shape_cast %10 : vector<2x512xf32> to vector<2x1x512xf32>
    %cst_7 = arith.constant dense<0.000000e+00> : vector<2x512xf32>
    %12 = vector.multi_reduction <add>, %11, %cst_7 [1] : vector<2x1x512xf32> to vector<2x512xf32>
    %cst_8 = arith.constant 1.000000e+00 : f32
    %13 = vector.broadcast %cst_8 : f32 to vector<2x512xf32>
    %14 = arith.divf %12, %13 : vector<2x512xf32>
    %15 = arith.truncf %14 : vector<2x512xf32> to vector<2x512xbf16>
    %c0_9 = arith.constant 0 : index
    %c0_10 = arith.constant 0 : index
    %16 = vector.load %arg4[%c0_9, %c0_10] : memref<512x128xbf16, #tpu.memory_space<vmem>>, vector<512x128xbf16>
    %cst_11 = arith.constant dense<0.000000e+00> : vector<2x128xf32>
    %17 = tpu.matmul %15, %16, %cst_11 {dimension_numbers = #tpu.dot_dimension_numbers<[1], [0], [0], [1], [0, 0, 1, 1], [], []>} : vector<2x512xbf16>, vector<512x128xbf16>, vector<2x128xf32> -> vector<2x128xf32>
    %c0_i32_12 = arith.constant 0 : i32
    %18 = arith.cmpi eq, %arg0, %c0_i32_12 : i32
    %19 = arith.extui %18 : i1 to i32
    %c0_i32_13 = arith.constant 0 : i32
    %20 = arith.cmpi ne, %19, %c0_i32_13 : i32
    scf.if %20 {
      %c0_16 = arith.constant 0 : index
      %c0_17 = arith.constant 0 : index
      %24 = vector.load %arg5[%c0_16, %c0_17] : memref<1x128xf32, #tpu.memory_space<vmem>>, vector<1x128xf32>
      %25 = vector.broadcast %24 : vector<1x128xf32> to vector<2x128xf32>
      %26 = arith.addf %17, %25 : vector<2x128xf32>
      %c0_18 = arith.constant 0 : index
      %c0_19 = arith.constant 0 : index
      %27 = vector.load %arg6[%c0_18, %c0_19] : memref<2x128xf32, #tpu.memory_space<vmem>>, vector<2x128xf32>
      tpu.vector_store %arg6[%c0_18, %c0_19], %26 {strides = array<i32>} : memref<2x128xf32, #tpu.memory_space<vmem>>, vector<2x128xf32>,
    } else {
    }
    %c0_i32_14 = arith.constant 0 : i32
    %21 = arith.cmpi sgt, %arg0, %c0_i32_14 : i32
    %22 = arith.extui %21 : i1 to i32
    %c0_i32_15 = arith.constant 0 : i32
    %23 = arith.cmpi ne, %22, %c0_i32_15 : i32
    scf.if %23 {
      %c0_16 = arith.constant 0 : index
      %c0_17 = arith.constant 0 : index
      %24 = vector.load %arg6[%c0_16, %c0_17] : memref<2x128xf32, #tpu.memory_space<vmem>>, vector<2x128xf32>
      %25 = arith.addf %24, %17 : vector<2x128xf32>
      %c0_18 = arith.constant 0 : index
      %c0_19 = arith.constant 0 : index
      %26 = vector.load %arg6[%c0_18, %c0_19] : memref<2x128xf32, #tpu.memory_space<vmem>>, vector<2x128xf32>
      tpu.vector_store %arg6[%c0_18, %c0_19], %25 {strides = array<i32>} : memref<2x128xf32, #tpu.memory_space<vmem>>, vector<2x128xf32>,
    } else {
    }
    return
  }
  func.func @transform_0(%arg0: i32) -> (i32, i32, i32, i32) {
    %c0_i32 = arith.constant 0 : i32
    %c0_i32_0 = arith.constant 0 : i32
    %c0_i32_1 = arith.constant 0 : i32
    %c0_i32_2 = arith.constant 0 : i32
    %c0_i32_3 = arith.constant 0 : i32
    return %c0_i32, %c0_i32_0, %c0_i32_1, %c0_i32_2 : i32, i32, i32, i32
  }
  func.func @transform_1(%arg0: i32) -> (i32, i32) {
    %c0_i32 = arith.constant 0 : i32
    %c0_i32_0 = arith.constant 0 : i32
    return %c0_i32, %arg0 : i32, i32
  }
  func.func @transform_2(%arg0: i32) -> (i32, i32) {
    %c0_i32 = arith.constant 0 : i32
    %c0_i32_0 = arith.constant 0 : i32
    return %c0_i32, %arg0 : i32, i32
  }
  func.func @transform_3(%arg0: i32) -> (i32, i32) {
    %c0_i32 = arith.constant 0 : i32
    %c0_i32_0 = arith.constant 0 : i32
    return %arg0, %c0_i32 : i32, i32
  }
  func.func @transform_4(%arg0: i32) -> (i32, i32) {
    %c0_i32 = arith.constant 0 : i32
    %c0_i32_0 = arith.constant 0 : i32
    %c0_i32_1 = arith.constant 0 : i32
    return %c0_i32, %c0_i32_0 : i32, i32
  }
  func.func @transform_5(%arg0: i32) -> (i32, i32) {
    %c0_i32 = arith.constant 0 : i32
    %c0_i32_0 = arith.constant 0 : i32
    %c0_i32_1 = arith.constant 0 : i32
    return %c0_i32, %c0_i32_0 : i32, i32
  }
}

</mosaic_0001>

<bundles_post_ra>
// kernel: san_forward.6
= control target key start
LH: loop header
LB: loop body
LE: loop exit
PB: predicated region body
PF: predicated region fallthrough
CT: control target
= control target key end

     0   :  { %8 = vsyncpa [#allocation3], 0  ;;  %s925_s0 = inlined_call_operand.vmem [shape: bf16[16,2,8,128], index: 0, kind: input, shape index: {}]   ;;  %s926_s1 = inlined_call_operand.hbm [shape: bf16[64,256], index: 1, kind: input, shape index: {}]   ;;  %s927_s2 = inlined_call_operand.hbm [shape: f32[1,256], index: 2, kind: input, shape index: {}]   ;;  %s928_s3 = inlined_call_operand.vmem [shape: bf16[128,256], index: 3, kind: output, shape index: {}]  }
   0x1   :  { %9 = vsyncpa [#allocation5], 0  ;;  %s792_s12 = smov 0  }
   0x2 LB: > { %s590_s13 = sadd.s32 4294967295, %s764_s12   ;;  %p592_p0 = scmp.ge.s32.totalorder %s764_s12, 1  ;;  %s764_s12 = sphi %s792_s12, %s15_s12  }
   0x3   : > { %p114_p1 = scmp.lt.s32.totalorder %s764_s12, 3  ;;  %s766_s14 = smov [#allocation2]  }
   0x4   : > { %s126_s15 = sshll.u32 %s766_s14, 4  ;;  %p806_p3 = scmp.eq.s32.totalorder %s590_s13, 0  ;;  %s127_s15 = int_to_ptr.vmem [resolvable:$true] %s126_s15 }
   0x5   : > { %p800_p2 = pnand %p592_p0, %p114_p1  ;;  %s767_s18 = smov [#allocation4]  }
   0x6   : > { %s933_s17 = scalar_select %p806_p3, 1, 0 }
   0x7   : > { %s932_s16 = scalar_select %p800_p2, 1, 0 }
   0x8   : > { %p657_p4 = pneg %p800_p2  ;;  %s140_s19 = sshll.u32 %s767_s18, 4  ;;  %s818_s19 = int_to_ptr.vmem [resolvable:$true] %s140_s19 }
   0x9   : > { %s694_s23 = scalar_lea.hbm %s926_s1, 1024 }
   0xa   : > { %p814_p5 = pnand %p806_p3, %p657_p4  ;;  %p695_p6 = scmp.ne.s32.totalorder %s926_s1, %s694_s23 }
   0xb   : > { %p701_p10 = scmp.lt.u32.totalorder %s694_s23, %s926_s1 }
   0xc   : > { %p696_p7 = pneg %p814_p5 }
   0xe   : > { %p697_p8 = pnand %p696_p7, %p695_p6 }
  0x10   : > { %p698_p9 = pneg %p697_p8 }
  0x12   : > { %p703_p11 = pnand %p701_p10, %p698_p9 }
  0x14   : > { %706 = shalt.err (!%p703_p11)
}
  0x15   : > { %s707_s28 = scalar_lea.vmem %s127_s15, 1024  ;;  %p715_p1 = scmp.lt.s32.totalorder %s127_s15, %s127_s15 }
  0x16   : > { %p708_p12 = scmp.ne.s32.totalorder %s127_s15, %s707_s28  ;;  %p716_p4 = scmp.lt.s32.totalorder %s707_s28, %s707_s28 }
  0x18   : > { %p710_p13 = pnand %p708_p12, %p696_p7  ;;  %p717_p3 = por %p716_p4, %p715_p1 }
  0x1a   : > { %p711_p0 = pneg %p710_p13 }
  0x1c   : > { %p718_p2 = pnand %p717_p3, %p711_p0 }
  0x1e   : > { %721 = shalt.err (!%p718_p2)
}
  0x1f   : > { %s768_s29 = smov 128   ;;  %s769_s30 = smov 8  }
  0x20   : > { %660 = dma.hbm_to_vmem [thread:$0]  (!%p814_p5), %s926_s1, 1024, %s127_s15, [#allocation3], %s768_s29, %s768_s29, %s769_s30  }
  0x21   : > { %s722_s8 = scalar_lea.hbm %s927_s2, 32 }
  0x22   : > { %p723_p6 = scmp.ne.s32.totalorder %s927_s2, %s722_s8  ;;  %p729_p8 = scmp.lt.u32.totalorder %s722_s8, %s927_s2 }
  0x24   : > { %p725_p2 = pnand %p723_p6, %p696_p7 }
  0x26   : > { %p726_p3 = pneg %p725_p2 }
  0x28   : > { %p731_p9 = pnand %p729_p8, %p726_p3 }
  0x2a   : > { %734 = shalt.err (!%p731_p9)
}
  0x2b   : > { %s735_s15 = scalar_lea.vmem %s818_s19, 32  ;;  %p743_p13 = scmp.lt.s32.totalorder %s818_s19, %s818_s19 }
  0x2c   : > { %p736_p10 = scmp.ne.s32.totalorder %s818_s19, %s735_s15  ;;  %p744_p0 = scmp.lt.s32.totalorder %s735_s15, %s735_s15 }
  0x2e   : > { %p738_p11 = pnand %p736_p10, %p696_p7  ;;  %p745_p1 = por %p744_p0, %p743_p13 }
  0x30   : > { %p739_p12 = pneg %p738_p11 }
  0x32   : > { %p746_p4 = pnand %p745_p1, %p739_p12 }
  0x34   : > { %749 = shalt.err (!%p746_p4)
}
  0x35   : > { %663 = dma.hbm_to_vmem [thread:$0]  (!%p814_p5), %s927_s2, 32, %s818_s19, [#allocation5]  }
  0x36   : > { %p935_p6 = scmp.ne.s32.totalorder %s932_s16, 0 }
  0x37   : > { %p936_p2 = scmp.ne.s32.totalorder (!%p935_p6), %s933_s17, 0 }
  0x38   : > { %163 = sbr.rel (%p935_p6) target bundleno = 429 (0x1ad), region = 32 }
  0x3f   : > { %755 = dma.done.wait (%p936_p2), [#allocation3], 1024  }
  0x40   : > { %757 = vsyncadd (%p936_p2), [#allocation3], 4294966272 }
  0x41   : > { %759 = dma.done.wait (%p936_p2), [#allocation5], 32  }
  0x42   : > { %761 = vsyncadd (%p936_p2), [#allocation5], 4294967264  ;;  %s599_s20 = sshll.u32 %s590_s13, 3  ;;  %v770_v0 = vmov 0   ;;  %s771_s13 = smov 64   ;;  %vm352_vm0 = vcmask 523264   ;;  %v282_v53 = vlaneseq }
  0x43   : > { %p194_p7 = scmp.lt.s32.totalorder %s599_s20, 15  ;;  %397 = vmatprep.mubr.bf16.mxu0 %v770_v0  ;;  %417 = vmatprep.mubr.bf16.mxu1 %v770_v0  ;;  %v682_v19 = vld [vmem:[#allocation2 + $0x4] ss:$8 sps:$4 sm:$0xff]   ;;  %v684_v20 = vld [vmem:[#allocation2] ss:$8 sps:$4 sm:$0xff]  }
  0x44   : > { %v685_v23 = vld [vmem:[#allocation2 + $0x14] ss:$8 sps:$4 sm:$0xff]   ;;  %365 = vmatprep.subr.bf16.mxu0 %v682_v19  ;;  %641 = vmatprep.subr.bf16.mxu1 %v682_v19  ;;  %v687_v26 = vld [vmem:[#allocation2 + $0x10] ss:$8 sps:$4 sm:$0xff]   ;;  %v688_v27 = vld [vmem:[#allocation2 + $0x24] ss:$8 sps:$4 sm:$0xff]  }
  0x45   : > { %s938_s20 = smov (!%p194_p7, %s599_s20), 15  ;;  %366 = vmatpush1.bf16.msra.mxu0 %v684_v20  ;;  %645 = vmatpush1.bf16.msra.mxu1 %v684_v20  ;;  %v690_v30 = vld [vmem:[#allocation2 + $0x20] ss:$8 sps:$4 sm:$0xff]   ;;  %v691_v31 = vld [vmem:[#allocation2 + $0x34] ss:$8 sps:$4 sm:$0xff]   ;;  %v283_v54 = vshrl.u32 %v282_v53, 7 }
  0x46   : > { %s631_s16 = sshll.u32 %s938_s20, 3  ;;  %367 = vmatprep.subr.bf16.mxu0 %v685_v23  ;;  %642 = vmatprep.subr.bf16.mxu1 %v685_v23  ;;  %v693_v32 = vld [vmem:[#allocation2 + $0x30] ss:$8 sps:$4 sm:$0xff]   ;;  %v280_v56 = vld [vmem:[#allocation4] sm:$0x3] }
  0x47   : > { %s198_s17 = scalar_lea.vmem %s925_s0, %s631_s16  ;;  %v284_v55 = vsub.s32 0, %v283_v54  ;;  %v288_v57 = vsub.s32 1, %v283_v54  ;;  %s912_s25 = scalar_lea.vmem %s928_s3, %s631_s16 }
  0x48   : > { %v216_v1 = vld [vmem:[%s198_s17 + $0x20] sm:$0xf]  ;;  %v217_v2 = vld [vmem:[%s198_s17 + $0x24] sm:$0xf]  ;;  %v218_v6 = vld [vmem:[%s198_s17 + $0x28] sm:$0xf] }
  0x49   : > { %v208_v3 = vld [vmem:[%s198_s17] sm:$0xf]  ;;  %v889_v4 = vmax.bf16 %v217_v2, %v216_v1  ;;  %v209_v5 = vld [vmem:[%s198_s17 + $0x4] sm:$0xf]  ;;  %v219_v7 = vld [vmem:[%s198_s17 + $0x2c] sm:$0xf]  ;;  %368 = vmatpush1.bf16.msra.mxu0 %v687_v26  ;;  %646 = vmatpush1.bf16.msra.mxu1 %v687_v26  ;;  %v285_v58 = vrot.slane %v280_v56, %v284_v55  ;;  %v289_v59 = vrot.slane %v280_v56, %v288_v57 }
  0x4a   : > { %v224_v8 = vmax.bf16 %v209_v5, %v208_v3  ;;  %v210_v9 = vld [vmem:[%s198_s17 + $0x8] sm:$0xf]  ;;  %v211_v10 = vld [vmem:[%s198_s17 + $0xc] sm:$0xf]  ;;  %v229_v11 = vmax.bf16 %v219_v7, %v218_v6  ;;  %v214_v13 = vld [vmem:[%s198_s17 + $0x18] sm:$0xf]  ;;  %369 = vmatprep.subr.bf16.mxu0 %v688_v27  ;;  %643 = vmatprep.subr.bf16.mxu1 %v688_v27 }
  0x4b   : > { %248 = vrot.lane.b32.xlu1 %v889_v4, %s771_s13  ;;  %v225_v12 = vmax.bf16 %v211_v10, %v210_v9  ;;  %v215_v14 = vld [vmem:[%s198_s17 + $0x1c] sm:$0xf]  ;;  %v212_v15 = vld [vmem:[%s198_s17 + $0x10] sm:$0xf]  ;;  %v213_v16 = vld [vmem:[%s198_s17 + $0x14] sm:$0xf] }
  0x4c   : > { %240 = vrot.lane.b32.xlu0 %v224_v8, %s771_s13  ;;  %v222_v17 = vld [vmem:[%s198_s17 + $0x38] sm:$0xf]  ;;  %v223_v18 = vld [vmem:[%s198_s17 + $0x3c] sm:$0xf]  ;;  %v227_v21 = vmax.bf16 %v215_v14, %v214_v13  ;;  %v220_v22 = vld [vmem:[%s198_s17 + $0x30] sm:$0xf]  ;;  %v226_v24 = vmax.bf16 %v213_v16, %v212_v15 }
  0x4d   : > { %v221_v25 = vld [vmem:[%s198_s17 + $0x34] sm:$0xf]  ;;  %v231_v28 = vmax.bf16 %v223_v18, %v222_v17  ;;  %370 = vmatpush1.bf16.msra.mxu0 %v690_v30  ;;  %647 = vmatpush1.bf16.msra.mxu1 %v690_v30 }
  0x4e   : > { %v230_v29 = vmax.bf16 %v221_v25, %v220_v22  ;;  %371 = vmatprep.subr.bf16.mxu0 %v691_v31  ;;  %644 = vmatprep.subr.bf16.mxu1 %v691_v31 }
  0x4f   : > { %250 = vrot.lane.b32.xlu1 %v229_v11, %s771_s13 }
  0x50   : > { %242 = vrot.lane.b32.xlu0 %v225_v12, %s771_s13 }
  0x51   : > { %372 = vmatpush1.bf16.msra.mxu0 %v693_v32  ;;  %648 = vmatpush1.bf16.msra.mxu1 %v693_v32 }
  0x53   : > { %246 = vrot.lane.b32.xlu1 %v227_v21, %s771_s13 }
  0x54   : > { %244 = vrot.lane.b32.xlu0 %v226_v24, %s771_s13 }
  0x57   : > { %254 = vrot.lane.b32.xlu1 %v231_v28, %s771_s13 }
  0x58   : > { %252 = vrot.lane.b32.xlu0 %v230_v29, %s771_s13 }
  0xbd   : > { %v249_v33 = vpop.permute.xlu1 %248 }
  0xbe   : > { %v241_v34 = vpop.permute.xlu0 %240  ;;  %v268_v36 = vmax.bf16 %v249_v33, %v889_v4 }
  0xbf   : > { %v264_v39 = vmax.bf16 %v241_v34, %v224_v8 }
  0xc1   : > { %v251_v35 = vpop.permute.xlu1 %250 }
  0xc2   : > { %v269_v37 = vmax.bf16 %v251_v35, %v229_v11  ;;  %v243_v38 = vpop.permute.xlu0 %242 }
  0xc3   : > { %v265_v40 = vmax.bf16 %v243_v38, %v225_v12 }
  0xc4   : > { %v607_v41 = vcombine.low %v268_v36, %v269_v37 }
  0xc5   : > { %v605_v42 = vcombine.low %v264_v39, %v265_v40  ;;  %v247_v43 = vpop.permute.xlu1 %246 }
  0xc6   : > { %v245_v44 = vpop.permute.xlu0 %244  ;;  %619 = vmatmul.mubr.msk.bf16.vlgmr.msra.gmra.mrb[0].mxu1 %vm352_vm0, %v607_v41  ;;  %v267_v45 = vmax.bf16 %v247_v43, %v227_v21 }
  0xc7   : > { %617 = vmatmul.mubr.msk.bf16.vlgmr.msra.gmra.mrb[0].mxu0 %vm352_vm0, %v605_v42  ;;  %427 = vmatprep.mubr.bf16.mxu1 %v770_v0  ;;  %v266_v46 = vmax.bf16 %v245_v44, %v226_v24 }
  0xc8   : > { %407 = vmatprep.mubr.bf16.mxu0 %v770_v0 }
  0xc9   : > { %v255_v47 = vpop.permute.xlu1 %254  ;;  %v606_v51 = vcombine.low %v266_v46, %v267_v45 }
  0xca   : > { %v271_v48 = vmax.bf16 %v255_v47, %v231_v28  ;;  %v253_v49 = vpop.permute.xlu0 %252 }
  0xcb   : > { %v270_v50 = vmax.bf16 %v253_v49, %v230_v29 }
  0xcd   : > { %v608_v52 = vcombine.low %v270_v50, %v271_v48 }
  0xcf   : > { %618 = vmatmul.mubr.msk.bf16.gmra.mrb[4].mxu0 %vm352_vm0, %v606_v51  ;;  %620 = vmatmul.mubr.msk.bf16.gmra.mrb[4].mxu1 %vm352_vm0, %v608_v52 }
 0x199   : > { %v419_v60 = vpop.f32.mrb[0].mxu1 }
 0x19a   : > { %v399_v61 = vpop.f32.mrb[0].mxu0  ;;  %v420_v62 = vadd.f32 %v419_v60, %v285_v58  ;;  %v421_v63 = vpop.f32.mrb[1].mxu1 }
 0x19b   : > { %v400_v0 = vadd.f32 %v399_v61, %v285_v58  ;;  %v401_v1 = vpop.f32.mrb[1].mxu0  ;;  %v422_v2 = vadd.f32 %v421_v63, %v289_v59  ;;  %v423_v3 = vpop.f32.mrb[2].mxu1 }
 0x19c   : > { %v446_v4 = vmax.f32 %v420_v62, 0.0  ;;  %v402_v5 = vadd.f32 %v401_v1, %v289_v59  ;;  %v403_v6 = vpop.f32.mrb[2].mxu0  ;;  %v424_v7 = vadd.f32 %v423_v3, %v285_v58  ;;  %v425_v8 = vpop.f32.mrb[3].mxu1 }
 0x19d   : > { %v438_v9 = vmax.f32 %v400_v0, 0.0  ;;  %v447_v10 = vmax.f32 %v422_v2, 0.0  ;;  %v404_v11 = vadd.f32 %v403_v6, %v285_v58  ;;  %v405_v12 = vpop.f32.mrb[3].mxu0  ;;  %v426_v13 = vadd.f32 %v425_v8, %v289_v59 }
 0x19e   : > { %v439_v14 = vmax.f32 %v402_v5, 0.0  ;;  %v448_v15 = vmax.f32 %v424_v7, 0.0  ;;  %v406_v16 = vadd.f32 %v405_v12, %v289_v59 }
 0x19f   : > { %v637_v17 = vpack.c.bf16 %v447_v10, %v446_v4  ;;  %v440_v18 = vmax.f32 %v404_v11, 0.0  ;;  %v449_v19 = vmax.f32 %v426_v13, 0.0 }
 0x1a0   : > { %v633_v20 = vpack.c.bf16 %v439_v14, %v438_v9  ;;  %v441_v21 = vmax.f32 %v406_v16, 0.0 }
 0x1a1   : > { %506 = vst [vmem:[%s912_s25 + $0x20] sm:$0xff] %v637_v17  ;;  %v638_v22 = vpack.c.bf16 %v449_v19, %v448_v15 }
 0x1a2   : > { %502 = vst [vmem:[%s912_s25] sm:$0xff] %v633_v20  ;;  %v634_v23 = vpack.c.bf16 %v441_v21, %v440_v18  ;;  %v409_v24 = vpop.f32.mrb[4].mxu0  ;;  %v429_v25 = vpop.f32.mrb[4].mxu1 }
 0x1a3   : > { %507 = vst [vmem:[%s912_s25 + $0x28] sm:$0xff] %v638_v22  ;;  %v410_v26 = vadd.f32 %v409_v24, %v285_v58  ;;  %v430_v27 = vadd.f32 %v429_v25, %v285_v58  ;;  %v411_v28 = vpop.f32.mrb[5].mxu0  ;;  %v431_v29 = vpop.f32.mrb[5].mxu1 }
 0x1a4   : > { %503 = vst [vmem:[%s912_s25 + $0x8] sm:$0xff] %v634_v23  ;;  %v412_v30 = vadd.f32 %v411_v28, %v289_v59  ;;  %v432_v31 = vadd.f32 %v431_v29, %v289_v59  ;;  %v413_v32 = vpop.f32.mrb[6].mxu0  ;;  %v433_v33 = vpop.f32.mrb[6].mxu1 }
 0x1a5   : > { %v442_v34 = vmax.f32 %v410_v26, 0.0  ;;  %v450_v35 = vmax.f32 %v430_v27, 0.0  ;;  %v414_v36 = vadd.f32 %v413_v32, %v285_v58  ;;  %v434_v37 = vadd.f32 %v433_v33, %v285_v58  ;;  %v415_v38 = vpop.f32.mrb[7].mxu0  ;;  %v435_v39 = vpop.f32.mrb[7].mxu1 }
 0x1a6   : > { %v443_v40 = vmax.f32 %v412_v30, 0.0  ;;  %v451_v41 = vmax.f32 %v432_v31, 0.0  ;;  %v416_v42 = vadd.f32 %v415_v38, %v289_v59  ;;  %v436_v43 = vadd.f32 %v435_v39, %v289_v59 }
 0x1a7   : > { %v444_v44 = vmax.f32 %v414_v36, 0.0  ;;  %v452_v45 = vmax.f32 %v434_v37, 0.0 }
 0x1a8   : > { %v635_v46 = vpack.c.bf16 %v443_v40, %v442_v34  ;;  %v639_v47 = vpack.c.bf16 %v451_v41, %v450_v35  ;;  %v445_v48 = vmax.f32 %v416_v42, 0.0  ;;  %v453_v49 = vmax.f32 %v436_v43, 0.0 }
 0x1aa   : > { %504 = vst [vmem:[%s912_s25 + $0x10] sm:$0xff] %v635_v46  ;;  %508 = vst [vmem:[%s912_s25 + $0x30] sm:$0xff] %v639_v47  ;;  %v636_v50 = vpack.c.bf16 %v445_v48, %v444_v44  ;;  %v640_v51 = vpack.c.bf16 %v453_v49, %v452_v45 }
 0x1ac   : > { %505 = vst [vmem:[%s912_s25 + $0x18] sm:$0xff] %v636_v50  ;;  %509 = vst [vmem:[%s912_s25 + $0x38] sm:$0xff] %v640_v51 }
 0x1ad PF: > { %s15_s12 = sadd.s32 1, %s764_s12  }
 0x1ae   : > { %p12_p5 = scmp.ge.s32.totalorder %s15_s12, 4  }
 0x1b0   :  { %14 = sbr.rel (!%p12_p5) target bundleno = 2 (0x2), region = 71 }
 0x1b7   :  { %534 = vsyncpa [#allocation3], 1 }
 0x1b8   :  { %536 = vsyncpa [#allocation3 + $0x1], 1 }
 0x1b9   :  { %537 = vsyncpa [#allocation5], 1 }

// kernel: san_forward.7
= control target key start
LH: loop header
LB: loop body
LE: loop exit
PB: predicated region body
PF: predicated region fallthrough
CT: control target
= control target key end

     0   :  { %8 = vsyncpa [#allocation3], 0  ;;  %s1283_s0 = inlined_call_operand.vmem [shape: bf16[8,2,4,512], index: 0, kind: input, shape index: {}]   ;;  %s1284_s1 = inlined_call_operand.hbm [shape: bf16[256,512], index: 1, kind: input, shape index: {}]   ;;  %s1285_s2 = inlined_call_operand.hbm [shape: f32[1,512], index: 2, kind: input, shape index: {}]   ;;  %s1286_s3 = inlined_call_operand.vmem [shape: bf16[32,512], index: 3, kind: output, shape index: {}]  }
   0x1   :  { %9 = vsyncpa [#allocation5], 0  ;;  %s1183_s12 = smov 0  }
   0x2 LB: > { %s1189_s13 = sadd.s32 4294967295, %s1156_s12   ;;  %p869_p0 = scmp.ge.s32.totalorder %s1156_s12, 1  ;;  %s1156_s12 = sphi %s1183_s12, %s15_s12  }
   0x3   : > { %p114_p1 = scmp.lt.s32.totalorder %s1156_s12, 3  ;;  %s1158_s14 = smov [#allocation2]  }
   0x4   : > { %s126_s15 = sshll.u32 %s1158_s14, 4  ;;  %p1287_p3 = scmp.eq.s32.totalorder %s1189_s13, 0  ;;  %s127_s15 = int_to_ptr.vmem [resolvable:$true] %s126_s15 }
   0x5   : > { %p1193_p2 = pnand %p869_p0, %p114_p1  ;;  %s1159_s17 = smov [#allocation4]  }
   0x6   : > { %s140_s18 = sshll.u32 %s1159_s17, 4  ;;  %s1086_s22 = scalar_lea.hbm %s1284_s1, 8192  ;;  %s1206_s18 = int_to_ptr.vmem [resolvable:$true] %s140_s18 }
   0x7   : > { %s1289_s16 = scalar_select %p1193_p2, 1, 0 }
   0x8   : > { %p966_p4 = pneg %p1193_p2  ;;  %p1087_p6 = scmp.ne.s32.totalorder %s1284_s1, %s1086_s22 }
   0x9   : > { %p1093_p10 = scmp.lt.u32.totalorder %s1086_s22, %s1284_s1 }
   0xa   : > { %p1202_p5 = pnand %p1287_p3, %p966_p4 }
   0xc   : > { %p1088_p7 = pneg %p1202_p5 }
   0xe   : > { %p1089_p8 = pnand %p1088_p7, %p1087_p6 }
  0x10   : > { %p1090_p9 = pneg %p1089_p8 }
  0x12   : > { %p1095_p11 = pnand %p1093_p10, %p1090_p9 }
  0x14   : > { %1098 = shalt.err (!%p1095_p11)
}
  0x15   : > { %s1099_s27 = scalar_lea.vmem %s127_s15, 8192  ;;  %p1107_p1 = scmp.lt.s32.totalorder %s127_s15, %s127_s15 }
  0x16   : > { %p1100_p12 = scmp.ne.s32.totalorder %s127_s15, %s1099_s27  ;;  %p1108_p4 = scmp.lt.s32.totalorder %s1099_s27, %s1099_s27 }
  0x18   : > { %p1102_p13 = pnand %p1100_p12, %p1088_p7  ;;  %p1109_p3 = por %p1108_p4, %p1107_p1 }
  0x1a   : > { %p1103_p0 = pneg %p1102_p13 }
  0x1c   : > { %p1110_p2 = pnand %p1109_p3, %p1103_p0 }
  0x1e   : > { %1113 = shalt.err (!%p1110_p2)
}
  0x1f   : > { %s1160_s28 = smov 256   ;;  %s1161_s29 = smov 16  }
  0x20   : > { %969 = dma.hbm_to_vmem [thread:$0]  (!%p1202_p5), %s1284_s1, 8192, %s127_s15, [#allocation3], %s1160_s28, %s1160_s28, %s1161_s29  }
  0x21   : > { %s1114_s7 = scalar_lea.hbm %s1285_s2, 64 }
  0x22   : > { %p1115_p6 = scmp.ne.s32.totalorder %s1285_s2, %s1114_s7  ;;  %p1121_p8 = scmp.lt.u32.totalorder %s1114_s7, %s1285_s2 }
  0x24   : > { %p1117_p2 = pnand %p1115_p6, %p1088_p7 }
  0x26   : > { %p1118_p3 = pneg %p1117_p2 }
  0x28   : > { %p1123_p9 = pnand %p1121_p8, %p1118_p3 }
  0x2a   : > { %1126 = shalt.err (!%p1123_p9)
}
  0x2b   : > { %s1127_s14 = scalar_lea.vmem %s1206_s18, 64  ;;  %p1135_p13 = scmp.lt.s32.totalorder %s1206_s18, %s1206_s18 }
  0x2c   : > { %p1128_p10 = scmp.ne.s32.totalorder %s1206_s18, %s1127_s14  ;;  %p1136_p0 = scmp.lt.s32.totalorder %s1127_s14, %s1127_s14 }
  0x2e   : > { %p1130_p11 = pnand %p1128_p10, %p1088_p7  ;;  %p1137_p1 = por %p1136_p0, %p1135_p13 }
  0x30   : > { %p1131_p12 = pneg %p1130_p11 }
  0x32   : > { %p1138_p4 = pnand %p1137_p1, %p1131_p12 }
  0x34   : > { %1141 = shalt.err (!%p1138_p4)
}
  0x35   : > { %972 = dma.hbm_to_vmem [thread:$0]  (!%p1202_p5), %s1285_s2, 64, %s1206_s18, [#allocation5]  }
  0x36   : > { %p1291_p6 = scmp.ne.s32.totalorder %s1289_s16, 0 }
  0x37   : > { %p1292_p2 = scmp.eq.s32.totalorder (!%p1291_p6), %s1189_s13, 0 }
  0x38   : > { %163 = sbr.rel (%p1291_p6) target bundleno = 354 (0x162), region = 32 }
  0x3f   : > { %1147 = dma.done.wait (%p1292_p2), [#allocation3], 8192   ;;  %p1293_p7 = pmov %p1292_p2 }
  0x40   : > { %p1294_p3 = pmov %p1292_p2 }
  0x41   : > { %1149 = vsyncadd (%p1293_p7), [#allocation3], 4294959104 }
  0x42   : > { %1151 = dma.done.wait (%p1294_p3), [#allocation5], 64   ;;  %p1295_p8 = pmov %p1292_p2 }
  0x43   : > { %v990_v0 = vld [vmem:[#allocation2 + $0x4] ss:$16 sps:$4 sm:$0xff]   ;;  %v992_v1 = vld [vmem:[#allocation2 + $0xc] ss:$16 sps:$4 sm:$0xff]   ;;  %v994_v2 = vld [vmem:[#allocation2] ss:$16 sps:$4 sm:$0xff]   ;;  %v301_v45 = vlaneseq }
  0x44   : > { %1153 = vsyncadd (%p1295_p8), [#allocation5], 4294967232  ;;  %665 = vmatprep.subr.bf16.mxu0 %v990_v0  ;;  %v995_v3 = vld [vmem:[#allocation2 + $0x8] ss:$16 sps:$4 sm:$0xff]   ;;  %708 = vmatprep.subr.bf16.mxu1 %v992_v1  ;;  %v996_v4 = vld [vmem:[#allocation2 + $0x24] ss:$16 sps:$4 sm:$0xff]  }
  0x45   : > { %666 = vmatpush1.bf16.msra.mxu0 %v994_v2  ;;  %709 = vmatpush1.bf16.msra.mxu1 %v995_v3  ;;  %v998_v5 = vld [vmem:[#allocation2 + $0x2c] ss:$16 sps:$4 sm:$0xff]   ;;  %v1000_v6 = vld [vmem:[#allocation2 + $0x20] ss:$16 sps:$4 sm:$0xff]   ;;  %v1001_v7 = vld [vmem:[#allocation2 + $0x28] ss:$16 sps:$4 sm:$0xff]  }
  0x46   : > { %667 = vmatprep.subr.bf16.mxu0 %v996_v4  ;;  %710 = vmatprep.subr.bf16.mxu1 %v998_v5  ;;  %v1002_v8 = vld [vmem:[#allocation2 + $0x44] ss:$16 sps:$4 sm:$0xff]   ;;  %v1004_v9 = vld [vmem:[#allocation2 + $0x4c] ss:$16 sps:$4 sm:$0xff]   ;;  %v1006_v10 = vld [vmem:[#allocation2 + $0x40] ss:$16 sps:$4 sm:$0xff]  }
  0x47   : > { %v1007_v11 = vld [vmem:[#allocation2 + $0x48] ss:$16 sps:$4 sm:$0xff]   ;;  %v1008_v12 = vld [vmem:[#allocation2 + $0x64] ss:$16 sps:$4 sm:$0xff]   ;;  %v1010_v13 = vld [vmem:[#allocation2 + $0x6c] ss:$16 sps:$4 sm:$0xff]  }
  0x48   : > { %v1012_v14 = vld [vmem:[#allocation2 + $0x60] ss:$16 sps:$4 sm:$0xff]   ;;  %v1013_v15 = vld [vmem:[#allocation2 + $0x68] ss:$16 sps:$4 sm:$0xff]   ;;  %v1014_v16 = vld [vmem:[#allocation2 + $0x84] ss:$16 sps:$4 sm:$0xff]  }
  0x49   : > { %668 = vmatpush1.bf16.msra.mxu0 %v1000_v6  ;;  %711 = vmatpush1.bf16.msra.mxu1 %v1001_v7  ;;  %v1016_v17 = vld [vmem:[#allocation2 + $0x8c] ss:$16 sps:$4 sm:$0xff]   ;;  %v1018_v18 = vld [vmem:[#allocation2 + $0x80] ss:$16 sps:$4 sm:$0xff]   ;;  %v1019_v19 = vld [vmem:[#allocation2 + $0x88] ss:$16 sps:$4 sm:$0xff]  }
  0x4a   : > { %669 = vmatprep.subr.bf16.mxu0 %v1002_v8  ;;  %712 = vmatprep.subr.bf16.mxu1 %v1004_v9  ;;  %v1020_v20 = vld [vmem:[#allocation2 + $0xa4] ss:$16 sps:$4 sm:$0xff]   ;;  %v1022_v21 = vld [vmem:[#allocation2 + $0xac] ss:$16 sps:$4 sm:$0xff]   ;;  %v1024_v22 = vld [vmem:[#allocation2 + $0xa0] ss:$16 sps:$4 sm:$0xff]  }
  0x4b   : > { %v1025_v23 = vld [vmem:[#allocation2 + $0xa8] ss:$16 sps:$4 sm:$0xff]   ;;  %v1026_v24 = vld [vmem:[#allocation2 + $0xc4] ss:$16 sps:$4 sm:$0xff]   ;;  %v1028_v25 = vld [vmem:[#allocation2 + $0xcc] ss:$16 sps:$4 sm:$0xff]  }
  0x4c   : > { %v1030_v26 = vld [vmem:[#allocation2 + $0xc0] ss:$16 sps:$4 sm:$0xff]   ;;  %v1031_v27 = vld [vmem:[#allocation2 + $0xc8] ss:$16 sps:$4 sm:$0xff]   ;;  %v1032_v28 = vld [vmem:[#allocation2 + $0xe4] ss:$16 sps:$4 sm:$0xff]  }
  0x4d   : > { %670 = vmatpush1.bf16.msra.mxu0 %v1006_v10  ;;  %713 = vmatpush1.bf16.msra.mxu1 %v1007_v11  ;;  %v1034_v29 = vld [vmem:[#allocation2 + $0xec] ss:$16 sps:$4 sm:$0xff]   ;;  %s876_s16 = sshll.u32 %s1189_s13, 2  ;;  %v1036_v30 = vld [vmem:[#allocation2 + $0xe0] ss:$16 sps:$4 sm:$0xff]   ;;  %v1269_v60 = vshrl.u32 %v301_v45, 7 }
  0x4e   : > { %671 = vmatprep.subr.bf16.mxu0 %v1008_v12  ;;  %714 = vmatprep.subr.bf16.mxu1 %v1010_v13  ;;  %v1037_v31 = vld [vmem:[#allocation2 + $0xe8] ss:$16 sps:$4 sm:$0xff]   ;;  %v1038_v32 = vld [vmem:[#allocation2 + $0x104] ss:$16 sps:$4 sm:$0xff]   ;;  %p194_p5 = scmp.lt.s32.totalorder %s876_s16, 7  ;;  %s879_s22 = sshll.u32 %s1189_s13, 1 }
  0x4f   : > { %v1040_v33 = vld [vmem:[#allocation2 + $0x10c] ss:$16 sps:$4 sm:$0xff]   ;;  %v1042_v34 = vld [vmem:[#allocation2 + $0x100] ss:$16 sps:$4 sm:$0xff]   ;;  %v1043_v35 = vld [vmem:[#allocation2 + $0x108] ss:$16 sps:$4 sm:$0xff]  }
  0x50   : > { %v1044_v36 = vld [vmem:[#allocation2 + $0x124] ss:$16 sps:$4 sm:$0xff]   ;;  %s1297_s16 = smov (!%p194_p5, %s876_s16), 7  ;;  %v1046_v37 = vld [vmem:[#allocation2 + $0x12c] ss:$16 sps:$4 sm:$0xff]   ;;  %p201_p9 = scmp.lt.s32.totalorder %s879_s22, 3 }
  0x51   : > { %672 = vmatpush1.bf16.msra.mxu0 %v1012_v14  ;;  %715 = vmatpush1.bf16.msra.mxu1 %v1013_v15  ;;  %v1048_v38 = vld [vmem:[#allocation2 + $0x120] ss:$16 sps:$4 sm:$0xff]   ;;  %v1049_v39 = vld [vmem:[#allocation2 + $0x128] ss:$16 sps:$4 sm:$0xff]   ;;  %v1050_v40 = vld [vmem:[#allocation2 + $0x144] ss:$16 sps:$4 sm:$0xff]  }
  0x52   : > { %673 = vmatprep.subr.bf16.mxu0 %v1014_v16  ;;  %716 = vmatprep.subr.bf16.mxu1 %v1016_v17  ;;  %s952_s18 = sshll.u32 %s1297_s16, 4  ;;  %v1052_v41 = vld [vmem:[#allocation2 + $0x14c] ss:$16 sps:$4 sm:$0xff]   ;;  %v1054_v42 = vld [vmem:[#allocation2 + $0x140] ss:$16 sps:$4 sm:$0xff]   ;;  %s1299_s22 = smov (!%p201_p9, %s879_s22), 3 }
  0x53   : > { %v1055_v43 = vld [vmem:[#allocation2 + $0x148] ss:$16 sps:$4 sm:$0xff]   ;;  %s198_s21 = scalar_lea.vmem %s1283_s0, %s952_s18  ;;  %v1056_v44 = vld [vmem:[#allocation2 + $0x164] ss:$16 sps:$4 sm:$0xff]   ;;  %v1162_v46 = vmov 1983009808  }
  0x54   : > { %v328_v47 = vunpack.c.l.s4 %v1162_v46  ;;  %v1058_v48 = vld [vmem:[#allocation2 + $0x16c] ss:$16 sps:$4 sm:$0xff]   ;;  %v1060_v49 = vld [vmem:[#allocation2 + $0x160] ss:$16 sps:$4 sm:$0xff]   ;;  %v1061_v50 = vld [vmem:[#allocation2 + $0x168] ss:$16 sps:$4 sm:$0xff]  }
  0x55   : > { %674 = vmatpush1.bf16.msra.mxu0 %v1018_v18  ;;  %717 = vmatpush1.bf16.msra.mxu1 %v1019_v19  ;;  %v207_v51 = vld [vmem:[%s198_s21] sm:$0xff]  ;;  %v208_v52 = vld [vmem:[%s198_s21 + $0x8] sm:$0xff]  ;;  %v209_v53 = vld [vmem:[%s198_s21 + $0x10] sm:$0xff]  ;;  %s953_s13 = sshll.u32 %s1299_s22, 4 }
  0x56   : > { %675 = vmatprep.subr.bf16.mxu0 %v1020_v20  ;;  %718 = vmatprep.subr.bf16.mxu1 %v1022_v21  ;;  %v210_v54 = vld [vmem:[%s198_s21 + $0x18] sm:$0xff]  ;;  %v211_v55 = vld [vmem:[%s198_s21 + $0x20] sm:$0xff]  ;;  %v212_v56 = vld [vmem:[%s198_s21 + $0x28] sm:$0xff]  ;;  %v215_v58 = vmax.bf16 %v208_v52, %v207_v51  ;;  %v329_v61 = vunpack.c.0.s8 %v328_v47  ;;  %s205_s25 = scalar_lea.vmem %s1286_s3, %s953_s13 }
  0x57   : > { %v213_v57 = vld [vmem:[%s198_s21 + $0x30] sm:$0xff]  ;;  %v216_v59 = vmax.bf16 %v210_v54, %v209_v53  ;;  %v1064_v63 = vld [vmem:[#allocation2 + $0x18c] ss:$16 sps:$4 sm:$0xff]   ;;  %v217_v1 = vmax.bf16 %v212_v56, %v211_v55  ;;  %v1067_v7 = vld [vmem:[#allocation2 + $0x188] ss:$16 sps:$4 sm:$0xff]  }
  0x58   : > { %v1062_v62 = vld [vmem:[#allocation2 + $0x184] ss:$16 sps:$4 sm:$0xff]   ;;  %v214_v0 = vld [vmem:[%s198_s21 + $0x38] sm:$0xff]  ;;  %v223_v3 = vrot.slane %v215_v58, 4  ;;  %v1066_v6 = vld [vmem:[#allocation2 + $0x180] ss:$16 sps:$4 sm:$0xff]   ;;  %v332_v11 = vsub.s32 %v329_v61, %v1269_v60 }
  0x59   : > { %676 = vmatpush1.bf16.msra.mxu0 %v1024_v22  ;;  %719 = vmatpush1.bf16.msra.mxu1 %v1025_v23  ;;  %v218_v2 = vmax.bf16 %v214_v0, %v213_v57  ;;  %v224_v4 = vrot.slane %v216_v59, 4  ;;  %v225_v5 = vrot.slane %v217_v1, 4  ;;  %v1068_v12 = vld [vmem:[#allocation2 + $0x1a4] ss:$16 sps:$4 sm:$0xff]   ;;  %v1070_v13 = vld [vmem:[#allocation2 + $0x1ac] ss:$16 sps:$4 sm:$0xff]  }
  0x5a   : > { %677 = vmatprep.subr.bf16.mxu0 %v1026_v24  ;;  %720 = vmatprep.subr.bf16.mxu1 %v1028_v25  ;;  %v231_v9 = vmax.bf16 %v223_v3, %v215_v58  ;;  %v1072_v17 = vld [vmem:[#allocation2 + $0x1a0] ss:$16 sps:$4 sm:$0xff]   ;;  %v1073_v18 = vld [vmem:[#allocation2 + $0x1a8] ss:$16 sps:$4 sm:$0xff]   ;;  %v1074_v21 = vld [vmem:[#allocation2 + $0x1c4] ss:$16 sps:$4 sm:$0xff]  }
  0x5b   : > { %v226_v8 = vrot.slane %v218_v2, 4  ;;  %v232_v10 = vmax.bf16 %v224_v4, %v216_v59  ;;  %v233_v14 = vmax.bf16 %v225_v5, %v217_v1  ;;  %v1076_v22 = vld [vmem:[#allocation2 + $0x1cc] ss:$16 sps:$4 sm:$0xff]   ;;  %v1078_v24 = vld [vmem:[#allocation2 + $0x1c0] ss:$16 sps:$4 sm:$0xff]  }
  0x5c   : > { %v1079_v25 = vld [vmem:[#allocation2 + $0x1c8] ss:$16 sps:$4 sm:$0xff]  }
  0x5d   : > { %678 = vmatpush1.bf16.msra.mxu0 %v1030_v26  ;;  %721 = vmatpush1.bf16.msra.mxu1 %v1031_v27  ;;  %v234_v15 = vmax.bf16 %v226_v8, %v218_v2  ;;  %v325_v16 = vcombine.low %v231_v9, %v232_v10  ;;  %v1080_v27 = vld [vmem:[#allocation2 + $0x1e4] ss:$16 sps:$4 sm:$0xff]  }
  0x5e   : > { %679 = vmatprep.subr.bf16.mxu0 %v1032_v28  ;;  %722 = vmatprep.subr.bf16.mxu1 %v1034_v29  ;;  %v1082_v28 = vld [vmem:[#allocation2 + $0x1ec] ss:$16 sps:$4 sm:$0xff]   ;;  %v1084_v29 = vld [vmem:[#allocation2 + $0x1e0] ss:$16 sps:$4 sm:$0xff]  }
  0x5f   : > { %v326_v19 = vcombine.low %v233_v14, %v234_v15  ;;  %v333_v20 = vrot.slane %v325_v16, %v332_v11 }
  0x61   : > { %680 = vmatpush1.bf16.msra.mxu0 %v1036_v30  ;;  %723 = vmatpush1.bf16.msra.mxu1 %v1037_v31  ;;  %v340_v23 = vrot.slane %v326_v19, %v332_v11  ;;  %v1085_v30 = vld [vmem:[#allocation2 + $0x1e8] ss:$16 sps:$4 sm:$0xff]  }
  0x62   : > { %681 = vmatprep.subr.bf16.mxu0 %v1038_v32  ;;  %724 = vmatprep.subr.bf16.mxu1 %v1040_v33  ;;  %v303_v32 = vsub.s32 0, %v1269_v60  ;;  %v311_v33 = vsub.s32 2, %v1269_v60 }
  0x63   : > { %v342_v26 = vcombine.high %v333_v20, %v340_v23  ;;  %v341_v31 = vcombine.low %v333_v20, %v340_v23 }
  0x65   : > { %682 = vmatpush1.bf16.msra.mxu0 %v1042_v34  ;;  %725 = vmatpush1.bf16.msra.mxu1 %v1043_v35  ;;  %v299_v34 = vld [vmem:[#allocation4] sm:$0xf]  ;;  %v307_v35 = vsub.s32 1, %v1269_v60 }
  0x66   : > { %683 = vmatprep.subr.bf16.mxu0 %v1044_v36  ;;  %726 = vmatprep.subr.bf16.mxu1 %v1046_v37  ;;  %v315_v36 = vsub.s32 3, %v1269_v60  ;;  %v304_v37 = vrot.slane %v299_v34, %v303_v32 }
  0x67   : > { %697 = vmatprep.mubr.bf16.mxu0 %v342_v26  ;;  %740 = vmatprep.mubr.bf16.mxu1 %v342_v26 }
  0x69   : > { %684 = vmatpush1.bf16.msra.mxu0 %v1048_v38  ;;  %727 = vmatpush1.bf16.msra.mxu1 %v1049_v39  ;;  %v312_v38 = vrot.slane %v299_v34, %v311_v33  ;;  %v308_v39 = vrot.slane %v299_v34, %v307_v35 }
  0x6a   : > { %685 = vmatprep.subr.bf16.mxu0 %v1050_v40  ;;  %728 = vmatprep.subr.bf16.mxu1 %v1052_v41  ;;  %v316_v40 = vrot.slane %v299_v34, %v315_v36 }
  0x6d   : > { %686 = vmatpush1.bf16.msra.mxu0 %v1054_v42  ;;  %729 = vmatpush1.bf16.msra.mxu1 %v1055_v43 }
  0x6e   : > { %687 = vmatprep.subr.bf16.mxu0 %v1056_v44  ;;  %730 = vmatprep.subr.bf16.mxu1 %v1058_v48 }
  0x71   : > { %688 = vmatpush1.bf16.msra.mxu0 %v1060_v49  ;;  %731 = vmatpush1.bf16.msra.mxu1 %v1061_v50 }
  0x72   : > { %689 = vmatprep.subr.bf16.mxu0 %v1062_v62  ;;  %732 = vmatprep.subr.bf16.mxu1 %v1064_v63 }
  0x75   : > { %690 = vmatpush1.bf16.msra.mxu0 %v1066_v6  ;;  %733 = vmatpush1.bf16.msra.mxu1 %v1067_v7 }
  0x76   : > { %691 = vmatprep.subr.bf16.mxu0 %v1068_v12  ;;  %734 = vmatprep.subr.bf16.mxu1 %v1070_v13 }
  0x79   : > { %692 = vmatpush1.bf16.msra.mxu0 %v1072_v17  ;;  %735 = vmatpush1.bf16.msra.mxu1 %v1073_v18 }
  0x7a   : > { %693 = vmatprep.subr.bf16.mxu0 %v1074_v21  ;;  %736 = vmatprep.subr.bf16.mxu1 %v1076_v22 }
  0x7d   : > { %694 = vmatpush1.bf16.msra.mxu0 %v1078_v24  ;;  %737 = vmatpush1.bf16.msra.mxu1 %v1079_v25 }
  0x7e   : > { %695 = vmatprep.subr.bf16.mxu0 %v1080_v27  ;;  %738 = vmatprep.subr.bf16.mxu1 %v1082_v28 }
  0x81   : > { %696 = vmatpush1.bf16.msra.mxu0 %v1084_v29  ;;  %739 = vmatpush1.bf16.msra.mxu1 %v1085_v30 }
  0x84   : > { %698 = vmatmul.mubr.bf16.vlgmr.msra.gmra.mrb[0].mxu0 %v341_v31  ;;  %741 = vmatmul.mubr.bf16.vlgmr.msra.gmra.mrb[0].mxu1 %v341_v31 }
 0x157   : > { %v699_v41 = vpop.f32.mrb[0].mxu0  ;;  %v742_v42 = vpop.f32.mrb[0].mxu1 }
 0x158   : > { %v700_v43 = vadd.f32 %v699_v41, %v304_v37  ;;  %v743_v44 = vadd.f32 %v742_v42, %v312_v38  ;;  %v701_v45 = vpop.f32.mrb[1].mxu0  ;;  %v744_v46 = vpop.f32.mrb[1].mxu1 }
 0x159   : > { %v702_v47 = vadd.f32 %v701_v45, %v308_v39  ;;  %v745_v48 = vadd.f32 %v744_v46, %v316_v40  ;;  %v703_v49 = vpop.f32.mrb[2].mxu0  ;;  %v746_v50 = vpop.f32.mrb[2].mxu1 }
 0x15a   : > { %v751_v51 = vmax.f32 %v700_v43, 0.0  ;;  %v753_v52 = vmax.f32 %v743_v44, 0.0  ;;  %v704_v53 = vadd.f32 %v703_v49, %v304_v37  ;;  %v747_v54 = vadd.f32 %v746_v50, %v312_v38  ;;  %v705_v55 = vpop.f32.mrb[3].mxu0  ;;  %v748_v56 = vpop.f32.mrb[3].mxu1 }
 0x15b   : > { %v752_v57 = vmax.f32 %v702_v47, 0.0  ;;  %v754_v58 = vmax.f32 %v745_v48, 0.0  ;;  %v706_v59 = vadd.f32 %v705_v55, %v308_v39  ;;  %v749_v60 = vadd.f32 %v748_v56, %v316_v40 }
 0x15c   : > { %v755_v61 = vmax.f32 %v704_v53, 0.0  ;;  %v757_v62 = vmax.f32 %v747_v54, 0.0 }
 0x15d   : > { %v954_v63 = vpack.c.bf16 %v752_v57, %v751_v51  ;;  %v955_v0 = vpack.c.bf16 %v754_v58, %v753_v52  ;;  %v756_v1 = vmax.f32 %v706_v59, 0.0  ;;  %v758_v2 = vmax.f32 %v749_v60, 0.0 }
 0x15f   : > { %783 = vst [vmem:[%s205_s25] sm:$0xff] %v954_v63  ;;  %784 = vst [vmem:[%s205_s25 + $0x8] sm:$0xff] %v955_v0  ;;  %v956_v3 = vpack.c.bf16 %v756_v1, %v755_v61  ;;  %v957_v4 = vpack.c.bf16 %v758_v2, %v757_v62 }
 0x161   : > { %785 = vst [vmem:[%s205_s25 + $0x10] sm:$0xff] %v956_v3  ;;  %786 = vst [vmem:[%s205_s25 + $0x18] sm:$0xff] %v957_v4 }
 0x162 PF: > { %s15_s12 = sadd.s32 1, %s1156_s12  }
 0x163   : > { %p12_p10 = scmp.ge.s32.totalorder %s15_s12, 4  }
 0x165   :  { %14 = sbr.rel (!%p12_p10) target bundleno = 2 (0x2), region = 71 }
 0x16c   :  { %811 = vsyncpa [#allocation3], 1 }
 0x16d   :  { %813 = vsyncpa [#allocation3 + $0x1], 1 }
 0x16e   :  { %814 = vsyncpa [#allocation5], 1 }

// kernel: san_forward.5
= control target key start
LH: loop header
LB: loop body
LE: loop exit
PB: predicated region body
PF: predicated region fallthrough
CT: control target
= control target key end

     0   :  { %10 = vsyncpa [#allocation3], 0  ;;  %s7314_s0 = inlined_call_operand.vmem [shape: f32[32,2,16,6], index: 0, kind: input, shape index: {}]   ;;  %s7315_s1 = inlined_call_operand.hbm [shape: f32[6,128], index: 1, kind: input, shape index: {}]   ;;  %s7316_s2 = inlined_call_operand.hbm [shape: f32[1,128], index: 2, kind: input, shape index: {}]   ;;  %s7317_s3 = inlined_call_operand.hbm [shape: bf16[64,64], index: 3, kind: input, shape index: {}]   ;;  %s7318_s4 = inlined_call_operand.hbm [shape: f32[1,64], index: 4, kind: input, shape index: {}]   ;;  %s7319_s5 = inlined_call_operand.vmem [shape: bf16[512,64], index: 5, kind: output, shape index: {}]  }
   0x1   :  { %11 = vsyncpa [#allocation5], 0 }
   0x2   :  { %12 = vsyncpa [#allocation8], 0  ;;  %s4137_s18 = smov 0  }
   0x3 LB: > { %s4094_s19 = smov [#allocation4]   ;;  %s4143_s21 = sadd.s32 4294967295, %s4092_s18   ;;  %s4092_s18 = sphi %s4137_s18, %s18_s18  }
   0x4   : > { %s183_s20 = sshll.u32 %s4094_s19, 4  ;;  %p3562_p0 = scmp.ge.s32.totalorder %s4092_s18, 1  ;;  %s4148_s20 = int_to_ptr.vmem [resolvable:$true] %s183_s20 }
   0x5   : > { %p159_p1 = scmp.lt.s32.totalorder %s4092_s18, 3  ;;  %p7320_p2 = scmp.eq.s32.totalorder %s4143_s21, 0 }
   0x6   : > { %s4095_s23 = smov [#allocation2]   ;;  %s4096_s25 = smov [#allocation6]  }
   0x7   : > { %p4150_p3 = pnand %p3562_p0, %p159_p1  ;;  %s172_s24 = sshll.u32 %s4095_s23, 4  ;;  %s4156_s24 = int_to_ptr.vmem [resolvable:$true] %s172_s24 }
   0x8   : > { %s193_s26 = sshll.u32 %s4096_s25, 4  ;;  %s4097_s28 = smov [#allocation7]   ;;  %s4164_s26 = int_to_ptr.vmem [resolvable:$true] %s193_s26 }
   0x9   : > { %s7389_s22 = scalar_select %p4150_p3, 1, 0 }
   0xa   : > { %p3751_p4 = pneg %p4150_p3  ;;  %s4166_s29 = sshll.u32 %s4097_s28, 4  ;;  %s208_s29 = int_to_ptr.vmem [resolvable:$true] %s4166_s29 }
   0xb   : > { %s3962_s7 = scalar_lea.hbm %s7316_s2, 16 }
   0xc   : > { %p4160_p5 = pnand %p7320_p2, %p3751_p4  ;;  %p3963_p6 = scmp.ne.s32.totalorder %s7316_s2, %s3962_s7 }
   0xd   : > { %p3969_p10 = scmp.lt.u32.totalorder %s3962_s7, %s7316_s2 }
   0xe   : > { %p4176_p7 = pneg %p4160_p5 }
  0x10   : > { %p3965_p8 = pnand %p4176_p7, %p3963_p6 }
  0x12   : > { %p3966_p9 = pneg %p3965_p8 }
  0x14   : > { %p3971_p11 = pnand %p3969_p10, %p3966_p9 }
  0x16   : > { %3974 = shalt.err (!%p3971_p11)
}
  0x17   : > { %s3975_s13 = scalar_lea.vmem %s4148_s20, 16  ;;  %s3982_s14 = scalar_lea.vmem %s4148_s20, 32 }
  0x18   : > { %p3976_p12 = scmp.ne.s32.totalorder %s4148_s20, %s3975_s13  ;;  %p3983_p1 = scmp.lt.s32.totalorder %s4148_s20, %s4148_s20 }
  0x19   : > { %p3984_p4 = scmp.lt.s32.totalorder %s3982_s14, %s3975_s13 }
  0x1a   : > { %p3978_p13 = pnand %p3976_p12, %p4176_p7 }
  0x1b   : > { %p3985_p6 = por %p3984_p4, %p3983_p1 }
  0x1c   : > { %p3979_p0 = pneg %p3978_p13 }
  0x1e   : > { %p3986_p8 = pnand %p3985_p6, %p3979_p0 }
  0x20   : > { %3989 = shalt.err (!%p3986_p8)
}
  0x21   : > { %3757 = dma.hbm_to_vmem [thread:$0]  (!%p4160_p5), %s7316_s2, 16, %s4148_s20, [#allocation5]  }
  0x22   : > { %s3990_s23 = scalar_lea.hbm %s7315_s1, 128 }
  0x23   : > { %p3991_p9 = scmp.ne.s32.totalorder %s7315_s1, %s3990_s23  ;;  %p3997_p12 = scmp.lt.u32.totalorder %s3990_s23, %s7315_s1 }
  0x25   : > { %p3993_p10 = pnand %p3991_p9, %p4176_p7 }
  0x27   : > { %p3994_p11 = pneg %p3993_p10 }
  0x29   : > { %p3999_p13 = pnand %p3997_p12, %p3994_p11 }
  0x2b   : > { %4002 = shalt.err (!%p3999_p13)
}
  0x2c   : > { %s4003_s20 = scalar_lea.vmem %s4156_s24, 128  ;;  %p4011_p6 = scmp.lt.s32.totalorder %s4156_s24, %s4156_s24 }
  0x2d   : > { %p4004_p0 = scmp.ne.s32.totalorder %s4156_s24, %s4003_s20  ;;  %p4012_p8 = scmp.lt.s32.totalorder %s4003_s20, %s4003_s20 }
  0x2f   : > { %p4006_p1 = pnand %p4004_p0, %p4176_p7  ;;  %p4013_p9 = por %p4012_p8, %p4011_p6 }
  0x31   : > { %p4007_p4 = pneg %p4006_p1 }
  0x33   : > { %p4014_p10 = pnand %p4013_p9, %p4007_p4 }
  0x35   : > { %4017 = shalt.err (!%p4014_p10)
}
  0x36   : > { %3754 = dma.hbm_to_vmem [thread:$0]  (!%p4160_p5), %s7315_s1, 128, %s4156_s24, [#allocation3]  }
  0x37   : > { %s4018_s12 = scalar_lea.hbm %s7317_s3, 512 }
  0x38   : > { %p4019_p11 = scmp.ne.s32.totalorder %s7317_s3, %s4018_s12  ;;  %p4025_p0 = scmp.lt.u32.totalorder %s4018_s12, %s7317_s3 }
  0x3a   : > { %p4021_p12 = pnand %p4019_p11, %p4176_p7 }
  0x3c   : > { %p4022_p13 = pneg %p4021_p12 }
  0x3e   : > { %p4027_p1 = pnand %p4025_p0, %p4022_p13 }
  0x40   : > { %4030 = shalt.err (!%p4027_p1)
}
  0x41   : > { %s4031_s24 = scalar_lea.vmem %s4164_s26, 512  ;;  %p4039_p9 = scmp.lt.s32.totalorder %s4164_s26, %s4164_s26 }
  0x42   : > { %p4032_p4 = scmp.ne.s32.totalorder %s4164_s26, %s4031_s24  ;;  %p4040_p10 = scmp.lt.s32.totalorder %s4031_s24, %s4031_s24 }
  0x44   : > { %p4034_p6 = pnand %p4032_p4, %p4176_p7  ;;  %p4041_p11 = por %p4040_p10, %p4039_p9 }
  0x46   : > { %p4035_p8 = pneg %p4034_p6 }
  0x48   : > { %p4042_p12 = pnand %p4041_p11, %p4035_p8 }
  0x4a   : > { %4045 = shalt.err (!%p4042_p12)
}
  0x4b   : > { %s4098_s17 = smov 64   ;;  %s4099_s19 = smov 4  }
  0x4c   : > { %3760 = dma.hbm_to_vmem [thread:$0]  (!%p4160_p5), %s7317_s3, 512, %s4164_s26, [#allocation5], %s4098_s17, %s4098_s17, %s4099_s19  }
  0x4d   : > { %s4046_s6 = scalar_lea.hbm %s7318_s4, 16 }
  0x4e   : > { %p4047_p13 = scmp.ne.s32.totalorder %s7318_s4, %s4046_s6  ;;  %p4053_p4 = scmp.lt.u32.totalorder %s4046_s6, %s7318_s4 }
  0x50   : > { %p4049_p0 = pnand %p4047_p13, %p4176_p7 }
  0x52   : > { %p4050_p1 = pneg %p4049_p0 }
  0x54   : > { %p4055_p6 = pnand %p4053_p4, %p4050_p1 }
  0x56   : > { %4058 = shalt.err (!%p4055_p6)
}
  0x57   : > { %s4059_s11 = scalar_lea.vmem %s208_s29, 16  ;;  %s4066_s26 = scalar_lea.vmem %s208_s29, 32 }
  0x58   : > { %p4060_p8 = scmp.ne.s32.totalorder %s208_s29, %s4059_s11  ;;  %p4067_p11 = scmp.lt.s32.totalorder %s208_s29, %s208_s29 }
  0x59   : > { %p4068_p12 = scmp.lt.s32.totalorder %s4066_s26, %s4059_s11 }
  0x5a   : > { %p4062_p9 = pnand %p4060_p8, %p4176_p7 }
  0x5b   : > { %p4069_p2 = por %p4068_p12, %p4067_p11 }
  0x5c   : > { %p4063_p10 = pneg %p4062_p9 }
  0x5e   : > { %p4070_p3 = pnand %p4069_p2, %p4063_p10 }
  0x60   : > { %4073 = shalt.err (!%p4070_p3)
}
  0x61   : > { %3763 = dma.hbm_to_vmem [thread:$0]  (!%p4160_p5), %s7318_s4, 16, %s208_s29, [#allocation8]  }
  0x62   : > { %p7392_p13 = scmp.ne.s32.totalorder %s7389_s22, 0 }
  0x64   : > { %230 = sbr.rel (%p7392_p13) target bundleno = 1404 (0x57c), region = 40 }
  0x6b   : > { %p7393_p0 = scmp.eq.s32.totalorder %s4143_s21, 0 }
  0x6d   : > { %4079 = dma.done.wait (%p7393_p0), [#allocation3], 128   ;;  %p7394_p7 = pmov %p7393_p0 }
  0x6e   : > { %p7395_p1 = pmov %p7393_p0 }
  0x6f   : > { %4081 = vsyncadd (%p7394_p7), [#allocation3], 4294967168 }
  0x70   : > { %4083 = dma.done.wait (%p7395_p1), [#allocation5], 528   ;;  %p7396_p2 = pmov %p7393_p0 }
  0x71   : > { %p7397_p3 = pmov %p7393_p0 }
  0x72   : > { %4085 = vsyncadd (%p7396_p2), [#allocation5], 4294966768 }
  0x73   : > { %4087 = dma.done.wait (%p7397_p3), [#allocation8], 16   ;;  %p7398_p5 = pmov %p7393_p0 }
  0x74   : > { %s3573_s22 = sshll.u32 %s4143_s21, 4  ;;  %v4100_v0 = vmov 0   ;;  %s4106_s15 = smov 64   ;;  %vm3060_vm0 = vcmask 523264   ;;  %vm3430_vm1 = vcmask 519168  }
  0x75   : > { %4089 = vsyncadd (%p7398_p5), [#allocation8], 4294967280  ;;  %3794 = vset.pattern.permute.xlu1 %v4100_v0  ;;  %3793 = vset.pattern.permute.xlu0 %v4100_v0  ;;  %p272_p4 = scmp.lt.s32.totalorder %s3573_s22, 31  ;;  %s3576_s16 = sshll.u32 %s4143_s21, 5 }
  0x76   : > { %p279_p6 = scmp.lt.s32.totalorder %s3576_s16, 63 }
  0x77   : > { %s8211_s22 = smov (!%p272_p4, %s3573_s22), 31 }
  0x78   : > { %s3634_s27 = sshll.u32 %s8211_s22, 5  ;;  %s8213_s16 = smov (!%p279_p6, %s3576_s16), 63 }
  0x79   : > { %s4281_s14 = scalar_lea.vmem %s7314_s0, %s3634_s27  ;;  %s3577_s24 = sshll.u32 %s8213_s16, 2 }
  0x7a   : > { %v4284_v1 = vld [vmem:[%s4281_s14 + $0x10] sm:$0xff]  ;;  %v4287_v2 = vld [vmem:[%s4281_s14] sm:$0xff]  ;;  %v4292_v3 = vld [vmem:[%s4281_s14 + $0x18] sm:$0xff]  ;;  %s7216_s21 = scalar_lea.vmem %s7319_s5, %s3577_s24 }
  0x7b   : > { %362 = vperm.xlu1 %3794, %v4284_v1   ;;  %352 = vperm.xlu0 %3793, %v4287_v2   ;;  %v4295_v4 = vld [vmem:[%s4281_s14 + $0x8] sm:$0xff]  ;;  %v4303_v6 = vld [vmem:[%s4281_s14 + $0x20] sm:$0xff]  ;;  %v4308_v7 = vld [vmem:[%s4281_s14 + $0x38] sm:$0xff] }
  0x7c   : > { %v4300_v5 = vld [vmem:[%s4281_s14 + $0x28] sm:$0xff]  ;;  %v4311_v8 = vld [vmem:[%s4281_s14 + $0x30] sm:$0xff]  ;;  %v4319_v10 = vld [vmem:[%s4281_s14 + $0x40] sm:$0xff] }
  0x7d   : > { %v4316_v9 = vld [vmem:[%s4281_s14 + $0x48] sm:$0xff]  ;;  %v4324_v11 = vld [vmem:[%s4281_s14 + $0x58] sm:$0xff]  ;;  %v4327_v12 = vld [vmem:[%s4281_s14 + $0x50] sm:$0xff] }
  0x7e   : > { %v4332_v13 = vld [vmem:[%s4281_s14 + $0x68] sm:$0xff]  ;;  %v4335_v14 = vld [vmem:[%s4281_s14 + $0x60] sm:$0xff]  ;;  %v4340_v15 = vld [vmem:[%s4281_s14 + $0x78] sm:$0xff] }
  0x7f   : > { %367 = vperm.xlu1 %3794, %v4292_v3   ;;  %357 = vperm.xlu0 %3793, %v4295_v4   ;;  %v4343_v16 = vld [vmem:[%s4281_s14 + $0x70] sm:$0xff]  ;;  %v4348_v17 = vld [vmem:[%s4281_s14 + $0x88] sm:$0xff]  ;;  %v4351_v18 = vld [vmem:[%s4281_s14 + $0x80] sm:$0xff] }
  0x80   : > { %v4356_v19 = vld [vmem:[%s4281_s14 + $0x98] sm:$0xff]  ;;  %v4359_v20 = vld [vmem:[%s4281_s14 + $0x90] sm:$0xff]  ;;  %v4364_v21 = vld [vmem:[%s4281_s14 + $0xa8] sm:$0xff] }
  0x81   : > { %v4367_v22 = vld [vmem:[%s4281_s14 + $0xa0] sm:$0xff]  ;;  %v4372_v23 = vld [vmem:[%s4281_s14 + $0xb8] sm:$0xff]  ;;  %v4375_v24 = vld [vmem:[%s4281_s14 + $0xb0] sm:$0xff] }
  0x82   : > { %v4380_v25 = vld [vmem:[%s4281_s14 + $0xc8] sm:$0xff]  ;;  %v4383_v26 = vld [vmem:[%s4281_s14 + $0xc0] sm:$0xff]  ;;  %v4388_v27 = vld [vmem:[%s4281_s14 + $0xd8] sm:$0xff] }
  0x83   : > { %377 = vperm.xlu1 %3794, %v4300_v5   ;;  %372 = vperm.xlu0 %3793, %v4303_v6   ;;  %v4391_v28 = vld [vmem:[%s4281_s14 + $0xd0] sm:$0xff]  ;;  %v4396_v29 = vld [vmem:[%s4281_s14 + $0xe8] sm:$0xff]  ;;  %v4399_v30 = vld [vmem:[%s4281_s14 + $0xe0] sm:$0xff] }
  0x84   : > { %v4404_v31 = vld [vmem:[%s4281_s14 + $0xf8] sm:$0xff]  ;;  %v4407_v32 = vld [vmem:[%s4281_s14 + $0xf0] sm:$0xff]  ;;  %v4412_v33 = vld [vmem:[%s4281_s14 + $0x108] sm:$0xff] }
  0x85   : > { %v4415_v34 = vld [vmem:[%s4281_s14 + $0x100] sm:$0xff]  ;;  %v4420_v35 = vld [vmem:[%s4281_s14 + $0x118] sm:$0xff]  ;;  %v4423_v36 = vld [vmem:[%s4281_s14 + $0x110] sm:$0xff] }
  0x86   : > { %v4428_v37 = vld [vmem:[%s4281_s14 + $0x128] sm:$0xff]  ;;  %v4431_v38 = vld [vmem:[%s4281_s14 + $0x120] sm:$0xff]  ;;  %v4436_v39 = vld [vmem:[%s4281_s14 + $0x138] sm:$0xff] }
  0x87   : > { %387 = vperm.xlu1 %3794, %v4308_v7   ;;  %382 = vperm.xlu0 %3793, %v4311_v8   ;;  %v4439_v40 = vld [vmem:[%s4281_s14 + $0x130] sm:$0xff]  ;;  %v4444_v41 = vld [vmem:[%s4281_s14 + $0x148] sm:$0xff]  ;;  %v4447_v42 = vld [vmem:[%s4281_s14 + $0x140] sm:$0xff] }
  0x88   : > { %v4452_v43 = vld [vmem:[%s4281_s14 + $0x158] sm:$0xff]  ;;  %v4455_v44 = vld [vmem:[%s4281_s14 + $0x150] sm:$0xff]  ;;  %v4460_v45 = vld [vmem:[%s4281_s14 + $0x168] sm:$0xff] }
  0x89   : > { %v4463_v46 = vld [vmem:[%s4281_s14 + $0x160] sm:$0xff]  ;;  %v4468_v47 = vld [vmem:[%s4281_s14 + $0x178] sm:$0xff]  ;;  %v4471_v48 = vld [vmem:[%s4281_s14 + $0x170] sm:$0xff] }
  0x8a   : > { %7399 = vst [vmem:[#allocation12_spill] sm:$0xff] %v4471_v48  ;;  %v4476_v49 = vld [vmem:[%s4281_s14 + $0x188] sm:$0xff]  ;;  %v4479_v50 = vld [vmem:[%s4281_s14 + $0x180] sm:$0xff]  ;;  %v4484_v51 = vld [vmem:[%s4281_s14 + $0x198] sm:$0xff] }
  0x8b   : > { %397 = vperm.xlu1 %3794, %v4316_v9   ;;  %392 = vperm.xlu0 %3793, %v4319_v10   ;;  %7400 = vst [vmem:[#allocation13_spill] sm:$0xff] %v4479_v50  ;;  %7401 = vst [vmem:[#allocation14_spill] sm:$0xff] %v4484_v51  ;;  %v4487_v52 = vld [vmem:[%s4281_s14 + $0x190] sm:$0xff]  ;;  %v4492_v53 = vld [vmem:[%s4281_s14 + $0x1a8] sm:$0xff] }
  0x8c   : > { %7402 = vst [vmem:[#allocation15_spill] sm:$0xff] %v4487_v52  ;;  %7403 = vst [vmem:[#allocation16_spill] sm:$0xff] %v4492_v53  ;;  %v4495_v54 = vld [vmem:[%s4281_s14 + $0x1a0] sm:$0xff]  ;;  %v4500_v55 = vld [vmem:[%s4281_s14 + $0x1b8] sm:$0xff] }
  0x8d   : > { %7404 = vst [vmem:[#allocation17_spill] sm:$0xff] %v4495_v54  ;;  %7405 = vst [vmem:[#allocation18_spill] sm:$0xff] %v4500_v55  ;;  %v4503_v56 = vld [vmem:[%s4281_s14 + $0x1b0] sm:$0xff]  ;;  %v4508_v57 = vld [vmem:[%s4281_s14 + $0x1c8] sm:$0xff] }
  0x8e   : > { %7406 = vst [vmem:[#allocation19_spill] sm:$0xff] %v4503_v56  ;;  %7407 = vst [vmem:[#allocation20_spill] sm:$0xff] %v4508_v57  ;;  %v4511_v58 = vld [vmem:[%s4281_s14 + $0x1c0] sm:$0xff]  ;;  %v4516_v59 = vld [vmem:[%s4281_s14 + $0x1d8] sm:$0xff] }
  0x8f   : > { %407 = vperm.xlu1 %3794, %v4324_v11   ;;  %402 = vperm.xlu0 %3793, %v4327_v12   ;;  %7408 = vst [vmem:[#allocation21_spill] sm:$0xff] %v4511_v58  ;;  %7409 = vst [vmem:[#allocation22_spill] sm:$0xff] %v4516_v59  ;;  %v4519_v60 = vld [vmem:[%s4281_s14 + $0x1d0] sm:$0xff]  ;;  %v4524_v61 = vld [vmem:[%s4281_s14 + $0x1e8] sm:$0xff] }
  0x90   : > { %7410 = vst [vmem:[#allocation23_spill] sm:$0xff] %v4519_v60  ;;  %7411 = vst [vmem:[#allocation24_spill] sm:$0xff] %v4524_v61  ;;  %v4527_v62 = vld [vmem:[%s4281_s14 + $0x1e0] sm:$0xff]  ;;  %v4532_v63 = vld [vmem:[%s4281_s14 + $0x1f8] sm:$0xff] }
  0x91   : > { %7412 = vst [vmem:[#allocation25_spill] sm:$0xff] %v4527_v62  ;;  %7413 = vst [vmem:[#allocation26_spill] sm:$0xff] %v4532_v63  ;;  %v4535_v0 = vld [vmem:[%s4281_s14 + $0x1f0] sm:$0xff] }
  0x93   : > { %417 = vperm.xlu1 %3794, %v4332_v13   ;;  %412 = vperm.xlu0 %3793, %v4335_v14  }
  0x97   : > { %427 = vperm.xlu1 %3794, %v4340_v15   ;;  %422 = vperm.xlu0 %3793, %v4343_v16  }
  0x9b   : > { %437 = vperm.xlu1 %3794, %v4348_v17   ;;  %432 = vperm.xlu0 %3793, %v4351_v18  }
  0x9f   : > { %447 = vperm.xlu1 %3794, %v4356_v19   ;;  %442 = vperm.xlu0 %3793, %v4359_v20  }
  0xa3   : > { %457 = vperm.xlu1 %3794, %v4364_v21   ;;  %452 = vperm.xlu0 %3793, %v4367_v22  }
  0xa7   : > { %467 = vperm.xlu1 %3794, %v4372_v23   ;;  %462 = vperm.xlu0 %3793, %v4375_v24  }
  0xab   : > { %477 = vperm.xlu1 %3794, %v4380_v25   ;;  %472 = vperm.xlu0 %3793, %v4383_v26  }
  0xaf   : > { %487 = vperm.xlu1 %3794, %v4388_v27   ;;  %482 = vperm.xlu0 %3793, %v4391_v28  }
  0xb3   : > { %497 = vperm.xlu1 %3794, %v4396_v29   ;;  %492 = vperm.xlu0 %3793, %v4399_v30  }
  0xb7   : > { %507 = vperm.xlu1 %3794, %v4404_v31   ;;  %502 = vperm.xlu0 %3793, %v4407_v32  }
  0xbb   : > { %517 = vperm.xlu1 %3794, %v4412_v33   ;;  %512 = vperm.xlu0 %3793, %v4415_v34  }
  0xbf   : > { %527 = vperm.xlu1 %3794, %v4420_v35   ;;  %522 = vperm.xlu0 %3793, %v4423_v36  }
  0xc3   : > { %537 = vperm.xlu1 %3794, %v4428_v37   ;;  %532 = vperm.xlu0 %3793, %v4431_v38  }
  0xc7   : > { %547 = vperm.xlu1 %3794, %v4436_v39   ;;  %542 = vperm.xlu0 %3793, %v4439_v40  }
  0xcb   : > { %557 = vperm.xlu1 %3794, %v4444_v41   ;;  %552 = vperm.xlu0 %3793, %v4447_v42  }
  0xcf   : > { %567 = vperm.xlu1 %3794, %v4452_v43   ;;  %562 = vperm.xlu0 %3793, %v4455_v44  }
  0xd3   : > { %577 = vperm.xlu1 %3794, %v4460_v45   ;;  %572 = vperm.xlu0 %3793, %v4463_v46  }
  0xd7   : > { %587 = vperm.xlu1 %3794, %v4468_v47   ;;  %582 = vperm.xlu0 %3793, %v4471_v48  }
  0xdb   : > { %597 = vperm.xlu1 %3794, %v4476_v49   ;;  %592 = vperm.xlu0 %3793, %v4479_v50  }
  0xdf   : > { %607 = vperm.xlu1 %3794, %v4484_v51   ;;  %602 = vperm.xlu0 %3793, %v4487_v52  }
  0xe3   : > { %617 = vperm.xlu1 %3794, %v4492_v53   ;;  %612 = vperm.xlu0 %3793, %v4495_v54  }
  0xe7   : > { %627 = vperm.xlu1 %3794, %v4500_v55   ;;  %622 = vperm.xlu0 %3793, %v4503_v56  }
  0xeb   : > { %637 = vperm.xlu1 %3794, %v4508_v57   ;;  %632 = vperm.xlu0 %3793, %v4511_v58  }
  0xef   : > { %647 = vperm.xlu1 %3794, %v4516_v59   ;;  %642 = vperm.xlu0 %3793, %v4519_v60   ;;  %v4101_v60 = vmov 1  }
  0xf3   : > { %657 = vperm.xlu1 %3794, %v4524_v61   ;;  %652 = vperm.xlu0 %3793, %v4527_v62  }
  0xf7   : > { %667 = vperm.xlu1 %3794, %v4532_v63   ;;  %662 = vperm.xlu0 %3793, %v4535_v0  }
  0xfa   : > { %v4539_v57 = vpop.permute.xlu1 %362  ;;  %v4541_v59 = vpop.permute.xlu0 %352 }
  0xfb   : > { %7414 = vst [vmem:[#allocation27_spill] sm:$0xff] %v4539_v57  ;;  %7415 = vst [vmem:[#allocation28_spill] sm:$0xff] %v4541_v59  ;;  %3796 = vset.pattern.permute.xlu1 %v4101_v60  ;;  %3795 = vset.pattern.permute.xlu0 %v4101_v60 }
  0xfc   : > { %743 = vperm.xlu1 %3796, %v4295_v4   ;;  %739 = vperm.xlu0 %3795, %v4287_v2  }
  0xfe   : > { %v4545_v61 = vpop.permute.xlu1 %367  ;;  %v4547_v62 = vpop.permute.xlu0 %357 }
  0xff   : > { %7416 = vst [vmem:[#allocation29_spill] sm:$0xff] %v4545_v61  ;;  %7417 = vst [vmem:[#allocation30_spill] sm:$0xff] %v4547_v62 }
 0x100   : > { %747 = vperm.xlu1 %3796, %v4284_v1   ;;  %751 = vperm.xlu0 %3795, %v4292_v3  }
 0x102   : > { %v4551_v63 = vpop.permute.xlu1 %377  ;;  %v4553_v57 = vpop.permute.xlu0 %372 }
 0x103   : > { %7418 = vst [vmem:[#allocation31_spill] sm:$0xff] %v4551_v63  ;;  %7419 = vst [vmem:[#allocation32_spill] sm:$0xff] %v4553_v57 }
 0x104   : > { %755 = vperm.xlu1 %3796, %v4303_v6   ;;  %759 = vperm.xlu0 %3795, %v4300_v5  }
 0x106   : > { %v4557_v60 = vpop.permute.xlu1 %387  ;;  %v4559_v59 = vpop.permute.xlu0 %382 }
 0x107   : > { %7420 = vst [vmem:[#allocation33_spill] sm:$0xff] %v4557_v60  ;;  %7421 = vst [vmem:[#allocation34_spill] sm:$0xff] %v4559_v59 }
 0x108   : > { %763 = vperm.xlu1 %3796, %v4311_v8   ;;  %767 = vperm.xlu0 %3795, %v4308_v7  }
 0x10a   : > { %v4563_v62 = vpop.permute.xlu1 %397  ;;  %v4565_v61 = vpop.permute.xlu0 %392 }
 0x10b   : > { %7422 = vst [vmem:[#allocation35_spill] sm:$0xff] %v4563_v62  ;;  %7423 = vst [vmem:[#allocation36_spill] sm:$0xff] %v4565_v61 }
 0x10c   : > { %771 = vperm.xlu1 %3796, %v4319_v10   ;;  %775 = vperm.xlu0 %3795, %v4316_v9  }
 0x10e   : > { %v4569_v57 = vpop.permute.xlu1 %407  ;;  %v4571_v63 = vpop.permute.xlu0 %402 }
 0x10f   : > { %7424 = vst [vmem:[#allocation37_spill] sm:$0xff] %v4569_v57  ;;  %7425 = vst [vmem:[#allocation38_spill] sm:$0xff] %v4571_v63 }
 0x110   : > { %779 = vperm.xlu1 %3796, %v4327_v12   ;;  %783 = vperm.xlu0 %3795, %v4324_v11  }
 0x112   : > { %v4575_v59 = vpop.permute.xlu1 %417  ;;  %v4577_v60 = vpop.permute.xlu0 %412 }
 0x113   : > { %7426 = vst [vmem:[#allocation39_spill] sm:$0xff] %v4575_v59  ;;  %7427 = vst [vmem:[#allocation40_spill] sm:$0xff] %v4577_v60 }
 0x114   : > { %787 = vperm.xlu1 %3796, %v4335_v14   ;;  %791 = vperm.xlu0 %3795, %v4332_v13  }
 0x116   : > { %v4581_v61 = vpop.permute.xlu1 %427  ;;  %v4583_v62 = vpop.permute.xlu0 %422 }
 0x117   : > { %7428 = vst [vmem:[#allocation41_spill] sm:$0xff] %v4581_v61  ;;  %7429 = vst [vmem:[#allocation42_spill] sm:$0xff] %v4583_v62 }
 0x118   : > { %795 = vperm.xlu1 %3796, %v4343_v16   ;;  %799 = vperm.xlu0 %3795, %v4340_v15  }
 0x11a   : > { %v4587_v63 = vpop.permute.xlu1 %437  ;;  %v4589_v57 = vpop.permute.xlu0 %432 }
 0x11b   : > { %7430 = vst [vmem:[#allocation43_spill] sm:$0xff] %v4587_v63  ;;  %7431 = vst [vmem:[#allocation44_spill] sm:$0xff] %v4589_v57 }
 0x11c   : > { %803 = vperm.xlu1 %3796, %v4351_v18   ;;  %807 = vperm.xlu0 %3795, %v4348_v17  }
 0x11e   : > { %v4593_v60 = vpop.permute.xlu1 %447  ;;  %v4595_v59 = vpop.permute.xlu0 %442 }
 0x11f   : > { %7432 = vst [vmem:[#allocation45_spill] sm:$0xff] %v4593_v60  ;;  %7433 = vst [vmem:[#allocation46_spill] sm:$0xff] %v4595_v59 }
 0x120   : > { %811 = vperm.xlu1 %3796, %v4359_v20   ;;  %815 = vperm.xlu0 %3795, %v4356_v19  }
 0x122   : > { %v4599_v62 = vpop.permute.xlu1 %457  ;;  %v4601_v61 = vpop.permute.xlu0 %452 }
 0x123   : > { %7434 = vst [vmem:[#allocation47_spill] sm:$0xff] %v4599_v62  ;;  %7435 = vst [vmem:[#allocation48_spill] sm:$0xff] %v4601_v61 }
 0x124   : > { %819 = vperm.xlu1 %3796, %v4367_v22   ;;  %823 = vperm.xlu0 %3795, %v4364_v21  }
 0x126   : > { %v4605_v57 = vpop.permute.xlu1 %467  ;;  %v4607_v63 = vpop.permute.xlu0 %462 }
 0x127   : > { %7436 = vst [vmem:[#allocation49_spill] sm:$0xff] %v4605_v57  ;;  %7437 = vst [vmem:[#allocation50_spill] sm:$0xff] %v4607_v63 }
 0x128   : > { %827 = vperm.xlu1 %3796, %v4375_v24   ;;  %831 = vperm.xlu0 %3795, %v4372_v23  }
 0x12a   : > { %v4611_v59 = vpop.permute.xlu1 %477  ;;  %v4613_v60 = vpop.permute.xlu0 %472 }
 0x12b   : > { %7438 = vst [vmem:[#allocation51_spill] sm:$0xff] %v4611_v59  ;;  %7439 = vst [vmem:[#allocation52_spill] sm:$0xff] %v4613_v60 }
 0x12c   : > { %835 = vperm.xlu1 %3796, %v4383_v26   ;;  %839 = vperm.xlu0 %3795, %v4380_v25  }
 0x12e   : > { %v4617_v61 = vpop.permute.xlu1 %487  ;;  %v4619_v62 = vpop.permute.xlu0 %482 }
 0x12f   : > { %7440 = vst [vmem:[#allocation53_spill] sm:$0xff] %v4617_v61  ;;  %7441 = vst [vmem:[#allocation54_spill] sm:$0xff] %v4619_v62 }
 0x130   : > { %843 = vperm.xlu1 %3796, %v4391_v28   ;;  %847 = vperm.xlu0 %3795, %v4388_v27  }
 0x132   : > { %v4623_v63 = vpop.permute.xlu1 %497  ;;  %v4625_v57 = vpop.permute.xlu0 %492 }
 0x133   : > { %7442 = vst [vmem:[#allocation55_spill] sm:$0xff] %v4623_v63  ;;  %7443 = vst [vmem:[#allocation56_spill] sm:$0xff] %v4625_v57 }
 0x134   : > { %851 = vperm.xlu1 %3796, %v4399_v30   ;;  %855 = vperm.xlu0 %3795, %v4396_v29  }
 0x136   : > { %v4629_v60 = vpop.permute.xlu1 %507  ;;  %v4631_v59 = vpop.permute.xlu0 %502 }
 0x137   : > { %7444 = vst [vmem:[#allocation57_spill] sm:$0xff] %v4629_v60  ;;  %7445 = vst [vmem:[#allocation58_spill] sm:$0xff] %v4631_v59 }
 0x138   : > { %859 = vperm.xlu1 %3796, %v4407_v32   ;;  %863 = vperm.xlu0 %3795, %v4404_v31  }
 0x13a   : > { %v4635_v62 = vpop.permute.xlu1 %517  ;;  %v4637_v61 = vpop.permute.xlu0 %512 }
 0x13b   : > { %7446 = vst [vmem:[#allocation59_spill] sm:$0xff] %v4635_v62  ;;  %7447 = vst [vmem:[#allocation60_spill] sm:$0xff] %v4637_v61 }
 0x13c   : > { %867 = vperm.xlu1 %3796, %v4415_v34   ;;  %871 = vperm.xlu0 %3795, %v4412_v33  }
 0x13e   : > { %v4641_v57 = vpop.permute.xlu1 %527  ;;  %v4643_v63 = vpop.permute.xlu0 %522 }
 0x13f   : > { %7448 = vst [vmem:[#allocation61_spill] sm:$0xff] %v4641_v57  ;;  %7449 = vst [vmem:[#allocation62_spill] sm:$0xff] %v4643_v63 }
 0x140   : > { %875 = vperm.xlu1 %3796, %v4423_v36   ;;  %879 = vperm.xlu0 %3795, %v4420_v35  }
 0x142   : > { %v4647_v59 = vpop.permute.xlu1 %537  ;;  %v4649_v60 = vpop.permute.xlu0 %532 }
 0x143   : > { %7450 = vst [vmem:[#allocation63_spill] sm:$0xff] %v4647_v59  ;;  %7451 = vst [vmem:[#allocation64_spill] sm:$0xff] %v4649_v60 }
 0x144   : > { %883 = vperm.xlu1 %3796, %v4431_v38   ;;  %887 = vperm.xlu0 %3795, %v4428_v37  }
 0x146   : > { %v4653_v61 = vpop.permute.xlu1 %547  ;;  %v4655_v62 = vpop.permute.xlu0 %542 }
 0x147   : > { %7452 = vst [vmem:[#allocation65_spill] sm:$0xff] %v4653_v61  ;;  %7453 = vst [vmem:[#allocation66_spill] sm:$0xff] %v4655_v62 }
 0x148   : > { %891 = vperm.xlu1 %3796, %v4439_v40   ;;  %895 = vperm.xlu0 %3795, %v4436_v39  }
 0x14a   : > { %v4659_v63 = vpop.permute.xlu1 %557  ;;  %v4661_v57 = vpop.permute.xlu0 %552 }
 0x14b   : > { %7454 = vst [vmem:[#allocation67_spill] sm:$0xff] %v4659_v63  ;;  %7455 = vst [vmem:[#allocation68_spill] sm:$0xff] %v4661_v57 }
 0x14c   : > { %899 = vperm.xlu1 %3796, %v4447_v42   ;;  %903 = vperm.xlu0 %3795, %v4444_v41  }
 0x14e   : > { %v4665_v60 = vpop.permute.xlu1 %567  ;;  %v4667_v59 = vpop.permute.xlu0 %562 }
 0x14f   : > { %7456 = vst [vmem:[#allocation69_spill] sm:$0xff] %v4665_v60  ;;  %7457 = vst [vmem:[#allocation70_spill] sm:$0xff] %v4667_v59 }
 0x150   : > { %907 = vperm.xlu1 %3796, %v4455_v44   ;;  %911 = vperm.xlu0 %3795, %v4452_v43  }
 0x152   : > { %v4671_v62 = vpop.permute.xlu1 %577  ;;  %v4673_v61 = vpop.permute.xlu0 %572 }
 0x153   : > { %7458 = vst [vmem:[#allocation71_spill] sm:$0xff] %v4671_v62  ;;  %7459 = vst [vmem:[#allocation72_spill] sm:$0xff] %v4673_v61 }
 0x154   : > { %915 = vperm.xlu1 %3796, %v4463_v46   ;;  %919 = vperm.xlu0 %3795, %v4460_v45  }
 0x156   : > { %v4677_v57 = vpop.permute.xlu1 %587  ;;  %v4679_v63 = vpop.permute.xlu0 %582 }
 0x157   : > { %7460 = vst [vmem:[#allocation73_spill] sm:$0xff] %v4677_v57  ;;  %7461 = vst [vmem:[#allocation74_spill] sm:$0xff] %v4679_v63 }
 0x158   : > { %923 = vperm.xlu1 %3796, %v4471_v48   ;;  %927 = vperm.xlu0 %3795, %v4468_v47  }
 0x15a   : > { %v4683_v59 = vpop.permute.xlu1 %597  ;;  %v4685_v60 = vpop.permute.xlu0 %592 }
 0x15b   : > { %7462 = vst [vmem:[#allocation75_spill] sm:$0xff] %v4683_v59  ;;  %7463 = vst [vmem:[#allocation76_spill] sm:$0xff] %v4685_v60 }
 0x15c   : > { %931 = vperm.xlu1 %3796, %v4479_v50   ;;  %935 = vperm.xlu0 %3795, %v4476_v49  }
 0x15e   : > { %v4689_v61 = vpop.permute.xlu1 %607  ;;  %v4691_v62 = vpop.permute.xlu0 %602 }
 0x15f   : > { %7464 = vst [vmem:[#allocation77_spill] sm:$0xff] %v4689_v61  ;;  %7465 = vst [vmem:[#allocation78_spill] sm:$0xff] %v4691_v62 }
 0x160   : > { %939 = vperm.xlu1 %3796, %v4487_v52   ;;  %943 = vperm.xlu0 %3795, %v4484_v51  }
 0x162   : > { %v4695_v63 = vpop.permute.xlu1 %617  ;;  %v4697_v57 = vpop.permute.xlu0 %612 }
 0x163   : > { %7466 = vst [vmem:[#allocation79_spill] sm:$0xff] %v4695_v63  ;;  %7467 = vst [vmem:[#allocation80_spill] sm:$0xff] %v4697_v57  ;;  %v7472_v63 = vld [vmem:[#allocation20_spill] sm:$0xff] }
 0x164   : > { %947 = vperm.xlu1 %3796, %v4495_v54   ;;  %951 = vperm.xlu0 %3795, %v4492_v53   ;;  %v7475_v53 = vld [vmem:[#allocation23_spill] sm:$0xff] }
 0x166   : > { %v4701_v60 = vpop.permute.xlu1 %627  ;;  %v4703_v59 = vpop.permute.xlu0 %622 }
 0x167   : > { %7468 = vst [vmem:[#allocation81_spill] sm:$0xff] %v4701_v60  ;;  %7469 = vst [vmem:[#allocation82_spill] sm:$0xff] %v4703_v59  ;;  %v7476_v60 = vld [vmem:[#allocation22_spill] sm:$0xff] }
 0x168   : > { %955 = vperm.xlu1 %3796, %v4503_v56   ;;  %959 = vperm.xlu0 %3795, %v4500_v55   ;;  %v7479_v55 = vld [vmem:[#allocation25_spill] sm:$0xff] }
 0x16a   : > { %v4707_v62 = vpop.permute.xlu1 %637  ;;  %v4709_v61 = vpop.permute.xlu0 %632 }
 0x16b   : > { %7470 = vst [vmem:[#allocation83_spill] sm:$0xff] %v4707_v62  ;;  %7471 = vst [vmem:[#allocation84_spill] sm:$0xff] %v4709_v61  ;;  %v7480_v62 = vld [vmem:[#allocation24_spill] sm:$0xff] }
 0x16c   : > { %963 = vperm.xlu1 %3796, %v4511_v58   ;;  %967 = vperm.xlu0 %3795, %v7472_v63  }
 0x16e   : > { %v4713_v57 = vpop.permute.xlu1 %647  ;;  %v4715_v51 = vpop.permute.xlu0 %642 }
 0x16f   : > { %7473 = vst [vmem:[#allocation85_spill] sm:$0xff] %v4713_v57  ;;  %7474 = vst [vmem:[#allocation86_spill] sm:$0xff] %v4715_v51  ;;  %v7483_v57 = vld [vmem:[#allocation26_spill] sm:$0xff] }
 0x170   : > { %971 = vperm.xlu1 %3796, %v7475_v53   ;;  %975 = vperm.xlu0 %3795, %v7476_v60   ;;  %v4102_v60 = vmov 2  }
 0x172   : > { %v4719_v59 = vpop.permute.xlu1 %657  ;;  %v4721_v56 = vpop.permute.xlu0 %652 }
 0x173   : > { %7477 = vst [vmem:[#allocation23_spill] sm:$0xff] %v4719_v59  ;;  %7478 = vst [vmem:[#allocation87_spill] sm:$0xff] %v4721_v56 }
 0x174   : > { %979 = vperm.xlu1 %3796, %v7479_v55   ;;  %983 = vperm.xlu0 %3795, %v7480_v62  }
 0x176   : > { %v4725_v61 = vpop.permute.xlu1 %667  ;;  %v4727_v58 = vpop.permute.xlu0 %662 }
 0x177   : > { %7481 = vst [vmem:[#allocation24_spill] sm:$0xff] %v4725_v61  ;;  %7482 = vst [vmem:[#allocation88_spill] sm:$0xff] %v4727_v58 }
 0x178   : > { %987 = vperm.xlu1 %3796, %v4535_v0   ;;  %991 = vperm.xlu0 %3795, %v7483_v57  }
 0x17b   : > { %v4731_v51 = vpop.permute.xlu1 %743  ;;  %v4733_v63 = vpop.permute.xlu0 %739 }
 0x17c   : > { %7484 = vst [vmem:[#allocation26_spill] sm:$0xff] %v4731_v51  ;;  %7485 = vst [vmem:[#allocation89_spill] sm:$0xff] %v4733_v63  ;;  %3797 = vset.pattern.permute.xlu1 %v4102_v60  ;;  %3798 = vset.pattern.permute.xlu0 %v4102_v60  ;;  %v7538_v51 = vld [vmem:[#allocation14_spill] sm:$0xff] }
 0x17d   : > { %1127 = vperm.xlu1 %3797, %v4287_v2   ;;  %1131 = vperm.xlu0 %3798, %v4295_v4  }
 0x17f   : > { %v4737_v56 = vpop.permute.xlu1 %747  ;;  %v4739_v61 = vpop.permute.xlu0 %751 }
 0x180   : > { %7486 = vst [vmem:[#allocation90_spill] sm:$0xff] %v4737_v56  ;;  %7487 = vst [vmem:[#allocation91_spill] sm:$0xff] %v4739_v61 }
 0x181   : > { %1135 = vperm.xlu1 %3797, %v4284_v1   ;;  %1143 = vperm.xlu0 %3798, %v4303_v6  }
 0x183   : > { %v4743_v58 = vpop.permute.xlu1 %755  ;;  %v4745_v59 = vpop.permute.xlu0 %759 }
 0x184   : > { %7488 = vst [vmem:[#allocation92_spill] sm:$0xff] %v4743_v58  ;;  %7489 = vst [vmem:[#allocation93_spill] sm:$0xff] %v4745_v59 }
 0x185   : > { %1139 = vperm.xlu1 %3797, %v4292_v3   ;;  %1151 = vperm.xlu0 %3798, %v4311_v8  }
 0x187   : > { %v4749_v60 = vpop.permute.xlu1 %763  ;;  %v4751_v63 = vpop.permute.xlu0 %767 }
 0x188   : > { %7490 = vst [vmem:[#allocation94_spill] sm:$0xff] %v4749_v60  ;;  %7491 = vst [vmem:[#allocation95_spill] sm:$0xff] %v4751_v63 }
 0x189   : > { %1147 = vperm.xlu1 %3797, %v4300_v5   ;;  %1159 = vperm.xlu0 %3798, %v4319_v10  }
 0x18b   : > { %v4755_v61 = vpop.permute.xlu1 %771  ;;  %v4757_v56 = vpop.permute.xlu0 %775 }
 0x18c   : > { %7492 = vst [vmem:[#allocation96_spill] sm:$0xff] %v4755_v61  ;;  %7493 = vst [vmem:[#allocation97_spill] sm:$0xff] %v4757_v56 }
 0x18d   : > { %1155 = vperm.xlu1 %3797, %v4308_v7   ;;  %1167 = vperm.xlu0 %3798, %v4327_v12  }
 0x18f   : > { %v4761_v59 = vpop.permute.xlu1 %779  ;;  %v4763_v58 = vpop.permute.xlu0 %783 }
 0x190   : > { %7494 = vst [vmem:[#allocation98_spill] sm:$0xff] %v4761_v59  ;;  %7495 = vst [vmem:[#allocation99_spill] sm:$0xff] %v4763_v58 }
 0x191   : > { %1163 = vperm.xlu1 %3797, %v4316_v9   ;;  %1175 = vperm.xlu0 %3798, %v4335_v14  }
 0x193   : > { %v4767_v63 = vpop.permute.xlu1 %787  ;;  %v4769_v60 = vpop.permute.xlu0 %791 }
 0x194   : > { %7496 = vst [vmem:[#allocation100_spill] sm:$0xff] %v4767_v63  ;;  %7497 = vst [vmem:[#allocation101_spill] sm:$0xff] %v4769_v60 }
 0x195   : > { %1171 = vperm.xlu1 %3797, %v4324_v11   ;;  %1183 = vperm.xlu0 %3798, %v4343_v16  }
 0x197   : > { %v4773_v56 = vpop.permute.xlu1 %795  ;;  %v4775_v61 = vpop.permute.xlu0 %799 }
 0x198   : > { %7498 = vst [vmem:[#allocation102_spill] sm:$0xff] %v4773_v56  ;;  %7499 = vst [vmem:[#allocation103_spill] sm:$0xff] %v4775_v61 }
 0x199   : > { %1179 = vperm.xlu1 %3797, %v4332_v13   ;;  %1191 = vperm.xlu0 %3798, %v4351_v18  }
 0x19b   : > { %v4779_v58 = vpop.permute.xlu1 %803  ;;  %v4781_v59 = vpop.permute.xlu0 %807 }
 0x19c   : > { %7500 = vst [vmem:[#allocation104_spill] sm:$0xff] %v4779_v58  ;;  %7501 = vst [vmem:[#allocation105_spill] sm:$0xff] %v4781_v59 }
 0x19d   : > { %1187 = vperm.xlu1 %3797, %v4340_v15   ;;  %1199 = vperm.xlu0 %3798, %v4359_v20  }
 0x19f   : > { %v4785_v60 = vpop.permute.xlu1 %811  ;;  %v4787_v63 = vpop.permute.xlu0 %815 }
 0x1a0   : > { %7502 = vst [vmem:[#allocation106_spill] sm:$0xff] %v4785_v60  ;;  %7503 = vst [vmem:[#allocation107_spill] sm:$0xff] %v4787_v63 }
 0x1a1   : > { %1195 = vperm.xlu1 %3797, %v4348_v17   ;;  %1207 = vperm.xlu0 %3798, %v4367_v22  }
 0x1a3   : > { %v4791_v61 = vpop.permute.xlu1 %819  ;;  %v4793_v56 = vpop.permute.xlu0 %823 }
 0x1a4   : > { %7504 = vst [vmem:[#allocation108_spill] sm:$0xff] %v4791_v61  ;;  %7505 = vst [vmem:[#allocation109_spill] sm:$0xff] %v4793_v56 }
 0x1a5   : > { %1203 = vperm.xlu1 %3797, %v4356_v19   ;;  %1215 = vperm.xlu0 %3798, %v4375_v24  }
 0x1a7   : > { %v4797_v59 = vpop.permute.xlu1 %827  ;;  %v4799_v58 = vpop.permute.xlu0 %831 }
 0x1a8   : > { %7506 = vst [vmem:[#allocation110_spill] sm:$0xff] %v4797_v59  ;;  %7507 = vst [vmem:[#allocation111_spill] sm:$0xff] %v4799_v58 }
 0x1a9   : > { %1211 = vperm.xlu1 %3797, %v4364_v21   ;;  %1223 = vperm.xlu0 %3798, %v4383_v26  }
 0x1ab   : > { %v4803_v63 = vpop.permute.xlu1 %835  ;;  %v4805_v60 = vpop.permute.xlu0 %839 }
 0x1ac   : > { %7508 = vst [vmem:[#allocation112_spill] sm:$0xff] %v4803_v63  ;;  %7509 = vst [vmem:[#allocation113_spill] sm:$0xff] %v4805_v60 }
 0x1ad   : > { %1219 = vperm.xlu1 %3797, %v4372_v23   ;;  %1231 = vperm.xlu0 %3798, %v4391_v28  }
 0x1af   : > { %v4809_v56 = vpop.permute.xlu1 %843  ;;  %v4811_v61 = vpop.permute.xlu0 %847 }
 0x1b0   : > { %7510 = vst [vmem:[#allocation114_spill] sm:$0xff] %v4809_v56  ;;  %7511 = vst [vmem:[#allocation115_spill] sm:$0xff] %v4811_v61 }
 0x1b1   : > { %1227 = vperm.xlu1 %3797, %v4380_v25   ;;  %1239 = vperm.xlu0 %3798, %v4399_v30  }
 0x1b3   : > { %v4815_v58 = vpop.permute.xlu1 %851  ;;  %v4817_v59 = vpop.permute.xlu0 %855 }
 0x1b4   : > { %7512 = vst [vmem:[#allocation116_spill] sm:$0xff] %v4815_v58  ;;  %7513 = vst [vmem:[#allocation117_spill] sm:$0xff] %v4817_v59 }
 0x1b5   : > { %1235 = vperm.xlu1 %3797, %v4388_v27   ;;  %1247 = vperm.xlu0 %3798, %v4407_v32  }
 0x1b7   : > { %v4821_v60 = vpop.permute.xlu1 %859  ;;  %v4823_v63 = vpop.permute.xlu0 %863 }
 0x1b8   : > { %7514 = vst [vmem:[#allocation118_spill] sm:$0xff] %v4821_v60  ;;  %7515 = vst [vmem:[#allocation119_spill] sm:$0xff] %v4823_v63 }
 0x1b9   : > { %1243 = vperm.xlu1 %3797, %v4396_v29   ;;  %1255 = vperm.xlu0 %3798, %v4415_v34  }
 0x1bb   : > { %v4827_v61 = vpop.permute.xlu1 %867  ;;  %v4829_v56 = vpop.permute.xlu0 %871 }
 0x1bc   : > { %7516 = vst [vmem:[#allocation120_spill] sm:$0xff] %v4827_v61  ;;  %7517 = vst [vmem:[#allocation121_spill] sm:$0xff] %v4829_v56 }
 0x1bd   : > { %1251 = vperm.xlu1 %3797, %v4404_v31   ;;  %1263 = vperm.xlu0 %3798, %v4423_v36  }
 0x1bf   : > { %v4833_v59 = vpop.permute.xlu1 %875  ;;  %v4835_v58 = vpop.permute.xlu0 %879 }
 0x1c0   : > { %7518 = vst [vmem:[#allocation122_spill] sm:$0xff] %v4833_v59  ;;  %7519 = vst [vmem:[#allocation123_spill] sm:$0xff] %v4835_v58 }
 0x1c1   : > { %1259 = vperm.xlu1 %3797, %v4412_v33   ;;  %1271 = vperm.xlu0 %3798, %v4431_v38  }
 0x1c3   : > { %v4839_v63 = vpop.permute.xlu1 %883  ;;  %v4841_v60 = vpop.permute.xlu0 %887 }
 0x1c4   : > { %7520 = vst [vmem:[#allocation124_spill] sm:$0xff] %v4839_v63  ;;  %7521 = vst [vmem:[#allocation125_spill] sm:$0xff] %v4841_v60 }
 0x1c5   : > { %1267 = vperm.xlu1 %3797, %v4420_v35   ;;  %1279 = vperm.xlu0 %3798, %v4439_v40  }
 0x1c7   : > { %v4845_v56 = vpop.permute.xlu1 %891  ;;  %v4847_v61 = vpop.permute.xlu0 %895 }
 0x1c8   : > { %7522 = vst [vmem:[#allocation126_spill] sm:$0xff] %v4845_v56  ;;  %7523 = vst [vmem:[#allocation127_spill] sm:$0xff] %v4847_v61 }
 0x1c9   : > { %1275 = vperm.xlu1 %3797, %v4428_v37   ;;  %1287 = vperm.xlu0 %3798, %v4447_v42  }
 0x1cb   : > { %v4851_v58 = vpop.permute.xlu1 %899  ;;  %v4853_v59 = vpop.permute.xlu0 %903 }
 0x1cc   : > { %7524 = vst [vmem:[#allocation128_spill] sm:$0xff] %v4851_v58  ;;  %7525 = vst [vmem:[#allocation129_spill] sm:$0xff] %v4853_v59 }
 0x1cd   : > { %1283 = vperm.xlu1 %3797, %v4436_v39   ;;  %1295 = vperm.xlu0 %3798, %v4455_v44  }
 0x1cf   : > { %v4857_v60 = vpop.permute.xlu1 %907  ;;  %v4859_v63 = vpop.permute.xlu0 %911 }
 0x1d0   : > { %7526 = vst [vmem:[#allocation130_spill] sm:$0xff] %v4857_v60  ;;  %7527 = vst [vmem:[#allocation131_spill] sm:$0xff] %v4859_v63 }
 0x1d1   : > { %1291 = vperm.xlu1 %3797, %v4444_v41   ;;  %1303 = vperm.xlu0 %3798, %v4463_v46  }
 0x1d3   : > { %v4863_v61 = vpop.permute.xlu1 %915  ;;  %v4865_v56 = vpop.permute.xlu0 %919 }
 0x1d4   : > { %7528 = vst [vmem:[#allocation132_spill] sm:$0xff] %v4863_v61  ;;  %7529 = vst [vmem:[#allocation133_spill] sm:$0xff] %v4865_v56 }
 0x1d5   : > { %1299 = vperm.xlu1 %3797, %v4452_v43   ;;  %1311 = vperm.xlu0 %3798, %v4471_v48  }
 0x1d7   : > { %v4869_v59 = vpop.permute.xlu1 %923  ;;  %v4871_v58 = vpop.permute.xlu0 %927 }
 0x1d8   : > { %7530 = vst [vmem:[#allocation134_spill] sm:$0xff] %v4869_v59  ;;  %7531 = vst [vmem:[#allocation135_spill] sm:$0xff] %v4871_v58 }
 0x1d9   : > { %1307 = vperm.xlu1 %3797, %v4460_v45   ;;  %1319 = vperm.xlu0 %3798, %v4479_v50  }
 0x1db   : > { %v4875_v63 = vpop.permute.xlu1 %931  ;;  %v4877_v60 = vpop.permute.xlu0 %935 }
 0x1dc   : > { %7532 = vst [vmem:[#allocation136_spill] sm:$0xff] %v4875_v63  ;;  %7533 = vst [vmem:[#allocation137_spill] sm:$0xff] %v4877_v60  ;;  %v7539_v63 = vld [vmem:[#allocation19_spill] sm:$0xff] }
 0x1dd   : > { %1315 = vperm.xlu1 %3797, %v4468_v47   ;;  %1327 = vperm.xlu0 %3798, %v4487_v52   ;;  %v7542_v52 = vld [vmem:[#allocation16_spill] sm:$0xff] }
 0x1df   : > { %v4881_v56 = vpop.permute.xlu1 %939  ;;  %v4883_v61 = vpop.permute.xlu0 %943 }
 0x1e0   : > { %7534 = vst [vmem:[#allocation138_spill] sm:$0xff] %v4881_v56  ;;  %7535 = vst [vmem:[#allocation139_spill] sm:$0xff] %v4883_v61  ;;  %v7543_v56 = vld [vmem:[#allocation21_spill] sm:$0xff] }
 0x1e1   : > { %1323 = vperm.xlu1 %3797, %v4476_v49   ;;  %1335 = vperm.xlu0 %3798, %v4495_v54   ;;  %v7546_v54 = vld [vmem:[#allocation18_spill] sm:$0xff] }
 0x1e3   : > { %v4887_v58 = vpop.permute.xlu1 %947  ;;  %v4889_v59 = vpop.permute.xlu0 %951 }
 0x1e4   : > { %7536 = vst [vmem:[#allocation140_spill] sm:$0xff] %v4887_v58  ;;  %7537 = vst [vmem:[#allocation141_spill] sm:$0xff] %v4889_v59 }
 0x1e5   : > { %1331 = vperm.xlu1 %3797, %v7538_v51   ;;  %1343 = vperm.xlu0 %3798, %v7539_v63   ;;  %v7549_v63 = vld [vmem:[#allocation20_spill] sm:$0xff] }
 0x1e7   : > { %v4893_v60 = vpop.permute.xlu1 %955  ;;  %v4895_v50 = vpop.permute.xlu0 %959 }
 0x1e8   : > { %7540 = vst [vmem:[#allocation14_spill] sm:$0xff] %v4893_v60  ;;  %7541 = vst [vmem:[#allocation142_spill] sm:$0xff] %v4895_v50 }
 0x1e9   : > { %1339 = vperm.xlu1 %3797, %v7542_v52   ;;  %1351 = vperm.xlu0 %3798, %v7543_v56   ;;  %v7552_v56 = vld [vmem:[#allocation22_spill] sm:$0xff] }
 0x1eb   : > { %v4899_v61 = vpop.permute.xlu1 %963  ;;  %v4901_v48 = vpop.permute.xlu0 %967 }
 0x1ec   : > { %7544 = vst [vmem:[#allocation16_spill] sm:$0xff] %v4899_v61  ;;  %7545 = vst [vmem:[#allocation143_spill] sm:$0xff] %v4901_v48 }
 0x1ed   : > { %1347 = vperm.xlu1 %3797, %v7546_v54   ;;  %1359 = vperm.xlu0 %3798, %v7475_v53  }
 0x1ef   : > { %v4905_v59 = vpop.permute.xlu1 %971  ;;  %v4907_v58 = vpop.permute.xlu0 %975 }
 0x1f0   : > { %7547 = vst [vmem:[#allocation18_spill] sm:$0xff] %v4905_v59  ;;  %7548 = vst [vmem:[#allocation144_spill] sm:$0xff] %v4907_v58  ;;  %v4103_v59 = vmov 3  }
 0x1f1   : > { %1355 = vperm.xlu1 %3797, %v7549_v63   ;;  %1367 = vperm.xlu0 %3798, %v7479_v55  }
 0x1f3   : > { %v4911_v50 = vpop.permute.xlu1 %979  ;;  %v4913_v60 = vpop.permute.xlu0 %983 }
 0x1f4   : > { %7550 = vst [vmem:[#allocation20_spill] sm:$0xff] %v4911_v50  ;;  %7551 = vst [vmem:[#allocation145_spill] sm:$0xff] %v4913_v60 }
 0x1f5   : > { %1363 = vperm.xlu1 %3797, %v7552_v56   ;;  %1375 = vperm.xlu0 %3798, %v4535_v0  }
 0x1f7   : > { %v4917_v48 = vpop.permute.xlu1 %987  ;;  %v4919_v61 = vpop.permute.xlu0 %991 }
 0x1f8   : > { %7553 = vst [vmem:[#allocation22_spill] sm:$0xff] %v4917_v48  ;;  %7554 = vst [vmem:[#allocation146_spill] sm:$0xff] %v4919_v61 }
 0x1f9   : > { %1371 = vperm.xlu1 %3797, %v7480_v62   ;;  %3799 = vset.pattern.permute.xlu0 %v4103_v59 }
 0x1fa   : > { %1515 = vperm.xlu0 %3799, %v4287_v2  }
 0x1fc   : > { %v4923_v58 = vpop.permute.xlu1 %1127  ;;  %v4925_v55 = vpop.permute.xlu0 %1131 }
 0x1fd   : > { %7555 = vst [vmem:[#allocation147_spill] sm:$0xff] %v4923_v58  ;;  %7556 = vst [vmem:[#allocation148_spill] sm:$0xff] %v4925_v55  ;;  %1379 = vperm.xlu1 %3797, %v7483_v57   ;;  %v7794_v55 = vld [vmem:[#allocation73_spill] sm:$0xff] }
 0x1fe   : > { %1527 = vperm.xlu0 %3799, %v4292_v3  }
 0x200   : > { %v4929_v60 = vpop.permute.xlu1 %1135  ;;  %v4931_v50 = vpop.permute.xlu0 %1143 }
 0x201   : > { %7557 = vst [vmem:[#allocation149_spill] sm:$0xff] %v4929_v60  ;;  %7558 = vst [vmem:[#allocation150_spill] sm:$0xff] %v4931_v50  ;;  %3800 = vset.pattern.permute.xlu1 %v4103_v59  ;;  %v7790_v50 = vld [vmem:[#allocation71_spill] sm:$0xff]  ;;  %v7792_v60 = vld [vmem:[#allocation72_spill] sm:$0xff] }
 0x202   : > { %1519 = vperm.xlu1 %3800, %v4295_v4   ;;  %1535 = vperm.xlu0 %3799, %v4300_v5  }
 0x204   : > { %v4935_v61 = vpop.permute.xlu1 %1139  ;;  %v4937_v2 = vpop.permute.xlu0 %1151 }
 0x205   : > { %7559 = vst [vmem:[#allocation151_spill] sm:$0xff] %v4935_v61  ;;  %7560 = vst [vmem:[#allocation152_spill] sm:$0xff] %v4937_v2  ;;  %v7786_v2 = vld [vmem:[#allocation69_spill] sm:$0xff]  ;;  %v7788_v61 = vld [vmem:[#allocation70_spill] sm:$0xff] }
 0x206   : > { %1523 = vperm.xlu1 %3800, %v4284_v1   ;;  %1543 = vperm.xlu0 %3799, %v4308_v7  }
 0x208   : > { %v4941_v48 = vpop.permute.xlu1 %1147  ;;  %v4943_v3 = vpop.permute.xlu0 %1159 }
 0x209   : > { %7561 = vst [vmem:[#allocation153_spill] sm:$0xff] %v4941_v48  ;;  %7562 = vst [vmem:[#allocation154_spill] sm:$0xff] %v4943_v3  ;;  %v7781_v3 = vld [vmem:[#allocation65_spill] sm:$0xff]  ;;  %v7783_v48 = vld [vmem:[#allocation67_spill] sm:$0xff] }
 0x20a   : > { %1531 = vperm.xlu1 %3800, %v4303_v6   ;;  %1551 = vperm.xlu0 %3799, %v4316_v9  }
 0x20c   : > { %v4947_v59 = vpop.permute.xlu1 %1155  ;;  %v4949_v4 = vpop.permute.xlu0 %1167 }
 0x20d   : > { %7563 = vst [vmem:[#allocation155_spill] sm:$0xff] %v4947_v59  ;;  %7564 = vst [vmem:[#allocation156_spill] sm:$0xff] %v4949_v4  ;;  %v7780_v59 = vld [vmem:[#allocation64_spill] sm:$0xff] }
 0x20e   : > { %1539 = vperm.xlu1 %3800, %v4311_v8   ;;  %1559 = vperm.xlu0 %3799, %v4324_v11  }
 0x210   : > { %v4953_v5 = vpop.permute.xlu1 %1163  ;;  %v4955_v1 = vpop.permute.xlu0 %1175 }
 0x211   : > { %7565 = vst [vmem:[#allocation157_spill] sm:$0xff] %v4953_v5  ;;  %7566 = vst [vmem:[#allocation158_spill] sm:$0xff] %v4955_v1  ;;  %v5429_v1 = vld [vmem:[%s4281_s14 + $0x1c8] sm:$0xff]  ;;  %v3946_v5 = vld [vmem:[%s4281_s14 + $0x1e0] sm:$0xff] }
 0x212   : > { %1547 = vperm.xlu1 %3800, %v4319_v10   ;;  %1567 = vperm.xlu0 %3799, %v4332_v13   ;;  %7688 = vst [vmem:[#allocation265_spill] sm:$0xff] %v5429_v1 }
 0x214   : > { %v4959_v7 = vpop.permute.xlu1 %1171  ;;  %v4961_v6 = vpop.permute.xlu0 %1183 }
 0x215   : > { %7567 = vst [vmem:[#allocation159_spill] sm:$0xff] %v4959_v7  ;;  %7568 = vst [vmem:[#allocation160_spill] sm:$0xff] %v4961_v6  ;;  %v7356_v7 = vmov 5  }
 0x216   : > { %1555 = vperm.xlu1 %3800, %v4327_v12   ;;  %1575 = vperm.xlu0 %3799, %v4340_v15  }
 0x218   : > { %v4965_v9 = vpop.permute.xlu1 %1179  ;;  %v4967_v8 = vpop.permute.xlu0 %1191 }
 0x219   : > { %7569 = vst [vmem:[#allocation161_spill] sm:$0xff] %v4965_v9  ;;  %7570 = vst [vmem:[#allocation162_spill] sm:$0xff] %v4967_v8  ;;  %v5206_v8 = vld [vmem:[%s4281_s14 + $0x58] sm:$0xff] }
 0x21a   : > { %1563 = vperm.xlu1 %3800, %v4335_v14   ;;  %1583 = vperm.xlu0 %3799, %v4348_v17   ;;  %v5416_v9 = vld [vmem:[%s4281_s14 + $0x178] sm:$0xff] }
 0x21c   : > { %v4971_v11 = vpop.permute.xlu1 %1187  ;;  %v4973_v10 = vpop.permute.xlu0 %1199 }
 0x21d   : > { %7571 = vst [vmem:[#allocation163_spill] sm:$0xff] %v4971_v11  ;;  %7572 = vst [vmem:[#allocation164_spill] sm:$0xff] %v4973_v10 }
 0x21e   : > { %1571 = vperm.xlu1 %3800, %v4343_v16   ;;  %1591 = vperm.xlu0 %3799, %v4356_v19  }
 0x220   : > { %v4977_v13 = vpop.permute.xlu1 %1195  ;;  %v4979_v12 = vpop.permute.xlu0 %1207 }
 0x221   : > { %7573 = vst [vmem:[#allocation165_spill] sm:$0xff] %v4977_v13  ;;  %7574 = vst [vmem:[#allocation166_spill] sm:$0xff] %v4979_v12  ;;  %v5198_v12 = vld [vmem:[%s4281_s14 + $0x80] sm:$0xff] }
 0x222   : > { %1579 = vperm.xlu1 %3800, %v4351_v18   ;;  %1599 = vperm.xlu0 %3799, %v4364_v21  }
 0x224   : > { %v4983_v15 = vpop.permute.xlu1 %1203  ;;  %v4985_v14 = vpop.permute.xlu0 %1215 }
 0x225   : > { %7575 = vst [vmem:[#allocation167_spill] sm:$0xff] %v4983_v15  ;;  %7576 = vst [vmem:[#allocation168_spill] sm:$0xff] %v4985_v14  ;;  %v5194_v15 = vld [vmem:[%s4281_s14 + $0x48] sm:$0xff] }
 0x226   : > { %1587 = vperm.xlu1 %3800, %v4359_v20   ;;  %1607 = vperm.xlu0 %3799, %v4372_v23  }
 0x228   : > { %v4989_v17 = vpop.permute.xlu1 %1211  ;;  %v4991_v16 = vpop.permute.xlu0 %1223 }
 0x229   : > { %7577 = vst [vmem:[#allocation169_spill] sm:$0xff] %v4989_v17  ;;  %7578 = vst [vmem:[#allocation170_spill] sm:$0xff] %v4991_v16  ;;  %v5158_v16 = vld [vmem:[%s4281_s14 + $0x18] sm:$0xff] }
 0x22a   : > { %1595 = vperm.xlu1 %3800, %v4367_v22   ;;  %1615 = vperm.xlu0 %3799, %v4380_v25  }
 0x22c   : > { %v4995_v19 = vpop.permute.xlu1 %1219  ;;  %v4997_v18 = vpop.permute.xlu0 %1231 }
 0x22d   : > { %7579 = vst [vmem:[#allocation171_spill] sm:$0xff] %v4995_v19  ;;  %7580 = vst [vmem:[#allocation172_spill] sm:$0xff] %v4997_v18  ;;  %v5186_v19 = vld [vmem:[%s4281_s14 + $0x70] sm:$0xff] }
 0x22e   : > { %1603 = vperm.xlu1 %3800, %v4375_v24   ;;  %1623 = vperm.xlu0 %3799, %v4388_v27  }
 0x230   : > { %v5001_v21 = vpop.permute.xlu1 %1227  ;;  %v5003_v20 = vpop.permute.xlu0 %1239 }
 0x231   : > { %7581 = vst [vmem:[#allocation173_spill] sm:$0xff] %v5001_v21  ;;  %7582 = vst [vmem:[#allocation174_spill] sm:$0xff] %v5003_v20  ;;  %v7620_v20 = vld [vmem:[#allocation21_spill] sm:$0xff] }
 0x232   : > { %1611 = vperm.xlu1 %3800, %v4383_v26   ;;  %1631 = vperm.xlu0 %3799, %v4396_v29  }
 0x234   : > { %v5007_v23 = vpop.permute.xlu1 %1235  ;;  %v5009_v22 = vpop.permute.xlu0 %1247 }
 0x235   : > { %7583 = vst [vmem:[#allocation175_spill] sm:$0xff] %v5007_v23  ;;  %7584 = vst [vmem:[#allocation176_spill] sm:$0xff] %v5009_v22 }
 0x236   : > { %1619 = vperm.xlu1 %3800, %v4391_v28   ;;  %1639 = vperm.xlu0 %3799, %v4404_v31  }
 0x238   : > { %v5013_v25 = vpop.permute.xlu1 %1243  ;;  %v5015_v24 = vpop.permute.xlu0 %1255 }
 0x239   : > { %7585 = vst [vmem:[#allocation177_spill] sm:$0xff] %v5013_v25  ;;  %7586 = vst [vmem:[#allocation178_spill] sm:$0xff] %v5015_v24  ;;  %v5404_v24 = vld [vmem:[%s4281_s14 + $0x168] sm:$0xff] }
 0x23a   : > { %1627 = vperm.xlu1 %3800, %v4399_v30   ;;  %1647 = vperm.xlu0 %3799, %v4412_v33  }
 0x23c   : > { %v5019_v27 = vpop.permute.xlu1 %1251  ;;  %v5021_v26 = vpop.permute.xlu0 %1263 }
 0x23d   : > { %7587 = vst [vmem:[#allocation179_spill] sm:$0xff] %v5019_v27  ;;  %7588 = vst [vmem:[#allocation180_spill] sm:$0xff] %v5021_v26 }
 0x23e   : > { %1635 = vperm.xlu1 %3800, %v4407_v32   ;;  %1655 = vperm.xlu0 %3799, %v4420_v35  }
 0x240   : > { %v5025_v29 = vpop.permute.xlu1 %1259  ;;  %v5027_v28 = vpop.permute.xlu0 %1271 }
 0x241   : > { %7589 = vst [vmem:[#allocation181_spill] sm:$0xff] %v5025_v29  ;;  %7590 = vst [vmem:[#allocation182_spill] sm:$0xff] %v5027_v28  ;;  %v5392_v29 = vld [vmem:[%s4281_s14 + $0x158] sm:$0xff] }
 0x242   : > { %1643 = vperm.xlu1 %3800, %v4415_v34   ;;  %1663 = vperm.xlu0 %3799, %v4428_v37  }
 0x244   : > { %v5031_v31 = vpop.permute.xlu1 %1267  ;;  %v5033_v30 = vpop.permute.xlu0 %1279 }
 0x245   : > { %7591 = vst [vmem:[#allocation183_spill] sm:$0xff] %v5031_v31  ;;  %7592 = vst [vmem:[#allocation184_spill] sm:$0xff] %v5033_v30  ;;  %v5380_v31 = vld [vmem:[%s4281_s14 + $0x148] sm:$0xff] }
 0x246   : > { %1651 = vperm.xlu1 %3800, %v4423_v36   ;;  %1671 = vperm.xlu0 %3799, %v4436_v39  }
 0x248   : > { %v5037_v33 = vpop.permute.xlu1 %1275  ;;  %v5039_v32 = vpop.permute.xlu0 %1287 }
 0x249   : > { %7593 = vst [vmem:[#allocation185_spill] sm:$0xff] %v5037_v33  ;;  %7594 = vst [vmem:[#allocation186_spill] sm:$0xff] %v5039_v32  ;;  %v5356_v32 = vld [vmem:[%s4281_s14 + $0x128] sm:$0xff]  ;;  %v5368_v33 = vld [vmem:[%s4281_s14 + $0x138] sm:$0xff] }
 0x24a   : > { %1659 = vperm.xlu1 %3800, %v4431_v38   ;;  %1679 = vperm.xlu0 %3799, %v4444_v41  }
 0x24c   : > { %v5043_v35 = vpop.permute.xlu1 %1283  ;;  %v5045_v34 = vpop.permute.xlu0 %1295 }
 0x24d   : > { %7595 = vst [vmem:[#allocation187_spill] sm:$0xff] %v5043_v35  ;;  %7596 = vst [vmem:[#allocation188_spill] sm:$0xff] %v5045_v34  ;;  %v5344_v34 = vld [vmem:[%s4281_s14 + $0x118] sm:$0xff] }
 0x24e   : > { %1667 = vperm.xlu1 %3800, %v4439_v40   ;;  %1687 = vperm.xlu0 %3799, %v4452_v43  }
 0x250   : > { %v5049_v37 = vpop.permute.xlu1 %1291  ;;  %v5051_v36 = vpop.permute.xlu0 %1303 }
 0x251   : > { %7597 = vst [vmem:[#allocation189_spill] sm:$0xff] %v5049_v37  ;;  %7598 = vst [vmem:[#allocation190_spill] sm:$0xff] %v5051_v36  ;;  %v5332_v37 = vld [vmem:[%s4281_s14 + $0x108] sm:$0xff] }
 0x252   : > { %1675 = vperm.xlu1 %3800, %v4447_v42   ;;  %1695 = vperm.xlu0 %3799, %v4460_v45   ;;  %v7605_v45 = vld [vmem:[#allocation12_spill] sm:$0xff] }
 0x254   : > { %v5055_v39 = vpop.permute.xlu1 %1299  ;;  %v5057_v38 = vpop.permute.xlu0 %1311 }
 0x255   : > { %7599 = vst [vmem:[#allocation191_spill] sm:$0xff] %v5055_v39  ;;  %7600 = vst [vmem:[#allocation192_spill] sm:$0xff] %v5057_v38  ;;  %v5275_v38 = vld [vmem:[%s4281_s14 + $0xb8] sm:$0xff] }
 0x256   : > { %1683 = vperm.xlu1 %3800, %v4455_v44   ;;  %1703 = vperm.xlu0 %3799, %v4468_v47   ;;  %v7608_v47 = vld [vmem:[#allocation13_spill] sm:$0xff] }
 0x257   : > { %v5320_v39 = vld [vmem:[%s4281_s14 + $0xf8] sm:$0xff] }
 0x258   : > { %v5061_v41 = vpop.permute.xlu1 %1307  ;;  %v5063_v40 = vpop.permute.xlu0 %1319  ;;  %7667 = vst [vmem:[#allocation244_spill] sm:$0xff] %v5320_v39 }
 0x259   : > { %7601 = vst [vmem:[#allocation193_spill] sm:$0xff] %v5061_v41  ;;  %7602 = vst [vmem:[#allocation194_spill] sm:$0xff] %v5063_v40  ;;  %v5182_v40 = vld [vmem:[%s4281_s14 + $0x38] sm:$0xff] }
 0x25a   : > { %1691 = vperm.xlu1 %3800, %v4463_v46   ;;  %1711 = vperm.xlu0 %3799, %v4476_v49   ;;  %v7611_v49 = vld [vmem:[#allocation15_spill] sm:$0xff] }
 0x25c   : > { %v5067_v43 = vpop.permute.xlu1 %1315  ;;  %v5069_v42 = vpop.permute.xlu0 %1327 }
 0x25d   : > { %7603 = vst [vmem:[#allocation195_spill] sm:$0xff] %v5067_v43  ;;  %7604 = vst [vmem:[#allocation196_spill] sm:$0xff] %v5069_v42  ;;  %v5308_v43 = vld [vmem:[%s4281_s14 + $0xe8] sm:$0xff] }
 0x25e   : > { %1699 = vperm.xlu1 %3800, %v7605_v45   ;;  %1719 = vperm.xlu0 %3799, %v7538_v51   ;;  %v7614_v51 = vld [vmem:[#allocation17_spill] sm:$0xff]  ;;  %7664 = vst [vmem:[#allocation241_spill] sm:$0xff] %v5308_v43 }
 0x260   : > { %v5073_v27 = vpop.permute.xlu1 %1323  ;;  %v5075_v44 = vpop.permute.xlu0 %1335 }
 0x261   : > { %7606 = vst [vmem:[#allocation12_spill] sm:$0xff] %v5073_v27  ;;  %7607 = vst [vmem:[#allocation197_spill] sm:$0xff] %v5075_v44  ;;  %v5174_v44 = vld [vmem:[%s4281_s14 + $0x60] sm:$0xff] }
 0x262   : > { %1707 = vperm.xlu1 %3800, %v7608_v47   ;;  %1727 = vperm.xlu0 %3799, %v7542_v52   ;;  %v7617_v52 = vld [vmem:[#allocation19_spill] sm:$0xff] }
 0x264   : > { %v5079_v25 = vpop.permute.xlu1 %1331  ;;  %v5081_v46 = vpop.permute.xlu0 %1343 }
 0x265   : > { %7609 = vst [vmem:[#allocation13_spill] sm:$0xff] %v5079_v25  ;;  %7610 = vst [vmem:[#allocation198_spill] sm:$0xff] %v5081_v46  ;;  %v5170_v25 = vld [vmem:[%s4281_s14 + $0x28] sm:$0xff] }
 0x266   : > { %1715 = vperm.xlu1 %3800, %v7611_v49   ;;  %1735 = vperm.xlu0 %3799, %v7546_v54  }
 0x268   : > { %v5085_v22 = vpop.permute.xlu1 %1339  ;;  %v5087_v45 = vpop.permute.xlu0 %1351 }
 0x269   : > { %7612 = vst [vmem:[#allocation15_spill] sm:$0xff] %v5085_v22  ;;  %7613 = vst [vmem:[#allocation199_spill] sm:$0xff] %v5087_v45  ;;  %v5150_v45 = vld [vmem:[%s4281_s14 + $0x40] sm:$0xff] }
 0x26a   : > { %1723 = vperm.xlu1 %3800, %v7614_v51   ;;  %1743 = vperm.xlu0 %3799, %v7549_v63  }
 0x26c   : > { %v5091_v23 = vpop.permute.xlu1 %1347  ;;  %v5093_v47 = vpop.permute.xlu0 %1359 }
 0x26d   : > { %7615 = vst [vmem:[#allocation17_spill] sm:$0xff] %v5091_v23  ;;  %7616 = vst [vmem:[#allocation200_spill] sm:$0xff] %v5093_v47  ;;  %v5146_v47 = vld [vmem:[%s4281_s14 + $0x10] sm:$0xff] }
 0x26e   : > { %1731 = vperm.xlu1 %3800, %v7617_v52   ;;  %1751 = vperm.xlu0 %3799, %v7552_v56   ;;  %v5162_v23 = vld [vmem:[%s4281_s14 + $0x50] sm:$0xff] }
 0x270   : > { %v5097_v49 = vpop.permute.xlu1 %1355  ;;  %v5099_v54 = vpop.permute.xlu0 %1367 }
 0x271   : > { %7618 = vst [vmem:[#allocation19_spill] sm:$0xff] %v5097_v49  ;;  %7619 = vst [vmem:[#allocation201_spill] sm:$0xff] %v5099_v54  ;;  %v7625_v49 = vld [vmem:[#allocation25_spill] sm:$0xff] }
 0x272   : > { %1739 = vperm.xlu1 %3800, %v7620_v20   ;;  %1759 = vperm.xlu0 %3799, %v7480_v62   ;;  %v7349_v20 = vmov 4   ;;  %v5116_v62 = vld [vmem:[%s4281_s14 + $0x8] sm:$0xff] }
 0x274   : > { %v5103_v51 = vpop.permute.xlu1 %1363  ;;  %v5105_v63 = vpop.permute.xlu0 %1375 }
 0x275   : > { %7621 = vst [vmem:[#allocation21_spill] sm:$0xff] %v5103_v51  ;;  %7622 = vst [vmem:[#allocation202_spill] sm:$0xff] %v5105_v63  ;;  %v5134_v51 = vld [vmem:[%s4281_s14] sm:$0xff] }
 0x276   : > { %1747 = vperm.xlu1 %3800, %v7475_v53   ;;  %1767 = vperm.xlu0 %3799, %v7483_v57   ;;  %v5125_v57 = vld [vmem:[%s4281_s14 + $0x20] sm:$0xff] }
 0x278   : > { %v5109_v52 = vpop.permute.xlu1 %1371 }
 0x279   : > { %7623 = vst [vmem:[#allocation203_spill] sm:$0xff] %v5109_v52  ;;  %v5111_v56 = vpop.permute.xlu0 %1515  ;;  %v7630_v52 = vmov 4  }
 0x27a   : > { %7624 = vst [vmem:[#allocation204_spill] sm:$0xff] %v5111_v56  ;;  %1755 = vperm.xlu1 %3800, %v7625_v49   ;;  %3802 = vset.pattern.permute.xlu0 %v7349_v20  ;;  %v5284_v56 = vld [vmem:[%s4281_s14 + $0xc8] sm:$0xff] }
 0x27b   : > { %1907 = vperm.xlu0 %3802, %v5116_v62   ;;  %7658 = vst [vmem:[#allocation235_spill] sm:$0xff] %v5284_v56 }
 0x27c   : > { %v5119_v63 = vpop.permute.xlu1 %1379 }
 0x27d   : > { %7626 = vst [vmem:[#allocation25_spill] sm:$0xff] %v5119_v63  ;;  %v5121_v53 = vpop.permute.xlu0 %1527  ;;  %v5138_v63 = vld [vmem:[%s4281_s14 + $0x30] sm:$0xff] }
 0x27e   : > { %7627 = vst [vmem:[#allocation205_spill] sm:$0xff] %v5121_v53  ;;  %1763 = vperm.xlu1 %3800, %v4535_v0  }
 0x27f   : > { %1919 = vperm.xlu0 %3802, %v5125_v57  }
 0x281   : > { %v5128_v49 = vpop.permute.xlu1 %1519  ;;  %v5130_v20 = vpop.permute.xlu0 %1535 }
 0x282   : > { %7628 = vst [vmem:[#allocation206_spill] sm:$0xff] %v5128_v49  ;;  %7629 = vst [vmem:[#allocation207_spill] sm:$0xff] %v5130_v20  ;;  %3801 = vset.pattern.permute.xlu1 %v7630_v52  ;;  %v5266_v49 = vld [vmem:[%s4281_s14 + $0xa8] sm:$0xff] }
 0x283   : > { %1903 = vperm.xlu1 %3801, %v5134_v51   ;;  %1927 = vperm.xlu0 %3802, %v5138_v63  }
 0x285   : > { %v5141_v0 = vpop.permute.xlu1 %1523  ;;  %v5143_v54 = vpop.permute.xlu0 %1543 }
 0x286   : > { %7631 = vst [vmem:[#allocation208_spill] sm:$0xff] %v5141_v0  ;;  %7632 = vst [vmem:[#allocation209_spill] sm:$0xff] %v5143_v54  ;;  %v5254_v0 = vld [vmem:[%s4281_s14 + $0x98] sm:$0xff] }
 0x287   : > { %1911 = vperm.xlu1 %3801, %v5146_v47   ;;  %1935 = vperm.xlu0 %3802, %v5150_v45  }
 0x289   : > { %v5153_v21 = vpop.permute.xlu1 %1531  ;;  %v5155_v18 = vpop.permute.xlu0 %1551 }
 0x28a   : > { %7633 = vst [vmem:[#allocation210_spill] sm:$0xff] %v5153_v21  ;;  %7634 = vst [vmem:[#allocation211_spill] sm:$0xff] %v5155_v18  ;;  %v5242_v21 = vld [vmem:[%s4281_s14 + $0x88] sm:$0xff] }
 0x28b   : > { %1915 = vperm.xlu1 %3801, %v5158_v16   ;;  %1943 = vperm.xlu0 %3802, %v5162_v23  }
 0x28d   : > { %v5165_v22 = vpop.permute.xlu1 %1539  ;;  %v5167_v46 = vpop.permute.xlu0 %1559 }
 0x28e   : > { %7635 = vst [vmem:[#allocation212_spill] sm:$0xff] %v5165_v22  ;;  %7636 = vst [vmem:[#allocation213_spill] sm:$0xff] %v5167_v46  ;;  %v5230_v22 = vld [vmem:[%s4281_s14 + $0x78] sm:$0xff] }
 0x28f   : > { %1923 = vperm.xlu1 %3801, %v5170_v25   ;;  %1951 = vperm.xlu0 %3802, %v5174_v44  }
 0x291   : > { %v5177_v27 = vpop.permute.xlu1 %1547  ;;  %v5179_v42 = vpop.permute.xlu0 %1567 }
 0x292   : > { %7637 = vst [vmem:[#allocation214_spill] sm:$0xff] %v5177_v27  ;;  %7638 = vst [vmem:[#allocation215_spill] sm:$0xff] %v5179_v42  ;;  %v5218_v27 = vld [vmem:[%s4281_s14 + $0x68] sm:$0xff] }
 0x293   : > { %1931 = vperm.xlu1 %3801, %v5182_v40   ;;  %1959 = vperm.xlu0 %3802, %v5186_v19  }
 0x295   : > { %v5189_v17 = vpop.permute.xlu1 %1555  ;;  %v5191_v14 = vpop.permute.xlu0 %1575 }
 0x296   : > { %7639 = vst [vmem:[#allocation216_spill] sm:$0xff] %v5189_v17  ;;  %7640 = vst [vmem:[#allocation217_spill] sm:$0xff] %v5191_v14  ;;  %v5210_v17 = vld [vmem:[%s4281_s14 + $0x90] sm:$0xff] }
 0x297   : > { %1939 = vperm.xlu1 %3801, %v5194_v15   ;;  %1967 = vperm.xlu0 %3802, %v5198_v12  }
 0x299   : > { %v5201_v13 = vpop.permute.xlu1 %1563  ;;  %v5203_v10 = vpop.permute.xlu0 %1583 }
 0x29a   : > { %7641 = vst [vmem:[#allocation218_spill] sm:$0xff] %v5201_v13  ;;  %7642 = vst [vmem:[#allocation219_spill] sm:$0xff] %v5203_v10  ;;  %v5222_v13 = vld [vmem:[%s4281_s14 + $0xa0] sm:$0xff] }
 0x29b   : > { %1947 = vperm.xlu1 %3801, %v5206_v8   ;;  %1975 = vperm.xlu0 %3802, %v5210_v17  }
 0x29d   : > { %v5213_v14 = vpop.permute.xlu1 %1571  ;;  %v5215_v42 = vpop.permute.xlu0 %1591 }
 0x29e   : > { %7643 = vst [vmem:[#allocation220_spill] sm:$0xff] %v5213_v14  ;;  %7644 = vst [vmem:[#allocation221_spill] sm:$0xff] %v5215_v42  ;;  %v5234_v14 = vld [vmem:[%s4281_s14 + $0xb0] sm:$0xff] }
 0x29f   : > { %1955 = vperm.xlu1 %3801, %v5218_v27   ;;  %1983 = vperm.xlu0 %3802, %v5222_v13  }
 0x2a1   : > { %v5225_v10 = vpop.permute.xlu1 %1579  ;;  %v5227_v46 = vpop.permute.xlu0 %1599 }
 0x2a2   : > { %7645 = vst [vmem:[#allocation222_spill] sm:$0xff] %v5225_v10  ;;  %7646 = vst [vmem:[#allocation223_spill] sm:$0xff] %v5227_v46  ;;  %v5246_v10 = vld [vmem:[%s4281_s14 + $0xc0] sm:$0xff] }
 0x2a3   : > { %1963 = vperm.xlu1 %3801, %v5230_v22   ;;  %1991 = vperm.xlu0 %3802, %v5234_v14  }
 0x2a5   : > { %v5237_v42 = vpop.permute.xlu1 %1587  ;;  %v5239_v18 = vpop.permute.xlu0 %1607 }
 0x2a6   : > { %7647 = vst [vmem:[#allocation224_spill] sm:$0xff] %v5237_v42  ;;  %7648 = vst [vmem:[#allocation225_spill] sm:$0xff] %v5239_v18  ;;  %v5258_v42 = vld [vmem:[%s4281_s14 + $0xd0] sm:$0xff] }
 0x2a7   : > { %1971 = vperm.xlu1 %3801, %v5242_v21   ;;  %1999 = vperm.xlu0 %3802, %v5246_v10   ;;  %7651 = vst [vmem:[#allocation228_spill] sm:$0xff] %v5258_v42 }
 0x2a9   : > { %v5249_v46 = vpop.permute.xlu1 %1595  ;;  %v5251_v54 = vpop.permute.xlu0 %1615 }
 0x2aa   : > { %7649 = vst [vmem:[#allocation226_spill] sm:$0xff] %v5249_v46  ;;  %7650 = vst [vmem:[#allocation227_spill] sm:$0xff] %v5251_v54  ;;  %v3918_v46 = vld [vmem:[%s4281_s14 + $0xe0] sm:$0xff] }
 0x2ab   : > { %1979 = vperm.xlu1 %3801, %v5254_v0   ;;  %2007 = vperm.xlu0 %3802, %v5258_v42  }
 0x2ad   : > { %v5261_v18 = vpop.permute.xlu1 %1603  ;;  %v5263_v20 = vpop.permute.xlu0 %1623 }
 0x2ae   : > { %7652 = vst [vmem:[#allocation229_spill] sm:$0xff] %v5261_v18  ;;  %7653 = vst [vmem:[#allocation230_spill] sm:$0xff] %v5263_v20  ;;  %v3920_v18 = vld [vmem:[%s4281_s14 + $0xf0] sm:$0xff] }
 0x2af   : > { %1987 = vperm.xlu1 %3801, %v5266_v49   ;;  %2015 = vperm.xlu0 %3802, %v3918_v46   ;;  %v5288_v46 = vld [vmem:[%s4281_s14 + $0x100] sm:$0xff] }
 0x2b1   : > { %v5270_v54 = vpop.permute.xlu1 %1611  ;;  %v5272_v53 = vpop.permute.xlu0 %1631 }
 0x2b2   : > { %7654 = vst [vmem:[#allocation231_spill] sm:$0xff] %v5270_v54  ;;  %7655 = vst [vmem:[#allocation232_spill] sm:$0xff] %v5272_v53 }
 0x2b3   : > { %1995 = vperm.xlu1 %3801, %v5275_v38   ;;  %2023 = vperm.xlu0 %3802, %v3920_v18   ;;  %v5296_v18 = vld [vmem:[%s4281_s14 + $0xd8] sm:$0xff] }
 0x2b4   : > { %7661 = vst [vmem:[#allocation238_spill] sm:$0xff] %v5296_v18 }
 0x2b5   : > { %v5279_v20 = vpop.permute.xlu1 %1619  ;;  %v5281_v42 = vpop.permute.xlu0 %1639 }
 0x2b6   : > { %7656 = vst [vmem:[#allocation233_spill] sm:$0xff] %v5279_v20  ;;  %7657 = vst [vmem:[#allocation234_spill] sm:$0xff] %v5281_v42  ;;  %v5300_v20 = vld [vmem:[%s4281_s14 + $0x110] sm:$0xff] }
 0x2b7   : > { %2003 = vperm.xlu1 %3801, %v5284_v56   ;;  %2031 = vperm.xlu0 %3802, %v5288_v46  }
 0x2b9   : > { %v5291_v53 = vpop.permute.xlu1 %1627  ;;  %v5293_v54 = vpop.permute.xlu0 %1647 }
 0x2ba   : > { %7659 = vst [vmem:[#allocation236_spill] sm:$0xff] %v5291_v53  ;;  %7660 = vst [vmem:[#allocation237_spill] sm:$0xff] %v5293_v54  ;;  %v5312_v53 = vld [vmem:[%s4281_s14 + $0x120] sm:$0xff] }
 0x2bb   : > { %2011 = vperm.xlu1 %3801, %v5296_v18   ;;  %2039 = vperm.xlu0 %3802, %v5300_v20   ;;  %v7822_v18 = vld [vmem:[#allocation94_spill] sm:$0xff] }
 0x2bd   : > { %v5303_v42 = vpop.permute.xlu1 %1635  ;;  %v5305_v56 = vpop.permute.xlu0 %1655 }
 0x2be   : > { %7662 = vst [vmem:[#allocation239_spill] sm:$0xff] %v5303_v42  ;;  %7663 = vst [vmem:[#allocation240_spill] sm:$0xff] %v5305_v56  ;;  %v5324_v42 = vld [vmem:[%s4281_s14 + $0x130] sm:$0xff] }
 0x2bf   : > { %2019 = vperm.xlu1 %3801, %v5308_v43   ;;  %2047 = vperm.xlu0 %3802, %v5312_v53  }
 0x2c1   : > { %v5315_v54 = vpop.permute.xlu1 %1643  ;;  %v5317_v41 = vpop.permute.xlu0 %1663 }
 0x2c2   : > { %7665 = vst [vmem:[#allocation242_spill] sm:$0xff] %v5315_v54  ;;  %7666 = vst [vmem:[#allocation243_spill] sm:$0xff] %v5317_v41  ;;  %v5336_v54 = vld [vmem:[%s4281_s14 + $0x140] sm:$0xff] }
 0x2c3   : > { %2027 = vperm.xlu1 %3801, %v5320_v39   ;;  %2055 = vperm.xlu0 %3802, %v5324_v42  }
 0x2c5   : > { %v5327_v56 = vpop.permute.xlu1 %1651  ;;  %v5329_v36 = vpop.permute.xlu0 %1671 }
 0x2c6   : > { %7668 = vst [vmem:[#allocation245_spill] sm:$0xff] %v5327_v56  ;;  %7669 = vst [vmem:[#allocation246_spill] sm:$0xff] %v5329_v36  ;;  %v5348_v56 = vld [vmem:[%s4281_s14 + $0x150] sm:$0xff] }
 0x2c7   : > { %2035 = vperm.xlu1 %3801, %v5332_v37   ;;  %2063 = vperm.xlu0 %3802, %v5336_v54  }
 0x2c9   : > { %v5339_v41 = vpop.permute.xlu1 %1659  ;;  %v5341_v39 = vpop.permute.xlu0 %1679 }
 0x2ca   : > { %7670 = vst [vmem:[#allocation247_spill] sm:$0xff] %v5339_v41  ;;  %7671 = vst [vmem:[#allocation248_spill] sm:$0xff] %v5341_v39  ;;  %v5360_v41 = vld [vmem:[%s4281_s14 + $0x160] sm:$0xff] }
 0x2cb   : > { %2043 = vperm.xlu1 %3801, %v5344_v34   ;;  %2071 = vperm.xlu0 %3802, %v5348_v56  }
 0x2cd   : > { %v5351_v36 = vpop.permute.xlu1 %1667  ;;  %v5353_v35 = vpop.permute.xlu0 %1687 }
 0x2ce   : > { %7672 = vst [vmem:[#allocation249_spill] sm:$0xff] %v5351_v36  ;;  %7673 = vst [vmem:[#allocation250_spill] sm:$0xff] %v5353_v35  ;;  %v5372_v36 = vld [vmem:[%s4281_s14 + $0x170] sm:$0xff] }
 0x2cf   : > { %2051 = vperm.xlu1 %3801, %v5356_v32   ;;  %2079 = vperm.xlu0 %3802, %v5360_v41  }
 0x2d1   : > { %v5363_v39 = vpop.permute.xlu1 %1675  ;;  %v5365_v43 = vpop.permute.xlu0 %1695 }
 0x2d2   : > { %7674 = vst [vmem:[#allocation251_spill] sm:$0xff] %v5363_v39  ;;  %7675 = vst [vmem:[#allocation252_spill] sm:$0xff] %v5365_v43  ;;  %v5384_v39 = vld [vmem:[%s4281_s14 + $0x180] sm:$0xff] }
 0x2d3   : > { %2059 = vperm.xlu1 %3801, %v5368_v33   ;;  %2087 = vperm.xlu0 %3802, %v5372_v36  }
 0x2d5   : > { %v5375_v35 = vpop.permute.xlu1 %1683  ;;  %v5377_v30 = vpop.permute.xlu0 %1703 }
 0x2d6   : > { %7676 = vst [vmem:[#allocation253_spill] sm:$0xff] %v5375_v35  ;;  %7677 = vst [vmem:[#allocation254_spill] sm:$0xff] %v5377_v30  ;;  %v5396_v35 = vld [vmem:[%s4281_s14 + $0x188] sm:$0xff] }
 0x2d7   : > { %2067 = vperm.xlu1 %3801, %v5380_v31   ;;  %2095 = vperm.xlu0 %3802, %v5384_v39  }
 0x2d9   : > { %v5387_v43 = vpop.permute.xlu1 %1691  ;;  %v5389_v28 = vpop.permute.xlu0 %1711 }
 0x2da   : > { %7678 = vst [vmem:[#allocation255_spill] sm:$0xff] %v5387_v43  ;;  %7679 = vst [vmem:[#allocation256_spill] sm:$0xff] %v5389_v28  ;;  %v5408_v43 = vld [vmem:[%s4281_s14 + $0x1a0] sm:$0xff] }
 0x2db   : > { %2075 = vperm.xlu1 %3801, %v5392_v29   ;;  %2099 = vperm.xlu0 %3802, %v5396_v35   ;;  %7682 = vst [vmem:[#allocation259_spill] sm:$0xff] %v5408_v43 }
 0x2dd   : > { %v5399_v30 = vpop.permute.xlu1 %1699  ;;  %v5401_v26 = vpop.permute.xlu0 %1719 }
 0x2de   : > { %7680 = vst [vmem:[#allocation257_spill] sm:$0xff] %v5399_v30  ;;  %7681 = vst [vmem:[#allocation258_spill] sm:$0xff] %v5401_v26  ;;  %v5420_v30 = vld [vmem:[%s4281_s14 + $0x1b0] sm:$0xff] }
 0x2df   : > { %2083 = vperm.xlu1 %3801, %v5404_v24   ;;  %2111 = vperm.xlu0 %3802, %v5408_v43   ;;  %7685 = vst [vmem:[#allocation262_spill] sm:$0xff] %v5420_v30  ;;  %v7796_v43 = vld [vmem:[#allocation74_spill] sm:$0xff] }
 0x2e1   : > { %v5411_v28 = vpop.permute.xlu1 %1707  ;;  %v5413_v11 = vpop.permute.xlu0 %1727 }
 0x2e2   : > { %7683 = vst [vmem:[#allocation260_spill] sm:$0xff] %v5411_v28  ;;  %7684 = vst [vmem:[#allocation261_spill] sm:$0xff] %v5413_v11 }
 0x2e3   : > { %2091 = vperm.xlu1 %3801, %v5416_v9   ;;  %2119 = vperm.xlu0 %3802, %v5420_v30   ;;  %v3947_v30 = vld [vmem:[%s4281_s14 + $0x1f0] sm:$0xff] }
 0x2e5   : > { %v5423_v26 = vpop.permute.xlu1 %1715  ;;  %v5425_v6 = vpop.permute.xlu0 %1735 }
 0x2e6   : > { %7686 = vst [vmem:[#allocation263_spill] sm:$0xff] %v5423_v26  ;;  %7687 = vst [vmem:[#allocation264_spill] sm:$0xff] %v5425_v6 }
 0x2e7   : > { %3803 = vset.pattern.permute.xlu1 %v7356_v7  ;;  %2131 = vperm.xlu0 %3802, %v5429_v1   ;;  %v7782_v1 = vld [vmem:[#allocation66_spill] sm:$0xff] }
 0x2e8   : > { %2291 = vperm.xlu1 %3803, %v5134_v51   ;;  %v7695_v51 = vmov 5  }
 0x2e9   : > { %v5433_v11 = vpop.permute.xlu1 %1723  ;;  %v5435_v28 = vpop.permute.xlu0 %1743 }
 0x2ea   : > { %7689 = vst [vmem:[#allocation266_spill] sm:$0xff] %v5433_v11  ;;  %7690 = vst [vmem:[#allocation267_spill] sm:$0xff] %v5435_v28  ;;  %v7730_v28 = vld [vmem:[#allocation28_spill] sm:$0xff] }
 0x2eb   : > { %2143 = vperm.xlu0 %3802, %v3946_v5   ;;  %v7736_v11 = vld [vmem:[#allocation32_spill] sm:$0xff] }
 0x2ec   : > { %2299 = vperm.xlu1 %3803, %v5146_v47  }
 0x2ed   : > { %v5439_v26 = vpop.permute.xlu1 %1731  ;;  %v5441_v6 = vpop.permute.xlu0 %1751 }
 0x2ee   : > { %7691 = vst [vmem:[#allocation268_spill] sm:$0xff] %v5439_v26  ;;  %7692 = vst [vmem:[#allocation269_spill] sm:$0xff] %v5441_v6 }
 0x2ef   : > { %2151 = vperm.xlu0 %3802, %v3947_v30  }
 0x2f0   : > { %2303 = vperm.xlu1 %3803, %v5158_v16  }
 0x2f1   : > { %v5445_v7 = vpop.permute.xlu1 %1739  ;;  %v5447_v4 = vpop.permute.xlu0 %1759 }
 0x2f2   : > { %7693 = vst [vmem:[#allocation270_spill] sm:$0xff] %v5445_v7  ;;  %7694 = vst [vmem:[#allocation271_spill] sm:$0xff] %v5447_v4 }
 0x2f3   : > { %3807 = vset.pattern.permute.xlu0 %v7695_v51 }
 0x2f4   : > { %2423 = vperm.xlu1 %3803, %v5332_v37   ;;  %2295 = vperm.xlu0 %3807, %v5116_v62  }
 0x2f5   : > { %v5452_v5 = vpop.permute.xlu1 %1747  ;;  %v5454_v47 = vpop.permute.xlu0 %1767 }
 0x2f6   : > { %7696 = vst [vmem:[#allocation272_spill] sm:$0xff] %v5452_v5  ;;  %7697 = vst [vmem:[#allocation273_spill] sm:$0xff] %v5454_v47  ;;  %v3949_v5 = vld [vmem:[%s4281_s14 + $0x198] sm:$0xff] }
 0x2f8   : > { %2431 = vperm.xlu1 %3803, %v5344_v34   ;;  %2419 = vperm.xlu0 %3807, %v5288_v46  }
 0x2f9   : > { %v5458_v30 = vpop.permute.xlu1 %1755 }
 0x2fa   : > { %7698 = vst [vmem:[#allocation274_spill] sm:$0xff] %v5458_v30  ;;  %v5460_v16 = vpop.permute.xlu0 %1907 }
 0x2fb   : > { %7699 = vst [vmem:[#allocation275_spill] sm:$0xff] %v5460_v16 }
 0x2fc   : > { %2311 = vperm.xlu1 %3803, %v5170_v25   ;;  %2427 = vperm.xlu0 %3807, %v5300_v20  }
 0x2fd   : > { %v5464_v4 = vpop.permute.xlu1 %1763 }
 0x2fe   : > { %7700 = vst [vmem:[#allocation276_spill] sm:$0xff] %v5464_v4  ;;  %v5466_v37 = vpop.permute.xlu0 %1919 }
 0x2ff   : > { %7701 = vst [vmem:[#allocation277_spill] sm:$0xff] %v5466_v37  ;;  %v7763_v37 = vld [vmem:[#allocation54_spill] sm:$0xff] }
 0x300   : > { %2319 = vperm.xlu1 %3803, %v5182_v40   ;;  %2307 = vperm.xlu0 %3807, %v5125_v57  }
 0x302   : > { %v5470_v62 = vpop.permute.xlu1 %1903  ;;  %v5472_v34 = vpop.permute.xlu0 %1927 }
 0x303   : > { %7702 = vst [vmem:[#allocation278_spill] sm:$0xff] %v5470_v62  ;;  %7703 = vst [vmem:[#allocation279_spill] sm:$0xff] %v5472_v34  ;;  %v7757_v34 = vld [vmem:[#allocation51_spill] sm:$0xff]  ;;  %v7761_v62 = vld [vmem:[#allocation53_spill] sm:$0xff] }
 0x304   : > { %2439 = vperm.xlu1 %3803, %v5356_v32   ;;  %2315 = vperm.xlu0 %3807, %v5138_v63  }
 0x306   : > { %v5476_v46 = vpop.permute.xlu1 %1911  ;;  %v5478_v25 = vpop.permute.xlu0 %1935 }
 0x307   : > { %7704 = vst [vmem:[#allocation280_spill] sm:$0xff] %v5476_v46  ;;  %7705 = vst [vmem:[#allocation281_spill] sm:$0xff] %v5478_v25  ;;  %v7755_v25 = vld [vmem:[#allocation49_spill] sm:$0xff]  ;;  %v7756_v46 = vld [vmem:[#allocation50_spill] sm:$0xff] }
 0x308   : > { %2447 = vperm.xlu1 %3803, %v5368_v33   ;;  %2435 = vperm.xlu0 %3807, %v5312_v53  }
 0x30a   : > { %v5482_v20 = vpop.permute.xlu1 %1915  ;;  %v5484_v40 = vpop.permute.xlu0 %1943 }
 0x30b   : > { %7706 = vst [vmem:[#allocation282_spill] sm:$0xff] %v5482_v20  ;;  %7707 = vst [vmem:[#allocation283_spill] sm:$0xff] %v5484_v40  ;;  %v7753_v40 = vld [vmem:[#allocation47_spill] sm:$0xff]  ;;  %v7754_v20 = vld [vmem:[#allocation48_spill] sm:$0xff] }
 0x30c   : > { %2327 = vperm.xlu1 %3803, %v5194_v15   ;;  %2443 = vperm.xlu0 %3807, %v5324_v42  }
 0x30e   : > { %v5488_v57 = vpop.permute.xlu1 %1923  ;;  %v5490_v32 = vpop.permute.xlu0 %1951 }
 0x30f   : > { %7708 = vst [vmem:[#allocation284_spill] sm:$0xff] %v5488_v57  ;;  %7709 = vst [vmem:[#allocation285_spill] sm:$0xff] %v5490_v32 }
 0x310   : > { %2335 = vperm.xlu1 %3803, %v5206_v8   ;;  %2323 = vperm.xlu0 %3807, %v5150_v45  }
 0x312   : > { %v5494_v63 = vpop.permute.xlu1 %1931  ;;  %v5496_v33 = vpop.permute.xlu0 %1959 }
 0x313   : > { %7710 = vst [vmem:[#allocation286_spill] sm:$0xff] %v5494_v63  ;;  %7711 = vst [vmem:[#allocation287_spill] sm:$0xff] %v5496_v33 }
 0x314   : > { %2455 = vperm.xlu1 %3803, %v5380_v31   ;;  %2331 = vperm.xlu0 %3807, %v5162_v23   ;;  %v670_v23 = vlaneseq }
 0x316   : > { %v5500_v53 = vpop.permute.xlu1 %1939  ;;  %v5502_v15 = vpop.permute.xlu0 %1967 }
 0x317   : > { %7712 = vst [vmem:[#allocation288_spill] sm:$0xff] %v5500_v53  ;;  %7713 = vst [vmem:[#allocation289_spill] sm:$0xff] %v5502_v15  ;;  %v7750_v53 = vld [vmem:[#allocation46_spill] sm:$0xff] }
 0x318   : > { %2463 = vperm.xlu1 %3803, %v5392_v29   ;;  %2451 = vperm.xlu0 %3807, %v5336_v54  }
 0x31a   : > { %v5506_v42 = vpop.permute.xlu1 %1947  ;;  %v5508_v8 = vpop.permute.xlu0 %1975 }
 0x31b   : > { %7714 = vst [vmem:[#allocation290_spill] sm:$0xff] %v5506_v42  ;;  %7715 = vst [vmem:[#allocation291_spill] sm:$0xff] %v5508_v8  ;;  %v7739_v8 = vld [vmem:[#allocation35_spill] sm:$0xff]  ;;  %v7749_v42 = vld [vmem:[#allocation45_spill] sm:$0xff] }
 0x31c   : > { %2343 = vperm.xlu1 %3803, %v5218_v27   ;;  %2459 = vperm.xlu0 %3807, %v5348_v56   ;;  %v5524_v27 = vshrl.u32 %v670_v23, 7  ;;  %v5543_v23 = vld [vmem:[%s4281_s14 + $0x190] sm:$0xff] }
 0x31e   : > { %v5512_v45 = vpop.permute.xlu1 %1955  ;;  %v5514_v31 = vpop.permute.xlu0 %1983  ;;  %7720 = vst [vmem:[#allocation296_spill] sm:$0xff] %v5524_v27 }
 0x31f   : > { %7716 = vst [vmem:[#allocation292_spill] sm:$0xff] %v5512_v45  ;;  %7717 = vst [vmem:[#allocation293_spill] sm:$0xff] %v5514_v31  ;;  %v7738_v31 = vld [vmem:[#allocation34_spill] sm:$0xff]  ;;  %v7748_v45 = vld [vmem:[#allocation44_spill] sm:$0xff] }
 0x320   : > { %2351 = vperm.xlu1 %3803, %v5230_v22   ;;  %2339 = vperm.xlu0 %3807, %v5174_v44   ;;  %v672_v22 = vsub.s32 0, %v5524_v27 }
 0x322   : > { %v5518_v29 = vpop.permute.xlu1 %1963  ;;  %v5520_v54 = vpop.permute.xlu0 %1991 }
 0x323   : > { %7718 = vst [vmem:[#allocation294_spill] sm:$0xff] %v5518_v29  ;;  %7719 = vst [vmem:[#allocation295_spill] sm:$0xff] %v5520_v54  ;;  %v7735_v54 = vld [vmem:[#allocation31_spill] sm:$0xff] }
 0x324   : > { %2471 = vperm.xlu1 %3803, %v5404_v24   ;;  %2347 = vperm.xlu0 %3807, %v5186_v19   ;;  %v5537_v24 = vld [vmem:[#allocation2] sm:$0x3f]  ;;  %v996_v19 = vsub.s32 1, %v5524_v27 }
 0x326   : > { %v5526_v56 = vpop.permute.xlu1 %1971  ;;  %v5528_v4 = vpop.permute.xlu0 %1999 }
 0x327   : > { %7721 = vst [vmem:[#allocation297_spill] sm:$0xff] %v5526_v56  ;;  %7722 = vst [vmem:[#allocation298_spill] sm:$0xff] %v5528_v4  ;;  %v7742_v56 = vld [vmem:[#allocation38_spill] sm:$0xff] }
 0x328   : > { %2479 = vperm.xlu1 %3803, %v5416_v9   ;;  %2467 = vperm.xlu0 %3807, %v5360_v41   ;;  %v5547_v9 = vrot.slane %v5537_v24, %v672_v22  ;;  %v7731_v22 = vld [vmem:[#allocation29_spill] sm:$0xff] }
 0x32a   : > { %v5533_v44 = vpop.permute.xlu1 %1979  ;;  %v5535_v30 = vpop.permute.xlu0 %2007  ;;  %7725 = vst [vmem:[#allocation301_spill] sm:$0xff] %v5547_v9  ;;  %v5564_v6 = vmul.f32 %v5547_v9, %v7730_v28  ;;  %v5568_v4 = vmul.f32 %v5547_v9, %v7731_v22  ;;  %v5584_v28 = vmul.f32 %v5547_v9, %v7736_v11 }
 0x32b   : > { %7723 = vst [vmem:[#allocation299_spill] sm:$0xff] %v5533_v44  ;;  %7724 = vst [vmem:[#allocation300_spill] sm:$0xff] %v5535_v30  ;;  %v5555_v30 = vrot.slane %v5537_v24, %v996_v19  ;;  %v7741_v44 = vld [vmem:[#allocation37_spill] sm:$0xff] }
 0x32c   : > { %3804 = vset.pattern.permute.xlu1 %v7630_v52  ;;  %2475 = vperm.xlu0 %3807, %v5372_v36   ;;  %v7729_v36 = vld [vmem:[#allocation27_spill] sm:$0xff]  ;;  %v5604_v11 = vmul.f32 %v5547_v9, %v7741_v44  ;;  %v7746_v44 = vld [vmem:[#allocation42_spill] sm:$0xff] }
 0x32d   : > { %2103 = vperm.xlu1 %3804, %v5543_v23   ;;  %7728 = vst [vmem:[#allocation304_spill] sm:$0xff] %v5555_v30  ;;  %v5560_v7 = vmul.f32 %v5547_v9, %v7729_v36  ;;  %v5580_v36 = vmul.f32 %v5547_v9, %v7735_v54  ;;  %v5625_v29 = vmul.f32 %v5547_v9, %v7746_v44  ;;  %v7779_v52 = vld [vmem:[#allocation63_spill] sm:$0xff] }
 0x32e   : > { %v5549_v41 = vpop.permute.xlu1 %1987  ;;  %v5551_v47 = vpop.permute.xlu0 %2015  ;;  %v5645_v44 = vmul.f32 %v5547_v9, %v7750_v53  ;;  %v5665_v53 = vmul.f32 %v5547_v9, %v7756_v46  ;;  %v7765_v46 = vld [vmem:[#allocation55_spill] sm:$0xff] }
 0x32f   : > { %7726 = vst [vmem:[#allocation302_spill] sm:$0xff] %v5549_v41  ;;  %7727 = vst [vmem:[#allocation303_spill] sm:$0xff] %v5551_v47  ;;  %v7732_v47 = vld [vmem:[#allocation30_spill] sm:$0xff]  ;;  %v7737_v41 = vld [vmem:[#allocation33_spill] sm:$0xff]  ;;  %v5686_v16 = vmul.f32 %v5547_v9, %v7765_v46 }
 0x330   : > { %2355 = vperm.xlu0 %3807, %v5198_v12   ;;  %v5572_v12 = vmul.f32 %v5547_v9, %v7732_v47  ;;  %v5588_v22 = vmul.f32 %v5547_v9, %v7737_v41  ;;  %v5592_v47 = vmul.f32 %v5547_v9, %v7738_v31  ;;  %v5608_v41 = vmul.f32 %v5547_v9, %v7742_v56  ;;  %v7743_v31 = vld [vmem:[#allocation39_spill] sm:$0xff] }
 0x331   : > { %2107 = vperm.xlu1 %3804, %v3949_v5   ;;  %v5613_v15 = vmul.f32 %v5547_v9, %v7743_v31  ;;  %v5628_v56 = vld [vmem:[%s4281_s14 + $0x1a8] sm:$0xff]  ;;  %7766 = vst [vmem:[#allocation35_spill] sm:$0xff] %v5686_v16 }
 0x332   : > { %v5574_v19 = vpop.permute.xlu1 %1995  ;;  %v5576_v26 = vpop.permute.xlu0 %2023  ;;  %v7774_v16 = vld [vmem:[#allocation60_spill] sm:$0xff] }
 0x333   : > { %7733 = vst [vmem:[#allocation27_spill] sm:$0xff] %v5574_v19  ;;  %7734 = vst [vmem:[#allocation28_spill] sm:$0xff] %v5576_v26  ;;  %v5596_v19 = vmul.f32 %v5547_v9, %v7739_v8  ;;  %v7740_v26 = vld [vmem:[#allocation36_spill] sm:$0xff] }
 0x334   : > { %v5600_v54 = vmul.f32 %v5547_v9, %v7740_v26  ;;  %2367 = vperm.xlu0 %3807, %v5254_v0   ;;  %v7744_v8 = vld [vmem:[#allocation40_spill] sm:$0xff]  ;;  %v7745_v26 = vld [vmem:[#allocation41_spill] sm:$0xff]  ;;  %v7747_v0 = vld [vmem:[#allocation43_spill] sm:$0xff] }
 0x335   : > { %v5617_v33 = vmul.f32 %v5547_v9, %v7744_v8  ;;  %v5621_v32 = vmul.f32 %v5547_v9, %v7745_v26  ;;  %2115 = vperm.xlu1 %3804, %v5628_v56   ;;  %v5633_v31 = vmul.f32 %v5547_v9, %v7747_v0  ;;  %v5637_v8 = vmul.f32 %v5547_v9, %v7748_v45 }
 0x336   : > { %v5641_v26 = vmul.f32 %v5547_v9, %v7749_v42  ;;  %v5647_v63 = vpop.permute.xlu1 %2003  ;;  %v5649_v57 = vpop.permute.xlu0 %2031  ;;  %v5653_v0 = vmul.f32 %v5547_v9, %v7753_v40  ;;  %v5657_v45 = vmul.f32 %v5547_v9, %v7754_v20  ;;  %v5661_v42 = vmul.f32 %v5547_v9, %v7755_v25 }
 0x337   : > { %7751 = vst [vmem:[#allocation29_spill] sm:$0xff] %v5647_v63  ;;  %7752 = vst [vmem:[#allocation30_spill] sm:$0xff] %v5649_v57  ;;  %v5669_v63 = vmul.f32 %v5547_v9, %v7757_v34  ;;  %v7759_v57 = vld [vmem:[#allocation52_spill] sm:$0xff]  ;;  %v5677_v20 = vmul.f32 %v5547_v9, %v7761_v62  ;;  %v5681_v25 = vmul.f32 %v5547_v9, %v7763_v37  ;;  %v7771_v62 = vld [vmem:[#allocation58_spill] sm:$0xff] }
 0x338   : > { %v5673_v40 = vmul.f32 %v5547_v9, %v7759_v57  ;;  %2487 = vperm.xlu0 %3807, %v5396_v35   ;;  %v7767_v34 = vld [vmem:[#allocation56_spill] sm:$0xff]  ;;  %v7769_v57 = vld [vmem:[#allocation57_spill] sm:$0xff]  ;;  %v7773_v35 = vld [vmem:[#allocation59_spill] sm:$0xff] }
 0x339   : > { %7758 = vst [vmem:[#allocation31_spill] sm:$0xff] %v5669_v63  ;;  %7762 = vst [vmem:[#allocation33_spill] sm:$0xff] %v5677_v20  ;;  %v5690_v63 = vmul.f32 %v5547_v9, %v7767_v34  ;;  %v5698_v20 = vmul.f32 %v5547_v9, %v7771_v62  ;;  %v5701_v37 = vld [vmem:[%s4281_s14 + $0x1b8] sm:$0xff]  ;;  %v5706_v46 = vmul.f32 %v5547_v9, %v7773_v35 }
 0x33a   : > { %7760 = vst [vmem:[#allocation32_spill] sm:$0xff] %v5673_v40  ;;  %7764 = vst [vmem:[#allocation34_spill] sm:$0xff] %v5681_v25  ;;  %v5694_v40 = vmul.f32 %v5547_v9, %v7769_v57  ;;  %2123 = vperm.xlu1 %3804, %v5701_v37   ;;  %v5710_v34 = vmul.f32 %v5547_v9, %v7774_v16  ;;  %v5722_v25 = vpop.permute.xlu0 %2039  ;;  %v5726_v35 = vmul.f32 %v5547_v9, %v7779_v52 }
 0x33b   : > { %7768 = vst [vmem:[#allocation36_spill] sm:$0xff] %v5690_v63  ;;  %7772 = vst [vmem:[#allocation38_spill] sm:$0xff] %v5698_v20  ;;  %v7775_v63 = vld [vmem:[#allocation61_spill] sm:$0xff]  ;;  %v5720_v20 = vpop.permute.xlu1 %2011  ;;  %v5730_v16 = vmul.f32 %v5547_v9, %v7780_v59  ;;  %v5750_v59 = vmul.f32 %v5547_v9, %v7786_v2  ;;  %v5770_v2 = vmul.f32 %v5547_v9, %v7796_v43 }
 0x33c   : > { %7770 = vst [vmem:[#allocation37_spill] sm:$0xff] %v5694_v40  ;;  %v5714_v57 = vmul.f32 %v5547_v9, %v7775_v63  ;;  %v7776_v40 = vld [vmem:[#allocation62_spill] sm:$0xff]  ;;  %7777 = vst [vmem:[#allocation39_spill] sm:$0xff] %v5720_v20  ;;  %v5734_v63 = vmul.f32 %v5547_v9, %v7781_v3  ;;  %v5742_v20 = vmul.f32 %v5547_v9, %v7783_v48  ;;  %2495 = vperm.xlu0 %3807, %v3949_v5  }
 0x33d   : > { %v5718_v62 = vmul.f32 %v5547_v9, %v7776_v40  ;;  %7778 = vst [vmem:[#allocation40_spill] sm:$0xff] %v5722_v25  ;;  %v5738_v40 = vmul.f32 %v5547_v9, %v7782_v1  ;;  %v7785_v25 = vld [vmem:[#allocation68_spill] sm:$0xff]  ;;  %7787 = vst [vmem:[#allocation42_spill] sm:$0xff] %v5750_v59  ;;  %v5754_v3 = vmul.f32 %v5547_v9, %v7788_v61  ;;  %v7798_v61 = vld [vmem:[#allocation75_spill] sm:$0xff] }
 0x33e   : > { %7784 = vst [vmem:[#allocation41_spill] sm:$0xff] %v5742_v20  ;;  %v5746_v52 = vmul.f32 %v5547_v9, %v7785_v25  ;;  %v5758_v1 = vmul.f32 %v5547_v9, %v7790_v50  ;;  %v5762_v48 = vmul.f32 %v5547_v9, %v7792_v60  ;;  %v5766_v25 = vmul.f32 %v5547_v9, %v7794_v55  ;;  %v7800_v50 = vld [vmem:[#allocation76_spill] sm:$0xff]  ;;  %v7802_v60 = vld [vmem:[#allocation77_spill] sm:$0xff]  ;;  %v7804_v55 = vld [vmem:[#allocation78_spill] sm:$0xff] }
 0x33f   : > { %7789 = vst [vmem:[#allocation43_spill] sm:$0xff] %v5754_v3  ;;  %7797 = vst [vmem:[#allocation47_spill] sm:$0xff] %v5770_v2  ;;  %3805 = vset.pattern.permute.xlu1 %v7695_v51  ;;  %v5775_v5 = vmul.f32 %v5547_v9, %v7798_v61  ;;  %v5779_v58 = vmul.f32 %v5547_v9, %v7800_v50  ;;  %v5790_v43 = vpop.permute.xlu1 %2019  ;;  %v5792_v51 = vpop.permute.xlu0 %2047  ;;  %v7808_v61 = vld [vmem:[#allocation79_spill] sm:$0xff]  ;;  %v7810_v50 = vld [vmem:[#allocation80_spill] sm:$0xff] }
 0x340   : > { %7791 = vst [vmem:[#allocation44_spill] sm:$0xff] %v5758_v1  ;;  %7793 = vst [vmem:[#allocation45_spill] sm:$0xff] %v5762_v48  ;;  %v5783_v1 = vmul.f32 %v5547_v9, %v7802_v60  ;;  %2359 = vperm.xlu1 %3805, %v5242_v21   ;;  %v7812_v60 = vld [vmem:[#allocation81_spill] sm:$0xff]  ;;  %v7816_v2 = vld [vmem:[#allocation90_spill] sm:$0xff]  ;;  %2375 = vperm.xlu0 %3807, %v5266_v49  }
 0x341   : > { %7795 = vst [vmem:[#allocation46_spill] sm:$0xff] %v5766_v25  ;;  %7799 = vst [vmem:[#allocation48_spill] sm:$0xff] %v5775_v5  ;;  %v5787_v25 = vmul.f32 %v5547_v9, %v7804_v55  ;;  %v5796_v5 = vmul.f32 %v5547_v9, %v7808_v61  ;;  %v1384_v55 = vsub.s32 2, %v5524_v27  ;;  %v1000_v61 = vmul.f32 %v5555_v30, %v7816_v2  ;;  %v7821_v27 = vld [vmem:[#allocation93_spill] sm:$0xff]  ;;  %v7823_v59 = vld [vmem:[#allocation83_spill] sm:$0xff] }
 0x342   : > { %7801 = vst [vmem:[#allocation49_spill] sm:$0xff] %v5779_v58  ;;  %7803 = vst [vmem:[#allocation50_spill] sm:$0xff] %v5783_v1  ;;  %v5800_v58 = vmul.f32 %v5547_v9, %v7810_v50  ;;  %v5804_v1 = vmul.f32 %v5547_v9, %v7812_v60  ;;  %v7818_v50 = vld [vmem:[#allocation82_spill] sm:$0xff]  ;;  %v5828_v2 = vmul.f32 %v5547_v9, %v7823_v59  ;;  %v7827_v3 = vld [vmem:[#allocation85_spill] sm:$0xff] }
 0x343   : > { %7805 = vst [vmem:[#allocation51_spill] sm:$0xff] %v5787_v25  ;;  %7806 = vst [vmem:[#allocation52_spill] sm:$0xff] %v5790_v43  ;;  %v7814_v25 = vld [vmem:[#allocation26_spill] sm:$0xff]  ;;  %v7815_v43 = vld [vmem:[#allocation89_spill] sm:$0xff]  ;;  %v5818_v60 = vmul.f32 %v5547_v9, %v7818_v50  ;;  %v5836_v50 = vmul.f32 %v5547_v9, %v7827_v3 }
 0x344   : > { %7807 = vst [vmem:[#allocation53_spill] sm:$0xff] %v5792_v51  ;;  %7809 = vst [vmem:[#allocation54_spill] sm:$0xff] %v5796_v5  ;;  %v999_v21 = vmul.f32 %v5555_v30, %v7814_v25  ;;  %v998_v51 = vmul.f32 %v5555_v30, %v7815_v43  ;;  %v7817_v5 = vld [vmem:[#allocation91_spill] sm:$0xff]  ;;  %v1003_v25 = vmul.f32 %v5555_v30, %v7821_v27  ;;  %2363 = vperm.xlu1 %3805, %v5210_v17   ;;  %v5841_v27 = vpop.permute.xlu1 %2027  ;;  %v7832_v20 = vld [vmem:[#allocation86_spill] sm:$0xff] }
 0x345   : > { %7811 = vst [vmem:[#allocation55_spill] sm:$0xff] %v5800_v58  ;;  %7813 = vst [vmem:[#allocation56_spill] sm:$0xff] %v5804_v1  ;;  %v1001_v48 = vmul.f32 %v5555_v30, %v7817_v5  ;;  %v7820_v1 = vld [vmem:[#allocation92_spill] sm:$0xff]  ;;  %v1004_v43 = vmul.f32 %v5555_v30, %v7822_v18  ;;  %v5843_v18 = vpop.permute.xlu0 %2055  ;;  %v5847_v59 = vmul.f32 %v5547_v9, %v7832_v20  ;;  %2383 = vperm.xlu0 %3807, %v5275_v38  }
 0x346   : > { %7819 = vst [vmem:[#allocation57_spill] sm:$0xff] %v5818_v60  ;;  %v1002_v58 = vmul.f32 %v5555_v30, %v7820_v1  ;;  %7824 = vst [vmem:[#allocation58_spill] sm:$0xff] %v5828_v2  ;;  %v7825_v5 = vld [vmem:[#allocation84_spill] sm:$0xff]  ;;  %v7829_v60 = vld [vmem:[#allocation95_spill] sm:$0xff]  ;;  %v5861_v17 = vadd.f32 %v999_v21, %v5572_v12  ;;  %v5867_v20 = vadd.f32 %v1000_v61, %v5560_v7 }
 0x347   : > { %v5832_v49 = vmul.f32 %v5547_v9, %v7825_v5  ;;  %7828 = vst [vmem:[#allocation60_spill] sm:$0xff] %v5836_v50  ;;  %v1005_v1 = vmul.f32 %v5555_v30, %v7829_v60  ;;  %7830 = vst [vmem:[#allocation61_spill] sm:$0xff] %v5841_v27  ;;  %v7834_v2 = vld [vmem:[#allocation23_spill] sm:$0xff]  ;;  %v5858_v60 = vrot.slane %v5537_v24, %v1384_v55  ;;  %v7839_v21 = vld [vmem:[#allocation96_spill] sm:$0xff] }
 0x348   : > { %7831 = vst [vmem:[#allocation62_spill] sm:$0xff] %v5843_v18  ;;  %7833 = vst [vmem:[#allocation63_spill] sm:$0xff] %v5847_v59  ;;  %v5851_v5 = vmul.f32 %v5547_v9, %v7834_v2  ;;  %v5864_v27 = vadd.f32 %v998_v51, %v5564_v6  ;;  %v5870_v50 = vadd.f32 %v1001_v48, %v5568_v4  ;;  %v7840_v51 = vld [vmem:[#allocation97_spill] sm:$0xff]  ;;  %v7841_v48 = vld [vmem:[#allocation98_spill] sm:$0xff]  ;;  %2483 = vperm.xlu1 %3805, %v5384_v39  }
 0x349   : > { %7826 = vst [vmem:[#allocation59_spill] sm:$0xff] %v5832_v49  ;;  %v7836_v49 = vld [vmem:[#allocation87_spill] sm:$0xff]  ;;  %7838 = vst [vmem:[#allocation66_spill] sm:$0xff] %v5858_v60  ;;  %v5874_v2 = vadd.f32 %v1002_v58, %v5584_v28  ;;  %v5877_v55 = vadd.f32 %v1003_v25, %v5580_v36  ;;  %v5880_v12 = vadd.f32 %v1004_v43, %v5592_v47  ;;  %v5894_v36 = vpop.permute.xlu1 %2035  ;;  %v5896_v47 = vpop.permute.xlu0 %2063  ;;  %v7845_v61 = vld [vmem:[#allocation100_spill] sm:$0xff]  ;;  %2503 = vperm.xlu0 %3807, %v5628_v56  }
 0x34a   : > { %7835 = vst [vmem:[#allocation64_spill] sm:$0xff] %v5851_v5  ;;  %v5855_v3 = vmul.f32 %v5547_v9, %v7836_v49  ;;  %v1006_v6 = vmul.f32 %v5555_v30, %v7839_v21  ;;  %v5885_v7 = vadd.f32 %v1005_v1, %v5588_v22  ;;  %v1007_v4 = vmul.f32 %v5555_v30, %v7840_v51  ;;  %v7842_v58 = vld [vmem:[#allocation99_spill] sm:$0xff]  ;;  %v7846_v22 = vld [vmem:[#allocation101_spill] sm:$0xff]  ;;  %v7847_v49 = vld [vmem:[#allocation102_spill] sm:$0xff] }
 0x34b   : > { %v1008_v38 = vmul.f32 %v5555_v30, %v7841_v48  ;;  %v1009_v28 = vmul.f32 %v5555_v30, %v7842_v58  ;;  %7843 = vst [vmem:[#allocation67_spill] sm:$0xff] %v5894_v36  ;;  %7844 = vst [vmem:[#allocation68_spill] sm:$0xff] %v5896_v47  ;;  %v1010_v25 = vmul.f32 %v5555_v30, %v7845_v61  ;;  %v7848_v21 = vld [vmem:[#allocation103_spill] sm:$0xff]  ;;  %v7849_v48 = vld [vmem:[#allocation104_spill] sm:$0xff] }
 0x34c   : > { %7837 = vst [vmem:[#allocation65_spill] sm:$0xff] %v5855_v3  ;;  %v1011_v43 = vmul.f32 %v5555_v30, %v7846_v22  ;;  %v1012_v1 = vmul.f32 %v5555_v30, %v7847_v49  ;;  %v1013_v51 = vmul.f32 %v5555_v30, %v7848_v21  ;;  %v1014_v58 = vmul.f32 %v5555_v30, %v7849_v48  ;;  %v7850_v39 = vld [vmem:[#allocation105_spill] sm:$0xff]  ;;  %v7851_v3 = vld [vmem:[#allocation106_spill] sm:$0xff]  ;;  %v7852_v9 = vld [vmem:[#allocation107_spill] sm:$0xff] }
 0x34d   : > { %v1015_v5 = vmul.f32 %v5555_v30, %v7850_v39  ;;  %v1016_v59 = vmul.f32 %v5555_v30, %v7851_v3  ;;  %v1017_v61 = vmul.f32 %v5555_v30, %v7852_v9  ;;  %v5916_v22 = vadd.f32 %v1006_v6, %v5600_v54  ;;  %v7853_v49 = vld [vmem:[#allocation108_spill] sm:$0xff]  ;;  %v7854_v47 = vld [vmem:[#allocation109_spill] sm:$0xff]  ;;  %v7855_v18 = vld [vmem:[#allocation110_spill] sm:$0xff]  ;;  %2491 = vperm.xlu1 %3805, %v5543_v23   ;;  %v5936_v6 = vpop.permute.xlu1 %2043 }
 0x34e   : > { %v1018_v21 = vmul.f32 %v5555_v30, %v7853_v49  ;;  %v1019_v48 = vmul.f32 %v5555_v30, %v7854_v47  ;;  %v1020_v39 = vmul.f32 %v5555_v30, %v7855_v18  ;;  %v5925_v36 = vadd.f32 %v1007_v4, %v5596_v19  ;;  %v7856_v54 = vld [vmem:[#allocation111_spill] sm:$0xff]  ;;  %v5938_v47 = vpop.permute.xlu0 %2071  ;;  %2511 = vperm.xlu0 %3807, %v5701_v37  }
 0x34f   : > { %v5928_v3 = vadd.f32 %v1008_v38, %v5608_v41  ;;  %v5931_v9 = vadd.f32 %v1009_v28, %v5604_v11  ;;  %v1021_v56 = vmul.f32 %v5555_v30, %v7856_v54  ;;  %v5941_v18 = vadd.f32 %v1010_v25, %v5617_v33  ;;  %v7870_v25 = vld [vmem:[#allocation124_spill] sm:$0xff]  ;;  %v7876_v54 = vld [vmem:[#allocation130_spill] sm:$0xff] }
 0x350   : > { %v5944_v19 = vadd.f32 %v1011_v43, %v5613_v15  ;;  %v5947_v41 = vadd.f32 %v1012_v1, %v5625_v29  ;;  %v5950_v11 = vadd.f32 %v1013_v51, %v5621_v32  ;;  %v5953_v4 = vadd.f32 %v1014_v58, %v5637_v8  ;;  %v7864_v8 = vld [vmem:[#allocation120_spill] sm:$0xff]  ;;  %v7872_v51 = vld [vmem:[#allocation126_spill] sm:$0xff] }
 0x351   : > { %v5956_v23 = vadd.f32 %v1015_v5, %v5633_v31  ;;  %v5959_v38 = vadd.f32 %v1016_v59, %v5645_v44  ;;  %v5962_v33 = vadd.f32 %v1017_v61, %v5641_v26  ;;  %v5966_v15 = vadd.f32 %v1018_v21, %v5657_v45  ;;  %v7866_v59 = vld [vmem:[#allocation121_spill] sm:$0xff]  ;;  %v7867_v5 = vld [vmem:[#allocation122_spill] sm:$0xff]  ;;  %v7868_v45 = vld [vmem:[#allocation123_spill] sm:$0xff]  ;;  %2371 = vperm.xlu1 %3805, %v5222_v13  }
 0x352   : > { %7857 = vst [vmem:[#allocation69_spill] sm:$0xff] %v5953_v4  ;;  %v5969_v32 = vadd.f32 %v1019_v48, %v5653_v0  ;;  %v5972_v29 = vadd.f32 %v1020_v39, %v5665_v53  ;;  %v1030_v31 = vmul.f32 %v5555_v30, %v7864_v8  ;;  %v5977_v44 = vadd.f32 %v1021_v56, %v5661_v42  ;;  %v5986_v0 = vpop.permute.xlu1 %2051  ;;  %v5988_v53 = vpop.permute.xlu0 %2079  ;;  %v7871_v42 = vld [vmem:[#allocation125_spill] sm:$0xff]  ;;  %v7873_v61 = vld [vmem:[#allocation127_spill] sm:$0xff]  ;;  %v7874_v21 = vld [vmem:[#allocation128_spill] sm:$0xff] }
 0x353   : > { %7858 = vst [vmem:[#allocation70_spill] sm:$0xff] %v5956_v23  ;;  %7859 = vst [vmem:[#allocation71_spill] sm:$0xff] %v5959_v38  ;;  %v1031_v26 = vmul.f32 %v5555_v30, %v7866_v59  ;;  %v1032_v37 = vmul.f32 %v5555_v30, %v7867_v5  ;;  %v1033_v28 = vmul.f32 %v5555_v30, %v7868_v45  ;;  %v7875_v13 = vld [vmem:[#allocation129_spill] sm:$0xff]  ;;  %v7877_v8 = vld [vmem:[#allocation131_spill] sm:$0xff]  ;;  %2387 = vperm.xlu0 %3807, %v5246_v10  }
 0x354   : > { %7860 = vst [vmem:[#allocation72_spill] sm:$0xff] %v5962_v33  ;;  %7861 = vst [vmem:[#allocation73_spill] sm:$0xff] %v5966_v15  ;;  %v1034_v43 = vmul.f32 %v5555_v30, %v7870_v25  ;;  %v1035_v1 = vmul.f32 %v5555_v30, %v7871_v42  ;;  %v1036_v58 = vmul.f32 %v5555_v30, %v7872_v51  ;;  %v7878_v45 = vld [vmem:[#allocation132_spill] sm:$0xff]  ;;  %v7879_v42 = vld [vmem:[#allocation133_spill] sm:$0xff] }
 0x355   : > { %7862 = vst [vmem:[#allocation74_spill] sm:$0xff] %v5969_v32  ;;  %7863 = vst [vmem:[#allocation75_spill] sm:$0xff] %v5972_v29  ;;  %v1037_v49 = vmul.f32 %v5555_v30, %v7873_v61  ;;  %v1038_v48 = vmul.f32 %v5555_v30, %v7874_v21  ;;  %v1039_v39 = vmul.f32 %v5555_v30, %v7875_v13  ;;  %v7880_v61 = vld [vmem:[#allocation134_spill] sm:$0xff]  ;;  %2379 = vperm.xlu1 %3805, %v5234_v14   ;;  %v7883_v14 = vld [vmem:[#allocation41_spill] sm:$0xff] }
 0x356   : > { %7865 = vst [vmem:[#allocation76_spill] sm:$0xff] %v5977_v44  ;;  %7869 = vst [vmem:[#allocation77_spill] sm:$0xff] %v5988_v53  ;;  %v1040_v56 = vmul.f32 %v5555_v30, %v7876_v54  ;;  %v1041_v59 = vmul.f32 %v5555_v30, %v7877_v8  ;;  %v6008_v5 = vadd.f32 %v1030_v31, %v5710_v34  ;;  %v7881_v34 = vld [vmem:[#allocation135_spill] sm:$0xff]  ;;  %v6028_v8 = vpop.permute.xlu1 %2059  ;;  %v7904_v29 = vld [vmem:[#allocation138_spill] sm:$0xff] }
 0x357   : > { %v1042_v25 = vmul.f32 %v5555_v30, %v7878_v45  ;;  %v1043_v51 = vmul.f32 %v5555_v30, %v7879_v42  ;;  %v1044_v21 = vmul.f32 %v5555_v30, %v7880_v61  ;;  %v6017_v13 = vadd.f32 %v1031_v26, %v5706_v46  ;;  %v6030_v45 = vpop.permute.xlu0 %2087  ;;  %v7909_v15 = vld [vmem:[#allocation153_spill] sm:$0xff]  ;;  %v7914_v4 = vld [vmem:[#allocation155_spill] sm:$0xff] }
 0x358   : > { %v6020_v54 = vadd.f32 %v1032_v37, %v5718_v62  ;;  %v6023_v10 = vadd.f32 %v1033_v28, %v5714_v57  ;;  %v1045_v31 = vmul.f32 %v5555_v30, %v7881_v34  ;;  %7882 = vst [vmem:[#allocation78_spill] sm:$0xff] %v6030_v45  ;;  %v6033_v42 = vadd.f32 %v1034_v43, %v5730_v16  ;;  %v7884_v28 = vld [vmem:[#allocation43_spill] sm:$0xff]  ;;  %v7885_v16 = vld [vmem:[#allocation42_spill] sm:$0xff]  ;;  %v7910_v23 = vld [vmem:[#allocation265_spill] sm:$0xff] }
 0x359   : > { %v6036_v46 = vadd.f32 %v1035_v1, %v5726_v35  ;;  %v6039_v62 = vadd.f32 %v1036_v58, %v5738_v40  ;;  %v6042_v57 = vadd.f32 %v1037_v49, %v5734_v63  ;;  %v6045_v26 = vadd.f32 %v1038_v48, %v5746_v52  ;;  %v7886_v35 = vld [vmem:[#allocation238_spill] sm:$0xff]  ;;  %v7887_v1 = vld [vmem:[#allocation45_spill] sm:$0xff]  ;;  %v7888_v58 = vld [vmem:[#allocation44_spill] sm:$0xff] }
 0x35a   : > { %v6048_v37 = vadd.f32 %v1039_v39, %v7883_v14  ;;  %v6051_v61 = vadd.f32 %v1040_v56, %v7884_v28  ;;  %v6054_v43 = vadd.f32 %v1041_v59, %v7885_v16  ;;  %2399 = vperm.xlu0 %3807, %v7886_v35   ;;  %v6058_v40 = vadd.f32 %v1042_v25, %v7887_v1  ;;  %v7889_v49 = vld [vmem:[#allocation47_spill] sm:$0xff]  ;;  %v7891_v48 = vld [vmem:[#allocation296_spill] sm:$0xff]  ;;  %v7892_v34 = vld [vmem:[#allocation46_spill] sm:$0xff] }
 0x35b   : > { %v6061_v63 = vadd.f32 %v1043_v51, %v7888_v58  ;;  %v6064_v52 = vadd.f32 %v1044_v21, %v7889_v49  ;;  %v1772_v39 = vsub.s32 3, %v7891_v48  ;;  %v6068_v14 = vadd.f32 %v1045_v31, %v7892_v34  ;;  %v7893_v56 = vld [vmem:[#allocation136_spill] sm:$0xff]  ;;  %v7895_v28 = vld [vmem:[#allocation137_spill] sm:$0xff]  ;;  %v7897_v25 = vld [vmem:[#allocation147_spill] sm:$0xff]  ;;  %v6081_v21 = vpop.permute.xlu1 %2067  ;;  %v6083_v1 = vpop.permute.xlu0 %2095 }
 0x35c   : > { %v6072_v59 = vmul.f32 %v5555_v30, %v7893_v56  ;;  %v6076_v16 = vmul.f32 %v5555_v30, %v7895_v28  ;;  %v1386_v51 = vmul.f32 %v5858_v60, %v7897_v25  ;;  %v7898_v35 = vld [vmem:[#allocation259_spill] sm:$0xff]  ;;  %7899 = vst [vmem:[#allocation26_spill] sm:$0xff] %v6083_v1  ;;  %v7900_v58 = vld [vmem:[#allocation148_spill] sm:$0xff]  ;;  %v7901_v49 = vld [vmem:[#allocation149_spill] sm:$0xff]  ;;  %v6095_v25 = vmul.f32 %v5555_v30, %v7904_v29 }
 0x35d   : > { %7890 = vst [vmem:[#allocation79_spill] sm:$0xff] %v6064_v52  ;;  %2499 = vperm.xlu1 %3805, %v7898_v35   ;;  %v1387_v31 = vmul.f32 %v5858_v60, %v7900_v58  ;;  %v1388_v34 = vmul.f32 %v5858_v60, %v7901_v49  ;;  %v7902_v56 = vld [vmem:[#allocation150_spill] sm:$0xff]  ;;  %v7903_v28 = vld [vmem:[#allocation151_spill] sm:$0xff]  ;;  %v7908_v1 = vld [vmem:[#allocation152_spill] sm:$0xff]  ;;  %v1391_v49 = vmul.f32 %v5858_v60, %v7909_v15 }
 0x35e   : > { %7894 = vst [vmem:[#allocation80_spill] sm:$0xff] %v6072_v59  ;;  %7896 = vst [vmem:[#allocation81_spill] sm:$0xff] %v6076_v16  ;;  %v1390_v44 = vmul.f32 %v5858_v60, %v7902_v56  ;;  %v1389_v32 = vmul.f32 %v5858_v60, %v7903_v28  ;;  %v7906_v35 = vld [vmem:[#allocation139_spill] sm:$0xff]  ;;  %v1392_v58 = vmul.f32 %v5858_v60, %v7908_v1  ;;  %2519 = vperm.xlu0 %3807, %v7910_v23   ;;  %v7911_v56 = vld [vmem:[#allocation140_spill] sm:$0xff] }
 0x35f   : > { %7905 = vst [vmem:[#allocation89_spill] sm:$0xff] %v6095_v25  ;;  %v6099_v33 = vmul.f32 %v5555_v30, %v7906_v35  ;;  %v6108_v38 = vmul.f32 %v5555_v30, %v7911_v56  ;;  %v7913_v28 = vld [vmem:[#allocation154_spill] sm:$0xff]  ;;  %v1393_v25 = vmul.f32 %v5858_v60, %v7914_v4  ;;  %v6115_v35 = vrot.slane %v5537_v24, %v1772_v39  ;;  %v7915_v15 = vld [vmem:[#allocation156_spill] sm:$0xff]  ;;  %v6127_v59 = vpop.permute.xlu1 %2075  ;;  %v6129_v4 = vpop.permute.xlu0 %2099  ;;  %v7939_v53 = vld [vmem:[#allocation189_spill] sm:$0xff] }
 0x360   : > { %v1394_v29 = vmul.f32 %v5858_v60, %v7913_v28  ;;  %v6118_v1 = vadd.f32 %v1386_v51, %v5864_v27  ;;  %v1396_v23 = vmul.f32 %v5858_v60, %v7915_v15  ;;  %v7918_v28 = vld [vmem:[#allocation262_spill] sm:$0xff]  ;;  %7919 = vst [vmem:[#allocation82_spill] sm:$0xff] %v6129_v4  ;;  %v6132_v39 = vadd.f32 %v1387_v31, %v5861_v17  ;;  %v7921_v17 = vld [vmem:[#allocation160_spill] sm:$0xff] }
 0x361   : > { %7907 = vst [vmem:[#allocation90_spill] sm:$0xff] %v6099_v33  ;;  %7912 = vst [vmem:[#allocation91_spill] sm:$0xff] %v6108_v38  ;;  %v7916_v33 = vld [vmem:[#allocation157_spill] sm:$0xff]  ;;  %v7917_v38 = vld [vmem:[#allocation158_spill] sm:$0xff]  ;;  %2507 = vperm.xlu1 %3805, %v7918_v28   ;;  %v6135_v27 = vadd.f32 %v1388_v34, %v5867_v20  ;;  %v6138_v51 = vadd.f32 %v1390_v44, %v5874_v2  ;;  %v6147_v15 = vadd.f32 %v1391_v49, %v5877_v55 }
 0x362   : > { %v1395_v56 = vmul.f32 %v5858_v60, %v7916_v33  ;;  %v1398_v16 = vmul.f32 %v5858_v60, %v7917_v38  ;;  %v6141_v33 = vadd.f32 %v1389_v32, %v5870_v50  ;;  %v6144_v38 = vadd.f32 %v1392_v58, %v5880_v12  ;;  %v7920_v28 = vld [vmem:[#allocation159_spill] sm:$0xff]  ;;  %v3952_v20 = vld [vmem:[%s4281_s14 + $0x1d8] sm:$0xff]  ;;  %v7938_v52 = vld [vmem:[#allocation188_spill] sm:$0xff] }
 0x363   : > { %v1397_v4 = vmul.f32 %v5858_v60, %v7920_v28  ;;  %v1400_v31 = vmul.f32 %v5858_v60, %v7921_v17  ;;  %2527 = vperm.xlu0 %3807, %v3952_v20   ;;  %v6155_v2 = vadd.f32 %v1394_v29, %v5916_v22  ;;  %v6158_v50 = vadd.f32 %v1393_v25, %v5885_v7  ;;  %v7922_v12 = vld [vmem:[#allocation161_spill] sm:$0xff]  ;;  %v7923_v55 = vld [vmem:[#allocation163_spill] sm:$0xff]  ;;  %v7924_v22 = vld [vmem:[#allocation178_spill] sm:$0xff]  ;;  %v6176_v25 = vpop.permute.xlu1 %2083  ;;  %v6178_v28 = vpop.permute.xlu0 %2111 }
 0x364   : > { %v1399_v32 = vmul.f32 %v5858_v60, %v7922_v12  ;;  %v1401_v44 = vmul.f32 %v5858_v60, %v7923_v55  ;;  %v6165_v34 = vadd.f32 %v1396_v23, %v5928_v3  ;;  %v6168_v58 = vadd.f32 %v1395_v56, %v5925_v36  ;;  %7926 = vst [vmem:[#allocation92_spill] sm:$0xff] %v6176_v25  ;;  %v7928_v17 = vld [vmem:[#allocation180_spill] sm:$0xff]  ;;  %v7929_v3 = vld [vmem:[#allocation181_spill] sm:$0xff]  ;;  %v7930_v36 = vld [vmem:[#allocation182_spill] sm:$0xff] }
 0x365   : > { %v6171_v49 = vadd.f32 %v1398_v16, %v5941_v18  ;;  %v1418_v29 = vmul.f32 %v5858_v60, %v7924_v22  ;;  %v7925_v7 = vmov 4   ;;  %7927 = vst [vmem:[#allocation93_spill] sm:$0xff] %v6178_v28  ;;  %v1420_v12 = vmul.f32 %v5858_v60, %v7928_v17  ;;  %v7931_v18 = vld [vmem:[#allocation183_spill] sm:$0xff]  ;;  %v7933_v17 = vld [vmem:[#allocation184_spill] sm:$0xff] }
 0x366   : > { %3806 = vset.pattern.permute.xlu1 %v7925_v7  ;;  %v1419_v23 = vmul.f32 %v5858_v60, %v7929_v3  ;;  %v1422_v56 = vmul.f32 %v5858_v60, %v7930_v36  ;;  %v1421_v16 = vmul.f32 %v5858_v60, %v7931_v18  ;;  %v6189_v55 = vld [vmem:[%s4281_s14 + $0x1c0] sm:$0xff]  ;;  %v6193_v22 = vadd.f32 %v1397_v4, %v5931_v9  ;;  %v7934_v3 = vld [vmem:[#allocation185_spill] sm:$0xff] }
 0x367   : > { %2127 = vperm.xlu1 %3806, %v6189_v55   ;;  %v6196_v7 = vadd.f32 %v1400_v31, %v5947_v41  ;;  %v1424_v28 = vmul.f32 %v5858_v60, %v7933_v17  ;;  %v1423_v30 = vmul.f32 %v5858_v60, %v7934_v3  ;;  %v7935_v36 = vld [vmem:[#allocation241_spill] sm:$0xff]  ;;  %v6204_v18 = vadd.f32 %v1399_v32, %v5944_v19  ;;  %v7936_v9 = vld [vmem:[#allocation186_spill] sm:$0xff]  ;;  %v7937_v41 = vld [vmem:[#allocation187_spill] sm:$0xff] }
 0x368   : > { %2407 = vperm.xlu0 %3807, %v7935_v36   ;;  %v6207_v45 = vadd.f32 %v1401_v44, %v5950_v11  ;;  %v1426_v4 = vmul.f32 %v5858_v60, %v7936_v9  ;;  %v1425_v31 = vmul.f32 %v5858_v60, %v7937_v41  ;;  %v6214_v17 = vadd.f32 %v1418_v29, %v6008_v5  ;;  %v7940_v19 = vld [vmem:[#allocation190_spill] sm:$0xff]  ;;  %v6222_v11 = vpop.permute.xlu1 %2091  ;;  %v6224_v44 = vpop.permute.xlu0 %2119 }
 0x369   : > { %7932 = vst [vmem:[#allocation94_spill] sm:$0xff] %v6196_v7  ;;  %v1428_v3 = vmul.f32 %v5858_v60, %v7938_v52  ;;  %v1427_v36 = vmul.f32 %v5858_v60, %v7939_v53  ;;  %v1430_v32 = vmul.f32 %v5858_v60, %v7940_v19  ;;  %7941 = vst [vmem:[#allocation83_spill] sm:$0xff] %v6222_v11  ;;  %v6239_v53 = vld [vmem:[%s4281_s14 + $0x1d0] sm:$0xff]  ;;  %v7983_v11 = vld [vmem:[#allocation250_spill] sm:$0xff] }
 0x36a   : > { %7942 = vst [vmem:[#allocation84_spill] sm:$0xff] %v6224_v44  ;;  %v6227_v9 = vadd.f32 %v1420_v12, %v6020_v54  ;;  %v6230_v41 = vadd.f32 %v1419_v23, %v6017_v13  ;;  %v6233_v5 = vadd.f32 %v1422_v56, %v6033_v42  ;;  %v6236_v52 = vadd.f32 %v1421_v16, %v6023_v10  ;;  %v7943_v54 = vld [vmem:[#allocation191_spill] sm:$0xff]  ;;  %v7944_v12 = vld [vmem:[#allocation193_spill] sm:$0xff]  ;;  %v7945_v23 = vld [vmem:[#allocation244_spill] sm:$0xff] }
 0x36b   : > { %2135 = vperm.xlu1 %3806, %v6239_v53   ;;  %v6243_v29 = vadd.f32 %v1424_v28, %v6039_v62  ;;  %v6246_v19 = vadd.f32 %v1423_v30, %v6036_v46  ;;  %v1429_v13 = vmul.f32 %v5858_v60, %v7943_v54  ;;  %v1431_v42 = vmul.f32 %v5858_v60, %v7944_v12  ;;  %v7946_v16 = vld [vmem:[#allocation195_spill] sm:$0xff]  ;;  %v7957_v44 = vld [vmem:[#allocation209_spill] sm:$0xff]  ;;  %v7997_v7 = vld [vmem:[#allocation282_spill] sm:$0xff] }
 0x36c   : > { %2415 = vperm.xlu0 %3807, %v7945_v23   ;;  %v6254_v10 = vadd.f32 %v1426_v4, %v6045_v26  ;;  %v6257_v56 = vadd.f32 %v1425_v31, %v6042_v57  ;;  %v1433_v62 = vmul.f32 %v5858_v60, %v7946_v16  ;;  %v2160_v30 = vsub.s32 4, %v7891_v48  ;;  %v7948_v26 = vld [vmem:[#allocation204_spill] sm:$0xff]  ;;  %v6273_v57 = vpop.permute.xlu0 %2131  ;;  %v7952_v23 = vld [vmem:[#allocation205_spill] sm:$0xff] }
 0x36d   : > { %v6263_v46 = vadd.f32 %v1428_v3, %v6051_v61  ;;  %v6266_v28 = vadd.f32 %v1427_v36, %v6048_v37  ;;  %v6269_v54 = vadd.f32 %v1430_v32, %v6058_v40  ;;  %v1774_v4 = vmul.f32 %v6115_v35, %v7948_v26  ;;  %7949 = vst [vmem:[#allocation95_spill] sm:$0xff] %v6273_v57  ;;  %v7950_v31 = vld [vmem:[#allocation192_spill] sm:$0xff]  ;;  %v7953_v61 = vld [vmem:[#allocation206_spill] sm:$0xff]  ;;  %v7954_v37 = vld [vmem:[#allocation207_spill] sm:$0xff]  ;;  %v6285_v40 = vpop.permute.xlu1 %2291 }
 0x36e   : > { %v6277_v12 = vmul.f32 %v5858_v60, %v7950_v31  ;;  %v1777_v16 = vmul.f32 %v6115_v35, %v7952_v23  ;;  %v1775_v3 = vmul.f32 %v6115_v35, %v7953_v61  ;;  %v1779_v36 = vmul.f32 %v6115_v35, %v7954_v37  ;;  %v7956_v31 = vld [vmem:[#allocation208_spill] sm:$0xff] }
 0x36f   : > { %7947 = vst [vmem:[#allocation85_spill] sm:$0xff] %v6269_v54  ;;  %2139 = vperm.xlu1 %3806, %v3952_v20   ;;  %v6288_v32 = vadd.f32 %v1429_v13, %v6054_v43  ;;  %v6291_v26 = vadd.f32 %v1431_v42, %v6061_v63  ;;  %v1776_v57 = vmul.f32 %v6115_v35, %v7956_v31  ;;  %v3955_v60 = vld [vmem:[%s4281_s14 + $0x1e8] sm:$0xff]  ;;  %v7959_v20 = vld [vmem:[#allocation210_spill] sm:$0xff]  ;;  %v7962_v31 = vld [vmem:[#allocation213_spill] sm:$0xff] }
 0x370   : > { %7951 = vst [vmem:[#allocation86_spill] sm:$0xff] %v6277_v12  ;;  %v1781_v23 = vmul.f32 %v6115_v35, %v7957_v44  ;;  %2535 = vperm.xlu0 %3807, %v3955_v60   ;;  %v6299_v61 = vadd.f32 %v1433_v62, %v6068_v14  ;;  %v1778_v37 = vmul.f32 %v6115_v35, %v7959_v20  ;;  %v7960_v54 = vld [vmem:[#allocation211_spill] sm:$0xff]  ;;  %v7961_v42 = vld [vmem:[#allocation212_spill] sm:$0xff]  ;;  %v7963_v62 = vld [vmem:[#allocation214_spill] sm:$0xff]  ;;  %v6317_v20 = vpop.permute.xlu0 %2143 }
 0x371   : > { %7955 = vst [vmem:[#allocation23_spill] sm:$0xff] %v6291_v26  ;;  %v1783_v43 = vmul.f32 %v6115_v35, %v7960_v54  ;;  %v6306_v63 = vrot.slane %v5537_v24, %v2160_v30  ;;  %v6309_v13 = vadd.f32 %v1774_v4, %v6118_v1  ;;  %v1780_v44 = vmul.f32 %v6115_v35, %v7961_v42  ;;  %v7965_v1 = vld [vmem:[#allocation215_spill] sm:$0xff]  ;;  %v6328_v42 = vpop.permute.xlu1 %2299 }
 0x372   : > { %7958 = vst [vmem:[#allocation87_spill] sm:$0xff] %v6299_v61  ;;  %v1785_v14 = vmul.f32 %v6115_v35, %v7962_v31  ;;  %v1782_v12 = vmul.f32 %v6115_v35, %v7963_v62  ;;  %7964 = vst [vmem:[#allocation96_spill] sm:$0xff] %v6317_v20  ;;  %v6320_v54 = vadd.f32 %v1777_v16, %v6141_v33  ;;  %v7966_v20 = vld [vmem:[#allocation216_spill] sm:$0xff]  ;;  %v7967_v16 = vld [vmem:[#allocation217_spill] sm:$0xff] }
 0x373   : > { %v1839_v30 = vadd.f32 %v1775_v3, %v6132_v39  ;;  %v6324_v61 = vadd.f32 %v1779_v36, %v6147_v15  ;;  %v1787_v4 = vmul.f32 %v6115_v35, %v7965_v1  ;;  %2147 = vperm.xlu1 %3806, %v3955_v60   ;;  %v6331_v31 = vadd.f32 %v1776_v57, %v6135_v27  ;;  %v3956_v15 = vld [vmem:[%s4281_s14 + $0x1f8] sm:$0xff]  ;;  %v7969_v57 = vld [vmem:[#allocation240_spill] sm:$0xff] }
 0x374   : > { %v6334_v62 = vadd.f32 %v1781_v23, %v6158_v50  ;;  %v1784_v33 = vmul.f32 %v6115_v35, %v7966_v20  ;;  %v1789_v39 = vmul.f32 %v6115_v35, %v7967_v16  ;;  %2543 = vperm.xlu0 %3807, %v3956_v15   ;;  %v1842_v3 = vadd.f32 %v1778_v37, %v6138_v51  ;;  %v7968_v36 = vld [vmem:[#allocation237_spill] sm:$0xff]  ;;  %v7970_v16 = vld [vmem:[#allocation242_spill] sm:$0xff]  ;;  %v6358_v37 = vpop.permute.xlu0 %2151 }
 0x375   : > { %v6343_v60 = vadd.f32 %v1783_v43, %v6168_v58  ;;  %v1807_v27 = vmul.f32 %v6115_v35, %v7968_v36  ;;  %v1809_v50 = vmul.f32 %v6115_v35, %v7969_v57  ;;  %v1844_v23 = vadd.f32 %v1780_v44, %v6144_v38  ;;  %7971 = vst [vmem:[#allocation97_spill] sm:$0xff] %v6358_v37  ;;  %v7973_v43 = vld [vmem:[#allocation243_spill] sm:$0xff]  ;;  %v7974_v57 = vld [vmem:[#allocation245_spill] sm:$0xff]  ;;  %v7975_v44 = vld [vmem:[#allocation246_spill] sm:$0xff] }
 0x376   : > { %v6351_v20 = vadd.f32 %v1785_v14, %v6193_v22  ;;  %v6354_v1 = vadd.f32 %v1782_v12, %v6155_v2  ;;  %v1806_v51 = vmul.f32 %v6115_v35, %v7970_v16  ;;  %v6361_v58 = vadd.f32 %v1787_v4, %v6204_v18  ;;  %v6369_v2 = vpop.permute.xlu1 %2303  ;;  %v7977_v18 = vld [vmem:[#allocation247_spill] sm:$0xff]  ;;  %v7979_v37 = vld [vmem:[#allocation220_spill] sm:$0xff] }
 0x377   : > { %v1811_v36 = vmul.f32 %v6115_v35, %v7973_v43  ;;  %v1808_v38 = vmul.f32 %v6115_v35, %v7974_v57  ;;  %v1813_v22 = vmul.f32 %v6115_v35, %v7975_v44  ;;  %2155 = vperm.xlu1 %3806, %v3956_v15   ;;  %v6372_v12 = vadd.f32 %v1784_v33, %v6165_v34  ;;  %v7978_v43 = vld [vmem:[#allocation218_spill] sm:$0xff]  ;;  %v7981_v33 = vld [vmem:[#allocation248_spill] sm:$0xff] }
 0x378   : > { %7972 = vst [vmem:[#allocation98_spill] sm:$0xff] %v6361_v58  ;;  %v6375_v14 = vadd.f32 %v1789_v39, %v6207_v45  ;;  %v1810_v4 = vmul.f32 %v6115_v35, %v7977_v18  ;;  %v2548_v16 = vsub.s32 5, %v7891_v48  ;;  %v6382_v57 = vmul.f32 %v6115_v35, %v7978_v43  ;;  %v7982_v18 = vld [vmem:[#allocation249_spill] sm:$0xff] }
 0x379   : > { %v6386_v15 = vmul.f32 %v6115_v35, %v7979_v37  ;;  %v1871_v44 = vadd.f32 %v1807_v27, %v6230_v41  ;;  %v1873_v34 = vadd.f32 %v1809_v50, %v6236_v52  ;;  %v1870_v45 = vadd.f32 %v1806_v51, %v6214_v17  ;;  %v7984_v52 = vld [vmem:[#allocation275_spill] sm:$0xff]  ;;  %v2296_v51 = vpop.permute.xlu0 %2295 }
 0x37a   : > { %7976 = vst [vmem:[#allocation99_spill] sm:$0xff] %v6375_v14  ;;  %v1815_v39 = vmul.f32 %v6115_v35, %v7981_v33  ;;  %v1812_v48 = vmul.f32 %v6115_v35, %v7982_v18  ;;  %v1817_v43 = vmul.f32 %v6115_v35, %v7983_v11  ;;  %v6398_v25 = vadd.f32 %v1811_v36, %v6246_v19  ;;  %v2424_v50 = vpop.permute.xlu1 %2423  ;;  %v7986_v18 = vld [vmem:[#allocation67_spill] sm:$0xff]  ;;  %v7988_v36 = vld [vmem:[#allocation277_spill] sm:$0xff] }
 0x37b   : > { %7980 = vst [vmem:[#allocation100_spill] sm:$0xff] %v6386_v15  ;;  %v1872_v37 = vadd.f32 %v1808_v38, %v6227_v9  ;;  %v6402_v41 = vadd.f32 %v1813_v22, %v6257_v56  ;;  %v2163_v17 = vmul.f32 %v6306_v63, %v7984_v52  ;;  %v7985_v27 = vmov 5   ;;  %v7987_v56 = vld [vmem:[#allocation235_spill] sm:$0xff]  ;;  %v7989_v22 = vld [vmem:[#allocation278_spill] sm:$0xff] }
 0x37c   : > { %3808 = vset.pattern.permute.xlu1 %v7985_v27  ;;  %v6408_v33 = vadd.f32 %v1810_v4, %v6233_v5  ;;  %v2195_v11 = vmul.f32 %v6306_v63, %v7986_v18  ;;  %v2197_v19 = vmul.f32 %v6306_v63, %v5936_v6  ;;  %v6415_v9 = vrot.slane %v5537_v24, %v2548_v16  ;;  %v7990_v27 = vld [vmem:[#allocation279_spill] sm:$0xff]  ;;  %v7991_v4 = vld [vmem:[#allocation30_spill] sm:$0xff] }
 0x37d   : > { %2391 = vperm.xlu1 %3808, %v7987_v56   ;;  %v2166_v38 = vmul.f32 %v6306_v63, %v7988_v36  ;;  %v2162_v52 = vmul.f32 %v6306_v63, %v7989_v22  ;;  %v2168_v5 = vmul.f32 %v6306_v63, %v7990_v27  ;;  %v2194_v18 = vmul.f32 %v6306_v63, %v7991_v4  ;;  %v7992_v56 = vld [vmem:[#allocation251_spill] sm:$0xff]  ;;  %v7993_v27 = vld [vmem:[#allocation280_spill] sm:$0xff]  ;;  %v2420_v26 = vpop.permute.xlu0 %2419 }
 0x37e   : > { %v6427_v14 = vadd.f32 %v1815_v39, %v6266_v28  ;;  %v6430_v24 = vadd.f32 %v1812_v48, %v6243_v29  ;;  %v6433_v6 = vadd.f32 %v1817_v43, %v6288_v32  ;;  %v2583_v16 = vmul.f32 %v6415_v9, %v2424_v50  ;;  %v7994_v4 = vld [vmem:[#allocation40_spill] sm:$0xff]  ;;  %v2432_v39 = vpop.permute.xlu1 %2431 }
 0x37f   : > { %v6438_v36 = vmul.f32 %v6115_v35, %v7992_v56  ;;  %v2227_v22 = vadd.f32 %v2163_v17, %v1839_v30  ;;  %v2164_v58 = vmul.f32 %v6306_v63, %v7993_v27  ;;  %v2196_v28 = vmul.f32 %v6306_v63, %v7994_v4  ;;  %v7995_v50 = vld [vmem:[#allocation228_spill] sm:$0xff]  ;;  %v7996_v27 = vld [vmem:[#allocation281_spill] sm:$0xff] }
 0x380   : > { %v2259_v29 = vadd.f32 %v2195_v11, %v1871_v44  ;;  %v2261_v48 = vadd.f32 %v2197_v19, %v1873_v34  ;;  %v2585_v32 = vmul.f32 %v6415_v9, %v2432_v39  ;;  %v2582_v43 = vmul.f32 %v6415_v9, %v2420_v26  ;;  %v7998_v26 = vld [vmem:[#allocation283_spill] sm:$0xff] }
 0x381   : > { %2395 = vperm.xlu1 %3808, %v7995_v50   ;;  %v6447_v15 = vadd.f32 %v2166_v38, %v1842_v3  ;;  %v2226_v30 = vadd.f32 %v2162_v52, %v6309_v13  ;;  %v6450_v17 = vadd.f32 %v2168_v5, %v1844_v23  ;;  %v2258_v56 = vadd.f32 %v2194_v18, %v1870_v45  ;;  %v7999_v3 = vld [vmem:[#allocation284_spill] sm:$0xff]  ;;  %v2428_v52 = vpop.permute.xlu0 %2427  ;;  %v8000_v45 = vld [vmem:[#allocation286_spill] sm:$0xff]  ;;  %v6463_v50 = vld [vmem:[#allocation4] ss:$0 sm:$0xff] }
 0x382   : > { %v2170_v4 = vmul.f32 %v6306_v63, %v7996_v27  ;;  %v2165_v44 = vmul.f32 %v6306_v63, %v7997_v7  ;;  %v2647_v34 = vadd.f32 %v2583_v16, %v2259_v29  ;;  %v2649_v11 = vadd.f32 %v2585_v32, %v2261_v48  ;;  %v2312_v23 = vpop.permute.xlu1 %2311 }
 0x383   : > { %v2228_v19 = vadd.f32 %v2164_v58, %v6331_v31  ;;  %v2172_v39 = vmul.f32 %v6306_v63, %v7998_v26  ;;  %v2167_v38 = vmul.f32 %v6306_v63, %v7999_v3  ;;  %v2646_v13 = vadd.f32 %v2582_v43, %v2258_v56  ;;  %v8001_v58 = vld [vmem:[#allocation53_spill] sm:$0xff]  ;;  %v8003_v3 = vld [vmem:[#allocation62_spill] sm:$0xff] }
 0x384   : > { %v2169_v5 = vmul.f32 %v6306_v63, %v8000_v45  ;;  %v2260_v18 = vadd.f32 %v2196_v28, %v1872_v37  ;;  %v2550_v7 = vmul.f32 %v6415_v9, %v6285_v40  ;;  %v2551_v31 = vmul.f32 %v6415_v9, %v2296_v51 }
 0x385   : > { %2515 = vperm.xlu1 %3808, %v6189_v55   ;;  %v2198_v16 = vmul.f32 %v6306_v63, %v8001_v58  ;;  %v2552_v29 = vmul.f32 %v6415_v9, %v6328_v42  ;;  %v2720_v48 = vadd.f32 %v6463_v50, %v2649_v11  ;;  %v2584_v32 = vmul.f32 %v6415_v9, %v2428_v52  ;;  %v2308_v11 = vpop.permute.xlu0 %2307  ;;  %v3890_v58 = vld [vmem:[#allocation6 + $0x8] sm:$0xff]  }
 0x386   : > { %v6476_v37 = vadd.f32 %v2170_v4, %v6354_v1  ;;  %v2229_v28 = vadd.f32 %v2165_v44, %v6320_v54  ;;  %v2553_v40 = vmul.f32 %v6415_v9, %v6369_v2  ;;  %v2718_v55 = vadd.f32 %v6463_v50, %v2647_v34  ;;  %v2320_v27 = vpop.permute.xlu1 %2319  ;;  %v8002_v4 = vld [vmem:[#allocation288_spill] sm:$0xff] }
 0x387   : > { %v6483_v51 = vadd.f32 %v2172_v39, %v6372_v12  ;;  %v2231_v43 = vadd.f32 %v2167_v38, %v6324_v61  ;;  %v2717_v42 = vadd.f32 %v6463_v50, %v2646_v13  ;;  %v2648_v56 = vadd.f32 %v2584_v32, %v2260_v18  ;;  %v3889_v34 = vld [vmem:[#allocation6] sm:$0xff]  }
 0x388   : > { %v2233_v1 = vadd.f32 %v2169_v5, %v6334_v62  ;;  %v6490_v54 = vmul.f32 %v6306_v63, %v8002_v4  ;;  %v2614_v44 = vadd.f32 %v2550_v7, %v2226_v30  ;;  %v2615_v2 = vadd.f32 %v2551_v31, %v2227_v22  ;;  %3727 = vmatprep.subr.bf16.mxu1 %v3889_v34  ;;  %v3957_v31 = vld [vmem:[%s4281_s14 + $0xe0] sm:$0xff] }
 0x389   : > { %2523 = vperm.xlu1 %3808, %v6239_v53   ;;  %v6494_v12 = vadd.f32 %v2198_v16, %v6408_v33  ;;  %v2616_v61 = vadd.f32 %v2552_v29, %v2228_v19  ;;  %v2784_v26 = vmax.f32 %v2720_v48, 0.0  ;;  %v2719_v39 = vadd.f32 %v6463_v50, %v2648_v56  ;;  %3687 = vmatprep.subr.bf16.mxu0 %v3889_v34  ;;  %v2316_v45 = vpop.permute.xlu0 %2315 }
 0x38a   : > { %v6499_v38 = vmul.f32 %v6306_v63, %v8003_v3  ;;  %v2199_v62 = vmul.f32 %v6306_v63, %v5986_v0  ;;  %v2617_v13 = vadd.f32 %v2553_v40, %v2229_v28  ;;  %v2782_v22 = vmax.f32 %v2718_v55, 0.0  ;;  %v2440_v52 = vpop.permute.xlu1 %2439  ;;  %3731 = vmatpush3.bf16.msra.mxu1 %v3889_v34  ;;  %3688 = vmatpush3.bf16.msra.mxu0 %v3889_v34  ;;  %v3891_v34 = vld [vmem:[#allocation6 + $0x10] sm:$0xff]  }
 0x38b   : > { %v2781_v53 = vmax.f32 %v2717_v42, 0.0  ;;  %v2783_v30 = vmax.f32 %v2719_v39, 0.0  ;;  %v2557_v33 = vmul.f32 %v6415_v9, %v2320_v27  ;;  %v2554_v19 = vmul.f32 %v6415_v9, %v2308_v11  ;;  %3728 = vmatprep.subr.bf16.mxu1 %v3890_v58  ;;  %3689 = vmatprep.subr.bf16.mxu0 %v3890_v58  ;;  %v8004_v39 = vld [vmem:[#allocation290_spill] sm:$0xff] }
 0x38c   : > { %v2201_v5 = vmul.f32 %v6306_v63, %v6028_v8  ;;  %v2685_v0 = vadd.f32 %v6463_v50, %v2614_v44  ;;  %v2686_v18 = vadd.f32 %v6463_v50, %v2615_v2  ;;  %v2556_v7 = vmul.f32 %v6415_v9, %v2316_v45 }
 0x38d   : > { %2403 = vperm.xlu1 %3808, %v3957_v31   ;;  %v2687_v16 = vadd.f32 %v6463_v50, %v2616_v61  ;;  %v6512_v29 = vmax.f32 %v2782_v22, %v2784_v26  ;;  %v2555_v48 = vmul.f32 %v6415_v9, %v2312_v23  ;;  %v6515_v32 = vmax.f32 %v2781_v53, %v2783_v30  ;;  %v2436_v27 = vpop.permute.xlu0 %2435 }
 0x38e   : > { %v2688_v28 = vadd.f32 %v6463_v50, %v2617_v13  ;;  %v2587_v8 = vmul.f32 %v6415_v9, %v2440_v52  ;;  %v2620_v40 = vadd.f32 %v2556_v7, %v6450_v17  ;;  %v2621_v55 = vadd.f32 %v2557_v33, %v2233_v1  ;;  %v2448_v56 = vpop.permute.xlu1 %2447  ;;  %3732 = vmatpush3.bf16.msra.mxu1 %v3890_v58  ;;  %v3958_v17 = vld [vmem:[%s4281_s14 + $0xf0] sm:$0xff] }
 0x38f   : > { %v2618_v42 = vadd.f32 %v2554_v19, %v6447_v15  ;;  %v3814_v11 = vpack.i.bf16 %v6512_v29, %v6515_v32  ;;  %3690 = vmatpush3.bf16.msra.mxu0 %v3890_v58  ;;  %v2263_v23 = vadd.f32 %v2199_v62, %v6398_v25  ;;  %v2265_v4 = vadd.f32 %v2201_v5, %v6402_v41 }
 0x390   : > { %v2750_v44 = vmax.f32 %v2686_v18, 0.0  ;;  %v2589_v2 = vmul.f32 %v6415_v9, %v2448_v56  ;;  %v2751_v1 = vmax.f32 %v2687_v16, 0.0  ;;  %v2619_v61 = vadd.f32 %v2555_v48, %v2231_v43  ;;  %3729 = vmatprep.subr.bf16.mxu1 %v3891_v34  ;;  %3691 = vmatprep.subr.bf16.mxu0 %v3891_v34  ;;  %v3892_v18 = vld [vmem:[#allocation6 + $0x18] sm:$0xff]  }
 0x391   : > { %2411 = vperm.xlu1 %3808, %v3958_v17   ;;  %v2691_v15 = vadd.f32 %v6463_v50, %v2620_v40  ;;  %v2586_v26 = vmul.f32 %v6415_v9, %v2436_v27  ;;  %3815 = vrot.lane.b32.xlu0 %v3814_v11, %s4106_s15  ;;  %v2173_v25 = vmul.f32 %v6306_v63, %v8004_v39  ;;  %v2752_v3 = vmax.f32 %v2688_v28, 0.0  ;;  %v2444_v33 = vpop.permute.xlu0 %2443 }
 0x392   : > { %v2651_v41 = vadd.f32 %v2587_v8, %v2263_v23  ;;  %v2653_v62 = vadd.f32 %v2589_v2, %v2265_v4  ;;  %v2749_v13 = vmax.f32 %v2685_v0, 0.0  ;;  %v2692_v22 = vadd.f32 %v6463_v50, %v2621_v55  ;;  %v2328_v30 = vpop.permute.xlu1 %2327  ;;  %3733 = vmatpush3.bf16.msra.mxu1 %v3891_v34  ;;  %v3959_v0 = vld [vmem:[%s4281_s14 + $0x1e0] sm:$0xff]  ;;  %v3960_v23 = vld [vmem:[%s4281_s14 + $0x1f0] sm:$0xff] }
 0x393   : > { %v2689_v43 = vadd.f32 %v6463_v50, %v2618_v42  ;;  %v2650_v53 = vadd.f32 %v2586_v26, %v6494_v12  ;;  %3692 = vmatpush3.bf16.msra.mxu0 %v3891_v34  ;;  %v2264_v19 = vadd.f32 %v6499_v38, %v6430_v24  ;;  %v6537_v52 = vmax.f32 %v2750_v44, %v2752_v3 }
 0x394   : > { %v2724_v45 = vadd.f32 %v6463_v50, %v2653_v62  ;;  %v2588_v5 = vmul.f32 %v6415_v9, %v2444_v33  ;;  %v6542_v7 = vmax.f32 %v2749_v13, %v2751_v1  ;;  %v2690_v12 = vadd.f32 %v6463_v50, %v2619_v61  ;;  %3730 = vmatprep.subr.bf16.mxu1 %v3892_v18 }
 0x395   : > { %2531 = vperm.xlu1 %3808, %v3959_v0   ;;  %v2755_v31 = vmax.f32 %v2691_v15, 0.0  ;;  %v2559_v58 = vmul.f32 %v6415_v9, %v2328_v30  ;;  %v2722_v16 = vadd.f32 %v6463_v50, %v2651_v41  ;;  %v2721_v24 = vadd.f32 %v6463_v50, %v2650_v53  ;;  %3693 = vmatprep.subr.bf16.mxu0 %v3892_v18  ;;  %v2324_v42 = vpop.permute.xlu0 %2323 }
 0x396   : > { %v2652_v38 = vadd.f32 %v2588_v5, %v2264_v19  ;;  %v2235_v48 = vadd.f32 %v6490_v54, %v6343_v60  ;;  %v2237_v28 = vadd.f32 %v2173_v25, %v6351_v20  ;;  %v2756_v8 = vmax.f32 %v2692_v22, 0.0  ;;  %v2336_v55 = vpop.permute.xlu1 %2335  ;;  %3734 = vmatpush3.bf16.msra.mxu1 %v3892_v18 }
 0x397   : > { %v2753_v40 = vmax.f32 %v2689_v43, 0.0  ;;  %3694 = vmatpush3.bf16.msra.mxu0 %v3892_v18  ;;  %v2788_v56 = vmax.f32 %v2724_v45, 0.0  ;;  %v2561_v11 = vmul.f32 %v6415_v9, %v2336_v55  ;;  %v3809_v4 = vpack.i.bf16 %v6537_v52, %v6542_v7  ;;  %v8009_v18 = vld [vmem:[#allocation252_spill] sm:$0xff] }
 0x398   : > { %v2723_v27 = vadd.f32 %v6463_v50, %v2652_v38  ;;  %v2754_v44 = vmax.f32 %v2690_v12, 0.0  ;;  %v2623_v20 = vadd.f32 %v2559_v58, %v2235_v48  ;;  %v2558_v54 = vmul.f32 %v6415_v9, %v2324_v42 }
 0x399   : > { %2539 = vperm.xlu1 %3808, %v3960_v23   ;;  %v6556_v60 = vmax.f32 %v2753_v40, %v2755_v31  ;;  %v2786_v2 = vmax.f32 %v2722_v16, 0.0  ;;  %v2785_v17 = vmax.f32 %v2721_v24, 0.0  ;;  %v2625_v1 = vadd.f32 %v2561_v11, %v2237_v28  ;;  %v2332_v3 = vpop.permute.xlu0 %2331 }
 0x39a   : > { %v2787_v34 = vmax.f32 %v2723_v27, 0.0  ;;  %v2203_v61 = vmul.f32 %v6306_v63, %v6081_v21  ;;  %v2205_v15 = vmul.f32 %v6306_v63, %v6127_v59  ;;  %v6563_v26 = vmax.f32 %v2754_v44, %v2756_v8  ;;  %v2456_v25 = vpop.permute.xlu1 %2455  ;;  %v8007_v21 = vld [vmem:[#allocation253_spill] sm:$0xff]  ;;  %v8008_v59 = vld [vmem:[#allocation68_spill] sm:$0xff]  ;;  %v8011_v27 = vld [vmem:[#allocation294_spill] sm:$0xff] }
 0x39b   : > { %8005 = vst [vmem:[#allocation101_spill] sm:$0xff] %v6556_v60  ;;  %v2622_v39 = vadd.f32 %v2558_v54, %v6476_v37  ;;  %v6566_v41 = vmax.f32 %v2786_v2, %v2788_v56  ;;  %v2696_v13 = vadd.f32 %v6463_v50, %v2625_v1  ;;  %v2560_v22 = vmul.f32 %v6415_v9, %v2332_v3  ;;  %v8014_v1 = vld [vmem:[#allocation94_spill] sm:$0xff] }
 0x39c   : > { %8006 = vst [vmem:[#allocation102_spill] sm:$0xff] %v6563_v26  ;;  %v6568_v62 = vmax.f32 %v2785_v17, %v2787_v34  ;;  %v1816_v43 = vmul.f32 %v6115_v35, %v8007_v21  ;;  %v2202_v53 = vmul.f32 %v6306_v63, %v8008_v59  ;;  %v2694_v37 = vadd.f32 %v6463_v50, %v2623_v20  ;;  %v8017_v59 = vld [vmem:[#allocation23_spill] sm:$0xff] }
 0x39d   : > { %3810 = vrot.lane.b32.xlu1 %v3809_v4, %s4106_s15  ;;  %v3819_v30 = vpack.i.bf16 %v6563_v26, %v6556_v60  ;;  %v2693_v33 = vadd.f32 %v6463_v50, %v2622_v39  ;;  %v2591_v19 = vmul.f32 %v6415_v9, %v2456_v25  ;;  %v2624_v45 = vadd.f32 %v2560_v22, %v6483_v51  ;;  %v2452_v24 = vpop.permute.xlu0 %2451  ;;  %v8016_v39 = vld [vmem:[#allocation285_spill] sm:$0xff] }
 0x39e   : > { %v3824_v5 = vpack.i.bf16 %v6566_v41, %v6568_v62  ;;  %v1878_v0 = vadd.f32 %v6438_v36, %v6254_v10  ;;  %v1819_v12 = vmul.f32 %v6115_v35, %v8009_v18  ;;  %v2204_v31 = vmul.f32 %v6306_v63, %v5938_v47  ;;  %v2464_v16 = vpop.permute.xlu1 %2463 }
 0x39f   : > { %v2267_v58 = vadd.f32 %v2203_v61, %v6427_v14  ;;  %v2269_v38 = vadd.f32 %v2205_v15, %v6433_v6  ;;  %v2760_v48 = vmax.f32 %v2696_v13, 0.0  ;;  %v2695_v51 = vadd.f32 %v6463_v50, %v2624_v45  ;;  %v8010_v6 = vld [vmem:[#allocation292_spill] sm:$0xff] }
 0x3a0   : > { %v2593_v28 = vmul.f32 %v6415_v9, %v2464_v16  ;;  %v1880_v10 = vadd.f32 %v1816_v43, %v6263_v46  ;;  %v2266_v36 = vadd.f32 %v2202_v53, %v1878_v0  ;;  %v2758_v8 = vmax.f32 %v2694_v37, 0.0  ;;  %3825 = vrot.lane.b32.xlu0 %v3824_v5, %s4106_s15  ;;  %v8015_v61 = vld [vmem:[#allocation100_spill] sm:$0xff]  ;;  %v8018_v37 = vld [vmem:[#allocation254_spill] sm:$0xff]  ;;  %v8021_v0 = vld [vmem:[#allocation99_spill] sm:$0xff] }
 0x3a1   : > { %3820 = vrot.lane.b32.xlu1 %v3819_v30, %s4106_s15  ;;  %v2590_v40 = vmul.f32 %v6415_v9, %v2452_v24  ;;  %v2757_v47 = vmax.f32 %v2693_v33, 0.0  ;;  %v2655_v14 = vadd.f32 %v2591_v19, %v2267_v58  ;;  %v2759_v55 = vmax.f32 %v2695_v51, 0.0  ;;  %v2460_v46 = vpop.permute.xlu0 %2459  ;;  %v8020_v33 = vld [vmem:[#allocation98_spill] sm:$0xff] }
 0x3a2   : > { %v2657_v42 = vadd.f32 %v2593_v28, %v2269_v38  ;;  %v2175_v56 = vmul.f32 %v6306_v63, %v8010_v6  ;;  %v2177_v11 = vmul.f32 %v6306_v63, %v8011_v27  ;;  %v2268_v23 = vadd.f32 %v2204_v31, %v1880_v10  ;;  %v2344_v44 = vpop.permute.xlu1 %2343 }
 0x3a3   : > { %v2654_v4 = vadd.f32 %v2590_v40, %v2266_v36  ;;  %v6603_v20 = vmax.f32 %v2758_v8, %v2760_v48  ;;  %v6605_v54 = vmax.f32 %v2757_v47, %v2759_v55  ;;  %v2592_v17 = vmul.f32 %v6415_v9, %v2460_v46  ;;  %v8023_v47 = vld [vmem:[#allocation92_spill] sm:$0xff]  ;;  %v8024_v55 = vld [vmem:[#allocation83_spill] sm:$0xff] }
 0x3a4   : > { %v2728_v2 = vadd.f32 %v6463_v50, %v2657_v42  ;;  %v1850_v34 = vadd.f32 %v6382_v57, %v6171_v49  ;;  %v1852_v15 = vadd.f32 %v8015_v61, %v8014_v1  ;;  %v2174_v25 = vmul.f32 %v6306_v63, %v8016_v39  ;;  %v8019_v57 = vld [vmem:[#allocation287_spill] sm:$0xff]  ;;  %v8029_v1 = vld [vmem:[#allocation77_spill] sm:$0xff] }
 0x3a5   : > { %8012 = vst [vmem:[#allocation103_spill] sm:$0xff] %v6603_v20  ;;  %8013 = vst [vmem:[#allocation104_spill] sm:$0xff] %v6605_v54  ;;  %v2563_v3 = vmul.f32 %v6415_v9, %v2344_v44  ;;  %v2726_v13 = vadd.f32 %v6463_v50, %v2655_v14  ;;  %v2725_v22 = vadd.f32 %v6463_v50, %v2654_v4  ;;  %v2340_v5 = vpop.permute.xlu0 %2339  ;;  %v8027_v46 = vld [vmem:[#allocation87_spill] sm:$0xff] }
 0x3a6   : > { %v2656_v21 = vadd.f32 %v2592_v17, %v2268_v23  ;;  %v3829_v43 = vpack.i.bf16 %v6603_v20, %v6605_v54  ;;  %v1883_v53 = vadd.f32 %v1819_v12, %v8017_v59  ;;  %v1821_v49 = vmul.f32 %v6115_v35, %v8018_v37  ;;  %v2352_v45 = vpop.permute.xlu1 %2351  ;;  %v8022_v12 = vld [vmem:[#allocation255_spill] sm:$0xff]  ;;  %v8028_v17 = vld [vmem:[#allocation257_spill] sm:$0xff]  ;;  %v8093_v20 = vld [vmem:[#allocation256_spill] sm:$0xff] }
 0x3a7   : > { %v2176_v30 = vmul.f32 %v6306_v63, %v8019_v57  ;;  %v2239_v19 = vadd.f32 %v2175_v56, %v8020_v33  ;;  %v2241_v18 = vadd.f32 %v2177_v11, %v8021_v0  ;;  %v2792_v31 = vmax.f32 %v2728_v2, 0.0  ;;  %v8032_v59 = vld [vmem:[#allocation85_spill] sm:$0xff]  ;;  %v8090_v54 = vld [vmem:[#allocation291_spill] sm:$0xff] }
 0x3a8   : > { %v2727_v58 = vadd.f32 %v6463_v50, %v2656_v21  ;;  %v2565_v16 = vmul.f32 %v6415_v9, %v2352_v45  ;;  %3830 = vrot.lane.b32.xlu1 %v3829_v43, %s4106_s15  ;;  %v1818_v24 = vmul.f32 %v6115_v35, %v8022_v12  ;;  %v2238_v38 = vadd.f32 %v2174_v25, %v1850_v34  ;;  %v8031_v21 = vld [vmem:[#allocation86_spill] sm:$0xff] }
 0x3a9   : > { %v2627_v48 = vadd.f32 %v2563_v3, %v2239_v19  ;;  %v2562_v51 = vmul.f32 %v6415_v9, %v2340_v5  ;;  %v2790_v28 = vmax.f32 %v2726_v13, 0.0  ;;  %v2789_v10 = vmax.f32 %v2725_v22, 0.0  ;;  %v2348_v27 = vpop.permute.xlu0 %2347  ;;  %v8030_v22 = vld [vmem:[#allocation79_spill] sm:$0xff] }
 0x3aa   : > { %v2791_v36 = vmax.f32 %v2727_v58, 0.0  ;;  %v2629_v8 = vadd.f32 %v2565_v16, %v2241_v18  ;;  %v2240_v40 = vadd.f32 %v2176_v30, %v1852_v15  ;;  %v2207_v14 = vmul.f32 %v6306_v63, %v8023_v47  ;;  %v2472_v56 = vpop.permute.xlu1 %2471 }
 0x3ab   : > { %v2209_v42 = vmul.f32 %v6306_v63, %v8024_v55  ;;  %v2626_v6 = vadd.f32 %v2562_v51, %v2238_v38  ;;  %v6637_v11 = vmax.f32 %v2790_v28, %v2792_v31  ;;  %v2564_v44 = vmul.f32 %v6415_v9, %v2348_v27  ;;  %v8035_v28 = vld [vmem:[#allocation304_spill] sm:$0xff] }
 0x3ac   : > { %v6639_v23 = vmax.f32 %v2789_v10, %v2791_v36  ;;  %v2700_v4 = vadd.f32 %v6463_v50, %v2629_v8  ;;  %v1885_v2 = vadd.f32 %v1821_v49, %v8027_v46  ;;  %v1820_v34 = vmul.f32 %v6115_v35, %v8028_v17  ;;  %v8033_v49 = vld [vmem:[#allocation78_spill] sm:$0xff]  ;;  %v8042_v17 = vld [vmem:[#allocation81_spill] sm:$0xff] }
 0x3ad   : > { %8025 = vst [vmem:[#allocation105_spill] sm:$0xff] %v6637_v11  ;;  %v2206_v61 = vmul.f32 %v6306_v63, %v8029_v1  ;;  %v2698_v15 = vadd.f32 %v6463_v50, %v2627_v48  ;;  %v2697_v39 = vadd.f32 %v6463_v50, %v2626_v6  ;;  %v2595_v25 = vmul.f32 %v6415_v9, %v2472_v56  ;;  %v2468_v19 = vpop.permute.xlu0 %2467  ;;  %v8036_v36 = vld [vmem:[#allocation14_spill] sm:$0xff] }
 0x3ae   : > { %8026 = vst [vmem:[#allocation106_spill] sm:$0xff] %v6639_v23  ;;  %v2628_v3 = vadd.f32 %v2564_v44, %v2240_v40  ;;  %v3834_v13 = vpack.i.bf16 %v6637_v11, %v6639_v23  ;;  %v1496_v43 = vadd.f32 %v8031_v21, %v8030_v22  ;;  %v1882_v37 = vadd.f32 %v1818_v24, %v8032_v59  ;;  %v2480_v33 = vpop.permute.xlu1 %2479  ;;  %v8040_v44 = vld [vmem:[#allocation80_spill] sm:$0xff]  ;;  %v8043_v1 = vld [vmem:[#allocation142_spill] sm:$0xff]  ;;  %v8047_v59 = vld [vmem:[#allocation89_spill] sm:$0xff] }
 0x3af   : > { %v2208_v57 = vmul.f32 %v6306_v63, %v8033_v49  ;;  %v2271_v30 = vadd.f32 %v2207_v14, %v1883_v53  ;;  %v2273_v45 = vadd.f32 %v2209_v42, %v1885_v2  ;;  %v2764_v5 = vmax.f32 %v2700_v4, 0.0  ;;  %v8034_v53 = vld [vmem:[#allocation141_spill] sm:$0xff]  ;;  %v8041_v2 = vld [vmem:[#allocation48_spill] sm:$0xff]  ;;  %v8048_v49 = vld [vmem:[#allocation50_spill] sm:$0xff] }
 0x3b0   : > { %v2699_v0 = vadd.f32 %v6463_v50, %v2628_v3  ;;  %v2597_v18 = vmul.f32 %v6415_v9, %v2480_v33  ;;  %3835 = vrot.lane.b32.xlu0 %v3834_v13, %s4106_s15  ;;  %v1884_v31 = vadd.f32 %v1820_v34, %v1496_v43  ;;  %v2270_v58 = vadd.f32 %v2206_v61, %v1882_v37  ;;  %v8039_v4 = vld [vmem:[#allocation49_spill] sm:$0xff]  ;;  %v8046_v43 = vld [vmem:[#allocation51_spill] sm:$0xff] }
 0x3b1   : > { %v2762_v16 = vmax.f32 %v2698_v15, 0.0  ;;  %v2594_v12 = vmul.f32 %v6415_v9, %v2468_v19  ;;  %v2761_v24 = vmax.f32 %v2697_v39, 0.0  ;;  %v2659_v38 = vadd.f32 %v2595_v25, %v2271_v30  ;;  %v2476_v14 = vpop.permute.xlu0 %2475  ;;  %v8044_v15 = vld [vmem:[#allocation162_spill] sm:$0xff]  ;;  %v8050_v33 = vld [vmem:[#allocation55_spill] sm:$0xff] }
 0x3b2   : > { %v2763_v48 = vmax.f32 %v2699_v0, 0.0  ;;  %v2661_v51 = vadd.f32 %v2597_v18, %v2273_v45  ;;  %v1051_v10 = vmul.f32 %v8035_v28, %v8034_v53  ;;  %v1052_v8 = vmul.f32 %v8035_v28, %v8036_v36  ;;  %v6672_v27 = vpop.permute.xlu1 %2103  ;;  %v8045_v39 = vld [vmem:[#allocation66_spill] sm:$0xff]  ;;  %v8051_v19 = vld [vmem:[#allocation91_spill] sm:$0xff]  ;;  %v8056_v36 = vld [vmem:[#allocation69_spill] sm:$0xff] }
 0x3b3   : > { %v2272_v40 = vadd.f32 %v2208_v57, %v1884_v31  ;;  %v2658_v47 = vadd.f32 %v2594_v12, %v2270_v58  ;;  %v6666_v55 = vmax.f32 %v2762_v16, %v2764_v5  ;;  %v2596_v56 = vmul.f32 %v6415_v9, %v2476_v14  ;;  %v8049_v57 = vld [vmem:[#allocation90_spill] sm:$0xff]  ;;  %v8052_v5 = vld [vmem:[#allocation164_spill] sm:$0xff]  ;;  %v8054_v16 = vld [vmem:[#allocation57_spill] sm:$0xff] }
 0x3b4   : > { %v6668_v42 = vmax.f32 %v2761_v24, %v2763_v48  ;;  %v2732_v6 = vadd.f32 %v6463_v50, %v2661_v51  ;;  %v1110_v46 = vadd.f32 %v8040_v44, %v8039_v4  ;;  %v1111_v34 = vadd.f32 %v8042_v17, %v8041_v2  ;;  %v8053_v31 = vld [vmem:[#allocation54_spill] sm:$0xff]  ;;  %v8055_v51 = vld [vmem:[#allocation56_spill] sm:$0xff]  ;;  %v8060_v17 = vld [vmem:[#allocation71_spill] sm:$0xff] }
 0x3b5   : > { %8037 = vst [vmem:[#allocation107_spill] sm:$0xff] %v6666_v55  ;;  %v1053_v61 = vmul.f32 %v8035_v28, %v8043_v1  ;;  %v1402_v25 = vmul.f32 %v8045_v39, %v8044_v15  ;;  %v2730_v3 = vadd.f32 %v6463_v50, %v2659_v38  ;;  %v2729_v13 = vadd.f32 %v6463_v50, %v2658_v47  ;;  %v2356_v18 = vpop.permute.xlu0 %2355  ;;  %v8057_v47 = vld [vmem:[#allocation165_spill] sm:$0xff]  ;;  %v8061_v15 = vld [vmem:[#allocation168_spill] sm:$0xff] }
 0x3b6   : > { %8038 = vst [vmem:[#allocation108_spill] sm:$0xff] %v6668_v42  ;;  %v2660_v22 = vadd.f32 %v2596_v56, %v2272_v40  ;;  %v3839_v21 = vpack.i.bf16 %v6666_v55, %v6668_v42  ;;  %v1112_v37 = vadd.f32 %v8047_v59, %v8046_v43  ;;  %v1113_v30 = vadd.f32 %v8049_v57, %v8048_v49  ;;  %v6697_v48 = vpop.permute.xlu1 %2107  ;;  %v8058_v56 = vld [vmem:[#allocation166_spill] sm:$0xff] }
 0x3b7   : > { %v1114_v45 = vadd.f32 %v8051_v19, %v8050_v33  ;;  %v1404_v0 = vmul.f32 %v8045_v39, %v8052_v5  ;;  %v1115_v58 = vadd.f32 %v1051_v10, %v8053_v31  ;;  %v1116_v12 = vadd.f32 %v1052_v8, %v8054_v16  ;;  %v8059_v10 = vld [vmem:[#allocation167_spill] sm:$0xff]  ;;  %v8064_v49 = vld [vmem:[#allocation194_spill] sm:$0xff]  ;;  %v8065_v33 = vld [vmem:[#allocation196_spill] sm:$0xff] }
 0x3b8   : > { %v2796_v24 = vmax.f32 %v2732_v6, 0.0  ;;  %v2731_v38 = vadd.f32 %v6463_v50, %v2660_v22  ;;  %3840 = vrot.lane.b32.xlu1 %v3839_v21, %s4106_s15  ;;  %v1117_v53 = vadd.f32 %v1053_v61, %v8055_v51  ;;  %v1466_v40 = vadd.f32 %v1402_v25, %v8056_v36  ;;  %v8062_v61 = vld [vmem:[#allocation169_spill] sm:$0xff]  ;;  %v8063_v21 = vld [vmem:[#allocation171_spill] sm:$0xff]  ;;  %v8070_v51 = vld [vmem:[#allocation12_spill] sm:$0xff] }
 0x3b9   : > { %v1403_v14 = vmul.f32 %v8045_v39, %v8057_v47  ;;  %v1406_v4 = vmul.f32 %v8045_v39, %v8058_v56  ;;  %v1405_v8 = vmul.f32 %v8045_v39, %v8059_v10  ;;  %v2794_v6 = vmax.f32 %v2730_v3, 0.0  ;;  %v2368_v59 = vpop.permute.xlu0 %2367  ;;  %v8069_v16 = vld [vmem:[#allocation73_spill] sm:$0xff]  ;;  %v8072_v10 = vld [vmem:[#allocation72_spill] sm:$0xff] }
 0x3ba   : > { %v2793_v44 = vmax.f32 %v2729_v13, 0.0  ;;  %v2795_v2 = vmax.f32 %v2731_v38, 0.0  ;;  %v1468_v1 = vadd.f32 %v1404_v0, %v8060_v17  ;;  %v1408_v22 = vmul.f32 %v8045_v39, %v8061_v15  ;;  %v6723_v5 = vpop.permute.xlu1 %2115  ;;  %v8068_v0 = vld [vmem:[#allocation70_spill] sm:$0xff]  ;;  %v8071_v47 = vld [vmem:[#allocation197_spill] sm:$0xff] }
 0x3bb   : > { %v1407_v25 = vmul.f32 %v8045_v39, %v8062_v61  ;;  %v1409_v43 = vmul.f32 %v8045_v39, %v8063_v21  ;;  %v1434_v57 = vmul.f32 %v8045_v39, %v8064_v49  ;;  %v1436_v3 = vmul.f32 %v8045_v39, %v8065_v33  ;;  %v8073_v15 = vld [vmem:[#allocation13_spill] sm:$0xff]  ;;  %v8077_v49 = vld [vmem:[#allocation76_spill] sm:$0xff] }
 0x3bc   : > { %v6719_v13 = vmax.f32 %v2794_v6, %v2796_v24  ;;  %v6721_v19 = vmax.f32 %v2793_v44, %v2795_v2  ;;  %v1467_v31 = vadd.f32 %v1403_v14, %v8068_v0  ;;  %v1470_v38 = vadd.f32 %v1406_v4, %v8069_v16  ;;  %v8074_v6 = vld [vmem:[#allocation198_spill] sm:$0xff]  ;;  %v8075_v14 = vld [vmem:[#allocation75_spill] sm:$0xff] }
 0x3bd   : > { %v1435_v36 = vmul.f32 %v8045_v39, %v8070_v51  ;;  %v1438_v56 = vmul.f32 %v8045_v39, %v8071_v47  ;;  %v1469_v17 = vadd.f32 %v1405_v8, %v8072_v10  ;;  %v1437_v24 = vmul.f32 %v8045_v39, %v8073_v15  ;;  %v8076_v4 = vld [vmem:[#allocation74_spill] sm:$0xff]  ;;  %v8078_v0 = vld [vmem:[#allocation15_spill] sm:$0xff]  ;;  %v6745_v8 = vpop.permute.xlu0 %2487 }
 0x3be   : > { %8066 = vst [vmem:[#allocation109_spill] sm:$0xff] %v6719_v13  ;;  %8067 = vst [vmem:[#allocation110_spill] sm:$0xff] %v6721_v19  ;;  %v1440_v44 = vmul.f32 %v8045_v39, %v8074_v6  ;;  %v3844_v2 = vpack.i.bf16 %v6719_v13, %v6721_v19  ;;  %v6739_v61 = vadd.f32 %v1408_v22, %v8075_v14  ;;  %v8079_v10 = vld [vmem:[#allocation219_spill] sm:$0xff]  ;;  %v8080_v6 = vld [vmem:[#allocation222_spill] sm:$0xff]  ;;  %v6753_v22 = vpop.permute.xlu1 %2123 }
 0x3bf   : > { %v1471_v21 = vadd.f32 %v1407_v25, %v8076_v4  ;;  %v1473_v33 = vadd.f32 %v1409_v43, %v8077_v49  ;;  %v1439_v16 = vmul.f32 %v8045_v39, %v8078_v0  ;;  %v1498_v51 = vadd.f32 %v1434_v57, %v1110_v46  ;;  %v8081_v14 = vld [vmem:[#allocation17_spill] sm:$0xff] }
 0x3c0   : > { %v6747_v47 = vadd.f32 %v1436_v3, %v1112_v37  ;;  %v1791_v15 = vmul.f32 %v6115_v35, %v8079_v10  ;;  %v1790_v19 = vmul.f32 %v6115_v35, %v8080_v6  ;;  %3845 = vrot.lane.b32.xlu0 %v3844_v2, %s4106_s15  ;;  %v1499_v25 = vadd.f32 %v1435_v36, %v1111_v34  ;;  %v8082_v49 = vld [vmem:[#allocation221_spill] sm:$0xff]  ;;  %v8085_v34 = vld [vmem:[#allocation223_spill] sm:$0xff]  ;;  %v8086_v36 = vld [vmem:[#allocation224_spill] sm:$0xff] }
 0x3c1   : > { %v6756_v43 = vadd.f32 %v1438_v56, %v1114_v45  ;;  %v1441_v4 = vmul.f32 %v8045_v39, %v8081_v14  ;;  %v1793_v46 = vmul.f32 %v6115_v35, %v8082_v49  ;;  %v1501_v37 = vadd.f32 %v1437_v24, %v1113_v30  ;;  %v8083_v3 = vld [vmem:[#allocation289_spill] sm:$0xff]  ;;  %v8087_v2 = vld [vmem:[#allocation299_spill] sm:$0xff]  ;;  %v2496_v30 = vpop.permute.xlu0 %2495 }
 0x3c2   : > { %v6762_v57 = vadd.f32 %v1440_v44, %v1116_v12  ;;  %v2178_v0 = vmul.f32 %v6306_v63, %v8083_v3  ;;  %v8084_v10 = vld [vmem:[#allocation297_spill] sm:$0xff]  ;;  %v6768_v13 = vadd.f32 %v1439_v16, %v1115_v58  ;;  %v1795_v45 = vmul.f32 %v6115_v35, %v8085_v34  ;;  %v8089_v16 = vld [vmem:[#allocation226_spill] sm:$0xff] }
 0x3c3   : > { %v2179_v6 = vmul.f32 %v6306_v63, %v8084_v10  ;;  %v1792_v56 = vmul.f32 %v6115_v35, %v8086_v36  ;;  %v2181_v14 = vmul.f32 %v6306_v63, %v8087_v2  ;;  %v1855_v12 = vadd.f32 %v1791_v15, %v1467_v31  ;;  %v8088_v44 = vld [vmem:[#allocation225_spill] sm:$0xff]  ;;  %v2360_v36 = vpop.permute.xlu1 %2359 }
 0x3c4   : > { %v1854_v24 = vadd.f32 %v1790_v19, %v1466_v40  ;;  %v1797_v49 = vmul.f32 %v6115_v35, %v8088_v44  ;;  %v2566_v3 = vmul.f32 %v6415_v9, %v2356_v18  ;;  %v6779_v10 = vadd.f32 %v1441_v4, %v1117_v53  ;;  %v8091_v18 = vld [vmem:[#allocation258_spill] sm:$0xff]  ;;  %v8092_v44 = vld [vmem:[#allocation260_spill] sm:$0xff] }
 0x3c5   : > { %v1857_v58 = vadd.f32 %v1793_v46, %v1469_v17  ;;  %v1794_v34 = vmul.f32 %v6115_v35, %v8089_v16  ;;  %v2569_v42 = vmul.f32 %v6415_v9, %v2368_v59  ;;  %v2180_v2 = vmul.f32 %v6306_v63, %v8090_v54  ;;  %v2376_v4 = vpop.permute.xlu0 %2375 }
 0x3c6   : > { %v2242_v55 = vadd.f32 %v2178_v0, %v1854_v24  ;;  %v2243_v31 = vadd.f32 %v2179_v6, %v1855_v12  ;;  %v2567_v40 = vmul.f32 %v6415_v9, %v2360_v36  ;;  %v6787_v19 = vadd.f32 %v1795_v45, %v1471_v21  ;;  %v8094_v45 = vld [vmem:[#allocation229_spill] sm:$0xff]  ;;  %v8095_v12 = vld [vmem:[#allocation26_spill] sm:$0xff] }
 0x3c7   : > { %v1856_v15 = vadd.f32 %v1792_v56, %v1468_v1  ;;  %v1825_v53 = vmul.f32 %v6115_v35, %v8091_v18  ;;  %v2245_v17 = vadd.f32 %v2181_v14, %v1857_v58  ;;  %v1861_v46 = vadd.f32 %v1797_v49, %v1473_v33  ;;  %v2364_v1 = vpop.permute.xlu1 %2363 }
 0x3c8   : > { %v1822_v59 = vmul.f32 %v6115_v35, %v8092_v44  ;;  %v2630_v16 = vadd.f32 %v2566_v3, %v2242_v55  ;;  %v2631_v0 = vadd.f32 %v2567_v40, %v2243_v31  ;;  %v1858_v24 = vadd.f32 %v1794_v34, %v1470_v38  ;;  %v8096_v3 = vld [vmem:[#allocation82_spill] sm:$0xff]  ;;  %v8097_v34 = vld [vmem:[#allocation263_spill] sm:$0xff] }
 0x3c9   : > { %v1823_v54 = vmul.f32 %v6115_v35, %v8093_v20  ;;  %v2213_v21 = vmul.f32 %v6306_v63, %v6697_v48  ;;  %v2633_v6 = vadd.f32 %v2569_v42, %v2245_v17  ;;  %v1796_v56 = vmul.f32 %v6115_v35, %v8094_v45  ;;  %v2384_v48 = vpop.permute.xlu0 %2383 }
 0x3ca   : > { %v2244_v14 = vadd.f32 %v2180_v2, %v1856_v15  ;;  %v2210_v33 = vmul.f32 %v6306_v63, %v8095_v12  ;;  %v2568_v49 = vmul.f32 %v6415_v9, %v2364_v1  ;;  %v1889_v55 = vadd.f32 %v1825_v53, %v1501_v37  ;;  %v8099_v12 = vld [vmem:[#allocation27_spill] sm:$0xff] }
 0x3cb   : > { %v2211_v38 = vmul.f32 %v6306_v63, %v8096_v3  ;;  %v2601_v20 = vmul.f32 %v6415_v9, %v2496_v30  ;;  %v2702_v58 = vadd.f32 %v6463_v50, %v2631_v0  ;;  %v1886_v42 = vadd.f32 %v1822_v59, %v1498_v51  ;;  %v2484_v53 = vpop.permute.xlu1 %2483  ;;  %v8098_v59 = vld [vmem:[#allocation261_spill] sm:$0xff] }
 0x3cc   : > { %v1824_v36 = vmul.f32 %v6115_v35, %v8097_v34  ;;  %v2701_v2 = vadd.f32 %v6463_v50, %v2630_v16  ;;  %v2632_v31 = vadd.f32 %v2568_v49, %v2244_v14  ;;  %v1887_v40 = vadd.f32 %v1823_v54, %v1499_v25  ;;  %v8100_v3 = vld [vmem:[#allocation293_spill] sm:$0xff] }
 0x3cd   : > { %v2277_v15 = vadd.f32 %v2213_v21, %v1889_v55  ;;  %v2704_v18 = vadd.f32 %v6463_v50, %v2633_v6  ;;  %v2599_v37 = vmul.f32 %v6415_v9, %v6745_v8  ;;  %v2274_v17 = vadd.f32 %v2210_v33, %v1886_v42  ;;  %v2504_v21 = vpop.permute.xlu0 %2503 }
 0x3ce   : > { %v2212_v30 = vmul.f32 %v6306_v63, %v6672_v27  ;;  %v2703_v51 = vadd.f32 %v6463_v50, %v2632_v31  ;;  %v2598_v44 = vmul.f32 %v6415_v9, %v2484_v53  ;;  %v1827_v16 = vmul.f32 %v6115_v35, %v8098_v59  ;;  %v8105_v59 = vld [vmem:[#allocation266_spill] sm:$0xff] }
 0x3cf   : > { %v2275_v0 = vadd.f32 %v2211_v38, %v1887_v40  ;;  %v2665_v25 = vadd.f32 %v2601_v20, %v2277_v15  ;;  %v2766_v54 = vmax.f32 %v2702_v58, 0.0  ;;  %v1888_v6 = vadd.f32 %v1824_v36, %v6747_v47  ;;  %v2492_v55 = vpop.permute.xlu1 %2491  ;;  %v8102_v47 = vld [vmem:[#allocation302_spill] sm:$0xff]  ;;  %v8104_v40 = vld [vmem:[#allocation264_spill] sm:$0xff] }
 0x3d0   : > { %v2765_v1 = vmax.f32 %v2701_v2, 0.0  ;;  %v2767_v8 = vmax.f32 %v2703_v51, 0.0  ;;  %v2662_v45 = vadd.f32 %v2598_v44, %v2274_v17  ;;  %v1860_v14 = vadd.f32 %v1796_v56, %v6739_v61 }
 0x3d1   : > { %v2185_v27 = vmul.f32 %v6306_v63, %v8099_v12  ;;  %v2768_v33 = vmax.f32 %v2704_v18, 0.0  ;;  %v2663_v49 = vadd.f32 %v2599_v37, %v2275_v0  ;;  %v2182_v42 = vmul.f32 %v6306_v63, %v8100_v3  ;;  %v2512_v2 = vpop.permute.xlu0 %2511 }
 0x3d2   : > { %v2276_v38 = vadd.f32 %v2212_v30, %v1888_v6  ;;  %v6824_v20 = vmax.f32 %v2765_v1, %v2767_v8  ;;  %v2600_v58 = vmul.f32 %v6415_v9, %v2492_v55  ;;  %v2183_v34 = vmul.f32 %v6306_v63, %v8102_v47  ;;  %v8107_v8 = vld [vmem:[#allocation93_spill] sm:$0xff] }
 0x3d3   : > { %v2736_v36 = vadd.f32 %v6463_v50, %v2665_v25  ;;  %v6830_v61 = vmax.f32 %v2766_v54, %v2768_v33  ;;  %v2573_v56 = vmul.f32 %v6415_v9, %v2384_v48  ;;  %v1891_v31 = vadd.f32 %v1827_v16, %v6768_v13  ;;  %v2372_v51 = vpop.permute.xlu1 %2371  ;;  %v8106_v25 = vld [vmem:[#allocation295_spill] sm:$0xff] }
 0x3d4   : > { %8101 = vst [vmem:[#allocation111_spill] sm:$0xff] %v6824_v20  ;;  %v1829_v15 = vmul.f32 %v6115_v35, %v8104_v40  ;;  %v2733_v18 = vadd.f32 %v6463_v50, %v2662_v45  ;;  %v2664_v37 = vadd.f32 %v2600_v58, %v2276_v38  ;;  %v2249_v53 = vadd.f32 %v2185_v27, %v1861_v46  ;;  %v8110_v40 = vld [vmem:[#allocation268_spill] sm:$0xff] }
 0x3d5   : > { %8103 = vst [vmem:[#allocation120_spill] sm:$0xff] %v6830_v61  ;;  %v2734_v17 = vadd.f32 %v6463_v50, %v2663_v49  ;;  %v2571_v30 = vmul.f32 %v6415_v9, %v2376_v4  ;;  %v3849_v44 = vpack.i.bf16 %v6830_v61, %v6824_v20  ;;  %v1826_v48 = vmul.f32 %v6115_v35, %v8105_v59  ;;  %v6849_v4 = vpop.permute.xlu0 %2387  ;;  %v8168_v20 = vld [vmem:[#allocation233_spill] sm:$0xff] }
 0x3d6   : > { %v2246_v0 = vadd.f32 %v2182_v42, %v1858_v24  ;;  %v2735_v13 = vadd.f32 %v6463_v50, %v2664_v37  ;;  %v2570_v16 = vmul.f32 %v6415_v9, %v2372_v51  ;;  %v2184_v54 = vmul.f32 %v6306_v63, %v8106_v25 }
 0x3d7   : > { %v2247_v46 = vadd.f32 %v2183_v34, %v6787_v19  ;;  %v2800_v6 = vmax.f32 %v2736_v36, 0.0  ;;  %v2637_v1 = vadd.f32 %v2573_v56, %v2249_v53  ;;  %3850 = vrot.lane.b32.xlu1 %v3849_v44, %s4106_s15  ;;  %v2214_v45 = vmul.f32 %v6306_v63, %v8107_v8  ;;  %v2380_v19 = vpop.permute.xlu1 %2379 }
 0x3d8   : > { %v2217_v24 = vmul.f32 %v6306_v63, %v6753_v22  ;;  %v2797_v12 = vmax.f32 %v2733_v18, 0.0  ;;  %v2799_v27 = vmax.f32 %v2735_v13, 0.0  ;;  %v1893_v33 = vadd.f32 %v1829_v15, %v6779_v10 }
 0x3d9   : > { %v2798_v49 = vmax.f32 %v2734_v17, 0.0  ;;  %v2635_v55 = vadd.f32 %v2571_v30, %v2247_v46  ;;  %v2634_v3 = vadd.f32 %v2570_v16, %v2246_v0  ;;  %v1890_v42 = vadd.f32 %v1826_v48, %v6756_v43  ;;  %v6866_v56 = vpop.permute.xlu0 %2399  ;;  %v8111_v30 = vld [vmem:[#allocation84_spill] sm:$0xff]  ;;  %v8114_v46 = vld [vmem:[#allocation114_spill] sm:$0xff] }
 0x3da   : > { %v2215_v38 = vmul.f32 %v6306_v63, %v6723_v5  ;;  %v6859_v58 = vmax.f32 %v2797_v12, %v2799_v27  ;;  %v2605_v47 = vmul.f32 %v6415_v9, %v2512_v2  ;;  %v2248_v34 = vadd.f32 %v2184_v54, %v1860_v14  ;;  %v8112_v0 = vld [vmem:[#allocation112_spill] sm:$0xff] }
 0x3db   : > { %v6862_v36 = vmax.f32 %v2798_v49, %v2800_v6  ;;  %v2708_v22 = vadd.f32 %v6463_v50, %v2637_v1  ;;  %v2572_v10 = vmul.f32 %v6415_v9, %v2380_v19  ;;  %v1828_v15 = vmul.f32 %v6115_v35, %v8110_v40 }
 0x3dc   : > { %8108 = vst [vmem:[#allocation121_spill] sm:$0xff] %v6859_v58  ;;  %v2278_v43 = vadd.f32 %v2214_v45, %v1890_v42  ;;  %v2281_v18 = vadd.f32 %v2217_v24, %v1893_v33  ;;  %v2603_v5 = vmul.f32 %v6415_v9, %v2504_v21  ;;  %v2706_v37 = vadd.f32 %v6463_v50, %v2635_v55  ;;  %v2500_v53 = vpop.permute.xlu1 %2499  ;;  %v8113_v21 = vld [vmem:[#allocation113_spill] sm:$0xff]  ;;  %v8115_v45 = vld [vmem:[#allocation115_spill] sm:$0xff] }
 0x3dd   : > { %8109 = vst [vmem:[#allocation122_spill] sm:$0xff] %v6862_v36  ;;  %v2705_v2 = vadd.f32 %v6463_v50, %v2634_v3  ;;  %v2636_v14 = vadd.f32 %v2572_v10, %v2248_v34  ;;  %v3854_v17 = vpack.i.bf16 %v6862_v36, %v6859_v58  ;;  %v2216_v51 = vmul.f32 %v6306_v63, %v8111_v30  ;;  %v6889_v49 = vpop.permute.xlu0 %2519  ;;  %v8116_v3 = vld [vmem:[#allocation116_spill] sm:$0xff]  ;;  %v8118_v34 = vld [vmem:[#allocation301_spill] sm:$0xff]  ;;  %v8124_v30 = vld [vmem:[#allocation31_spill] sm:$0xff] }
 0x3de   : > { %v2279_v44 = vadd.f32 %v2215_v38, %v1891_v31  ;;  %v2669_v59 = vadd.f32 %v2605_v47, %v2281_v18  ;;  %v2602_v48 = vmul.f32 %v6415_v9, %v2500_v53  ;;  %v1022_v13 = vmul.f32 %v8035_v28, %v8112_v0  ;;  %v8119_v10 = vld [vmem:[#allocation117_spill] sm:$0xff]  ;;  %v8122_v18 = vld [vmem:[#allocation88_spill] sm:$0xff] }
 0x3df   : > { %v1023_v16 = vmul.f32 %v8035_v28, %v8113_v21  ;;  %v2772_v25 = vmax.f32 %v2708_v22, 0.0  ;;  %v2707_v54 = vadd.f32 %v6463_v50, %v2636_v14  ;;  %3855 = vrot.lane.b32.xlu0 %v3854_v17, %s4106_s15  ;;  %v1024_v6 = vmul.f32 %v8035_v28, %v8114_v46  ;;  %v8123_v53 = vld [vmem:[#allocation32_spill] sm:$0xff]  ;;  %v8126_v0 = vld [vmem:[#allocation33_spill] sm:$0xff] }
 0x3e0   : > { %v1892_v1 = vadd.f32 %v1828_v15, %v6762_v57  ;;  %v2667_v31 = vadd.f32 %v2603_v5, %v2279_v44  ;;  %v2666_v8 = vadd.f32 %v2602_v48, %v2278_v43  ;;  %v1025_v24 = vmul.f32 %v8035_v28, %v8115_v45  ;;  %v2508_v55 = vpop.permute.xlu1 %2507  ;;  %v8117_v57 = vld [vmem:[#allocation24_spill] sm:$0xff]  ;;  %v8125_v44 = vld [vmem:[#allocation34_spill] sm:$0xff] }
 0x3e1   : > { %v2770_v12 = vmax.f32 %v2706_v37, 0.0  ;;  %v2769_v27 = vmax.f32 %v2705_v2, 0.0  ;;  %v2771_v33 = vmax.f32 %v2707_v54, 0.0  ;;  %v1026_v19 = vmul.f32 %v8035_v28, %v8116_v3  ;;  %v8167_v36 = vld [vmem:[#allocation232_spill] sm:$0xff] }
 0x3e2   : > { %v2280_v42 = vadd.f32 %v2216_v51, %v1892_v1  ;;  %v2740_v38 = vadd.f32 %v6463_v50, %v2669_v59  ;;  %v2604_v47 = vmul.f32 %v6415_v9, %v2508_v55  ;;  %v737_v22 = vmul.f32 %v8118_v34, %v8117_v57  ;;  %v6924_v55 = vpop.permute.xlu0 %2527  ;;  %v8134_v57 = vld [vmem:[#allocation144_spill] sm:$0xff] }
 0x3e3   : > { %v1027_v40 = vmul.f32 %v8035_v28, %v8119_v10  ;;  %v6899_v15 = vmax.f32 %v2770_v12, %v2772_v25  ;;  %v6901_v43 = vmax.f32 %v2769_v27, %v2771_v33  ;;  %v736_v5 = vmul.f32 %v8118_v34, %v8122_v18  ;;  %v8127_v25 = vld [vmem:[#allocation36_spill] sm:$0xff]  ;;  %v8129_v12 = vld [vmem:[#allocation118_spill] sm:$0xff]  ;;  %v8136_v18 = vld [vmem:[#allocation145_spill] sm:$0xff] }
 0x3e4   : > { %v2738_v37 = vadd.f32 %v6463_v50, %v2667_v31  ;;  %v2737_v2 = vadd.f32 %v6463_v50, %v2666_v8  ;;  %v2668_v14 = vadd.f32 %v2604_v47, %v2280_v42  ;;  %v1086_v17 = vadd.f32 %v1022_v13, %v8123_v53  ;;  %v8128_v8 = vld [vmem:[#allocation35_spill] sm:$0xff]  ;;  %v8131_v27 = vld [vmem:[#allocation16_spill] sm:$0xff]  ;;  %v8137_v53 = vld [vmem:[#allocation22_spill] sm:$0xff] }
 0x3e5   : > { %8120 = vst [vmem:[#allocation123_spill] sm:$0xff] %v6899_v15  ;;  %8121 = vst [vmem:[#allocation124_spill] sm:$0xff] %v6901_v43  ;;  %v1087_v51 = vadd.f32 %v1023_v16, %v8124_v30  ;;  %v1088_v59 = vadd.f32 %v1024_v6, %v8125_v44  ;;  %v3859_v48 = vpack.i.bf16 %v6899_v15, %v6901_v43  ;;  %v2804_v46 = vmax.f32 %v2740_v38, 0.0  ;;  %v8130_v16 = vld [vmem:[#allocation119_spill] sm:$0xff]  ;;  %v8133_v38 = vld [vmem:[#allocation18_spill] sm:$0xff] }
 0x3e6   : > { %v1089_v21 = vadd.f32 %v1025_v24, %v8126_v0  ;;  %v1090_v54 = vadd.f32 %v1026_v19, %v8127_v25  ;;  %v2739_v1 = vadd.f32 %v6463_v50, %v2668_v14  ;;  %v6915_v31 = vpop.permute.xlu1 %2127  ;;  %v1091_v45 = vadd.f32 %v1027_v40, %v8128_v8  ;;  %v8132_v24 = vld [vmem:[#allocation143_spill] sm:$0xff]  ;;  %v8135_v10 = vld [vmem:[#allocation20_spill] sm:$0xff]  ;;  %v8138_v44 = vld [vmem:[#allocation146_spill] sm:$0xff] }
 0x3e7   : > { %v1028_v13 = vmul.f32 %v8035_v28, %v8129_v12  ;;  %v1029_v6 = vmul.f32 %v8035_v28, %v8130_v16  ;;  %v1054_v33 = vmul.f32 %v8035_v28, %v8131_v27  ;;  %3860 = vrot.lane.b32.xlu1 %v3859_v48, %s4106_s15  ;;  %v1055_v50 = vmul.f32 %v8035_v28, %v8132_v24  ;;  %v8141_v25 = vld [vmem:[#allocation38_spill] sm:$0xff]  ;;  %v8142_v8 = vld [vmem:[#allocation37_spill] sm:$0xff]  ;;  %v8144_v24 = vld [vmem:[#allocation172_spill] sm:$0xff] }
 0x3e8   : > { %v2802_v3 = vmax.f32 %v2738_v37, 0.0  ;;  %v2801_v19 = vmax.f32 %v2737_v2, 0.0  ;;  %v2803_v42 = vmax.f32 %v2739_v1, 0.0  ;;  %v1056_v47 = vmul.f32 %v8035_v28, %v8133_v38  ;;  %v8143_v16 = vld [vmem:[#allocation170_spill] sm:$0xff] }
 0x3e9   : > { %v1057_v34 = vmul.f32 %v8035_v28, %v8134_v57  ;;  %v1058_v40 = vmul.f32 %v8035_v28, %v8135_v10  ;;  %v1059_v14 = vmul.f32 %v8035_v28, %v8136_v18  ;;  %v1060_v30 = vmul.f32 %v8035_v28, %v8137_v53  ;;  %v8145_v57 = vld [vmem:[#allocation59_spill] sm:$0xff]  ;;  %v8146_v18 = vld [vmem:[#allocation173_spill] sm:$0xff] }
 0x3ea   : > { %v1061_v37 = vmul.f32 %v8035_v28, %v8138_v44  ;;  %v6941_v2 = vmax.f32 %v2802_v3, %v2804_v46  ;;  %v6943_v48 = vmax.f32 %v2801_v19, %v2803_v42  ;;  %v6945_v0 = vpop.permute.xlu1 %2135  ;;  %v1092_v1 = vadd.f32 %v1028_v13, %v8141_v25  ;;  %v8147_v46 = vld [vmem:[#allocation174_spill] sm:$0xff]  ;;  %v8150_v44 = vld [vmem:[#allocation60_spill] sm:$0xff] }
 0x3eb   : > { %v1093_v12 = vadd.f32 %v1029_v6, %v8142_v8  ;;  %v1410_v27 = vmul.f32 %v8045_v39, %v8143_v16  ;;  %v1412_v38 = vmul.f32 %v8045_v39, %v8144_v24  ;;  %v1118_v10 = vadd.f32 %v1054_v33, %v8145_v57  ;;  %v8148_v13 = vld [vmem:[#allocation58_spill] sm:$0xff]  ;;  %v8149_v6 = vld [vmem:[#allocation63_spill] sm:$0xff]  ;;  %v6965_v24 = vpop.permute.xlu0 %2407  ;;  %v8152_v33 = vld [vmem:[#allocation65_spill] sm:$0xff] }
 0x3ec   : > { %8139 = vst [vmem:[#allocation125_spill] sm:$0xff] %v6941_v2  ;;  %8140 = vst [vmem:[#allocation126_spill] sm:$0xff] %v6943_v48  ;;  %v1411_v28 = vmul.f32 %v8045_v39, %v8146_v18  ;;  %v1414_v3 = vmul.f32 %v8045_v39, %v8147_v46  ;;  %v3864_v19 = vpack.i.bf16 %v6941_v2, %v6943_v48  ;;  %v8151_v8 = vld [vmem:[#allocation175_spill] sm:$0xff]  ;;  %v8153_v18 = vld [vmem:[#allocation64_spill] sm:$0xff] }
 0x3ed   : > { %v1119_v42 = vadd.f32 %v1055_v50, %v8148_v13  ;;  %v1120_v53 = vadd.f32 %v1056_v47, %v8149_v6  ;;  %v1121_v25 = vadd.f32 %v1057_v34, %v8150_v44  ;;  %v1413_v16 = vmul.f32 %v8045_v39, %v8151_v8  ;;  %v8154_v47 = vld [vmem:[#allocation176_spill] sm:$0xff]  ;;  %v8155_v6 = vld [vmem:[#allocation177_spill] sm:$0xff]  ;;  %v8156_v2 = vld [vmem:[#allocation179_spill] sm:$0xff] }
 0x3ee   : > { %v1122_v57 = vadd.f32 %v1058_v40, %v8152_v33  ;;  %v1123_v43 = vadd.f32 %v1059_v14, %v8153_v18  ;;  %v6969_v15 = vadd.f32 %v1060_v30, %v736_v5  ;;  %v1125_v46 = vadd.f32 %v1061_v37, %v737_v22  ;;  %v2140_v58 = vpop.permute.xlu1 %2139  ;;  %3865 = vrot.lane.b32.xlu0 %v3864_v19, %s4106_s15  ;;  %v8157_v14 = vld [vmem:[#allocation199_spill] sm:$0xff]  ;;  %v8158_v30 = vld [vmem:[#allocation200_spill] sm:$0xff]  ;;  %v8161_v19 = vld [vmem:[#allocation21_spill] sm:$0xff] }
 0x3ef   : > { %v1474_v50 = vadd.f32 %v1410_v27, %v1086_v17  ;;  %v1476_v13 = vadd.f32 %v1412_v38, %v1088_v59  ;;  %v1416_v34 = vmul.f32 %v8045_v39, %v8154_v47  ;;  %v1415_v44 = vmul.f32 %v8045_v39, %v8155_v6  ;;  %v8159_v17 = vld [vmem:[#allocation19_spill] sm:$0xff]  ;;  %v8160_v27 = vld [vmem:[#allocation201_spill] sm:$0xff]  ;;  %v8165_v6 = vld [vmem:[#allocation230_spill] sm:$0xff] }
 0x3f0   : > { %v1475_v8 = vadd.f32 %v1411_v28, %v1087_v51  ;;  %v1478_v48 = vadd.f32 %v1414_v3, %v1090_v54  ;;  %v1417_v40 = vmul.f32 %v8045_v39, %v8156_v2  ;;  %v1442_v5 = vmul.f32 %v8045_v39, %v8157_v14  ;;  %v8162_v54 = vld [vmem:[#allocation203_spill] sm:$0xff]  ;;  %v8163_v2 = vld [vmem:[#allocation25_spill] sm:$0xff] }
 0x3f1   : > { %v1477_v22 = vadd.f32 %v1413_v16, %v1089_v21  ;;  %v1444_v37 = vmul.f32 %v8045_v39, %v8158_v30  ;;  %v1443_v59 = vmul.f32 %v8045_v39, %v8159_v17  ;;  %v1446_v38 = vmul.f32 %v8045_v39, %v8160_v27  ;;  %v8164_v33 = vld [vmem:[#allocation227_spill] sm:$0xff]  ;;  %v7000_v27 = vpop.permute.xlu0 %2415 }
 0x3f2   : > { %v1445_v51 = vmul.f32 %v8045_v39, %v8161_v19  ;;  %v1447_v28 = vmul.f32 %v8045_v39, %v8162_v54  ;;  %v1449_v3 = vmul.f32 %v8045_v39, %v8163_v2  ;;  %v1799_v21 = vmul.f32 %v6115_v35, %v8164_v33  ;;  %v6994_v16 = vpop.permute.xlu1 %2147  ;;  %v8166_v30 = vld [vmem:[#allocation231_spill] sm:$0xff] }
 0x3f3   : > { %v1480_v18 = vadd.f32 %v1416_v34, %v1092_v1  ;;  %v1479_v47 = vadd.f32 %v1415_v44, %v1091_v45  ;;  %v1801_v14 = vmul.f32 %v6115_v35, %v8165_v6  ;;  %v1798_v17 = vmul.f32 %v6115_v35, %v8166_v30  ;;  %v8169_v45 = vld [vmem:[#allocation202_spill] sm:$0xff] }
 0x3f4   : > { %v1481_v19 = vadd.f32 %v1417_v40, %v1093_v12  ;;  %v1506_v54 = vadd.f32 %v1442_v5, %v1118_v10  ;;  %v1803_v2 = vmul.f32 %v6115_v35, %v8167_v36  ;;  %v1800_v33 = vmul.f32 %v6115_v35, %v8168_v20  ;;  %v8170_v5 = vld [vmem:[#allocation298_spill] sm:$0xff] }
 0x3f5   : > { %v1508_v61 = vadd.f32 %v1444_v37, %v1120_v53  ;;  %v1507_v23 = vadd.f32 %v1443_v59, %v1119_v42  ;;  %v7006_v1 = vadd.f32 %v1446_v38, %v1122_v57  ;;  %v7010_v34 = vmul.f32 %v8045_v39, %v8169_v45  ;;  %v8171_v53 = vld [vmem:[#allocation39_spill] sm:$0xff]  ;;  %v8172_v39 = vld [vmem:[#allocation234_spill] sm:$0xff]  ;;  %v8180_v45 = vld [vmem:[#allocation272_spill] sm:$0xff] }
 0x3f6   : > { %v1509_v44 = vadd.f32 %v1445_v51, %v1121_v25  ;;  %v1511_v6 = vadd.f32 %v1447_v28, %v1123_v43  ;;  %v7012_v30 = vadd.f32 %v1449_v3, %v1125_v46  ;;  %v1863_v12 = vadd.f32 %v1799_v21, %v1475_v8  ;;  %v7014_v10 = vpop.permute.xlu1 %2155  ;;  %v8173_v43 = vld [vmem:[#allocation29_spill] sm:$0xff]  ;;  %v8174_v8 = vld [vmem:[#allocation236_spill] sm:$0xff]  ;;  %v7034_v28 = vpop.permute.xlu0 %2535  ;;  %v8177_v21 = vld [vmem:[#allocation267_spill] sm:$0xff] }
 0x3f7   : > { %v1865_v40 = vadd.f32 %v1801_v14, %v1477_v22  ;;  %v1862_v36 = vadd.f32 %v1798_v17, %v1474_v50  ;;  %v2186_v20 = vmul.f32 %v6306_v63, %v8170_v5  ;;  %v2189_v42 = vmul.f32 %v6306_v63, %v8171_v53  ;;  %v8175_v22 = vld [vmem:[#allocation269_spill] sm:$0xff]  ;;  %v8178_v14 = vld [vmem:[#allocation270_spill] sm:$0xff] }
 0x3f8   : > { %v7020_v57 = vadd.f32 %v1803_v2, %v1479_v47  ;;  %v1864_v37 = vadd.f32 %v1800_v33, %v1476_v13  ;;  %v1805_v25 = vmul.f32 %v6115_v35, %v8172_v39  ;;  %v2187_v46 = vmul.f32 %v6306_v63, %v8173_v43  ;;  %v8176_v13 = vld [vmem:[#allocation239_spill] sm:$0xff] }
 0x3f9   : > { %v1802_v59 = vmul.f32 %v6115_v35, %v8174_v8  ;;  %v1833_v50 = vmul.f32 %v6115_v35, %v8175_v22  ;;  %v2574_v38 = vmul.f32 %v6415_v9, %v6849_v4  ;;  %v2577_v51 = vmul.f32 %v6415_v9, %v6866_v56  ;;  %v8179_v2 = vld [vmem:[#allocation271_spill] sm:$0xff]  ;;  %v8181_v8 = vld [vmem:[#allocation300_spill] sm:$0xff] }
 0x3fa   : > { %v1804_v3 = vmul.f32 %v6115_v35, %v8176_v13  ;;  %v1831_v47 = vmul.f32 %v6115_v35, %v8177_v21  ;;  %v1830_v17 = vmul.f32 %v6115_v35, %v8178_v14  ;;  %v1835_v33 = vmul.f32 %v6115_v35, %v8179_v2 }
 0x3fb   : > { %v1832_v4 = vmul.f32 %v6115_v35, %v8180_v45  ;;  %v2250_v5 = vadd.f32 %v2186_v20, %v1862_v36  ;;  %v2253_v53 = vadd.f32 %v2189_v42, %v1865_v40  ;;  %v2221_v56 = vmul.f32 %v6306_v63, %v2140_v58 }
 0x3fc   : > { %v2392_v39 = vpop.permute.xlu1 %2391  ;;  %v1869_v43 = vadd.f32 %v1805_v25, %v1481_v19  ;;  %v2188_v22 = vmul.f32 %v6306_v63, %v8181_v8  ;;  %v2251_v13 = vadd.f32 %v2187_v46, %v1863_v12  ;;  %v7050_v11 = vadd.f32 %v1802_v59, %v1478_v48  ;;  %v8182_v19 = vld [vmem:[#allocation95_spill] sm:$0xff]  ;;  %v7058_v12 = vpop.permute.xlu0 %2543 }
 0x3fd   : > { %v2575_v21 = vmul.f32 %v6415_v9, %v2392_v39  ;;  %v1897_v14 = vadd.f32 %v1833_v50, %v1509_v44  ;;  %v2638_v60 = vadd.f32 %v2574_v38, %v2250_v5  ;;  %v2641_v2 = vadd.f32 %v2577_v51, %v2253_v53  ;;  %v8183_v59 = vld [vmem:[#allocation303_spill] sm:$0xff] }
 0x3fe   : > { %v7052_v26 = vadd.f32 %v1804_v3, %v1480_v18  ;;  %v1895_v45 = vadd.f32 %v1831_v47, %v1507_v23  ;;  %v1894_v36 = vadd.f32 %v1830_v17, %v1506_v54  ;;  %v7054_v20 = vadd.f32 %v1835_v33, %v1511_v6  ;;  %v7062_v50 = vld [vmem:[#allocation4] ss:$0 sm:$0xff]  ;;  %v8185_v3 = vld [vmem:[#allocation61_spill] sm:$0xff] }
 0x3ff   : > { %v2639_v40 = vadd.f32 %v2575_v21, %v2251_v13  ;;  %v1896_v58 = vadd.f32 %v1832_v4, %v1508_v61  ;;  %v2219_v42 = vmul.f32 %v6306_v63, %v8182_v19  ;;  %v2285_v25 = vadd.f32 %v2221_v56, %v1897_v14 }
 0x400   : > { %v2396_v46 = vpop.permute.xlu1 %2395  ;;  %v2252_v48 = vadd.f32 %v2188_v22, %v1864_v37  ;;  %v2190_v44 = vmul.f32 %v6306_v63, %v8183_v59  ;;  %v2709_v54 = vadd.f32 %v7062_v50, %v2638_v60  ;;  %v2712_v61 = vadd.f32 %v7062_v50, %v2641_v2  ;;  %v8184_v37 = vld [vmem:[#allocation52_spill] sm:$0xff] }
 0x401   : > { %v2710_v23 = vadd.f32 %v7062_v50, %v2639_v40  ;;  %v2576_v18 = vmul.f32 %v6415_v9, %v2396_v46  ;;  %v2609_v6 = vmul.f32 %v6415_v9, %v6924_v55  ;;  %v2218_v38 = vmul.f32 %v6306_v63, %v6915_v31 }
 0x402   : > { %v2191_v51 = vmul.f32 %v6306_v63, %v8184_v37  ;;  %v2193_v47 = vmul.f32 %v6306_v63, %v8185_v3  ;;  %v2607_v17 = vmul.f32 %v6415_v9, %v6889_v49  ;;  %v2283_v4 = vadd.f32 %v2219_v42, %v1895_v45 }
 0x403   : > { %v2640_v33 = vadd.f32 %v2576_v18, %v2252_v48  ;;  %v2220_v60 = vmul.f32 %v6306_v63, %v6945_v0  ;;  %v2673_v5 = vadd.f32 %v2609_v6, %v2285_v25  ;;  %v3816_v53 = vpop.permute.xlu0 %3815  ;;  %v2774_v56 = vmax.f32 %v2710_v23, 0.0  ;;  %v8186_v18 = vld [vmem:[#allocation273_spill] sm:$0xff] }
 0x404   : > { %v2516_v55 = vpop.permute.xlu1 %2515  ;;  %v3818_v39 = vunpack.i.h.bf16 %v3816_v53  ;;  %v3817_v8 = vunpack.i.l.bf16 %v3816_v53  ;;  %v2773_v22 = vmax.f32 %v2709_v54, 0.0  ;;  %v2776_v13 = vmax.f32 %v2712_v61, 0.0  ;;  %v8187_v54 = vld [vmem:[#allocation274_spill] sm:$0xff] }
 0x405   : > { %v2711_v31 = vadd.f32 %v7062_v50, %v2640_v33  ;;  %v2282_v21 = vadd.f32 %v2218_v38, %v1894_v36  ;;  %v2606_v14 = vmul.f32 %v6415_v9, %v2516_v55  ;;  %v2671_v49 = vadd.f32 %v2607_v17, %v2283_v4 }
 0x406   : > { %v2989_v45 = vmax.f32 %v6515_v32, %v3817_v8  ;;  %v2990_v0 = vmax.f32 %v6512_v29, %v3818_v39  ;;  %v2284_v40 = vadd.f32 %v2220_v60, %v1896_v58  ;;  %v2581_v19 = vmul.f32 %v6415_v9, %v7000_v27 }
 0x407   : > { %v2775_v2 = vmax.f32 %v2711_v31, 0.0  ;;  %v2744_v42 = vadd.f32 %v7062_v50, %v2673_v5  ;;  %v2670_v25 = vadd.f32 %v2606_v14, %v2282_v21  ;;  %v7087_v48 = vmax.f32 %v2774_v56, %v2776_v13 }
 0x408   : > { %v2524_v46 = vpop.permute.xlu1 %2523  ;;  %v3013_v23 = vpack.c.bf16 %v2990_v0, %v2989_v45  ;;  %v1837_v32 = vmul.f32 %v6115_v35, %v8186_v18  ;;  %v1834_v29 = vmul.f32 %v6115_v35, %v8187_v54  ;;  %v2257_v58 = vadd.f32 %v2193_v47, %v1869_v43 }
 0x409   : > { %v7089_v59 = vmax.f32 %v2773_v22, %v2775_v2  ;;  %v2608_v36 = vmul.f32 %v6415_v9, %v2524_v46  ;;  %v2579_v27 = vmul.f32 %v6415_v9, %v6965_v24  ;;  %v2742_v61 = vadd.f32 %v7062_v50, %v2671_v49  ;;  %v8188_v24 = vld [vmem:[#allocation28_spill] sm:$0xff]  ;;  %v8191_v46 = vld [vmem:[#allocation97_spill] sm:$0xff] }
 0x40a   : > { %v2741_v6 = vadd.f32 %v7062_v50, %v2670_v25  ;;  %3711 = vmatprep.mubr.msk.bf16.mxu1 %vm3060_vm0, %v3013_v23  ;;  %v2254_v3 = vadd.f32 %v2190_v44, %v7050_v11  ;;  %v2255_v17 = vadd.f32 %v2191_v51, %v7020_v57  ;;  %v2645_v33 = vadd.f32 %v2581_v19, %v2257_v58  ;;  %v8189_v11 = vld [vmem:[#allocation96_spill] sm:$0xff] }
 0x40b   : > { %v2672_v38 = vadd.f32 %v2608_v36, %v2284_v40  ;;  %v3869_v37 = vpack.i.bf16 %v7087_v48, %v7089_v59  ;;  %v2225_v43 = vmul.f32 %v6306_v63, %v7014_v10  ;;  %v2192_v4 = vmul.f32 %v6306_v63, %v8188_v24  ;;  %v8190_v22 = vld [vmem:[#allocation276_spill] sm:$0xff] }
 0x40c   : > { %v2404_v47 = vpop.permute.xlu1 %2403  ;;  %v2808_v60 = vmax.f32 %v2744_v42, 0.0  ;;  %v1901_v55 = vadd.f32 %v1837_v32, %v7012_v30  ;;  %v2222_v57 = vmul.f32 %v6306_v63, %v8189_v11  ;;  %v2643_v44 = vadd.f32 %v2579_v27, %v2255_v17 }
 0x40d   : > { %v2743_v5 = vadd.f32 %v7062_v50, %v2672_v38  ;;  %v2578_v53 = vmul.f32 %v6415_v9, %v2404_v47  ;;  %3870 = vrot.lane.b32.xlu1 %v3869_v37, %s4106_s15  ;;  %v2223_v10 = vmul.f32 %v6306_v63, %v6994_v16  ;;  %v2806_v51 = vmax.f32 %v2742_v61, 0.0 }
 0x40e   : > { %v2805_v56 = vmax.f32 %v2741_v6, 0.0  ;;  %v1898_v8 = vadd.f32 %v1834_v29, %v7006_v1  ;;  %v1836_v13 = vmul.f32 %v6115_v35, %v8190_v22  ;;  %v2716_v21 = vadd.f32 %v7062_v50, %v2645_v33 }
 0x40f   : > { %v2807_v31 = vmax.f32 %v2743_v5, 0.0  ;;  %v2642_v39 = vadd.f32 %v2578_v53, %v2254_v3  ;;  %v2289_v14 = vadd.f32 %v2225_v43, %v1901_v55  ;;  %v2256_v49 = vadd.f32 %v2192_v4, %v7052_v26 }
 0x410   : > { %v2412_v30 = vpop.permute.xlu1 %2411  ;;  %v7122_v2 = vmax.f32 %v2806_v51, %v2808_v60  ;;  %v2714_v0 = vadd.f32 %v7062_v50, %v2643_v44  ;;  %v2287_v40 = vadd.f32 %v2223_v10, %v7054_v20  ;;  %v2613_v1 = vmul.f32 %v6415_v9, %v7058_v12 }
 0x411   : > { %v7124_v45 = vmax.f32 %v2805_v56, %v2807_v31  ;;  %v2580_v16 = vmul.f32 %v6415_v9, %v2412_v30  ;;  %v2713_v35 = vadd.f32 %v7062_v50, %v2642_v39  ;;  %v1512_v19 = vadd.f32 %v7010_v34, %v6969_v15 }
 0x412   : > { %v2286_v42 = vadd.f32 %v2222_v57, %v1898_v8  ;;  %v2224_v36 = vmul.f32 %v6306_v63, %v8191_v46  ;;  %v2780_v23 = vmax.f32 %v2716_v21, 0.0  ;;  %v2611_v20 = vmul.f32 %v6415_v9, %v7034_v28  ;;  %v3826_v32 = vpop.permute.xlu0 %3825  ;;  %v8195_v46 = vld [vmem:[#allocation106_spill] sm:$0xff] }
 0x413   : > { %v2644_v26 = vadd.f32 %v2580_v16, %v2256_v49  ;;  %v3874_v25 = vpack.i.bf16 %v7122_v2, %v7124_v45  ;;  %v2677_v18 = vadd.f32 %v2613_v1, %v2289_v14  ;;  %v3828_v29 = vunpack.i.h.bf16 %v3826_v32  ;;  %v8193_v49 = vld [vmem:[#allocation101_spill] sm:$0xff] }
 0x414   : > { %v2532_v12 = vpop.permute.xlu1 %2531  ;;  %v3827_v58 = vunpack.i.l.bf16 %v3826_v32  ;;  %v1900_v34 = vadd.f32 %v1836_v13, %v1512_v19  ;;  %v2778_v27 = vmax.f32 %v2714_v0, 0.0  ;;  %v2675_v61 = vadd.f32 %v2611_v20, %v2287_v40 }
 0x415   : > { %v2715_v54 = vadd.f32 %v7062_v50, %v2644_v26  ;;  %v2610_v15 = vmul.f32 %v6415_v9, %v2532_v12  ;;  %3875 = vrot.lane.b32.xlu0 %v3874_v25, %s4106_s15  ;;  %v2777_v6 = vmax.f32 %v2713_v35, 0.0  ;;  %v2992_v38 = vmax.f32 %v6566_v41, %v3828_v29  ;;  %v8194_v26 = vld [vmem:[#allocation105_spill] sm:$0xff] }
 0x416   : > { %v2991_v28 = vmax.f32 %v6568_v62, %v3827_v58  ;;  %v2288_v3 = vadd.f32 %v2224_v36, %v1900_v34  ;;  %v2748_v17 = vadd.f32 %v7062_v50, %v2677_v18  ;;  %v7146_v43 = vmax.f32 %v2778_v27, %v2780_v23  ;;  %v8196_v23 = vld [vmem:[#allocation103_spill] sm:$0xff]  ;;  %v8197_v18 = vld [vmem:[#allocation104_spill] sm:$0xff] }
 0x417   : > { %v2779_v63 = vmax.f32 %v2715_v54, 0.0  ;;  %v2674_v37 = vadd.f32 %v2610_v15, %v2286_v42  ;;  %v2746_v60 = vadd.f32 %v7062_v50, %v2675_v61  ;;  %v8198_v34 = vld [vmem:[#allocation107_spill] sm:$0xff]  ;;  %v8199_v61 = vld [vmem:[#allocation108_spill] sm:$0xff] }
 0x418   : > { %v2540_v33 = vpop.permute.xlu1 %2539  ;;  %v3014_v24 = vpack.c.bf16 %v2992_v38, %v2991_v28  ;;  %v2812_v62 = vmax.f32 %v2748_v17, 0.0 }
 0x419   : > { %v7148_v47 = vmax.f32 %v2777_v6, %v2779_v63  ;;  %v2612_v4 = vmul.f32 %v6415_v9, %v2540_v33  ;;  %v2745_v5 = vadd.f32 %v7062_v50, %v2674_v37  ;;  %v2810_v10 = vmax.f32 %v2746_v60, 0.0  ;;  %v8201_v33 = vld [vmem:[#allocation110_spill] sm:$0xff] }
 0x41a   : > { %3712 = vmatmul.mubr.msk.bf16.vlgmr.msra.gmra.mrb[0].mxu1 %vm3060_vm0, %v3014_v24 }
 0x41b   : > { %v2676_v53 = vadd.f32 %v2612_v4, %v2288_v3  ;;  %v3879_v41 = vpack.i.bf16 %v7146_v43, %v7148_v47  ;;  %v2809_v9 = vmax.f32 %v2745_v5, 0.0  ;;  %v7160_v39 = vmax.f32 %v2810_v10, %v2812_v62  ;;  %v8200_v3 = vld [vmem:[#allocation109_spill] sm:$0xff] }
 0x41c   : > { %v3811_v55 = vpop.permute.xlu1 %3810 }
 0x41d   : > { %v2747_v11 = vadd.f32 %v7062_v50, %v2676_v53  ;;  %v3813_v57 = vunpack.i.h.bf16 %v3811_v55  ;;  %v3812_v44 = vunpack.i.l.bf16 %v3811_v55  ;;  %3880 = vrot.lane.b32.xlu1 %v3879_v41, %s4106_s15  ;;  %v8192_v50 = vld [vmem:[#allocation102_spill] sm:$0xff]  ;;  %v8202_v41 = vld [vmem:[#allocation120_spill] sm:$0xff]  ;;  %v8203_v55 = vld [vmem:[#allocation111_spill] sm:$0xff] }
 0x41f   : > { %v2811_v51 = vmax.f32 %v2747_v11, 0.0  ;;  %v2973_v56 = vmax.f32 %v6542_v7, %v3812_v44  ;;  %v2974_v31 = vmax.f32 %v6537_v52, %v3813_v57 }
 0x420   : > { %v3821_v8 = vpop.permute.xlu1 %3820 }
 0x421   : > { %v7162_v22 = vmax.f32 %v2809_v9, %v2811_v51  ;;  %v3823_v13 = vunpack.i.h.bf16 %v3821_v8  ;;  %v3822_v21 = vunpack.i.l.bf16 %v3821_v8  ;;  %v3005_v14 = vpack.c.bf16 %v2974_v31, %v2973_v56  ;;  %v8204_v51 = vld [vmem:[#allocation122_spill] sm:$0xff]  ;;  %v8205_v31 = vld [vmem:[#allocation121_spill] sm:$0xff] }
 0x422   : > { %v3836_v0 = vpop.permute.xlu0 %3835 }
 0x423   : > { %v2976_v30 = vmax.f32 %v8192_v50, %v3823_v13  ;;  %v2975_v16 = vmax.f32 %v8193_v49, %v3822_v21  ;;  %3695 = vmatprep.mubr.msk.bf16.mxu0 %vm3060_vm0, %v3005_v14  ;;  %v3884_v7 = vpack.i.bf16 %v7160_v39, %v7162_v22  ;;  %v3838_v40 = vunpack.i.h.bf16 %v3836_v0 }
 0x424   : > { %v3837_v52 = vunpack.i.l.bf16 %v3836_v0  ;;  %v3831_v1 = vpop.permute.xlu1 %3830 }
 0x425   : > { %v3006_v35 = vpack.c.bf16 %v2976_v30, %v2975_v16  ;;  %v3833_v19 = vunpack.i.h.bf16 %v3831_v1  ;;  %v3832_v42 = vunpack.i.l.bf16 %v3831_v1  ;;  %3885 = vrot.lane.b32.xlu0 %v3884_v7, %s4106_s15  ;;  %v2994_v25 = vmax.f32 %v8194_v26, %v3838_v40  ;;  %v8206_v30 = vld [vmem:[#allocation123_spill] sm:$0xff]  ;;  %v8207_v16 = vld [vmem:[#allocation124_spill] sm:$0xff] }
 0x426   : > { %v2993_v36 = vmax.f32 %v8195_v46, %v3837_v52 }
 0x427   : > { %v2978_v20 = vmax.f32 %v8196_v23, %v3833_v19  ;;  %v2977_v32 = vmax.f32 %v8197_v18, %v3832_v42  ;;  %3696 = vmatmul.mubr.msk.bf16.vlgmr.msra.gmra.mrb[0].mxu0 %vm3060_vm0, %v3006_v35  ;;  %v8208_v35 = vld [vmem:[#allocation125_spill] sm:$0xff]  ;;  %v8209_v42 = vld [vmem:[#allocation126_spill] sm:$0xff] }
 0x428   : > { %v3015_v12 = vpack.c.bf16 %v2994_v25, %v2993_v36 }
 0x429   : > { %v3007_v54 = vpack.c.bf16 %v2978_v20, %v2977_v32 }
 0x42a   : > { %3715 = vmatprep.mubr.msk.bf16.mxu1 %vm3060_vm0, %v3015_v12  ;;  %v3841_v29 = vpop.permute.xlu1 %3840 }
 0x42b   : > { %3699 = vmatprep.mubr.msk.bf16.mxu0 %vm3060_vm0, %v3007_v54  ;;  %v3843_v58 = vunpack.i.h.bf16 %v3841_v29  ;;  %v3842_v15 = vunpack.i.l.bf16 %v3841_v29 }
 0x42d   : > { %v2980_v27 = vmax.f32 %v8198_v34, %v3843_v58  ;;  %v2979_v6 = vmax.f32 %v8199_v61, %v3842_v15 }
 0x42f   : > { %v3008_v63 = vpack.c.bf16 %v2980_v27, %v2979_v6 }
 0x431   : > { %3700 = vmatmul.mubr.msk.bf16.gmra.mrb[4].mxu0 %vm3060_vm0, %v3008_v63 }
 0x432   : > { %v3846_v38 = vpop.permute.xlu0 %3845 }
 0x433   : > { %v3848_v28 = vunpack.i.h.bf16 %v3846_v38  ;;  %v3847_v37 = vunpack.i.l.bf16 %v3846_v38 }
 0x435   : > { %v2996_v17 = vmax.f32 %v8200_v3, %v3848_v28  ;;  %v2995_v24 = vmax.f32 %v8201_v33, %v3847_v37 }
 0x437   : > { %v3016_v4 = vpack.c.bf16 %v2996_v17, %v2995_v24  ;;  %v7208_v17 = vld [vmem:[#allocation7] ss:$0 sm:$0xff] }
 0x439   : > { %3716 = vmatmul.mubr.msk.bf16.gmra.mrb[4].mxu1 %vm3060_vm0, %v3016_v4 }
 0x449   : > { %v3851_v60 = vpop.permute.xlu1 %3850 }
 0x44a   : > { %v3853_v5 = vunpack.i.h.bf16 %v3851_v60  ;;  %v3852_v53 = vunpack.i.l.bf16 %v3851_v60 }
 0x44c   : > { %v2982_v62 = vmax.f32 %v8202_v41, %v3853_v5  ;;  %v2981_v11 = vmax.f32 %v8203_v55, %v3852_v53 }
 0x44e   : > { %v3009_v57 = vpack.c.bf16 %v2982_v62, %v2981_v11 }
 0x450   : > { %3703 = vmatprep.mubr.msk.bf16.mxu0 %vm3060_vm0, %v3009_v57 }
 0x451   : > { %v3856_v44 = vpop.permute.xlu0 %3855 }
 0x452   : > { %v3858_v10 = vunpack.i.h.bf16 %v3856_v44  ;;  %v3857_v9 = vunpack.i.l.bf16 %v3856_v44 }
 0x454   : > { %v2998_v56 = vmax.f32 %v8204_v51, %v3858_v10  ;;  %v2997_v8 = vmax.f32 %v8205_v31, %v3857_v9 }
 0x456   : > { %v3017_v13 = vpack.c.bf16 %v2998_v56, %v2997_v8 }
 0x458   : > { %3719 = vmatprep.mubr.msk.bf16.mxu1 %vm3060_vm0, %v3017_v13 }
 0x459   : > { %v3861_v21 = vpop.permute.xlu1 %3860 }
 0x45a   : > { %v3863_v14 = vunpack.i.h.bf16 %v3861_v21  ;;  %v3862_v50 = vunpack.i.l.bf16 %v3861_v21 }
 0x45c   : > { %v2984_v49 = vmax.f32 %v8206_v30, %v3863_v14  ;;  %v2983_v0 = vmax.f32 %v8207_v16, %v3862_v50 }
 0x45e   : > { %v3010_v7 = vpack.c.bf16 %v2984_v49, %v2983_v0 }
 0x460   : > { %3704 = vmatmul.mubr.msk.bf16.gmra.mrb[8].mxu0 %vm3060_vm0, %v3010_v7  ;;  %v3866_v40 = vpop.permute.xlu0 %3865 }
 0x461   : > { %v3868_v52 = vunpack.i.h.bf16 %v3866_v40  ;;  %v3867_v1 = vunpack.i.l.bf16 %v3866_v40 }
 0x463   : > { %v3000_v19 = vmax.f32 %v8208_v35, %v3868_v52  ;;  %v2999_v26 = vmax.f32 %v8209_v42, %v3867_v1 }
 0x465   : > { %v3018_v25 = vpack.c.bf16 %v3000_v19, %v2999_v26 }
 0x467   : > { %3720 = vmatmul.mubr.msk.bf16.gmra.mrb[8].mxu1 %vm3060_vm0, %v3018_v25 }
 0x47f   : > { %v3871_v46 = vpop.permute.xlu1 %3870 }
 0x480   : > { %v3873_v36 = vunpack.i.h.bf16 %v3871_v46  ;;  %v3872_v23 = vunpack.i.l.bf16 %v3871_v46 }
 0x482   : > { %v2986_v20 = vmax.f32 %v7087_v48, %v3873_v36  ;;  %v2985_v18 = vmax.f32 %v7089_v59, %v3872_v23 }
 0x484   : > { %v3011_v32 = vpack.c.bf16 %v2986_v20, %v2985_v18 }
 0x486   : > { %3707 = vmatprep.mubr.msk.bf16.mxu0 %vm3060_vm0, %v3011_v32 }
 0x487   : > { %v3876_v12 = vpop.permute.xlu0 %3875 }
 0x488   : > { %v3878_v54 = vunpack.i.h.bf16 %v3876_v12  ;;  %v3877_v29 = vunpack.i.l.bf16 %v3876_v12 }
 0x48a   : > { %v3002_v58 = vmax.f32 %v7122_v2, %v3878_v54  ;;  %v3001_v15 = vmax.f32 %v7124_v45, %v3877_v29 }
 0x48c   : > { %v3019_v34 = vpack.c.bf16 %v3002_v58, %v3001_v15 }
 0x48e   : > { %3723 = vmatprep.mubr.msk.bf16.mxu1 %vm3060_vm0, %v3019_v34 }
 0x48f   : > { %v3881_v27 = vpop.permute.xlu1 %3880 }
 0x490   : > { %v3883_v61 = vunpack.i.h.bf16 %v3881_v27  ;;  %v3882_v6 = vunpack.i.l.bf16 %v3881_v27 }
 0x492   : > { %v2988_v48 = vmax.f32 %v7146_v43, %v3883_v61  ;;  %v2987_v59 = vmax.f32 %v7148_v47, %v3882_v6 }
 0x494   : > { %v3012_v63 = vpack.c.bf16 %v2988_v48, %v2987_v59 }
 0x496   : > { %3708 = vmatmul.mubr.msk.bf16.gmra.mrb[12].mxu0 %vm3060_vm0, %v3012_v63 }
 0x497   : > { %v3886_v38 = vpop.permute.xlu0 %3885 }
 0x498   : > { %v3888_v28 = vunpack.i.h.bf16 %v3886_v38  ;;  %v3887_v37 = vunpack.i.l.bf16 %v3886_v38 }
 0x49a   : > { %v3004_v2 = vmax.f32 %v7160_v39, %v3888_v28  ;;  %v3003_v45 = vmax.f32 %v7162_v22, %v3887_v37 }
 0x49c   : > { %v3020_v3 = vpack.c.bf16 %v3004_v2, %v3003_v45 }
 0x49e   : > { %3724 = vmatmul.mubr.msk.bf16.gmra.mrb[12].mxu1 %vm3060_vm0, %v3020_v3 }
 0x4ed   : > { %v3713_v43 = vpop.f32.mrb[0].mxu1 }
 0x4ee   : > { %v3216_v47 = vadd.f32 %v3713_v43, %v7208_v17  ;;  %v3207_v33 = vpop.f32.mrb[1].mxu1 }
 0x4ef   : > { %v3208_v24 = vadd.f32 %v7208_v17, %v3207_v33  ;;  %v3714_v4 = vpop.f32.mrb[2].mxu1 }
 0x4f0   : > { %v3288_v60 = vmax.f32 %v3216_v47, 0.0  ;;  %v3219_v39 = vadd.f32 %v3714_v4, %v7208_v17  ;;  %v3210_v22 = vpop.f32.mrb[3].mxu1 }
 0x4f1   : > { %v3286_v5 = vmax.f32 %v3208_v24, 0.0  ;;  %v3211_v53 = vadd.f32 %v7208_v17, %v3210_v22 }
 0x4f2   : > { %v3653_v41 = vpack.c.bf16 %v3288_v60, %v3288_v60  ;;  %v3289_v62 = vmax.f32 %v3219_v39, 0.0 }
 0x4f3   : > { %v3651_v55 = vpack.c.bf16 %v3286_v5, %v3286_v5  ;;  %v3287_v11 = vmax.f32 %v3211_v53, 0.0 }
 0x4f4   : > { %3449 = vst.msk [vmem:[%s7216_s21 + $0x48] sm:$0xf] %vm3430_vm1, %v3653_v41  ;;  %v3654_v57 = vpack.c.bf16 %v3289_v62, %v3289_v62 }
 0x4f5   : > { %3447 = vst.msk [vmem:[%s7216_s21 + $0x40] sm:$0xf] %vm3430_vm1, %v3651_v55  ;;  %v3652_v44 = vpack.c.bf16 %v3287_v11, %v3287_v11 }
 0x4f6   : > { %3450 = vst.msk [vmem:[%s7216_s21 + $0x4c] sm:$0xf] %vm3430_vm1, %v3654_v57 }
 0x4f7   : > { %3448 = vst.msk [vmem:[%s7216_s21 + $0x44] sm:$0xf] %vm3430_vm1, %v3652_v44 }
 0x4fa   : > { %v3697_v10 = vpop.f32.mrb[0].mxu0 }
 0x4fb   : > { %v3152_v9 = vadd.f32 %v3697_v10, %v7208_v17  ;;  %v3143_v51 = vpop.f32.mrb[1].mxu0 }
 0x4fc   : > { %v3144_v56 = vadd.f32 %v7208_v17, %v3143_v51  ;;  %v3698_v31 = vpop.f32.mrb[2].mxu0 }
 0x4fd   : > { %v3272_v8 = vmax.f32 %v3152_v9, 0.0  ;;  %v3155_v13 = vadd.f32 %v3698_v31, %v7208_v17  ;;  %v3146_v21 = vpop.f32.mrb[3].mxu0 }
 0x4fe   : > { %v3270_v14 = vmax.f32 %v3144_v56, 0.0  ;;  %v3147_v50 = vadd.f32 %v7208_v17, %v3146_v21 }
 0x4ff   : > { %v3637_v30 = vpack.c.bf16 %v3272_v8, %v3272_v8  ;;  %v3273_v49 = vmax.f32 %v3155_v13, 0.0 }
 0x500   : > { %v3635_v16 = vpack.c.bf16 %v3270_v14, %v3270_v14  ;;  %v3271_v0 = vmax.f32 %v3147_v50, 0.0 }
 0x501   : > { %3433 = vst.msk [vmem:[%s7216_s21 + $0x8] sm:$0xf] %vm3430_vm1, %v3637_v30  ;;  %v3638_v7 = vpack.c.bf16 %v3273_v49, %v3273_v49 }
 0x502   : > { %3431 = vst.msk [vmem:[%s7216_s21] sm:$0xf] %vm3430_vm1, %v3635_v16  ;;  %v3636_v40 = vpack.c.bf16 %v3271_v0, %v3271_v0 }
 0x503   : > { %3434 = vst.msk [vmem:[%s7216_s21 + $0xc] sm:$0xf] %vm3430_vm1, %v3638_v7 }
 0x504   : > { %3432 = vst.msk [vmem:[%s7216_s21 + $0x4] sm:$0xf] %vm3430_vm1, %v3636_v40  ;;  %v3701_v52 = vpop.f32.mrb[4].mxu0 }
 0x505   : > { %v3168_v1 = vadd.f32 %v3701_v52, %v7208_v17  ;;  %v3159_v35 = vpop.f32.mrb[5].mxu0 }
 0x506   : > { %v3160_v19 = vadd.f32 %v7208_v17, %v3159_v35  ;;  %v3702_v42 = vpop.f32.mrb[6].mxu0 }
 0x507   : > { %v3276_v26 = vmax.f32 %v3168_v1, 0.0  ;;  %v3171_v25 = vadd.f32 %v3702_v42, %v7208_v17  ;;  %v3162_v46 = vpop.f32.mrb[7].mxu0 }
 0x508   : > { %v3274_v36 = vmax.f32 %v3160_v19, 0.0  ;;  %v3163_v23 = vadd.f32 %v7208_v17, %v3162_v46 }
 0x509   : > { %v3641_v20 = vpack.c.bf16 %v3276_v26, %v3276_v26  ;;  %v3277_v18 = vmax.f32 %v3171_v25, 0.0 }
 0x50a   : > { %v3639_v32 = vpack.c.bf16 %v3274_v36, %v3274_v36  ;;  %v3275_v12 = vmax.f32 %v3163_v23, 0.0 }
 0x50b   : > { %3437 = vst.msk [vmem:[%s7216_s21 + $0x18] sm:$0xf] %vm3430_vm1, %v3641_v20  ;;  %v3642_v54 = vpack.c.bf16 %v3277_v18, %v3277_v18 }
 0x50c   : > { %3435 = vst.msk [vmem:[%s7216_s21 + $0x10] sm:$0xf] %vm3430_vm1, %v3639_v32  ;;  %v3640_v29 = vpack.c.bf16 %v3275_v12, %v3275_v12  ;;  %v3717_v58 = vpop.f32.mrb[4].mxu1 }
 0x50d   : > { %3438 = vst.msk [vmem:[%s7216_s21 + $0x1c] sm:$0xf] %vm3430_vm1, %v3642_v54  ;;  %v3232_v15 = vadd.f32 %v3717_v58, %v7208_v17  ;;  %v3223_v34 = vpop.f32.mrb[5].mxu1 }
 0x50e   : > { %3436 = vst.msk [vmem:[%s7216_s21 + $0x14] sm:$0xf] %vm3430_vm1, %v3640_v29  ;;  %v3224_v27 = vadd.f32 %v7208_v17, %v3223_v34  ;;  %v3718_v61 = vpop.f32.mrb[6].mxu1 }
 0x50f   : > { %v3292_v6 = vmax.f32 %v3232_v15, 0.0  ;;  %v3235_v48 = vadd.f32 %v3718_v61, %v7208_v17  ;;  %v3226_v59 = vpop.f32.mrb[7].mxu1 }
 0x510   : > { %v3290_v63 = vmax.f32 %v3224_v27, 0.0  ;;  %v3227_v38 = vadd.f32 %v7208_v17, %v3226_v59 }
 0x511   : > { %v3657_v28 = vpack.c.bf16 %v3292_v6, %v3292_v6  ;;  %v3293_v37 = vmax.f32 %v3235_v48, 0.0 }
 0x512   : > { %v3655_v2 = vpack.c.bf16 %v3290_v63, %v3290_v63  ;;  %v3291_v45 = vmax.f32 %v3227_v38, 0.0 }
 0x513   : > { %3453 = vst.msk [vmem:[%s7216_s21 + $0x58] sm:$0xf] %vm3430_vm1, %v3657_v28  ;;  %v3658_v3 = vpack.c.bf16 %v3293_v37, %v3293_v37 }
 0x514   : > { %3451 = vst.msk [vmem:[%s7216_s21 + $0x50] sm:$0xf] %vm3430_vm1, %v3655_v2  ;;  %v3656_v43 = vpack.c.bf16 %v3291_v45, %v3291_v45 }
 0x515   : > { %3454 = vst.msk [vmem:[%s7216_s21 + $0x5c] sm:$0xf] %vm3430_vm1, %v3658_v3 }
 0x516   : > { %3452 = vst.msk [vmem:[%s7216_s21 + $0x54] sm:$0xf] %vm3430_vm1, %v3656_v43 }
 0x533   : > { %v3705_v47 = vpop.f32.mrb[8].mxu0 }
 0x534   : > { %v3184_v33 = vadd.f32 %v3705_v47, %v7208_v17  ;;  %v3175_v24 = vpop.f32.mrb[9].mxu0 }
 0x535   : > { %v3176_v4 = vadd.f32 %v7208_v17, %v3175_v24  ;;  %v3706_v60 = vpop.f32.mrb[10].mxu0 }
 0x536   : > { %v3280_v39 = vmax.f32 %v3184_v33, 0.0  ;;  %v3187_v22 = vadd.f32 %v3706_v60, %v7208_v17  ;;  %v3178_v5 = vpop.f32.mrb[11].mxu0 }
 0x537   : > { %v3278_v53 = vmax.f32 %v3176_v4, 0.0  ;;  %v3179_v41 = vadd.f32 %v7208_v17, %v3178_v5 }
 0x538   : > { %v3645_v62 = vpack.c.bf16 %v3280_v39, %v3280_v39  ;;  %v3281_v55 = vmax.f32 %v3187_v22, 0.0 }
 0x539   : > { %v3643_v11 = vpack.c.bf16 %v3278_v53, %v3278_v53  ;;  %v3279_v57 = vmax.f32 %v3179_v41, 0.0 }
 0x53a   : > { %3441 = vst.msk [vmem:[%s7216_s21 + $0x28] sm:$0xf] %vm3430_vm1, %v3645_v62  ;;  %v3646_v44 = vpack.c.bf16 %v3281_v55, %v3281_v55  ;;  %v3721_v10 = vpop.f32.mrb[8].mxu1 }
 0x53b   : > { %3439 = vst.msk [vmem:[%s7216_s21 + $0x20] sm:$0xf] %vm3430_vm1, %v3643_v11  ;;  %v3644_v9 = vpack.c.bf16 %v3279_v57, %v3279_v57  ;;  %v3248_v51 = vadd.f32 %v3721_v10, %v7208_v17  ;;  %v3239_v56 = vpop.f32.mrb[9].mxu1 }
 0x53c   : > { %3442 = vst.msk [vmem:[%s7216_s21 + $0x2c] sm:$0xf] %vm3430_vm1, %v3646_v44  ;;  %v3240_v31 = vadd.f32 %v7208_v17, %v3239_v56  ;;  %v3722_v8 = vpop.f32.mrb[10].mxu1 }
 0x53d   : > { %3440 = vst.msk [vmem:[%s7216_s21 + $0x24] sm:$0xf] %vm3430_vm1, %v3644_v9  ;;  %v3296_v13 = vmax.f32 %v3248_v51, 0.0  ;;  %v3251_v21 = vadd.f32 %v3722_v8, %v7208_v17  ;;  %v3242_v14 = vpop.f32.mrb[11].mxu1 }
 0x53e   : > { %v3294_v50 = vmax.f32 %v3240_v31, 0.0  ;;  %v3243_v30 = vadd.f32 %v7208_v17, %v3242_v14 }
 0x53f   : > { %v3661_v49 = vpack.c.bf16 %v3296_v13, %v3296_v13  ;;  %v3297_v16 = vmax.f32 %v3251_v21, 0.0 }
 0x540   : > { %v3659_v0 = vpack.c.bf16 %v3294_v50, %v3294_v50  ;;  %v3295_v7 = vmax.f32 %v3243_v30, 0.0 }
 0x541   : > { %3457 = vst.msk [vmem:[%s7216_s21 + $0x68] sm:$0xf] %vm3430_vm1, %v3661_v49  ;;  %v3662_v40 = vpack.c.bf16 %v3297_v16, %v3297_v16 }
 0x542   : > { %3455 = vst.msk [vmem:[%s7216_s21 + $0x60] sm:$0xf] %vm3430_vm1, %v3659_v0  ;;  %v3660_v52 = vpack.c.bf16 %v3295_v7, %v3295_v7 }
 0x543   : > { %3458 = vst.msk [vmem:[%s7216_s21 + $0x6c] sm:$0xf] %vm3430_vm1, %v3662_v40 }
 0x544   : > { %3456 = vst.msk [vmem:[%s7216_s21 + $0x64] sm:$0xf] %vm3430_vm1, %v3660_v52 }
 0x569   : > { %v3709_v1 = vpop.f32.mrb[12].mxu0 }
 0x56a   : > { %v3200_v35 = vadd.f32 %v3709_v1, %v7208_v17  ;;  %v3191_v19 = vpop.f32.mrb[13].mxu0 }
 0x56b   : > { %v3192_v42 = vadd.f32 %v7208_v17, %v3191_v19  ;;  %v3710_v26 = vpop.f32.mrb[14].mxu0 }
 0x56c   : > { %v3284_v25 = vmax.f32 %v3200_v35, 0.0  ;;  %v3203_v46 = vadd.f32 %v3710_v26, %v7208_v17  ;;  %v3194_v36 = vpop.f32.mrb[15].mxu0 }
 0x56d   : > { %v3282_v23 = vmax.f32 %v3192_v42, 0.0  ;;  %v3195_v20 = vadd.f32 %v7208_v17, %v3194_v36 }
 0x56e   : > { %v3649_v18 = vpack.c.bf16 %v3284_v25, %v3284_v25  ;;  %v3285_v32 = vmax.f32 %v3203_v46, 0.0 }
 0x56f   : > { %v3647_v12 = vpack.c.bf16 %v3282_v23, %v3282_v23  ;;  %v3283_v54 = vmax.f32 %v3195_v20, 0.0 }
 0x570   : > { %3445 = vst.msk [vmem:[%s7216_s21 + $0x38] sm:$0xf] %vm3430_vm1, %v3649_v18  ;;  %v3650_v29 = vpack.c.bf16 %v3285_v32, %v3285_v32 }
 0x571   : > { %3443 = vst.msk [vmem:[%s7216_s21 + $0x30] sm:$0xf] %vm3430_vm1, %v3647_v12  ;;  %v3648_v58 = vpack.c.bf16 %v3283_v54, %v3283_v54  ;;  %v3725_v15 = vpop.f32.mrb[12].mxu1 }
 0x572   : > { %3446 = vst.msk [vmem:[%s7216_s21 + $0x3c] sm:$0xf] %vm3430_vm1, %v3650_v29  ;;  %v3264_v34 = vadd.f32 %v3725_v15, %v7208_v17  ;;  %v3255_v27 = vpop.f32.mrb[13].mxu1 }
 0x573   : > { %3444 = vst.msk [vmem:[%s7216_s21 + $0x34] sm:$0xf] %vm3430_vm1, %v3648_v58  ;;  %v3256_v61 = vadd.f32 %v7208_v17, %v3255_v27  ;;  %v3726_v6 = vpop.f32.mrb[14].mxu1 }
 0x574   : > { %v3300_v48 = vmax.f32 %v3264_v34, 0.0  ;;  %v3267_v59 = vadd.f32 %v3726_v6, %v7208_v17  ;;  %v3258_v63 = vpop.f32.mrb[15].mxu1 }
 0x575   : > { %v3298_v38 = vmax.f32 %v3256_v61, 0.0  ;;  %v3259_v28 = vadd.f32 %v7208_v17, %v3258_v63 }
 0x576   : > { %v3665_v37 = vpack.c.bf16 %v3300_v48, %v3300_v48  ;;  %v3301_v2 = vmax.f32 %v3267_v59, 0.0 }
 0x577   : > { %v3663_v45 = vpack.c.bf16 %v3298_v38, %v3298_v38  ;;  %v3299_v3 = vmax.f32 %v3259_v28, 0.0 }
 0x578   : > { %3461 = vst.msk [vmem:[%s7216_s21 + $0x78] sm:$0xf] %vm3430_vm1, %v3665_v37  ;;  %v3666_v43 = vpack.c.bf16 %v3301_v2, %v3301_v2 }
 0x579   : > { %3459 = vst.msk [vmem:[%s7216_s21 + $0x70] sm:$0xf] %vm3430_vm1, %v3663_v45  ;;  %v3664_v47 = vpack.c.bf16 %v3299_v3, %v3299_v3 }
 0x57a   : > { %3462 = vst.msk [vmem:[%s7216_s21 + $0x7c] sm:$0xf] %vm3430_vm1, %v3666_v43 }
 0x57b   : > { %3460 = vst.msk [vmem:[%s7216_s21 + $0x74] sm:$0xf] %vm3430_vm1, %v3664_v47 }
 0x57c PF: > { %s18_s18 = sadd.s32 1, %s4092_s18  }
 0x57d   : > { %p15_p8 = scmp.ge.s32.totalorder %s18_s18, 4  }
 0x57f   :  { %17 = sbr.rel (!%p15_p8) target bundleno = 3 (0x3), region = 87 }
 0x586   :  { %3485 = vsyncpa [#allocation3], 1 }
 0x587   :  { %3487 = vsyncpa [#allocation3 + $0x1], 1 }
 0x588   :  { %3488 = vsyncpa [#allocation5], 1 }
 0x589   :  { %3489 = vsyncpa [#allocation8], 1 }

// kernel: san_forward.9
= control target key start
LH: loop header
LB: loop body
LE: loop exit
PB: predicated region body
PF: predicated region fallthrough
CT: control target
= control target key end

     0   :  { %10 = vsyncpa [#allocation5], 0  ;;  %s4282_s18 = smov 0   ;;  %s4284_s19 = smov 0   ;;  %s5252_s0 = inlined_call_operand.vmem [shape: bf16[2,2,1,2048], index: 0, kind: input, shape index: {}]   ;;  %s5253_s1 = inlined_call_operand.vmem [shape: bf16[1024,2048], index: 1, kind: input, shape index: {}]   ;;  %s5254_s2 = inlined_call_operand.vmem [shape: f32[1,2048], index: 2, kind: input, shape index: {}]   ;;  %s5255_s3 = inlined_call_operand.vmem [shape: bf16[2048,128], index: 3, kind: input, shape index: {}]   ;;  %s5256_s4 = inlined_call_operand.vmem [shape: f32[1,128], index: 4, kind: input, shape index: {}]   ;;  %s5257_s5 = inlined_call_operand.hbm [shape: f32[2,128], index: 5, kind: output, shape index: {}]  }
   0x1   :  { %s4286_s20 = smov 0  }
   0x2 LB: > { %s4298_s21 = sadd.s32 4294967295, %s4246_s20   ;;  %s4301_s22 = sadd.s32 1, %s4246_s20   ;;  %s4246_s20 = sphi %s4286_s20, %s5260_s20   ;;  %s4242_s19 = sphi %s4284_s19, %s5259_s19   ;;  %s4238_s18 = sphi %s4282_s18, %s5258_s18  }
   0x3   : > { %s41_s23 = ssub.s32 %s4246_s20, %s4301_s22  ;;  %s44_s24 = sadd.s32 1, %s4242_s19 }
   0x4   : > { %p42_p0 = scmp.eq.s32.totalorder %s41_s23, 0  ;;  %p51_p1 = scmp.ne.s32.totalorder %s4242_s19, %s4238_s18 }
   0x5   : > { %p52_p2 = scmp.eq.s32.totalorder %s4246_s20, 0  ;;  %p3365_p4 = scmp.ge.s32.totalorder %s4246_s20, 4 }
   0x6   : > { %s4310_s25 = scalar_select %p42_p0, %s4242_s19, %s44_s24  }
   0x7   : > { %p53_p3 = por %p52_p2, %p51_p1  ;;  %177 = sbr.rel (%p3365_p4) target bundleno = 146 (0x92), region = 24 }
   0xe   : > { %180 = sbr.rel (!%p53_p3) target bundleno = 146 (0x92), region = 28  ;;  %s182_s26 = sand.u32 (%p53_p3), 1, %s4242_s19  }
   0xf   : > { %s3670_s27 = sshll.u32 (%p53_p3), %s4246_s20, 4  ;;  %s3366_s28 = sshll.u32 (%p53_p3), %s182_s26, 11 }
  0x10   : > { %s4318_s6 = scalar_lea.vmem (%p53_p3), %s5253_s1, %s3670_s27  ;;  %s4323_s7 = scalar_lea.vmem (%p53_p3), [#allocation3], %s3366_s28 }
  0x11   : > { %v200_v0 = vld [vmem:[%s4318_s6] sm:$0xff] (%p53_p3)  ;;  %v202_v1 = vld [vmem:[%s4318_s6 + $0x8] sm:$0xff] (%p53_p3) }
  0x12   : > { %v204_v2 = vld [vmem:[%s4318_s6 + $0x40] sm:$0xff] (%p53_p3)  ;;  %201 = vst [vmem:[%s4323_s7] sm:$0xff] (%p53_p3), %v200_v0  ;;  %203 = vst [vmem:[%s4323_s7 + $0x8] sm:$0xff] (%p53_p3), %v202_v1  ;;  %v206_v3 = vld [vmem:[%s4318_s6 + $0x48] sm:$0xff] (%p53_p3) }
  0x13   : > { %205 = vst [vmem:[%s4323_s7 + $0x10] sm:$0xff] (%p53_p3), %v204_v2  ;;  %v208_v4 = vld [vmem:[%s4318_s6 + $0x80] sm:$0xff] (%p53_p3)  ;;  %v210_v5 = vld [vmem:[%s4318_s6 + $0x88] sm:$0xff] (%p53_p3)  ;;  %207 = vst [vmem:[%s4323_s7 + $0x18] sm:$0xff] (%p53_p3), %v206_v3 }
  0x14   : > { %209 = vst [vmem:[%s4323_s7 + $0x20] sm:$0xff] (%p53_p3), %v208_v4  ;;  %211 = vst [vmem:[%s4323_s7 + $0x28] sm:$0xff] (%p53_p3), %v210_v5  ;;  %v212_v6 = vld [vmem:[%s4318_s6 + $0xc0] sm:$0xff] (%p53_p3)  ;;  %v214_v7 = vld [vmem:[%s4318_s6 + $0xc8] sm:$0xff] (%p53_p3) }
  0x15   : > { %v216_v8 = vld [vmem:[%s4318_s6 + $0x100] sm:$0xff]  ;;  %213 = vst [vmem:[%s4323_s7 + $0x30] sm:$0xff] %v212_v6  ;;  %215 = vst [vmem:[%s4323_s7 + $0x38] sm:$0xff] %v214_v7  ;;  %v218_v9 = vld [vmem:[%s4318_s6 + $0x108] sm:$0xff] }
  0x16   : > { %217 = vst [vmem:[%s4323_s7 + $0x40] sm:$0xff] %v216_v8  ;;  %v220_v10 = vld [vmem:[%s4318_s6 + $0x140] sm:$0xff]  ;;  %v222_v11 = vld [vmem:[%s4318_s6 + $0x148] sm:$0xff]  ;;  %219 = vst [vmem:[%s4323_s7 + $0x48] sm:$0xff] %v218_v9 }
  0x17   : > { %221 = vst [vmem:[%s4323_s7 + $0x50] sm:$0xff] %v220_v10  ;;  %223 = vst [vmem:[%s4323_s7 + $0x58] sm:$0xff] %v222_v11  ;;  %v224_v12 = vld [vmem:[%s4318_s6 + $0x180] sm:$0xff]  ;;  %v226_v13 = vld [vmem:[%s4318_s6 + $0x188] sm:$0xff] }
  0x18   : > { %v228_v14 = vld [vmem:[%s4318_s6 + $0x1c0] sm:$0xff]  ;;  %225 = vst [vmem:[%s4323_s7 + $0x60] sm:$0xff] %v224_v12  ;;  %227 = vst [vmem:[%s4323_s7 + $0x68] sm:$0xff] %v226_v13  ;;  %v230_v15 = vld [vmem:[%s4318_s6 + $0x1c8] sm:$0xff] }
  0x19   : > { %229 = vst [vmem:[%s4323_s7 + $0x70] sm:$0xff] %v228_v14  ;;  %v232_v16 = vld [vmem:[%s4318_s6 + $0x200] sm:$0xff]  ;;  %v234_v17 = vld [vmem:[%s4318_s6 + $0x208] sm:$0xff]  ;;  %231 = vst [vmem:[%s4323_s7 + $0x78] sm:$0xff] %v230_v15 }
  0x1a   : > { %233 = vst [vmem:[%s4323_s7 + $0x80] sm:$0xff] %v232_v16  ;;  %235 = vst [vmem:[%s4323_s7 + $0x88] sm:$0xff] %v234_v17  ;;  %v236_v18 = vld [vmem:[%s4318_s6 + $0x240] sm:$0xff]  ;;  %v238_v19 = vld [vmem:[%s4318_s6 + $0x248] sm:$0xff] }
  0x1b   : > { %v240_v20 = vld [vmem:[%s4318_s6 + $0x280] sm:$0xff]  ;;  %237 = vst [vmem:[%s4323_s7 + $0x90] sm:$0xff] %v236_v18  ;;  %239 = vst [vmem:[%s4323_s7 + $0x98] sm:$0xff] %v238_v19  ;;  %v242_v21 = vld [vmem:[%s4318_s6 + $0x288] sm:$0xff] }
  0x1c   : > { %241 = vst [vmem:[%s4323_s7 + $0xa0] sm:$0xff] %v240_v20  ;;  %v244_v22 = vld [vmem:[%s4318_s6 + $0x2c0] sm:$0xff]  ;;  %v246_v23 = vld [vmem:[%s4318_s6 + $0x2c8] sm:$0xff]  ;;  %243 = vst [vmem:[%s4323_s7 + $0xa8] sm:$0xff] %v242_v21 }
  0x1d   : > { %245 = vst [vmem:[%s4323_s7 + $0xb0] sm:$0xff] %v244_v22  ;;  %247 = vst [vmem:[%s4323_s7 + $0xb8] sm:$0xff] %v246_v23  ;;  %v248_v24 = vld [vmem:[%s4318_s6 + $0x300] sm:$0xff]  ;;  %v250_v25 = vld [vmem:[%s4318_s6 + $0x308] sm:$0xff] }
  0x1e   : > { %v252_v26 = vld [vmem:[%s4318_s6 + $0x340] sm:$0xff]  ;;  %249 = vst [vmem:[%s4323_s7 + $0xc0] sm:$0xff] %v248_v24  ;;  %251 = vst [vmem:[%s4323_s7 + $0xc8] sm:$0xff] %v250_v25  ;;  %v254_v27 = vld [vmem:[%s4318_s6 + $0x348] sm:$0xff] }
  0x1f   : > { %253 = vst [vmem:[%s4323_s7 + $0xd0] sm:$0xff] %v252_v26  ;;  %v256_v28 = vld [vmem:[%s4318_s6 + $0x380] sm:$0xff]  ;;  %v258_v29 = vld [vmem:[%s4318_s6 + $0x388] sm:$0xff]  ;;  %255 = vst [vmem:[%s4323_s7 + $0xd8] sm:$0xff] %v254_v27 }
  0x20   : > { %257 = vst [vmem:[%s4323_s7 + $0xe0] sm:$0xff] %v256_v28  ;;  %259 = vst [vmem:[%s4323_s7 + $0xe8] sm:$0xff] %v258_v29  ;;  %v260_v30 = vld [vmem:[%s4318_s6 + $0x3c0] sm:$0xff]  ;;  %v262_v31 = vld [vmem:[%s4318_s6 + $0x3c8] sm:$0xff] }
  0x21   : > { %v264_v32 = vld [vmem:[%s4318_s6 + $0x400] sm:$0xff]  ;;  %261 = vst [vmem:[%s4323_s7 + $0xf0] sm:$0xff] %v260_v30  ;;  %263 = vst [vmem:[%s4323_s7 + $0xf8] sm:$0xff] %v262_v31  ;;  %v266_v33 = vld [vmem:[%s4318_s6 + $0x408] sm:$0xff] }
  0x22   : > { %265 = vst [vmem:[%s4323_s7 + $0x100] sm:$0xff] %v264_v32  ;;  %v268_v34 = vld [vmem:[%s4318_s6 + $0x440] sm:$0xff]  ;;  %v270_v35 = vld [vmem:[%s4318_s6 + $0x448] sm:$0xff]  ;;  %267 = vst [vmem:[%s4323_s7 + $0x108] sm:$0xff] %v266_v33 }
  0x23   : > { %269 = vst [vmem:[%s4323_s7 + $0x110] sm:$0xff] %v268_v34  ;;  %271 = vst [vmem:[%s4323_s7 + $0x118] sm:$0xff] %v270_v35  ;;  %v272_v36 = vld [vmem:[%s4318_s6 + $0x480] sm:$0xff]  ;;  %v274_v37 = vld [vmem:[%s4318_s6 + $0x488] sm:$0xff] }
  0x24   : > { %v276_v38 = vld [vmem:[%s4318_s6 + $0x4c0] sm:$0xff]  ;;  %273 = vst [vmem:[%s4323_s7 + $0x120] sm:$0xff] %v272_v36  ;;  %275 = vst [vmem:[%s4323_s7 + $0x128] sm:$0xff] %v274_v37  ;;  %v278_v39 = vld [vmem:[%s4318_s6 + $0x4c8] sm:$0xff] }
  0x25   : > { %277 = vst [vmem:[%s4323_s7 + $0x130] sm:$0xff] %v276_v38  ;;  %v280_v40 = vld [vmem:[%s4318_s6 + $0x500] sm:$0xff]  ;;  %v282_v41 = vld [vmem:[%s4318_s6 + $0x508] sm:$0xff]  ;;  %279 = vst [vmem:[%s4323_s7 + $0x138] sm:$0xff] %v278_v39 }
  0x26   : > { %281 = vst [vmem:[%s4323_s7 + $0x140] sm:$0xff] %v280_v40  ;;  %283 = vst [vmem:[%s4323_s7 + $0x148] sm:$0xff] %v282_v41  ;;  %v284_v42 = vld [vmem:[%s4318_s6 + $0x540] sm:$0xff]  ;;  %v286_v43 = vld [vmem:[%s4318_s6 + $0x548] sm:$0xff] }
  0x27   : > { %v288_v44 = vld [vmem:[%s4318_s6 + $0x580] sm:$0xff]  ;;  %285 = vst [vmem:[%s4323_s7 + $0x150] sm:$0xff] %v284_v42  ;;  %287 = vst [vmem:[%s4323_s7 + $0x158] sm:$0xff] %v286_v43  ;;  %v290_v45 = vld [vmem:[%s4318_s6 + $0x588] sm:$0xff] }
  0x28   : > { %289 = vst [vmem:[%s4323_s7 + $0x160] sm:$0xff] %v288_v44  ;;  %v292_v46 = vld [vmem:[%s4318_s6 + $0x5c0] sm:$0xff]  ;;  %v294_v47 = vld [vmem:[%s4318_s6 + $0x5c8] sm:$0xff]  ;;  %291 = vst [vmem:[%s4323_s7 + $0x168] sm:$0xff] %v290_v45 }
  0x29   : > { %293 = vst [vmem:[%s4323_s7 + $0x170] sm:$0xff] %v292_v46  ;;  %295 = vst [vmem:[%s4323_s7 + $0x178] sm:$0xff] %v294_v47  ;;  %v296_v48 = vld [vmem:[%s4318_s6 + $0x600] sm:$0xff]  ;;  %v298_v49 = vld [vmem:[%s4318_s6 + $0x608] sm:$0xff] }
  0x2a   : > { %v300_v50 = vld [vmem:[%s4318_s6 + $0x640] sm:$0xff]  ;;  %297 = vst [vmem:[%s4323_s7 + $0x180] sm:$0xff] %v296_v48  ;;  %299 = vst [vmem:[%s4323_s7 + $0x188] sm:$0xff] %v298_v49  ;;  %v302_v51 = vld [vmem:[%s4318_s6 + $0x648] sm:$0xff] }
  0x2b   : > { %301 = vst [vmem:[%s4323_s7 + $0x190] sm:$0xff] %v300_v50  ;;  %v304_v52 = vld [vmem:[%s4318_s6 + $0x680] sm:$0xff]  ;;  %v306_v53 = vld [vmem:[%s4318_s6 + $0x688] sm:$0xff]  ;;  %303 = vst [vmem:[%s4323_s7 + $0x198] sm:$0xff] %v302_v51 }
  0x2c   : > { %305 = vst [vmem:[%s4323_s7 + $0x1a0] sm:$0xff] %v304_v52  ;;  %307 = vst [vmem:[%s4323_s7 + $0x1a8] sm:$0xff] %v306_v53  ;;  %v308_v54 = vld [vmem:[%s4318_s6 + $0x6c0] sm:$0xff]  ;;  %v310_v55 = vld [vmem:[%s4318_s6 + $0x6c8] sm:$0xff] }
  0x2d   : > { %v312_v56 = vld [vmem:[%s4318_s6 + $0x700] sm:$0xff]  ;;  %309 = vst [vmem:[%s4323_s7 + $0x1b0] sm:$0xff] %v308_v54  ;;  %311 = vst [vmem:[%s4323_s7 + $0x1b8] sm:$0xff] %v310_v55  ;;  %v314_v57 = vld [vmem:[%s4318_s6 + $0x708] sm:$0xff] }
  0x2e   : > { %313 = vst [vmem:[%s4323_s7 + $0x1c0] sm:$0xff] %v312_v56  ;;  %v316_v58 = vld [vmem:[%s4318_s6 + $0x740] sm:$0xff]  ;;  %v318_v59 = vld [vmem:[%s4318_s6 + $0x748] sm:$0xff]  ;;  %315 = vst [vmem:[%s4323_s7 + $0x1c8] sm:$0xff] %v314_v57 }
  0x2f   : > { %317 = vst [vmem:[%s4323_s7 + $0x1d0] sm:$0xff] %v316_v58  ;;  %319 = vst [vmem:[%s4323_s7 + $0x1d8] sm:$0xff] %v318_v59  ;;  %v320_v60 = vld [vmem:[%s4318_s6 + $0x780] sm:$0xff]  ;;  %v322_v61 = vld [vmem:[%s4318_s6 + $0x788] sm:$0xff] }
  0x30   : > { %v324_v62 = vld [vmem:[%s4318_s6 + $0x7c0] sm:$0xff]  ;;  %321 = vst [vmem:[%s4323_s7 + $0x1e0] sm:$0xff] %v320_v60  ;;  %323 = vst [vmem:[%s4323_s7 + $0x1e8] sm:$0xff] %v322_v61  ;;  %v326_v63 = vld [vmem:[%s4318_s6 + $0x7c8] sm:$0xff] }
  0x31   : > { %325 = vst [vmem:[%s4323_s7 + $0x1f0] sm:$0xff] %v324_v62  ;;  %v328_v0 = vld [vmem:[%s4318_s6 + $0x800] sm:$0xff]  ;;  %v330_v1 = vld [vmem:[%s4318_s6 + $0x808] sm:$0xff]  ;;  %327 = vst [vmem:[%s4323_s7 + $0x1f8] sm:$0xff] %v326_v63 }
  0x32   : > { %329 = vst [vmem:[%s4323_s7 + $0x200] sm:$0xff] %v328_v0  ;;  %331 = vst [vmem:[%s4323_s7 + $0x208] sm:$0xff] %v330_v1  ;;  %v332_v2 = vld [vmem:[%s4318_s6 + $0x840] sm:$0xff]  ;;  %v334_v3 = vld [vmem:[%s4318_s6 + $0x848] sm:$0xff] }
  0x33   : > { %v336_v4 = vld [vmem:[%s4318_s6 + $0x880] sm:$0xff]  ;;  %333 = vst [vmem:[%s4323_s7 + $0x210] sm:$0xff] %v332_v2  ;;  %335 = vst [vmem:[%s4323_s7 + $0x218] sm:$0xff] %v334_v3  ;;  %v338_v5 = vld [vmem:[%s4318_s6 + $0x888] sm:$0xff] }
  0x34   : > { %337 = vst [vmem:[%s4323_s7 + $0x220] sm:$0xff] %v336_v4  ;;  %v340_v6 = vld [vmem:[%s4318_s6 + $0x8c0] sm:$0xff]  ;;  %v342_v7 = vld [vmem:[%s4318_s6 + $0x8c8] sm:$0xff]  ;;  %339 = vst [vmem:[%s4323_s7 + $0x228] sm:$0xff] %v338_v5 }
  0x35   : > { %341 = vst [vmem:[%s4323_s7 + $0x230] sm:$0xff] %v340_v6  ;;  %343 = vst [vmem:[%s4323_s7 + $0x238] sm:$0xff] %v342_v7  ;;  %v344_v8 = vld [vmem:[%s4318_s6 + $0x900] sm:$0xff]  ;;  %v346_v9 = vld [vmem:[%s4318_s6 + $0x908] sm:$0xff] }
  0x36   : > { %v348_v10 = vld [vmem:[%s4318_s6 + $0x940] sm:$0xff]  ;;  %345 = vst [vmem:[%s4323_s7 + $0x240] sm:$0xff] %v344_v8  ;;  %347 = vst [vmem:[%s4323_s7 + $0x248] sm:$0xff] %v346_v9  ;;  %v350_v11 = vld [vmem:[%s4318_s6 + $0x948] sm:$0xff] }
  0x37   : > { %349 = vst [vmem:[%s4323_s7 + $0x250] sm:$0xff] %v348_v10  ;;  %v352_v12 = vld [vmem:[%s4318_s6 + $0x980] sm:$0xff]  ;;  %v354_v13 = vld [vmem:[%s4318_s6 + $0x988] sm:$0xff]  ;;  %351 = vst [vmem:[%s4323_s7 + $0x258] sm:$0xff] %v350_v11 }
  0x38   : > { %353 = vst [vmem:[%s4323_s7 + $0x260] sm:$0xff] %v352_v12  ;;  %355 = vst [vmem:[%s4323_s7 + $0x268] sm:$0xff] %v354_v13  ;;  %v356_v14 = vld [vmem:[%s4318_s6 + $0x9c0] sm:$0xff]  ;;  %v358_v15 = vld [vmem:[%s4318_s6 + $0x9c8] sm:$0xff] }
  0x39   : > { %v360_v16 = vld [vmem:[%s4318_s6 + $0xa00] sm:$0xff]  ;;  %357 = vst [vmem:[%s4323_s7 + $0x270] sm:$0xff] %v356_v14  ;;  %359 = vst [vmem:[%s4323_s7 + $0x278] sm:$0xff] %v358_v15  ;;  %v362_v17 = vld [vmem:[%s4318_s6 + $0xa08] sm:$0xff] }
  0x3a   : > { %361 = vst [vmem:[%s4323_s7 + $0x280] sm:$0xff] %v360_v16  ;;  %v364_v18 = vld [vmem:[%s4318_s6 + $0xa40] sm:$0xff]  ;;  %v366_v19 = vld [vmem:[%s4318_s6 + $0xa48] sm:$0xff]  ;;  %363 = vst [vmem:[%s4323_s7 + $0x288] sm:$0xff] %v362_v17 }
  0x3b   : > { %365 = vst [vmem:[%s4323_s7 + $0x290] sm:$0xff] %v364_v18  ;;  %367 = vst [vmem:[%s4323_s7 + $0x298] sm:$0xff] %v366_v19  ;;  %v368_v20 = vld [vmem:[%s4318_s6 + $0xa80] sm:$0xff]  ;;  %v370_v21 = vld [vmem:[%s4318_s6 + $0xa88] sm:$0xff] }
  0x3c   : > { %v372_v22 = vld [vmem:[%s4318_s6 + $0xac0] sm:$0xff]  ;;  %369 = vst [vmem:[%s4323_s7 + $0x2a0] sm:$0xff] %v368_v20  ;;  %371 = vst [vmem:[%s4323_s7 + $0x2a8] sm:$0xff] %v370_v21  ;;  %v374_v23 = vld [vmem:[%s4318_s6 + $0xac8] sm:$0xff] }
  0x3d   : > { %373 = vst [vmem:[%s4323_s7 + $0x2b0] sm:$0xff] %v372_v22  ;;  %v376_v24 = vld [vmem:[%s4318_s6 + $0xb00] sm:$0xff]  ;;  %v378_v25 = vld [vmem:[%s4318_s6 + $0xb08] sm:$0xff]  ;;  %375 = vst [vmem:[%s4323_s7 + $0x2b8] sm:$0xff] %v374_v23 }
  0x3e   : > { %377 = vst [vmem:[%s4323_s7 + $0x2c0] sm:$0xff] %v376_v24  ;;  %379 = vst [vmem:[%s4323_s7 + $0x2c8] sm:$0xff] %v378_v25  ;;  %v380_v26 = vld [vmem:[%s4318_s6 + $0xb40] sm:$0xff]  ;;  %v382_v27 = vld [vmem:[%s4318_s6 + $0xb48] sm:$0xff] }
  0x3f   : > { %v384_v28 = vld [vmem:[%s4318_s6 + $0xb80] sm:$0xff]  ;;  %381 = vst [vmem:[%s4323_s7 + $0x2d0] sm:$0xff] %v380_v26  ;;  %383 = vst [vmem:[%s4323_s7 + $0x2d8] sm:$0xff] %v382_v27  ;;  %v386_v29 = vld [vmem:[%s4318_s6 + $0xb88] sm:$0xff] }
  0x40   : > { %385 = vst [vmem:[%s4323_s7 + $0x2e0] sm:$0xff] %v384_v28  ;;  %v388_v30 = vld [vmem:[%s4318_s6 + $0xbc0] sm:$0xff]  ;;  %v390_v31 = vld [vmem:[%s4318_s6 + $0xbc8] sm:$0xff]  ;;  %387 = vst [vmem:[%s4323_s7 + $0x2e8] sm:$0xff] %v386_v29 }
  0x41   : > { %389 = vst [vmem:[%s4323_s7 + $0x2f0] sm:$0xff] %v388_v30  ;;  %391 = vst [vmem:[%s4323_s7 + $0x2f8] sm:$0xff] %v390_v31  ;;  %v392_v32 = vld [vmem:[%s4318_s6 + $0xc00] sm:$0xff]  ;;  %v394_v33 = vld [vmem:[%s4318_s6 + $0xc08] sm:$0xff] }
  0x42   : > { %v396_v34 = vld [vmem:[%s4318_s6 + $0xc40] sm:$0xff]  ;;  %393 = vst [vmem:[%s4323_s7 + $0x300] sm:$0xff] %v392_v32  ;;  %395 = vst [vmem:[%s4323_s7 + $0x308] sm:$0xff] %v394_v33  ;;  %v398_v35 = vld [vmem:[%s4318_s6 + $0xc48] sm:$0xff] }
  0x43   : > { %397 = vst [vmem:[%s4323_s7 + $0x310] sm:$0xff] %v396_v34  ;;  %v400_v36 = vld [vmem:[%s4318_s6 + $0xc80] sm:$0xff]  ;;  %v402_v37 = vld [vmem:[%s4318_s6 + $0xc88] sm:$0xff]  ;;  %399 = vst [vmem:[%s4323_s7 + $0x318] sm:$0xff] %v398_v35 }
  0x44   : > { %401 = vst [vmem:[%s4323_s7 + $0x320] sm:$0xff] %v400_v36  ;;  %403 = vst [vmem:[%s4323_s7 + $0x328] sm:$0xff] %v402_v37  ;;  %v404_v38 = vld [vmem:[%s4318_s6 + $0xcc0] sm:$0xff]  ;;  %v406_v39 = vld [vmem:[%s4318_s6 + $0xcc8] sm:$0xff] }
  0x45   : > { %v408_v40 = vld [vmem:[%s4318_s6 + $0xd00] sm:$0xff]  ;;  %405 = vst [vmem:[%s4323_s7 + $0x330] sm:$0xff] %v404_v38  ;;  %407 = vst [vmem:[%s4323_s7 + $0x338] sm:$0xff] %v406_v39  ;;  %v410_v41 = vld [vmem:[%s4318_s6 + $0xd08] sm:$0xff] }
  0x46   : > { %409 = vst [vmem:[%s4323_s7 + $0x340] sm:$0xff] %v408_v40  ;;  %v412_v42 = vld [vmem:[%s4318_s6 + $0xd40] sm:$0xff]  ;;  %v414_v43 = vld [vmem:[%s4318_s6 + $0xd48] sm:$0xff]  ;;  %411 = vst [vmem:[%s4323_s7 + $0x348] sm:$0xff] %v410_v41 }
  0x47   : > { %413 = vst [vmem:[%s4323_s7 + $0x350] sm:$0xff] %v412_v42  ;;  %415 = vst [vmem:[%s4323_s7 + $0x358] sm:$0xff] %v414_v43  ;;  %v416_v44 = vld [vmem:[%s4318_s6 + $0xd80] sm:$0xff]  ;;  %v418_v45 = vld [vmem:[%s4318_s6 + $0xd88] sm:$0xff] }
  0x48   : > { %v420_v46 = vld [vmem:[%s4318_s6 + $0xdc0] sm:$0xff]  ;;  %417 = vst [vmem:[%s4323_s7 + $0x360] sm:$0xff] %v416_v44  ;;  %419 = vst [vmem:[%s4323_s7 + $0x368] sm:$0xff] %v418_v45  ;;  %v422_v47 = vld [vmem:[%s4318_s6 + $0xdc8] sm:$0xff] }
  0x49   : > { %421 = vst [vmem:[%s4323_s7 + $0x370] sm:$0xff] %v420_v46  ;;  %v424_v48 = vld [vmem:[%s4318_s6 + $0xe00] sm:$0xff]  ;;  %v426_v49 = vld [vmem:[%s4318_s6 + $0xe08] sm:$0xff]  ;;  %423 = vst [vmem:[%s4323_s7 + $0x378] sm:$0xff] %v422_v47 }
  0x4a   : > { %425 = vst [vmem:[%s4323_s7 + $0x380] sm:$0xff] %v424_v48  ;;  %427 = vst [vmem:[%s4323_s7 + $0x388] sm:$0xff] %v426_v49  ;;  %v428_v50 = vld [vmem:[%s4318_s6 + $0xe40] sm:$0xff]  ;;  %v430_v51 = vld [vmem:[%s4318_s6 + $0xe48] sm:$0xff] }
  0x4b   : > { %v432_v52 = vld [vmem:[%s4318_s6 + $0xe80] sm:$0xff]  ;;  %429 = vst [vmem:[%s4323_s7 + $0x390] sm:$0xff] %v428_v50  ;;  %431 = vst [vmem:[%s4323_s7 + $0x398] sm:$0xff] %v430_v51  ;;  %v434_v53 = vld [vmem:[%s4318_s6 + $0xe88] sm:$0xff] }
  0x4c   : > { %433 = vst [vmem:[%s4323_s7 + $0x3a0] sm:$0xff] %v432_v52  ;;  %v436_v54 = vld [vmem:[%s4318_s6 + $0xec0] sm:$0xff]  ;;  %v438_v55 = vld [vmem:[%s4318_s6 + $0xec8] sm:$0xff]  ;;  %435 = vst [vmem:[%s4323_s7 + $0x3a8] sm:$0xff] %v434_v53 }
  0x4d   : > { %437 = vst [vmem:[%s4323_s7 + $0x3b0] sm:$0xff] %v436_v54  ;;  %439 = vst [vmem:[%s4323_s7 + $0x3b8] sm:$0xff] %v438_v55  ;;  %v440_v56 = vld [vmem:[%s4318_s6 + $0xf00] sm:$0xff]  ;;  %v442_v57 = vld [vmem:[%s4318_s6 + $0xf08] sm:$0xff] }
  0x4e   : > { %v444_v58 = vld [vmem:[%s4318_s6 + $0xf40] sm:$0xff]  ;;  %441 = vst [vmem:[%s4323_s7 + $0x3c0] sm:$0xff] %v440_v56  ;;  %443 = vst [vmem:[%s4323_s7 + $0x3c8] sm:$0xff] %v442_v57  ;;  %v446_v59 = vld [vmem:[%s4318_s6 + $0xf48] sm:$0xff] }
  0x4f   : > { %445 = vst [vmem:[%s4323_s7 + $0x3d0] sm:$0xff] %v444_v58  ;;  %v448_v60 = vld [vmem:[%s4318_s6 + $0xf80] sm:$0xff]  ;;  %v450_v61 = vld [vmem:[%s4318_s6 + $0xf88] sm:$0xff]  ;;  %447 = vst [vmem:[%s4323_s7 + $0x3d8] sm:$0xff] %v446_v59 }
  0x50   : > { %449 = vst [vmem:[%s4323_s7 + $0x3e0] sm:$0xff] %v448_v60  ;;  %451 = vst [vmem:[%s4323_s7 + $0x3e8] sm:$0xff] %v450_v61  ;;  %v452_v62 = vld [vmem:[%s4318_s6 + $0xfc0] sm:$0xff]  ;;  %v454_v63 = vld [vmem:[%s4318_s6 + $0xfc8] sm:$0xff] }
  0x51   : > { %v456_v0 = vld [vmem:[%s4318_s6 + $0x1000] sm:$0xff]  ;;  %453 = vst [vmem:[%s4323_s7 + $0x3f0] sm:$0xff] %v452_v62  ;;  %455 = vst [vmem:[%s4323_s7 + $0x3f8] sm:$0xff] %v454_v63  ;;  %v458_v1 = vld [vmem:[%s4318_s6 + $0x1008] sm:$0xff] }
  0x52   : > { %457 = vst [vmem:[%s4323_s7 + $0x400] sm:$0xff] %v456_v0  ;;  %v460_v2 = vld [vmem:[%s4318_s6 + $0x1040] sm:$0xff]  ;;  %v462_v3 = vld [vmem:[%s4318_s6 + $0x1048] sm:$0xff]  ;;  %459 = vst [vmem:[%s4323_s7 + $0x408] sm:$0xff] %v458_v1 }
  0x53   : > { %461 = vst [vmem:[%s4323_s7 + $0x410] sm:$0xff] %v460_v2  ;;  %463 = vst [vmem:[%s4323_s7 + $0x418] sm:$0xff] %v462_v3  ;;  %v464_v4 = vld [vmem:[%s4318_s6 + $0x1080] sm:$0xff]  ;;  %v466_v5 = vld [vmem:[%s4318_s6 + $0x1088] sm:$0xff] }
  0x54   : > { %v468_v6 = vld [vmem:[%s4318_s6 + $0x10c0] sm:$0xff]  ;;  %465 = vst [vmem:[%s4323_s7 + $0x420] sm:$0xff] %v464_v4  ;;  %467 = vst [vmem:[%s4323_s7 + $0x428] sm:$0xff] %v466_v5  ;;  %v470_v7 = vld [vmem:[%s4318_s6 + $0x10c8] sm:$0xff] }
  0x55   : > { %469 = vst [vmem:[%s4323_s7 + $0x430] sm:$0xff] %v468_v6  ;;  %v472_v8 = vld [vmem:[%s4318_s6 + $0x1100] sm:$0xff]  ;;  %v474_v9 = vld [vmem:[%s4318_s6 + $0x1108] sm:$0xff]  ;;  %471 = vst [vmem:[%s4323_s7 + $0x438] sm:$0xff] %v470_v7 }
  0x56   : > { %473 = vst [vmem:[%s4323_s7 + $0x440] sm:$0xff] %v472_v8  ;;  %475 = vst [vmem:[%s4323_s7 + $0x448] sm:$0xff] %v474_v9  ;;  %v476_v10 = vld [vmem:[%s4318_s6 + $0x1140] sm:$0xff]  ;;  %v478_v11 = vld [vmem:[%s4318_s6 + $0x1148] sm:$0xff] }
  0x57   : > { %v480_v12 = vld [vmem:[%s4318_s6 + $0x1180] sm:$0xff]  ;;  %477 = vst [vmem:[%s4323_s7 + $0x450] sm:$0xff] %v476_v10  ;;  %479 = vst [vmem:[%s4323_s7 + $0x458] sm:$0xff] %v478_v11  ;;  %v482_v13 = vld [vmem:[%s4318_s6 + $0x1188] sm:$0xff] }
  0x58   : > { %481 = vst [vmem:[%s4323_s7 + $0x460] sm:$0xff] %v480_v12  ;;  %v484_v14 = vld [vmem:[%s4318_s6 + $0x11c0] sm:$0xff]  ;;  %v486_v15 = vld [vmem:[%s4318_s6 + $0x11c8] sm:$0xff]  ;;  %483 = vst [vmem:[%s4323_s7 + $0x468] sm:$0xff] %v482_v13 }
  0x59   : > { %485 = vst [vmem:[%s4323_s7 + $0x470] sm:$0xff] %v484_v14  ;;  %487 = vst [vmem:[%s4323_s7 + $0x478] sm:$0xff] %v486_v15  ;;  %v488_v16 = vld [vmem:[%s4318_s6 + $0x1200] sm:$0xff]  ;;  %v490_v17 = vld [vmem:[%s4318_s6 + $0x1208] sm:$0xff] }
  0x5a   : > { %v492_v18 = vld [vmem:[%s4318_s6 + $0x1240] sm:$0xff]  ;;  %489 = vst [vmem:[%s4323_s7 + $0x480] sm:$0xff] %v488_v16  ;;  %491 = vst [vmem:[%s4323_s7 + $0x488] sm:$0xff] %v490_v17  ;;  %v494_v19 = vld [vmem:[%s4318_s6 + $0x1248] sm:$0xff] }
  0x5b   : > { %493 = vst [vmem:[%s4323_s7 + $0x490] sm:$0xff] %v492_v18  ;;  %v496_v20 = vld [vmem:[%s4318_s6 + $0x1280] sm:$0xff]  ;;  %v498_v21 = vld [vmem:[%s4318_s6 + $0x1288] sm:$0xff]  ;;  %495 = vst [vmem:[%s4323_s7 + $0x498] sm:$0xff] %v494_v19 }
  0x5c   : > { %497 = vst [vmem:[%s4323_s7 + $0x4a0] sm:$0xff] %v496_v20  ;;  %499 = vst [vmem:[%s4323_s7 + $0x4a8] sm:$0xff] %v498_v21  ;;  %v500_v22 = vld [vmem:[%s4318_s6 + $0x12c0] sm:$0xff]  ;;  %v502_v23 = vld [vmem:[%s4318_s6 + $0x12c8] sm:$0xff] }
  0x5d   : > { %v504_v24 = vld [vmem:[%s4318_s6 + $0x1300] sm:$0xff]  ;;  %501 = vst [vmem:[%s4323_s7 + $0x4b0] sm:$0xff] %v500_v22  ;;  %503 = vst [vmem:[%s4323_s7 + $0x4b8] sm:$0xff] %v502_v23  ;;  %v506_v25 = vld [vmem:[%s4318_s6 + $0x1308] sm:$0xff] }
  0x5e   : > { %505 = vst [vmem:[%s4323_s7 + $0x4c0] sm:$0xff] %v504_v24  ;;  %v508_v26 = vld [vmem:[%s4318_s6 + $0x1340] sm:$0xff]  ;;  %v510_v27 = vld [vmem:[%s4318_s6 + $0x1348] sm:$0xff]  ;;  %507 = vst [vmem:[%s4323_s7 + $0x4c8] sm:$0xff] %v506_v25 }
  0x5f   : > { %509 = vst [vmem:[%s4323_s7 + $0x4d0] sm:$0xff] %v508_v26  ;;  %511 = vst [vmem:[%s4323_s7 + $0x4d8] sm:$0xff] %v510_v27  ;;  %v512_v28 = vld [vmem:[%s4318_s6 + $0x1380] sm:$0xff]  ;;  %v514_v29 = vld [vmem:[%s4318_s6 + $0x1388] sm:$0xff] }
  0x60   : > { %v516_v30 = vld [vmem:[%s4318_s6 + $0x13c0] sm:$0xff]  ;;  %513 = vst [vmem:[%s4323_s7 + $0x4e0] sm:$0xff] %v512_v28  ;;  %515 = vst [vmem:[%s4323_s7 + $0x4e8] sm:$0xff] %v514_v29  ;;  %v518_v31 = vld [vmem:[%s4318_s6 + $0x13c8] sm:$0xff] }
  0x61   : > { %517 = vst [vmem:[%s4323_s7 + $0x4f0] sm:$0xff] %v516_v30  ;;  %v520_v32 = vld [vmem:[%s4318_s6 + $0x1400] sm:$0xff]  ;;  %v522_v33 = vld [vmem:[%s4318_s6 + $0x1408] sm:$0xff]  ;;  %519 = vst [vmem:[%s4323_s7 + $0x4f8] sm:$0xff] %v518_v31 }
  0x62   : > { %521 = vst [vmem:[%s4323_s7 + $0x500] sm:$0xff] %v520_v32  ;;  %523 = vst [vmem:[%s4323_s7 + $0x508] sm:$0xff] %v522_v33  ;;  %v524_v34 = vld [vmem:[%s4318_s6 + $0x1440] sm:$0xff]  ;;  %v526_v35 = vld [vmem:[%s4318_s6 + $0x1448] sm:$0xff] }
  0x63   : > { %v528_v36 = vld [vmem:[%s4318_s6 + $0x1480] sm:$0xff]  ;;  %525 = vst [vmem:[%s4323_s7 + $0x510] sm:$0xff] %v524_v34  ;;  %527 = vst [vmem:[%s4323_s7 + $0x518] sm:$0xff] %v526_v35  ;;  %v530_v37 = vld [vmem:[%s4318_s6 + $0x1488] sm:$0xff] }
  0x64   : > { %529 = vst [vmem:[%s4323_s7 + $0x520] sm:$0xff] %v528_v36  ;;  %v532_v38 = vld [vmem:[%s4318_s6 + $0x14c0] sm:$0xff]  ;;  %v534_v39 = vld [vmem:[%s4318_s6 + $0x14c8] sm:$0xff]  ;;  %531 = vst [vmem:[%s4323_s7 + $0x528] sm:$0xff] %v530_v37 }
  0x65   : > { %533 = vst [vmem:[%s4323_s7 + $0x530] sm:$0xff] %v532_v38  ;;  %535 = vst [vmem:[%s4323_s7 + $0x538] sm:$0xff] %v534_v39  ;;  %v536_v40 = vld [vmem:[%s4318_s6 + $0x1500] sm:$0xff]  ;;  %v538_v41 = vld [vmem:[%s4318_s6 + $0x1508] sm:$0xff] }
  0x66   : > { %v540_v42 = vld [vmem:[%s4318_s6 + $0x1540] sm:$0xff]  ;;  %537 = vst [vmem:[%s4323_s7 + $0x540] sm:$0xff] %v536_v40  ;;  %539 = vst [vmem:[%s4323_s7 + $0x548] sm:$0xff] %v538_v41  ;;  %v542_v43 = vld [vmem:[%s4318_s6 + $0x1548] sm:$0xff] }
  0x67   : > { %541 = vst [vmem:[%s4323_s7 + $0x550] sm:$0xff] %v540_v42  ;;  %v544_v44 = vld [vmem:[%s4318_s6 + $0x1580] sm:$0xff]  ;;  %v546_v45 = vld [vmem:[%s4318_s6 + $0x1588] sm:$0xff]  ;;  %543 = vst [vmem:[%s4323_s7 + $0x558] sm:$0xff] %v542_v43 }
  0x68   : > { %545 = vst [vmem:[%s4323_s7 + $0x560] sm:$0xff] %v544_v44  ;;  %547 = vst [vmem:[%s4323_s7 + $0x568] sm:$0xff] %v546_v45  ;;  %v548_v46 = vld [vmem:[%s4318_s6 + $0x15c0] sm:$0xff]  ;;  %v550_v47 = vld [vmem:[%s4318_s6 + $0x15c8] sm:$0xff] }
  0x69   : > { %v552_v48 = vld [vmem:[%s4318_s6 + $0x1600] sm:$0xff]  ;;  %549 = vst [vmem:[%s4323_s7 + $0x570] sm:$0xff] %v548_v46  ;;  %551 = vst [vmem:[%s4323_s7 + $0x578] sm:$0xff] %v550_v47  ;;  %v554_v49 = vld [vmem:[%s4318_s6 + $0x1608] sm:$0xff] }
  0x6a   : > { %553 = vst [vmem:[%s4323_s7 + $0x580] sm:$0xff] %v552_v48  ;;  %v556_v50 = vld [vmem:[%s4318_s6 + $0x1640] sm:$0xff]  ;;  %v558_v51 = vld [vmem:[%s4318_s6 + $0x1648] sm:$0xff]  ;;  %555 = vst [vmem:[%s4323_s7 + $0x588] sm:$0xff] %v554_v49 }
  0x6b   : > { %557 = vst [vmem:[%s4323_s7 + $0x590] sm:$0xff] %v556_v50  ;;  %559 = vst [vmem:[%s4323_s7 + $0x598] sm:$0xff] %v558_v51  ;;  %v560_v52 = vld [vmem:[%s4318_s6 + $0x1680] sm:$0xff]  ;;  %v562_v53 = vld [vmem:[%s4318_s6 + $0x1688] sm:$0xff] }
  0x6c   : > { %v564_v54 = vld [vmem:[%s4318_s6 + $0x16c0] sm:$0xff]  ;;  %561 = vst [vmem:[%s4323_s7 + $0x5a0] sm:$0xff] %v560_v52  ;;  %563 = vst [vmem:[%s4323_s7 + $0x5a8] sm:$0xff] %v562_v53  ;;  %v566_v55 = vld [vmem:[%s4318_s6 + $0x16c8] sm:$0xff] }
  0x6d   : > { %565 = vst [vmem:[%s4323_s7 + $0x5b0] sm:$0xff] %v564_v54  ;;  %v568_v56 = vld [vmem:[%s4318_s6 + $0x1700] sm:$0xff]  ;;  %v570_v57 = vld [vmem:[%s4318_s6 + $0x1708] sm:$0xff]  ;;  %567 = vst [vmem:[%s4323_s7 + $0x5b8] sm:$0xff] %v566_v55 }
  0x6e   : > { %569 = vst [vmem:[%s4323_s7 + $0x5c0] sm:$0xff] %v568_v56  ;;  %571 = vst [vmem:[%s4323_s7 + $0x5c8] sm:$0xff] %v570_v57  ;;  %v572_v58 = vld [vmem:[%s4318_s6 + $0x1740] sm:$0xff]  ;;  %v574_v59 = vld [vmem:[%s4318_s6 + $0x1748] sm:$0xff] }
  0x6f   : > { %v576_v60 = vld [vmem:[%s4318_s6 + $0x1780] sm:$0xff]  ;;  %573 = vst [vmem:[%s4323_s7 + $0x5d0] sm:$0xff] %v572_v58  ;;  %575 = vst [vmem:[%s4323_s7 + $0x5d8] sm:$0xff] %v574_v59  ;;  %v578_v61 = vld [vmem:[%s4318_s6 + $0x1788] sm:$0xff] }
  0x70   : > { %577 = vst [vmem:[%s4323_s7 + $0x5e0] sm:$0xff] %v576_v60  ;;  %v580_v62 = vld [vmem:[%s4318_s6 + $0x17c0] sm:$0xff]  ;;  %v582_v63 = vld [vmem:[%s4318_s6 + $0x17c8] sm:$0xff]  ;;  %579 = vst [vmem:[%s4323_s7 + $0x5e8] sm:$0xff] %v578_v61 }
  0x71   : > { %581 = vst [vmem:[%s4323_s7 + $0x5f0] sm:$0xff] %v580_v62  ;;  %583 = vst [vmem:[%s4323_s7 + $0x5f8] sm:$0xff] %v582_v63  ;;  %v584_v0 = vld [vmem:[%s4318_s6 + $0x1800] sm:$0xff]  ;;  %v586_v1 = vld [vmem:[%s4318_s6 + $0x1808] sm:$0xff] }
  0x72   : > { %v588_v2 = vld [vmem:[%s4318_s6 + $0x1840] sm:$0xff]  ;;  %585 = vst [vmem:[%s4323_s7 + $0x600] sm:$0xff] %v584_v0  ;;  %587 = vst [vmem:[%s4323_s7 + $0x608] sm:$0xff] %v586_v1  ;;  %v590_v3 = vld [vmem:[%s4318_s6 + $0x1848] sm:$0xff] }
  0x73   : > { %589 = vst [vmem:[%s4323_s7 + $0x610] sm:$0xff] %v588_v2  ;;  %v592_v4 = vld [vmem:[%s4318_s6 + $0x1880] sm:$0xff]  ;;  %v594_v5 = vld [vmem:[%s4318_s6 + $0x1888] sm:$0xff]  ;;  %591 = vst [vmem:[%s4323_s7 + $0x618] sm:$0xff] %v590_v3 }
  0x74   : > { %593 = vst [vmem:[%s4323_s7 + $0x620] sm:$0xff] %v592_v4  ;;  %595 = vst [vmem:[%s4323_s7 + $0x628] sm:$0xff] %v594_v5  ;;  %v596_v6 = vld [vmem:[%s4318_s6 + $0x18c0] sm:$0xff]  ;;  %v598_v7 = vld [vmem:[%s4318_s6 + $0x18c8] sm:$0xff] }
  0x75   : > { %v600_v8 = vld [vmem:[%s4318_s6 + $0x1900] sm:$0xff]  ;;  %597 = vst [vmem:[%s4323_s7 + $0x630] sm:$0xff] %v596_v6  ;;  %599 = vst [vmem:[%s4323_s7 + $0x638] sm:$0xff] %v598_v7  ;;  %v602_v9 = vld [vmem:[%s4318_s6 + $0x1908] sm:$0xff] }
  0x76   : > { %601 = vst [vmem:[%s4323_s7 + $0x640] sm:$0xff] %v600_v8  ;;  %v604_v10 = vld [vmem:[%s4318_s6 + $0x1940] sm:$0xff]  ;;  %v606_v11 = vld [vmem:[%s4318_s6 + $0x1948] sm:$0xff]  ;;  %603 = vst [vmem:[%s4323_s7 + $0x648] sm:$0xff] %v602_v9 }
  0x77   : > { %605 = vst [vmem:[%s4323_s7 + $0x650] sm:$0xff] %v604_v10  ;;  %607 = vst [vmem:[%s4323_s7 + $0x658] sm:$0xff] %v606_v11  ;;  %v608_v12 = vld [vmem:[%s4318_s6 + $0x1980] sm:$0xff]  ;;  %v610_v13 = vld [vmem:[%s4318_s6 + $0x1988] sm:$0xff] }
  0x78   : > { %v612_v14 = vld [vmem:[%s4318_s6 + $0x19c0] sm:$0xff]  ;;  %609 = vst [vmem:[%s4323_s7 + $0x660] sm:$0xff] %v608_v12  ;;  %611 = vst [vmem:[%s4323_s7 + $0x668] sm:$0xff] %v610_v13  ;;  %v614_v15 = vld [vmem:[%s4318_s6 + $0x19c8] sm:$0xff] }
  0x79   : > { %613 = vst [vmem:[%s4323_s7 + $0x670] sm:$0xff] %v612_v14  ;;  %v616_v16 = vld [vmem:[%s4318_s6 + $0x1a00] sm:$0xff]  ;;  %v618_v17 = vld [vmem:[%s4318_s6 + $0x1a08] sm:$0xff]  ;;  %615 = vst [vmem:[%s4323_s7 + $0x678] sm:$0xff] %v614_v15 }
  0x7a   : > { %617 = vst [vmem:[%s4323_s7 + $0x680] sm:$0xff] %v616_v16  ;;  %619 = vst [vmem:[%s4323_s7 + $0x688] sm:$0xff] %v618_v17  ;;  %v620_v18 = vld [vmem:[%s4318_s6 + $0x1a40] sm:$0xff]  ;;  %v622_v19 = vld [vmem:[%s4318_s6 + $0x1a48] sm:$0xff] }
  0x7b   : > { %v624_v20 = vld [vmem:[%s4318_s6 + $0x1a80] sm:$0xff]  ;;  %621 = vst [vmem:[%s4323_s7 + $0x690] sm:$0xff] %v620_v18  ;;  %623 = vst [vmem:[%s4323_s7 + $0x698] sm:$0xff] %v622_v19  ;;  %v626_v21 = vld [vmem:[%s4318_s6 + $0x1a88] sm:$0xff] }
  0x7c   : > { %625 = vst [vmem:[%s4323_s7 + $0x6a0] sm:$0xff] %v624_v20  ;;  %v628_v22 = vld [vmem:[%s4318_s6 + $0x1ac0] sm:$0xff]  ;;  %v630_v23 = vld [vmem:[%s4318_s6 + $0x1ac8] sm:$0xff]  ;;  %627 = vst [vmem:[%s4323_s7 + $0x6a8] sm:$0xff] %v626_v21 }
  0x7d   : > { %629 = vst [vmem:[%s4323_s7 + $0x6b0] sm:$0xff] %v628_v22  ;;  %631 = vst [vmem:[%s4323_s7 + $0x6b8] sm:$0xff] %v630_v23  ;;  %v632_v24 = vld [vmem:[%s4318_s6 + $0x1b00] sm:$0xff]  ;;  %v634_v25 = vld [vmem:[%s4318_s6 + $0x1b08] sm:$0xff] }
  0x7e   : > { %v636_v26 = vld [vmem:[%s4318_s6 + $0x1b40] sm:$0xff]  ;;  %633 = vst [vmem:[%s4323_s7 + $0x6c0] sm:$0xff] %v632_v24  ;;  %635 = vst [vmem:[%s4323_s7 + $0x6c8] sm:$0xff] %v634_v25  ;;  %v638_v27 = vld [vmem:[%s4318_s6 + $0x1b48] sm:$0xff] }
  0x7f   : > { %637 = vst [vmem:[%s4323_s7 + $0x6d0] sm:$0xff] %v636_v26  ;;  %v640_v28 = vld [vmem:[%s4318_s6 + $0x1b80] sm:$0xff]  ;;  %v642_v29 = vld [vmem:[%s4318_s6 + $0x1b88] sm:$0xff]  ;;  %639 = vst [vmem:[%s4323_s7 + $0x6d8] sm:$0xff] %v638_v27 }
  0x80   : > { %641 = vst [vmem:[%s4323_s7 + $0x6e0] sm:$0xff] %v640_v28  ;;  %643 = vst [vmem:[%s4323_s7 + $0x6e8] sm:$0xff] %v642_v29  ;;  %v644_v30 = vld [vmem:[%s4318_s6 + $0x1bc0] sm:$0xff]  ;;  %v646_v31 = vld [vmem:[%s4318_s6 + $0x1bc8] sm:$0xff] }
  0x81   : > { %v648_v32 = vld [vmem:[%s4318_s6 + $0x1c00] sm:$0xff]  ;;  %645 = vst [vmem:[%s4323_s7 + $0x6f0] sm:$0xff] %v644_v30  ;;  %647 = vst [vmem:[%s4323_s7 + $0x6f8] sm:$0xff] %v646_v31  ;;  %v650_v33 = vld [vmem:[%s4318_s6 + $0x1c08] sm:$0xff] }
  0x82   : > { %649 = vst [vmem:[%s4323_s7 + $0x700] sm:$0xff] %v648_v32  ;;  %v652_v34 = vld [vmem:[%s4318_s6 + $0x1c40] sm:$0xff]  ;;  %v654_v35 = vld [vmem:[%s4318_s6 + $0x1c48] sm:$0xff]  ;;  %651 = vst [vmem:[%s4323_s7 + $0x708] sm:$0xff] %v650_v33 }
  0x83   : > { %653 = vst [vmem:[%s4323_s7 + $0x710] sm:$0xff] %v652_v34  ;;  %655 = vst [vmem:[%s4323_s7 + $0x718] sm:$0xff] %v654_v35  ;;  %v656_v36 = vld [vmem:[%s4318_s6 + $0x1c80] sm:$0xff]  ;;  %v658_v37 = vld [vmem:[%s4318_s6 + $0x1c88] sm:$0xff] }
  0x84   : > { %v660_v38 = vld [vmem:[%s4318_s6 + $0x1cc0] sm:$0xff]  ;;  %657 = vst [vmem:[%s4323_s7 + $0x720] sm:$0xff] %v656_v36  ;;  %659 = vst [vmem:[%s4323_s7 + $0x728] sm:$0xff] %v658_v37  ;;  %v662_v39 = vld [vmem:[%s4318_s6 + $0x1cc8] sm:$0xff] }
  0x85   : > { %661 = vst [vmem:[%s4323_s7 + $0x730] sm:$0xff] %v660_v38  ;;  %v664_v40 = vld [vmem:[%s4318_s6 + $0x1d00] sm:$0xff]  ;;  %v666_v41 = vld [vmem:[%s4318_s6 + $0x1d08] sm:$0xff]  ;;  %663 = vst [vmem:[%s4323_s7 + $0x738] sm:$0xff] %v662_v39 }
  0x86   : > { %665 = vst [vmem:[%s4323_s7 + $0x740] sm:$0xff] %v664_v40  ;;  %667 = vst [vmem:[%s4323_s7 + $0x748] sm:$0xff] %v666_v41  ;;  %v668_v42 = vld [vmem:[%s4318_s6 + $0x1d40] sm:$0xff]  ;;  %v670_v43 = vld [vmem:[%s4318_s6 + $0x1d48] sm:$0xff] }
  0x87   : > { %v672_v44 = vld [vmem:[%s4318_s6 + $0x1d80] sm:$0xff]  ;;  %669 = vst [vmem:[%s4323_s7 + $0x750] sm:$0xff] %v668_v42  ;;  %671 = vst [vmem:[%s4323_s7 + $0x758] sm:$0xff] %v670_v43  ;;  %v674_v45 = vld [vmem:[%s4318_s6 + $0x1d88] sm:$0xff] }
  0x88   : > { %673 = vst [vmem:[%s4323_s7 + $0x760] sm:$0xff] %v672_v44  ;;  %v676_v46 = vld [vmem:[%s4318_s6 + $0x1dc0] sm:$0xff]  ;;  %v678_v47 = vld [vmem:[%s4318_s6 + $0x1dc8] sm:$0xff]  ;;  %675 = vst [vmem:[%s4323_s7 + $0x768] sm:$0xff] %v674_v45 }
  0x89   : > { %677 = vst [vmem:[%s4323_s7 + $0x770] sm:$0xff] %v676_v46  ;;  %679 = vst [vmem:[%s4323_s7 + $0x778] sm:$0xff] %v678_v47  ;;  %v680_v48 = vld [vmem:[%s4318_s6 + $0x1e00] sm:$0xff]  ;;  %v682_v49 = vld [vmem:[%s4318_s6 + $0x1e08] sm:$0xff] }
  0x8a   : > { %v684_v50 = vld [vmem:[%s4318_s6 + $0x1e40] sm:$0xff]  ;;  %681 = vst [vmem:[%s4323_s7 + $0x780] sm:$0xff] %v680_v48  ;;  %683 = vst [vmem:[%s4323_s7 + $0x788] sm:$0xff] %v682_v49  ;;  %v686_v51 = vld [vmem:[%s4318_s6 + $0x1e48] sm:$0xff] }
  0x8b   : > { %685 = vst [vmem:[%s4323_s7 + $0x790] sm:$0xff] %v684_v50  ;;  %v688_v52 = vld [vmem:[%s4318_s6 + $0x1e80] sm:$0xff]  ;;  %v690_v53 = vld [vmem:[%s4318_s6 + $0x1e88] sm:$0xff]  ;;  %687 = vst [vmem:[%s4323_s7 + $0x798] sm:$0xff] %v686_v51 }
  0x8c   : > { %689 = vst [vmem:[%s4323_s7 + $0x7a0] sm:$0xff] %v688_v52  ;;  %691 = vst [vmem:[%s4323_s7 + $0x7a8] sm:$0xff] %v690_v53  ;;  %v692_v54 = vld [vmem:[%s4318_s6 + $0x1ec0] sm:$0xff]  ;;  %v694_v55 = vld [vmem:[%s4318_s6 + $0x1ec8] sm:$0xff] }
  0x8d   : > { %v696_v56 = vld [vmem:[%s4318_s6 + $0x1f00] sm:$0xff]  ;;  %693 = vst [vmem:[%s4323_s7 + $0x7b0] sm:$0xff] %v692_v54  ;;  %695 = vst [vmem:[%s4323_s7 + $0x7b8] sm:$0xff] %v694_v55  ;;  %v698_v57 = vld [vmem:[%s4318_s6 + $0x1f08] sm:$0xff] }
  0x8e   : > { %697 = vst [vmem:[%s4323_s7 + $0x7c0] sm:$0xff] %v696_v56  ;;  %v700_v58 = vld [vmem:[%s4318_s6 + $0x1f40] sm:$0xff]  ;;  %v702_v59 = vld [vmem:[%s4318_s6 + $0x1f48] sm:$0xff]  ;;  %699 = vst [vmem:[%s4323_s7 + $0x7c8] sm:$0xff] %v698_v57 }
  0x8f   : > { %701 = vst [vmem:[%s4323_s7 + $0x7d0] sm:$0xff] %v700_v58  ;;  %703 = vst [vmem:[%s4323_s7 + $0x7d8] sm:$0xff] %v702_v59  ;;  %v704_v60 = vld [vmem:[%s4318_s6 + $0x1f80] sm:$0xff]  ;;  %v706_v61 = vld [vmem:[%s4318_s6 + $0x1f88] sm:$0xff] }
  0x90   : > { %v708_v62 = vld [vmem:[%s4318_s6 + $0x1fc0] sm:$0xff]  ;;  %705 = vst [vmem:[%s4323_s7 + $0x7e0] sm:$0xff] %v704_v60  ;;  %707 = vst [vmem:[%s4323_s7 + $0x7e8] sm:$0xff] %v706_v61  ;;  %v710_v63 = vld [vmem:[%s4318_s6 + $0x1fc8] sm:$0xff] }
  0x91   : > { %709 = vst [vmem:[%s4323_s7 + $0x7f0] sm:$0xff] %v708_v62  ;;  %711 = vst [vmem:[%s4323_s7 + $0x7f8] sm:$0xff] %v710_v63 }
  0x92 PF: > { %p3369_p5 = scmp.ge.s32.totalorder %s4246_s20, 1  ;;  %p733_p6 = scmp.lt.s32.totalorder %s4246_s20, 5 }
  0x94   : > { %p734_p7 = pnand %p3369_p5, %p733_p6 }
  0x95   : > { %s740_s8 = sand.u32 (!%p734_p7), 1, %s4238_s18   ;;  %s3371_s9 = sshll.u32 (!%p734_p7), %s4298_s21, 2 }
  0x96   : > { %737 = sbr.rel (%p734_p7) target bundleno = 922 (0x39a), region = 59  ;;  %s3370_s10 = sshll.u32 (!%p734_p7), %s740_s8, 11 }
  0x97   : > { %p773_p8 = scmp.lt.s32.totalorder (!%p734_p7), %s3371_s9, 15  ;;  %s3372_s11 = sshll.u32 (!%p734_p7), %s4298_s21, 6 }
  0x98   : > { %p778_p9 = scmp.lt.s32.totalorder (!%p734_p7), %s3372_s11, 255  ;;  %s4850_s18 = scalar_lea.vmem (!%p734_p7), [#allocation3], %s3370_s10 }
  0x99   : > { %p3374_p10 = scmp.ne.s32.totalorder (!%p734_p7), %s4298_s21, 0 }
  0x9d   : > { %s5262_s9 = smov (!%p773_p8, %s3371_s9), 15  ;;  %s5264_s11 = smov (!%p778_p9, %s3372_s11), 255 }
  0x9e   : > { %s775_s14 = scalar_lea.vmem %s5254_s2, %s5262_s9  ;;  %s3373_s15 = sshll.u32 %s5264_s11, 2  ;;  %v788_v0 = vld [vmem:[%s5252_s0] sm:$0xff] (!%p3374_p10)  ;;  %v789_v1 = vld [vmem:[%s5252_s0 + $0x8] sm:$0xff] (!%p3374_p10)  ;;  %v790_v2 = vld [vmem:[%s5252_s0 + $0x10] sm:$0xff] (!%p3374_p10)  ;;  %v808_v3 = vlaneseq (!%p3374_p10)  ;;  %v4248_v8 = vmov (!%p3374_p10), 1935823168  }
  0x9f   : > { %s4848_s20 = scalar_lea.vmem %s5255_s3, %s3373_s15  ;;  %787 = sbr.rel (%p3374_p10) target bundleno = 190 (0xbe), region = 67  ;;  %v791_v4 = vld [vmem:[%s5252_s0 + $0x18] sm:$0xff] (!%p3374_p10)  ;;  %v792_v5 = vld [vmem:[%s5252_s0 + $0x20] sm:$0xff] (!%p3374_p10)  ;;  %v793_v6 = vld [vmem:[%s5252_s0 + $0x28] sm:$0xff] (!%p3374_p10)  ;;  %v796_v7 = vmax.bf16 (!%p3374_p10), %v790_v2, %v788_v0  ;;  %v806_v9 = vunpack.c.l.s4 (!%p3374_p10), %v4248_v8  ;;  %v4249_v14 = vmov (!%p3374_p10), 1966171168  }
  0xa0   : > { %v794_v10 = vld [vmem:[%s5252_s0 + $0x30] sm:$0xff] (!%p3374_p10)  ;;  %v795_v11 = vld [vmem:[%s5252_s0 + $0x38] sm:$0xff] (!%p3374_p10)  ;;  %v797_v12 = vmax.bf16 (!%p3374_p10), %v791_v4, %v789_v1  ;;  %v809_v13 = vshrl.u32 (!%p3374_p10), %v808_v3, 7  ;;  %v932_v15 = vunpack.c.l.s4 (!%p3374_p10), %v4249_v14  ;;  %vm911_vm0 = vcmask (!%p3374_p10), 1041409  }
  0xa1   : > { %v798_v16 = vmax.bf16 (!%p3374_p10), %v794_v10, %v792_v5  ;;  %v799_v17 = vmax.bf16 (!%p3374_p10), %v795_v11, %v793_v6  ;;  %v807_v18 = vunpack.c.0.s8 (!%p3374_p10), %v806_v9 }
  0xa2   : > { %v800_v19 = vmax.bf16 (!%p3374_p10), %v797_v12, %v796_v7  ;;  %v933_v23 = vunpack.c.0.s8 (!%p3374_p10), %v932_v15 }
  0xa3   : > { %v801_v20 = vmax.bf16 (!%p3374_p10), %v799_v17, %v798_v16  ;;  %v810_v21 = vsub.s32 (!%p3374_p10), %v807_v18, %v809_v13 }
  0xa4   : > { %v804_v22 = vcombine.high (!%p3374_p10), %v800_v19, %v800_v19  ;;  %v936_v35 = vsub.s32 (!%p3374_p10), %v933_v23, %v809_v13 }
  0xa5   : > { %v811_v24 = vrot.slane (!%p3374_p10), %v800_v19, %v810_v21  ;;  %v849_v25 = vcombine.high (!%p3374_p10), %v801_v20, %v801_v20  ;;  %v856_v26 = vrot.slane (!%p3374_p10), %v801_v20, %v810_v21 }
  0xa6   : > { %v818_v27 = vrot.slane %v804_v22, %v810_v21 }
  0xa7   : > { %v819_v28 = vcombine.high %v811_v24, %v811_v24  ;;  %v827_v29 = vrot.slane %v811_v24, %v810_v21  ;;  %v863_v30 = vrot.slane %v849_v25, %v810_v21  ;;  %v864_v31 = vcombine.high %v856_v26, %v856_v26 }
  0xa8   : > { %v820_v32 = vcombine.high %v818_v27, %v818_v27  ;;  %v841_v33 = vrot.slane %v818_v27, %v810_v21  ;;  %v872_v34 = vrot.slane %v856_v26, %v810_v21 }
  0xa9   : > { %v834_v36 = vrot.slane %v819_v28, %v810_v21  ;;  %v865_v37 = vcombine.high %v863_v30, %v863_v30  ;;  %v879_v38 = vrot.slane %v864_v31, %v810_v21  ;;  %v886_v39 = vrot.slane %v863_v30, %v810_v21 }
  0xaa   : > { %v848_v40 = vrot.slane %v820_v32, %v810_v21  ;;  %v894_v41 = vunpack.c.l.b16 %v827_v29  ;;  %v895_v42 = vunpack.c.h.b16 %v827_v29  ;;  %v898_v43 = vunpack.c.l.b16 %v841_v33 }
  0xab   : > { %v893_v44 = vrot.slane %v865_v37, %v810_v21  ;;  %v896_v45 = vunpack.c.l.b16 %v834_v36  ;;  %v897_v46 = vunpack.c.h.b16 %v834_v36  ;;  %v899_v47 = vunpack.c.h.b16 %v841_v33 }
  0xac   : > { %v900_v48 = vunpack.c.l.b16 %v848_v40  ;;  %v901_v49 = vunpack.c.h.b16 %v848_v40  ;;  %v902_v50 = vunpack.c.l.b16 %v872_v34  ;;  %v903_v51 = vunpack.c.h.b16 %v872_v34 }
  0xad   : > { %v904_v52 = vunpack.c.l.b16 %v879_v38  ;;  %v905_v53 = vunpack.c.h.b16 %v879_v38  ;;  %v906_v54 = vunpack.c.l.b16 %v886_v39  ;;  %v907_v55 = vunpack.c.h.b16 %v886_v39 }
  0xae   : > { %v908_v56 = vunpack.c.l.b16 %v893_v44  ;;  %v909_v57 = vunpack.c.h.b16 %v893_v44  ;;  %v910_v58 = vrot.slane %v902_v50, 7  ;;  %v913_v59 = vrot.slane %v903_v51, 7 }
  0xaf   : > { %v915_v60 = vrot.slane %v904_v52, 7  ;;  %v917_v61 = vrot.slane %v905_v53, 7  ;;  %v919_v62 = vrot.slane %v906_v54, 7  ;;  %v921_v63 = vrot.slane %v907_v55, 7 }
  0xb0   : > { %v912_v0 = vsel %vm911_vm0, %v910_v58, %v894_v41  ;;  %v914_v1 = vsel %vm911_vm0, %v913_v59, %v895_v42  ;;  %v923_v2 = vrot.slane %v908_v56, 7  ;;  %v925_v3 = vrot.slane %v909_v57, 7 }
  0xb1   : > { %v916_v4 = vsel %vm911_vm0, %v915_v60, %v896_v45  ;;  %v918_v5 = vsel %vm911_vm0, %v917_v61, %v897_v46  ;;  %v920_v6 = vsel %vm911_vm0, %v919_v62, %v898_v43  ;;  %v922_v7 = vsel %vm911_vm0, %v921_v63, %v899_v47 }
  0xb2   : > { %v924_v8 = vsel %vm911_vm0, %v923_v2, %v900_v48  ;;  %v926_v9 = vsel %vm911_vm0, %v925_v3, %v901_v49  ;;  %v927_v10 = vpack.c.b16 %v914_v1, %v912_v0  ;;  %v928_v11 = vpack.c.b16 %v918_v5, %v916_v4 }
  0xb3   : > { %v929_v12 = vpack.c.b16 %v922_v7, %v920_v6  ;;  %v930_v13 = vpack.c.b16 %v926_v9, %v924_v8 }
  0xb4   : > { %v937_v14 = vrot.slane %v927_v10, %v936_v35  ;;  %v944_v15 = vrot.slane %v928_v11, %v936_v35 }
  0xb5   : > { %v951_v16 = vrot.slane %v929_v12, %v936_v35  ;;  %v958_v17 = vrot.slane %v930_v13, %v936_v35 }
  0xb6   : > { %v959_v18 = vcombine.low %v937_v14, %v944_v15 }
  0xb7   : > { %v960_v19 = vcombine.low %v951_v16, %v958_v17 }
  0xb8   : > { %v967_v20 = vrot.slane %v959_v18, %v936_v35 }
  0xb9   : > { %v974_v21 = vrot.slane %v960_v19, %v936_v35 }
  0xbb   : > { %v975_v22 = vcombine.low %v967_v20, %v974_v21 }
  0xbd   : > { %977 = vst [vmem:[#allocation2] sm:$0xff] %v975_v22 }
  0xbe PF: > { %v3777_v23 = vld [vmem:[%s4850_s18 + $0x4] ss:$16 sps:$4 sm:$0xff]   ;;  %v3779_v24 = vld [vmem:[%s4850_s18 + $0xc] ss:$16 sps:$4 sm:$0xff]   ;;  %v3781_v25 = vld [vmem:[%s4850_s18] ss:$16 sps:$4 sm:$0xff]   ;;  %v1237_v59 = vlaneseq }
  0xbf   : > { %2595 = vmatprep.subr.bf16.mxu0 %v3777_v23  ;;  %v3782_v26 = vld [vmem:[%s4850_s18 + $0x8] ss:$16 sps:$4 sm:$0xff]   ;;  %2759 = vmatprep.subr.bf16.mxu1 %v3779_v24  ;;  %v3783_v27 = vld [vmem:[%s4850_s18 + $0x24] ss:$16 sps:$4 sm:$0xff]   ;;  %v3785_v28 = vld [vmem:[%s4850_s18 + $0x2c] ss:$16 sps:$4 sm:$0xff]  }
  0xc0   : > { %2596 = vmatpush1.bf16.msra.mxu0 %v3781_v25  ;;  %2760 = vmatpush1.bf16.msra.mxu1 %v3782_v26  ;;  %v3787_v29 = vld [vmem:[%s4850_s18 + $0x20] ss:$16 sps:$4 sm:$0xff]   ;;  %v3788_v30 = vld [vmem:[%s4850_s18 + $0x28] ss:$16 sps:$4 sm:$0xff]   ;;  %v3789_v31 = vld [vmem:[%s4850_s18 + $0x44] ss:$16 sps:$4 sm:$0xff]  }
  0xc1   : > { %2597 = vmatprep.subr.bf16.mxu0 %v3783_v27  ;;  %2761 = vmatprep.subr.bf16.mxu1 %v3785_v28  ;;  %v3791_v32 = vld [vmem:[%s4850_s18 + $0x4c] ss:$16 sps:$4 sm:$0xff]   ;;  %v3793_v33 = vld [vmem:[%s4850_s18 + $0x40] ss:$16 sps:$4 sm:$0xff]   ;;  %v3794_v34 = vld [vmem:[%s4850_s18 + $0x48] ss:$16 sps:$4 sm:$0xff]  }
  0xc2   : > { %v3795_v35 = vld [vmem:[%s4850_s18 + $0x64] ss:$16 sps:$4 sm:$0xff]   ;;  %v3797_v36 = vld [vmem:[%s4850_s18 + $0x6c] ss:$16 sps:$4 sm:$0xff]   ;;  %v3799_v37 = vld [vmem:[%s4850_s18 + $0x60] ss:$16 sps:$4 sm:$0xff]  }
  0xc3   : > { %v3800_v38 = vld [vmem:[%s4850_s18 + $0x68] ss:$16 sps:$4 sm:$0xff]   ;;  %v3801_v39 = vld [vmem:[%s4850_s18 + $0x84] ss:$16 sps:$4 sm:$0xff]   ;;  %v3803_v40 = vld [vmem:[%s4850_s18 + $0x8c] ss:$16 sps:$4 sm:$0xff]  }
  0xc4   : > { %2598 = vmatpush1.bf16.msra.mxu0 %v3787_v29  ;;  %2762 = vmatpush1.bf16.msra.mxu1 %v3788_v30  ;;  %v3805_v41 = vld [vmem:[%s4850_s18 + $0x80] ss:$16 sps:$4 sm:$0xff]   ;;  %v3806_v42 = vld [vmem:[%s4850_s18 + $0x88] ss:$16 sps:$4 sm:$0xff]   ;;  %v3807_v43 = vld [vmem:[%s4850_s18 + $0xa4] ss:$16 sps:$4 sm:$0xff]  }
  0xc5   : > { %2599 = vmatprep.subr.bf16.mxu0 %v3789_v31  ;;  %2763 = vmatprep.subr.bf16.mxu1 %v3791_v32  ;;  %v3809_v44 = vld [vmem:[%s4850_s18 + $0xac] ss:$16 sps:$4 sm:$0xff]   ;;  %v3811_v45 = vld [vmem:[%s4850_s18 + $0xa0] ss:$16 sps:$4 sm:$0xff]   ;;  %v3812_v46 = vld [vmem:[%s4850_s18 + $0xa8] ss:$16 sps:$4 sm:$0xff]  }
  0xc6   : > { %v3813_v47 = vld [vmem:[%s4850_s18 + $0xc4] ss:$16 sps:$4 sm:$0xff]   ;;  %v3815_v48 = vld [vmem:[%s4850_s18 + $0xcc] ss:$16 sps:$4 sm:$0xff]   ;;  %v3817_v49 = vld [vmem:[%s4850_s18 + $0xc0] ss:$16 sps:$4 sm:$0xff]  }
  0xc7   : > { %v3818_v50 = vld [vmem:[%s4850_s18 + $0xc8] ss:$16 sps:$4 sm:$0xff]   ;;  %v3819_v51 = vld [vmem:[%s4850_s18 + $0xe4] ss:$16 sps:$4 sm:$0xff]   ;;  %v3821_v52 = vld [vmem:[%s4850_s18 + $0xec] ss:$16 sps:$4 sm:$0xff]  }
  0xc8   : > { %2600 = vmatpush1.bf16.msra.mxu0 %v3793_v33  ;;  %2764 = vmatpush1.bf16.msra.mxu1 %v3794_v34  ;;  %v3823_v53 = vld [vmem:[%s4850_s18 + $0xe0] ss:$16 sps:$4 sm:$0xff]   ;;  %v3824_v54 = vld [vmem:[%s4850_s18 + $0xe8] ss:$16 sps:$4 sm:$0xff]   ;;  %v3825_v55 = vld [vmem:[%s4850_s18 + $0x104] ss:$16 sps:$4 sm:$0xff]  }
  0xc9   : > { %2601 = vmatprep.subr.bf16.mxu0 %v3795_v35  ;;  %2765 = vmatprep.subr.bf16.mxu1 %v3797_v36  ;;  %v3827_v56 = vld [vmem:[%s4850_s18 + $0x10c] ss:$16 sps:$4 sm:$0xff]   ;;  %v3829_v57 = vld [vmem:[%s4850_s18 + $0x100] ss:$16 sps:$4 sm:$0xff]   ;;  %v3830_v58 = vld [vmem:[%s4850_s18 + $0x108] ss:$16 sps:$4 sm:$0xff]  }
  0xca   : > { %v4250_v60 = vmov 1966171168   ;;  %v3831_v62 = vld [vmem:[%s4850_s18 + $0x124] ss:$16 sps:$4 sm:$0xff]   ;;  %v3833_v63 = vld [vmem:[%s4850_s18 + $0x12c] ss:$16 sps:$4 sm:$0xff]  }
  0xcb   : > { %v1260_v61 = vunpack.c.l.s4 %v4250_v60  ;;  %v3835_v0 = vld [vmem:[%s4850_s18 + $0x120] ss:$16 sps:$4 sm:$0xff]   ;;  %v4926_v1 = vshrl.u32 %v1237_v59, 7  ;;  %v3836_v3 = vld [vmem:[%s4850_s18 + $0x128] ss:$16 sps:$4 sm:$0xff]  }
  0xcc   : > { %2602 = vmatpush1.bf16.msra.mxu0 %v3799_v37  ;;  %2766 = vmatpush1.bf16.msra.mxu1 %v3800_v38  ;;  %v3837_v4 = vld [vmem:[%s4850_s18 + $0x144] ss:$16 sps:$4 sm:$0xff]   ;;  %v3839_v5 = vld [vmem:[%s4850_s18 + $0x14c] ss:$16 sps:$4 sm:$0xff]   ;;  %v3841_v6 = vld [vmem:[%s4850_s18 + $0x140] ss:$16 sps:$4 sm:$0xff]  }
  0xcd   : > { %2603 = vmatprep.subr.bf16.mxu0 %v3801_v39  ;;  %2767 = vmatprep.subr.bf16.mxu1 %v3803_v40  ;;  %v1261_v2 = vunpack.c.0.s8 %v1260_v61  ;;  %v3842_v7 = vld [vmem:[%s4850_s18 + $0x148] ss:$16 sps:$4 sm:$0xff]   ;;  %v3843_v9 = vld [vmem:[%s4850_s18 + $0x164] ss:$16 sps:$4 sm:$0xff]   ;;  %v3845_v10 = vld [vmem:[%s4850_s18 + $0x16c] ss:$16 sps:$4 sm:$0xff]  }
  0xce   : > { %v978_v11 = vld [vmem:[#allocation2] sm:$0xff]  ;;  %v3847_v12 = vld [vmem:[%s4850_s18 + $0x160] ss:$16 sps:$4 sm:$0xff]   ;;  %v3849_v15 = vld [vmem:[%s4850_s18 + $0x184] ss:$16 sps:$4 sm:$0xff]  }
  0xcf   : > { %v4934_v8 = vsub.s32 %v1261_v2, %v4926_v1  ;;  %v3848_v14 = vld [vmem:[%s4850_s18 + $0x168] ss:$16 sps:$4 sm:$0xff]   ;;  %v3851_v16 = vld [vmem:[%s4850_s18 + $0x18c] ss:$16 sps:$4 sm:$0xff]   ;;  %v3853_v18 = vld [vmem:[%s4850_s18 + $0x180] ss:$16 sps:$4 sm:$0xff]   ;;  %v1258_v32 = vcombine.high %v978_v11, %v978_v11 }
  0xd0   : > { %2604 = vmatpush1.bf16.msra.mxu0 %v3805_v41  ;;  %2768 = vmatpush1.bf16.msra.mxu1 %v3806_v42  ;;  %v3854_v20 = vld [vmem:[%s4850_s18 + $0x188] ss:$16 sps:$4 sm:$0xff]   ;;  %v3855_v21 = vld [vmem:[%s4850_s18 + $0x1a4] ss:$16 sps:$4 sm:$0xff]   ;;  %v3857_v22 = vld [vmem:[%s4850_s18 + $0x1ac] ss:$16 sps:$4 sm:$0xff]  }
  0xd1   : > { %2605 = vmatprep.subr.bf16.mxu0 %v3807_v43  ;;  %2769 = vmatprep.subr.bf16.mxu1 %v3809_v44  ;;  %v1265_v13 = vrot.slane %v978_v11, %v4934_v8  ;;  %v3859_v23 = vld [vmem:[%s4850_s18 + $0x1a0] ss:$16 sps:$4 sm:$0xff]   ;;  %v3860_v24 = vld [vmem:[%s4850_s18 + $0x1a8] ss:$16 sps:$4 sm:$0xff]   ;;  %v3861_v25 = vld [vmem:[%s4850_s18 + $0x1c4] ss:$16 sps:$4 sm:$0xff]   ;;  %v1272_v36 = vrot.slane %v1258_v32, %v4934_v8 }
  0xd2   : > { %v3863_v26 = vld [vmem:[%s4850_s18 + $0x1cc] ss:$16 sps:$4 sm:$0xff]   ;;  %v3865_v27 = vld [vmem:[%s4850_s18 + $0x1c0] ss:$16 sps:$4 sm:$0xff]   ;;  %v3866_v28 = vld [vmem:[%s4850_s18 + $0x1c8] ss:$16 sps:$4 sm:$0xff]  }
  0xd3   : > { %v1273_v17 = vcombine.high %v1265_v13, %v1265_v13  ;;  %v3867_v29 = vld [vmem:[%s4850_s18 + $0x1e4] ss:$16 sps:$4 sm:$0xff]   ;;  %v3869_v30 = vld [vmem:[%s4850_s18 + $0x1ec] ss:$16 sps:$4 sm:$0xff]   ;;  %v3871_v31 = vld [vmem:[%s4850_s18 + $0x1e0] ss:$16 sps:$4 sm:$0xff]   ;;  %v4963_v38 = vrot.slane %v1265_v13, %v4934_v8  ;;  %v1274_v39 = vcombine.high %v1272_v36, %v1272_v36  ;;  %v4972_v44 = vrot.slane %v1272_v36, %v4934_v8 }
  0xd4   : > { %2606 = vmatpush1.bf16.msra.mxu0 %v3811_v45  ;;  %2770 = vmatpush1.bf16.msra.mxu1 %v3812_v46  ;;  %v3872_v33 = vld [vmem:[%s4850_s18 + $0x1e8] ss:$16 sps:$4 sm:$0xff]   ;;  %v3875_v34 = vld [vmem:[%s4850_s18 + $0x204] ss:$16 sps:$4 sm:$0xff]   ;;  %v3878_v35 = vld [vmem:[%s4850_s18 + $0x20c] ss:$16 sps:$4 sm:$0xff]  }
  0xd5   : > { %2607 = vmatprep.subr.bf16.mxu0 %v3813_v47  ;;  %2771 = vmatprep.subr.bf16.mxu1 %v3815_v48  ;;  %v1295_v19 = vrot.slane %v1273_v17, %v4934_v8  ;;  %v3873_v37 = vld [vmem:[%s4850_s18 + $0x200] ss:$16 sps:$4 sm:$0xff]   ;;  %v3876_v40 = vld [vmem:[%s4850_s18 + $0x208] ss:$16 sps:$4 sm:$0xff]   ;;  %v3881_v41 = vld [vmem:[%s4850_s18 + $0x224] ss:$16 sps:$4 sm:$0xff]   ;;  %v4969_v43 = vrot.slane %v1274_v39, %v4934_v8 }
  0xd6   : > { %v3884_v42 = vld [vmem:[%s4850_s18 + $0x22c] ss:$16 sps:$4 sm:$0xff]   ;;  %v3879_v46 = vld [vmem:[%s4850_s18 + $0x220] ss:$16 sps:$4 sm:$0xff]   ;;  %v3882_v47 = vld [vmem:[%s4850_s18 + $0x228] ss:$16 sps:$4 sm:$0xff]  }
  0xd7   : > { %2627 = vmatprep.mubr.bf16.mxu0 %v1295_v19  ;;  %2791 = vmatprep.mubr.bf16.mxu1 %v1295_v19  ;;  %v1305_v45 = vcombine.high %v1295_v19, %v1295_v19  ;;  %v3887_v48 = vld [vmem:[%s4850_s18 + $0x244] ss:$16 sps:$4 sm:$0xff]   ;;  %v3900_v59 = vld [vmem:[%s4850_s18 + $0x288] ss:$16 sps:$4 sm:$0xff]   ;;  %v3908_v61 = vld [vmem:[%s4850_s18 + $0x2ac] ss:$16 sps:$4 sm:$0xff]  }
  0xd8   : > { %2608 = vmatpush1.bf16.msra.mxu0 %v3817_v49  ;;  %2772 = vmatpush1.bf16.msra.mxu1 %v3818_v50  ;;  %v3890_v49 = vld [vmem:[%s4850_s18 + $0x24c] ss:$16 sps:$4 sm:$0xff]   ;;  %v3885_v50 = vld [vmem:[%s4850_s18 + $0x240] ss:$16 sps:$4 sm:$0xff]   ;;  %v3905_v60 = vld [vmem:[%s4850_s18 + $0x2a4] ss:$16 sps:$4 sm:$0xff]  }
  0xd9   : > { %2609 = vmatprep.subr.bf16.mxu0 %v3819_v51  ;;  %2773 = vmatprep.subr.bf16.mxu1 %v3821_v52  ;;  %v3888_v51 = vld [vmem:[%s4850_s18 + $0x248] ss:$16 sps:$4 sm:$0xff]   ;;  %v3893_v52 = vld [vmem:[%s4850_s18 + $0x264] ss:$16 sps:$4 sm:$0xff]   ;;  %v3914_v2 = vld [vmem:[%s4850_s18 + $0x2cc] ss:$16 sps:$4 sm:$0xff]  }
  0xda   : > { %v3918_v8 = vld [vmem:[%s4850_s18 + $0x2e8] ss:$16 sps:$4 sm:$0xff]   ;;  %v3921_v11 = vld [vmem:[%s4850_s18 + $0x300] ss:$16 sps:$4 sm:$0xff]   ;;  %v3929_v13 = vld [vmem:[%s4850_s18 + $0x324] ss:$16 sps:$4 sm:$0xff]  }
  0xdb   : > { %v3935_v17 = vld [vmem:[%s4850_s18 + $0x344] ss:$16 sps:$4 sm:$0xff]   ;;  %v3933_v19 = vld [vmem:[%s4850_s18 + $0x340] ss:$16 sps:$4 sm:$0xff]   ;;  %v3954_v32 = vld [vmem:[%s4850_s18 + $0x3a8] ss:$16 sps:$4 sm:$0xff]  }
  0xdc   : > { %2610 = vmatpush1.bf16.msra.mxu0 %v3823_v53  ;;  %2774 = vmatpush1.bf16.msra.mxu1 %v3824_v54  ;;  %v3896_v53 = vld [vmem:[%s4850_s18 + $0x26c] ss:$16 sps:$4 sm:$0xff]   ;;  %v3891_v54 = vld [vmem:[%s4850_s18 + $0x260] ss:$16 sps:$4 sm:$0xff]   ;;  %v3960_v36 = vld [vmem:[%s4850_s18 + $0x3c8] ss:$16 sps:$4 sm:$0xff]  }
  0xdd   : > { %2611 = vmatprep.subr.bf16.mxu0 %v3825_v55  ;;  %2775 = vmatprep.subr.bf16.mxu1 %v3827_v56  ;;  %v3894_v55 = vld [vmem:[%s4850_s18 + $0x268] ss:$16 sps:$4 sm:$0xff]   ;;  %v3899_v56 = vld [vmem:[%s4850_s18 + $0x284] ss:$16 sps:$4 sm:$0xff]   ;;  %v3968_v39 = vld [vmem:[%s4850_s18 + $0x3ec] ss:$16 sps:$4 sm:$0xff]  }
  0xe0   : > { %2612 = vmatpush1.bf16.msra.mxu0 %v3829_v57  ;;  %2776 = vmatpush1.bf16.msra.mxu1 %v3830_v58  ;;  %v3902_v57 = vld [vmem:[%s4850_s18 + $0x28c] ss:$16 sps:$4 sm:$0xff]   ;;  %v3897_v58 = vld [vmem:[%s4850_s18 + $0x280] ss:$16 sps:$4 sm:$0xff]  }
  0xe1   : > { %2613 = vmatprep.subr.bf16.mxu0 %v3831_v62  ;;  %2777 = vmatprep.subr.bf16.mxu1 %v3833_v63  ;;  %v3903_v62 = vld [vmem:[%s4850_s18 + $0x2a0] ss:$16 sps:$4 sm:$0xff]   ;;  %v3906_v63 = vld [vmem:[%s4850_s18 + $0x2a8] ss:$16 sps:$4 sm:$0xff]  }
  0xe4   : > { %2614 = vmatpush1.bf16.msra.mxu0 %v3835_v0  ;;  %2778 = vmatpush1.bf16.msra.mxu1 %v3836_v3  ;;  %v3911_v0 = vld [vmem:[%s4850_s18 + $0x2c4] ss:$16 sps:$4 sm:$0xff]   ;;  %v3909_v3 = vld [vmem:[%s4850_s18 + $0x2c0] ss:$16 sps:$4 sm:$0xff]  }
  0xe5   : > { %2615 = vmatprep.subr.bf16.mxu0 %v3837_v4  ;;  %2779 = vmatprep.subr.bf16.mxu1 %v3839_v5  ;;  %v3912_v4 = vld [vmem:[%s4850_s18 + $0x2c8] ss:$16 sps:$4 sm:$0xff]   ;;  %v3917_v5 = vld [vmem:[%s4850_s18 + $0x2e4] ss:$16 sps:$4 sm:$0xff]  }
  0xe8   : > { %2616 = vmatpush1.bf16.msra.mxu0 %v3841_v6  ;;  %2780 = vmatpush1.bf16.msra.mxu1 %v3842_v7  ;;  %v3920_v6 = vld [vmem:[%s4850_s18 + $0x2ec] ss:$16 sps:$4 sm:$0xff]   ;;  %v3915_v7 = vld [vmem:[%s4850_s18 + $0x2e0] ss:$16 sps:$4 sm:$0xff]  }
  0xe9   : > { %2617 = vmatprep.subr.bf16.mxu0 %v3843_v9  ;;  %2781 = vmatprep.subr.bf16.mxu1 %v3845_v10  ;;  %v3923_v9 = vld [vmem:[%s4850_s18 + $0x304] ss:$16 sps:$4 sm:$0xff]   ;;  %v3926_v10 = vld [vmem:[%s4850_s18 + $0x30c] ss:$16 sps:$4 sm:$0xff]  }
  0xec   : > { %2618 = vmatpush1.bf16.msra.mxu0 %v3847_v12  ;;  %2782 = vmatpush1.bf16.msra.mxu1 %v3848_v14  ;;  %v3924_v12 = vld [vmem:[%s4850_s18 + $0x308] ss:$16 sps:$4 sm:$0xff]   ;;  %v3932_v14 = vld [vmem:[%s4850_s18 + $0x32c] ss:$16 sps:$4 sm:$0xff]  }
  0xed   : > { %2619 = vmatprep.subr.bf16.mxu0 %v3849_v15  ;;  %2783 = vmatprep.subr.bf16.mxu1 %v3851_v16  ;;  %v3927_v15 = vld [vmem:[%s4850_s18 + $0x320] ss:$16 sps:$4 sm:$0xff]   ;;  %v3930_v16 = vld [vmem:[%s4850_s18 + $0x328] ss:$16 sps:$4 sm:$0xff]  }
  0xf0   : > { %2620 = vmatpush1.bf16.msra.mxu0 %v3853_v18  ;;  %2784 = vmatpush1.bf16.msra.mxu1 %v3854_v20  ;;  %v3938_v18 = vld [vmem:[%s4850_s18 + $0x34c] ss:$16 sps:$4 sm:$0xff]   ;;  %v3936_v20 = vld [vmem:[%s4850_s18 + $0x348] ss:$16 sps:$4 sm:$0xff]  }
  0xf1   : > { %2621 = vmatprep.subr.bf16.mxu0 %v3855_v21  ;;  %2785 = vmatprep.subr.bf16.mxu1 %v3857_v22  ;;  %v3941_v21 = vld [vmem:[%s4850_s18 + $0x364] ss:$16 sps:$4 sm:$0xff]   ;;  %v3944_v22 = vld [vmem:[%s4850_s18 + $0x36c] ss:$16 sps:$4 sm:$0xff]  }
  0xf4   : > { %2622 = vmatpush1.bf16.msra.mxu0 %v3859_v23  ;;  %2786 = vmatpush1.bf16.msra.mxu1 %v3860_v24  ;;  %v3939_v23 = vld [vmem:[%s4850_s18 + $0x360] ss:$16 sps:$4 sm:$0xff]   ;;  %v3942_v24 = vld [vmem:[%s4850_s18 + $0x368] ss:$16 sps:$4 sm:$0xff]  }
  0xf5   : > { %2623 = vmatprep.subr.bf16.mxu0 %v3861_v25  ;;  %2787 = vmatprep.subr.bf16.mxu1 %v3863_v26  ;;  %v3947_v25 = vld [vmem:[%s4850_s18 + $0x384] ss:$16 sps:$4 sm:$0xff]   ;;  %v3950_v26 = vld [vmem:[%s4850_s18 + $0x38c] ss:$16 sps:$4 sm:$0xff]  }
  0xf8   : > { %2624 = vmatpush1.bf16.msra.mxu0 %v3865_v27  ;;  %2788 = vmatpush1.bf16.msra.mxu1 %v3866_v28  ;;  %v3945_v27 = vld [vmem:[%s4850_s18 + $0x380] ss:$16 sps:$4 sm:$0xff]   ;;  %v3948_v28 = vld [vmem:[%s4850_s18 + $0x388] ss:$16 sps:$4 sm:$0xff]  }
  0xf9   : > { %2625 = vmatprep.subr.bf16.mxu0 %v3867_v29  ;;  %2789 = vmatprep.subr.bf16.mxu1 %v3869_v30  ;;  %v3953_v29 = vld [vmem:[%s4850_s18 + $0x3a4] ss:$16 sps:$4 sm:$0xff]   ;;  %v3956_v30 = vld [vmem:[%s4850_s18 + $0x3ac] ss:$16 sps:$4 sm:$0xff]  }
  0xfc   : > { %2626 = vmatpush1.bf16.msra.mxu0 %v3871_v31  ;;  %2790 = vmatpush1.bf16.msra.mxu1 %v3872_v33  ;;  %v3951_v31 = vld [vmem:[%s4850_s18 + $0x3a0] ss:$16 sps:$4 sm:$0xff]   ;;  %v3959_v33 = vld [vmem:[%s4850_s18 + $0x3c4] ss:$16 sps:$4 sm:$0xff]  }
  0xfd   : > { %2636 = vmatprep.subr.bf16.mxu0 %v3875_v34  ;;  %2800 = vmatprep.subr.bf16.mxu1 %v3878_v35  ;;  %v3962_v34 = vld [vmem:[%s4850_s18 + $0x3cc] ss:$16 sps:$4 sm:$0xff]   ;;  %v3957_v35 = vld [vmem:[%s4850_s18 + $0x3c0] ss:$16 sps:$4 sm:$0xff]  }
  0xff   : > { %2628 = vmatmul.mubr.bf16.vlgmr.msra.gmra.mrb[0].mxu0 %v4963_v38  ;;  %2792 = vmatmul.mubr.bf16.vlgmr.msra.gmra.mrb[0].mxu1 %v4963_v38 }
 0x100   : > { %2637 = vmatpush1.bf16.msra.mxu0 %v3873_v37  ;;  %2801 = vmatpush1.bf16.msra.mxu1 %v3876_v40  ;;  %v3965_v37 = vld [vmem:[%s4850_s18 + $0x3e4] ss:$16 sps:$4 sm:$0xff]   ;;  %v3963_v40 = vld [vmem:[%s4850_s18 + $0x3e0] ss:$16 sps:$4 sm:$0xff]  }
 0x101   : > { %2638 = vmatprep.subr.bf16.mxu0 %v3881_v41  ;;  %2802 = vmatprep.subr.bf16.mxu1 %v3884_v42  ;;  %v3966_v41 = vld [vmem:[%s4850_s18 + $0x3e8] ss:$16 sps:$4 sm:$0xff]   ;;  %v3971_v42 = vld [vmem:[%s4850_s18 + $0x404] ss:$16 sps:$4 sm:$0xff]  }
 0x102   : > { %2668 = vmatprep.mubr.bf16.mxu0 %v1305_v45  ;;  %2832 = vmatprep.mubr.bf16.mxu1 %v1305_v45  ;;  %v3974_v45 = vld [vmem:[%s4850_s18 + $0x40c] ss:$16 sps:$4 sm:$0xff]  }
 0x104   : > { %2639 = vmatpush1.bf16.msra.mxu0 %v3879_v46  ;;  %2803 = vmatpush1.bf16.msra.mxu1 %v3882_v47  ;;  %v3969_v46 = vld [vmem:[%s4850_s18 + $0x400] ss:$16 sps:$4 sm:$0xff]   ;;  %v1303_v47 = vcombine.high %v4963_v38, %v4963_v38  ;;  %v3978_v38 = vld [vmem:[%s4850_s18 + $0x428] ss:$16 sps:$4 sm:$0xff]  }
 0x105   : > { %2640 = vmatprep.subr.bf16.mxu0 %v3887_v48  ;;  %2804 = vmatprep.subr.bf16.mxu1 %v3890_v49  ;;  %v3972_v48 = vld [vmem:[%s4850_s18 + $0x408] ss:$16 sps:$4 sm:$0xff]   ;;  %v3977_v49 = vld [vmem:[%s4850_s18 + $0x424] ss:$16 sps:$4 sm:$0xff]  }
 0x108   : > { %2641 = vmatpush1.bf16.msra.mxu0 %v3885_v50  ;;  %2805 = vmatpush1.bf16.msra.mxu1 %v3888_v51  ;;  %v3980_v50 = vld [vmem:[%s4850_s18 + $0x42c] ss:$16 sps:$4 sm:$0xff]   ;;  %v3975_v51 = vld [vmem:[%s4850_s18 + $0x420] ss:$16 sps:$4 sm:$0xff]  }
 0x109   : > { %2642 = vmatprep.subr.bf16.mxu0 %v3893_v52  ;;  %2806 = vmatprep.subr.bf16.mxu1 %v3896_v53  ;;  %v3983_v52 = vld [vmem:[%s4850_s18 + $0x444] ss:$16 sps:$4 sm:$0xff]   ;;  %v3986_v53 = vld [vmem:[%s4850_s18 + $0x44c] ss:$16 sps:$4 sm:$0xff]  }
 0x10c   : > { %2643 = vmatpush1.bf16.msra.mxu0 %v3891_v54  ;;  %2807 = vmatpush1.bf16.msra.mxu1 %v3894_v55  ;;  %v3981_v54 = vld [vmem:[%s4850_s18 + $0x440] ss:$16 sps:$4 sm:$0xff]   ;;  %v3984_v55 = vld [vmem:[%s4850_s18 + $0x448] ss:$16 sps:$4 sm:$0xff]  }
 0x10d   : > { %2644 = vmatprep.subr.bf16.mxu0 %v3899_v56  ;;  %2808 = vmatprep.subr.bf16.mxu1 %v3902_v57  ;;  %v3989_v56 = vld [vmem:[%s4850_s18 + $0x464] ss:$16 sps:$4 sm:$0xff]   ;;  %v3992_v57 = vld [vmem:[%s4850_s18 + $0x46c] ss:$16 sps:$4 sm:$0xff]  }
 0x110   : > { %2645 = vmatpush1.bf16.msra.mxu0 %v3897_v58  ;;  %2809 = vmatpush1.bf16.msra.mxu1 %v3900_v59  ;;  %v3987_v58 = vld [vmem:[%s4850_s18 + $0x460] ss:$16 sps:$4 sm:$0xff]   ;;  %v3990_v59 = vld [vmem:[%s4850_s18 + $0x468] ss:$16 sps:$4 sm:$0xff]  }
 0x111   : > { %2646 = vmatprep.subr.bf16.mxu0 %v3905_v60  ;;  %2810 = vmatprep.subr.bf16.mxu1 %v3908_v61  ;;  %v3995_v60 = vld [vmem:[%s4850_s18 + $0x484] ss:$16 sps:$4 sm:$0xff]   ;;  %v3998_v61 = vld [vmem:[%s4850_s18 + $0x48c] ss:$16 sps:$4 sm:$0xff]  }
 0x114   : > { %2647 = vmatpush1.bf16.msra.mxu0 %v3903_v62  ;;  %2811 = vmatpush1.bf16.msra.mxu1 %v3906_v63  ;;  %v3993_v62 = vld [vmem:[%s4850_s18 + $0x480] ss:$16 sps:$4 sm:$0xff]   ;;  %v3996_v63 = vld [vmem:[%s4850_s18 + $0x488] ss:$16 sps:$4 sm:$0xff]  }
 0x115   : > { %2648 = vmatprep.subr.bf16.mxu0 %v3911_v0  ;;  %2812 = vmatprep.subr.bf16.mxu1 %v3914_v2  ;;  %v4001_v0 = vld [vmem:[%s4850_s18 + $0x4a4] ss:$16 sps:$4 sm:$0xff]   ;;  %v4004_v2 = vld [vmem:[%s4850_s18 + $0x4ac] ss:$16 sps:$4 sm:$0xff]  }
 0x118   : > { %2649 = vmatpush1.bf16.msra.mxu0 %v3909_v3  ;;  %2813 = vmatpush1.bf16.msra.mxu1 %v3912_v4  ;;  %v3999_v3 = vld [vmem:[%s4850_s18 + $0x4a0] ss:$16 sps:$4 sm:$0xff]   ;;  %v4002_v4 = vld [vmem:[%s4850_s18 + $0x4a8] ss:$16 sps:$4 sm:$0xff]  }
 0x119   : > { %2650 = vmatprep.subr.bf16.mxu0 %v3917_v5  ;;  %2814 = vmatprep.subr.bf16.mxu1 %v3920_v6  ;;  %v4007_v5 = vld [vmem:[%s4850_s18 + $0x4c4] ss:$16 sps:$4 sm:$0xff]   ;;  %v4010_v6 = vld [vmem:[%s4850_s18 + $0x4cc] ss:$16 sps:$4 sm:$0xff]  }
 0x11c   : > { %2651 = vmatpush1.bf16.msra.mxu0 %v3915_v7  ;;  %2815 = vmatpush1.bf16.msra.mxu1 %v3918_v8  ;;  %v4005_v7 = vld [vmem:[%s4850_s18 + $0x4c0] ss:$16 sps:$4 sm:$0xff]   ;;  %v4008_v8 = vld [vmem:[%s4850_s18 + $0x4c8] ss:$16 sps:$4 sm:$0xff]  }
 0x11d   : > { %2652 = vmatprep.subr.bf16.mxu0 %v3923_v9  ;;  %2816 = vmatprep.subr.bf16.mxu1 %v3926_v10  ;;  %v4013_v9 = vld [vmem:[%s4850_s18 + $0x4e4] ss:$16 sps:$4 sm:$0xff]   ;;  %v4016_v10 = vld [vmem:[%s4850_s18 + $0x4ec] ss:$16 sps:$4 sm:$0xff]  }
 0x120   : > { %2653 = vmatpush1.bf16.msra.mxu0 %v3921_v11  ;;  %2817 = vmatpush1.bf16.msra.mxu1 %v3924_v12  ;;  %v4011_v11 = vld [vmem:[%s4850_s18 + $0x4e0] ss:$16 sps:$4 sm:$0xff]   ;;  %v4014_v12 = vld [vmem:[%s4850_s18 + $0x4e8] ss:$16 sps:$4 sm:$0xff]  }
 0x121   : > { %2654 = vmatprep.subr.bf16.mxu0 %v3929_v13  ;;  %2818 = vmatprep.subr.bf16.mxu1 %v3932_v14  ;;  %v4019_v13 = vld [vmem:[%s4850_s18 + $0x504] ss:$16 sps:$4 sm:$0xff]   ;;  %v4022_v14 = vld [vmem:[%s4850_s18 + $0x50c] ss:$16 sps:$4 sm:$0xff]  }
 0x124   : > { %2655 = vmatpush1.bf16.msra.mxu0 %v3927_v15  ;;  %2819 = vmatpush1.bf16.msra.mxu1 %v3930_v16  ;;  %v4017_v15 = vld [vmem:[%s4850_s18 + $0x500] ss:$16 sps:$4 sm:$0xff]   ;;  %v4020_v16 = vld [vmem:[%s4850_s18 + $0x508] ss:$16 sps:$4 sm:$0xff]  }
 0x125   : > { %2656 = vmatprep.subr.bf16.mxu0 %v3935_v17  ;;  %2820 = vmatprep.subr.bf16.mxu1 %v3938_v18  ;;  %v4025_v17 = vld [vmem:[%s4850_s18 + $0x524] ss:$16 sps:$4 sm:$0xff]   ;;  %v4028_v18 = vld [vmem:[%s4850_s18 + $0x52c] ss:$16 sps:$4 sm:$0xff]  }
 0x128   : > { %2657 = vmatpush1.bf16.msra.mxu0 %v3933_v19  ;;  %2821 = vmatpush1.bf16.msra.mxu1 %v3936_v20  ;;  %v4023_v19 = vld [vmem:[%s4850_s18 + $0x520] ss:$16 sps:$4 sm:$0xff]   ;;  %v4026_v20 = vld [vmem:[%s4850_s18 + $0x528] ss:$16 sps:$4 sm:$0xff]  }
 0x129   : > { %2658 = vmatprep.subr.bf16.mxu0 %v3941_v21  ;;  %2822 = vmatprep.subr.bf16.mxu1 %v3944_v22  ;;  %v4031_v21 = vld [vmem:[%s4850_s18 + $0x544] ss:$16 sps:$4 sm:$0xff]   ;;  %v4034_v22 = vld [vmem:[%s4850_s18 + $0x54c] ss:$16 sps:$4 sm:$0xff]  }
 0x12c   : > { %2659 = vmatpush1.bf16.msra.mxu0 %v3939_v23  ;;  %2823 = vmatpush1.bf16.msra.mxu1 %v3942_v24  ;;  %v4029_v23 = vld [vmem:[%s4850_s18 + $0x540] ss:$16 sps:$4 sm:$0xff]   ;;  %v4032_v24 = vld [vmem:[%s4850_s18 + $0x548] ss:$16 sps:$4 sm:$0xff]  }
 0x12d   : > { %2660 = vmatprep.subr.bf16.mxu0 %v3947_v25  ;;  %2824 = vmatprep.subr.bf16.mxu1 %v3950_v26  ;;  %v4037_v25 = vld [vmem:[%s4850_s18 + $0x564] ss:$16 sps:$4 sm:$0xff]   ;;  %v4040_v26 = vld [vmem:[%s4850_s18 + $0x56c] ss:$16 sps:$4 sm:$0xff]  }
 0x130   : > { %2661 = vmatpush1.bf16.msra.mxu0 %v3945_v27  ;;  %2825 = vmatpush1.bf16.msra.mxu1 %v3948_v28  ;;  %v4035_v27 = vld [vmem:[%s4850_s18 + $0x560] ss:$16 sps:$4 sm:$0xff]   ;;  %v4038_v28 = vld [vmem:[%s4850_s18 + $0x568] ss:$16 sps:$4 sm:$0xff]  }
 0x131   : > { %2662 = vmatprep.subr.bf16.mxu0 %v3953_v29  ;;  %2826 = vmatprep.subr.bf16.mxu1 %v3956_v30  ;;  %v4043_v29 = vld [vmem:[%s4850_s18 + $0x584] ss:$16 sps:$4 sm:$0xff]   ;;  %v4046_v30 = vld [vmem:[%s4850_s18 + $0x58c] ss:$16 sps:$4 sm:$0xff]  }
 0x134   : > { %2663 = vmatpush1.bf16.msra.mxu0 %v3951_v31  ;;  %2827 = vmatpush1.bf16.msra.mxu1 %v3954_v32  ;;  %v4041_v31 = vld [vmem:[%s4850_s18 + $0x580] ss:$16 sps:$4 sm:$0xff]   ;;  %v4044_v32 = vld [vmem:[%s4850_s18 + $0x588] ss:$16 sps:$4 sm:$0xff]  }
 0x135   : > { %2664 = vmatprep.subr.bf16.mxu0 %v3959_v33  ;;  %2828 = vmatprep.subr.bf16.mxu1 %v3962_v34  ;;  %v4049_v33 = vld [vmem:[%s4850_s18 + $0x5a4] ss:$16 sps:$4 sm:$0xff]   ;;  %v4052_v34 = vld [vmem:[%s4850_s18 + $0x5ac] ss:$16 sps:$4 sm:$0xff]  }
 0x138   : > { %2665 = vmatpush1.bf16.msra.mxu0 %v3957_v35  ;;  %2829 = vmatpush1.bf16.msra.mxu1 %v3960_v36  ;;  %v4047_v35 = vld [vmem:[%s4850_s18 + $0x5a0] ss:$16 sps:$4 sm:$0xff]   ;;  %v4050_v36 = vld [vmem:[%s4850_s18 + $0x5a8] ss:$16 sps:$4 sm:$0xff]  }
 0x139   : > { %2666 = vmatprep.subr.bf16.mxu0 %v3965_v37  ;;  %2830 = vmatprep.subr.bf16.mxu1 %v3968_v39  ;;  %v4055_v37 = vld [vmem:[%s4850_s18 + $0x5c4] ss:$16 sps:$4 sm:$0xff]   ;;  %v4058_v39 = vld [vmem:[%s4850_s18 + $0x5cc] ss:$16 sps:$4 sm:$0xff]  }
 0x13c   : > { %2667 = vmatpush1.bf16.msra.mxu0 %v3963_v40  ;;  %2831 = vmatpush1.bf16.msra.mxu1 %v3966_v41  ;;  %v4053_v40 = vld [vmem:[%s4850_s18 + $0x5c0] ss:$16 sps:$4 sm:$0xff]   ;;  %v4056_v41 = vld [vmem:[%s4850_s18 + $0x5c8] ss:$16 sps:$4 sm:$0xff]  }
 0x13d   : > { %2677 = vmatprep.subr.bf16.mxu0 %v3971_v42  ;;  %2841 = vmatprep.subr.bf16.mxu1 %v3974_v45  ;;  %v4061_v42 = vld [vmem:[%s4850_s18 + $0x5e4] ss:$16 sps:$4 sm:$0xff]   ;;  %v4064_v45 = vld [vmem:[%s4850_s18 + $0x5ec] ss:$16 sps:$4 sm:$0xff]  }
 0x13f   : > { %2669 = vmatmul.mubr.bf16.vlgmr.msra.gmra.mrb[0].mxu0 %v1303_v47  ;;  %2833 = vmatmul.mubr.bf16.vlgmr.msra.gmra.mrb[0].mxu1 %v1303_v47  ;;  %v4062_v47 = vld [vmem:[%s4850_s18 + $0x5e8] ss:$16 sps:$4 sm:$0xff]  }
 0x140   : > { %2678 = vmatpush1.bf16.msra.mxu0 %v3969_v46  ;;  %2842 = vmatpush1.bf16.msra.mxu1 %v3972_v48  ;;  %v4059_v46 = vld [vmem:[%s4850_s18 + $0x5e0] ss:$16 sps:$4 sm:$0xff]   ;;  %v4068_v48 = vld [vmem:[%s4850_s18 + $0x604] ss:$16 sps:$4 sm:$0xff]  }
 0x141   : > { %2679 = vmatprep.subr.bf16.mxu0 %v3977_v49  ;;  %2843 = vmatprep.subr.bf16.mxu1 %v3980_v50  ;;  %v4071_v49 = vld [vmem:[%s4850_s18 + $0x60c] ss:$16 sps:$4 sm:$0xff]   ;;  %v4066_v50 = vld [vmem:[%s4850_s18 + $0x600] ss:$16 sps:$4 sm:$0xff]  }
 0x142   : > { %2709 = vmatprep.mubr.bf16.mxu0 %v4969_v43  ;;  %2873 = vmatprep.mubr.bf16.mxu1 %v4969_v43 }
 0x144   : > { %2680 = vmatpush1.bf16.msra.mxu0 %v3975_v51  ;;  %2844 = vmatpush1.bf16.msra.mxu1 %v3978_v38  ;;  %v4069_v51 = vld [vmem:[%s4850_s18 + $0x608] ss:$16 sps:$4 sm:$0xff]   ;;  %v4074_v38 = vld [vmem:[%s4850_s18 + $0x624] ss:$16 sps:$4 sm:$0xff]  }
 0x145   : > { %2681 = vmatprep.subr.bf16.mxu0 %v3983_v52  ;;  %2845 = vmatprep.subr.bf16.mxu1 %v3986_v53  ;;  %v4077_v52 = vld [vmem:[%s4850_s18 + $0x62c] ss:$16 sps:$4 sm:$0xff]   ;;  %v4072_v53 = vld [vmem:[%s4850_s18 + $0x620] ss:$16 sps:$4 sm:$0xff]  }
 0x148   : > { %2682 = vmatpush1.bf16.msra.mxu0 %v3981_v54  ;;  %2846 = vmatpush1.bf16.msra.mxu1 %v3984_v55  ;;  %v4075_v54 = vld [vmem:[%s4850_s18 + $0x628] ss:$16 sps:$4 sm:$0xff]   ;;  %v1306_v55 = vcombine.high %v4969_v43, %v4969_v43 }
 0x149   : > { %2683 = vmatprep.subr.bf16.mxu0 %v3989_v56  ;;  %2847 = vmatprep.subr.bf16.mxu1 %v3992_v57  ;;  %v4080_v56 = vld [vmem:[%s4850_s18 + $0x644] ss:$16 sps:$4 sm:$0xff]   ;;  %v4083_v57 = vld [vmem:[%s4850_s18 + $0x64c] ss:$16 sps:$4 sm:$0xff]   ;;  %v4081_v43 = vld [vmem:[%s4850_s18 + $0x648] ss:$16 sps:$4 sm:$0xff]  }
 0x14c   : > { %2684 = vmatpush1.bf16.msra.mxu0 %v3987_v58  ;;  %2848 = vmatpush1.bf16.msra.mxu1 %v3990_v59  ;;  %v4078_v58 = vld [vmem:[%s4850_s18 + $0x640] ss:$16 sps:$4 sm:$0xff]   ;;  %v4086_v59 = vld [vmem:[%s4850_s18 + $0x664] ss:$16 sps:$4 sm:$0xff]  }
 0x14d   : > { %2685 = vmatprep.subr.bf16.mxu0 %v3995_v60  ;;  %2849 = vmatprep.subr.bf16.mxu1 %v3998_v61  ;;  %v4089_v60 = vld [vmem:[%s4850_s18 + $0x66c] ss:$16 sps:$4 sm:$0xff]   ;;  %v4084_v61 = vld [vmem:[%s4850_s18 + $0x660] ss:$16 sps:$4 sm:$0xff]  }
 0x150   : > { %2686 = vmatpush1.bf16.msra.mxu0 %v3993_v62  ;;  %2850 = vmatpush1.bf16.msra.mxu1 %v3996_v63  ;;  %v4087_v62 = vld [vmem:[%s4850_s18 + $0x668] ss:$16 sps:$4 sm:$0xff]   ;;  %v4092_v63 = vld [vmem:[%s4850_s18 + $0x684] ss:$16 sps:$4 sm:$0xff]  }
 0x151   : > { %2687 = vmatprep.subr.bf16.mxu0 %v4001_v0  ;;  %2851 = vmatprep.subr.bf16.mxu1 %v4004_v2  ;;  %v4095_v0 = vld [vmem:[%s4850_s18 + $0x68c] ss:$16 sps:$4 sm:$0xff]   ;;  %v4090_v2 = vld [vmem:[%s4850_s18 + $0x680] ss:$16 sps:$4 sm:$0xff]  }
 0x154   : > { %2688 = vmatpush1.bf16.msra.mxu0 %v3999_v3  ;;  %2852 = vmatpush1.bf16.msra.mxu1 %v4002_v4  ;;  %v4093_v3 = vld [vmem:[%s4850_s18 + $0x688] ss:$16 sps:$4 sm:$0xff]   ;;  %v4098_v4 = vld [vmem:[%s4850_s18 + $0x6a4] ss:$16 sps:$4 sm:$0xff]  }
 0x155   : > { %2689 = vmatprep.subr.bf16.mxu0 %v4007_v5  ;;  %2853 = vmatprep.subr.bf16.mxu1 %v4010_v6  ;;  %v4101_v5 = vld [vmem:[%s4850_s18 + $0x6ac] ss:$16 sps:$4 sm:$0xff]   ;;  %v4096_v6 = vld [vmem:[%s4850_s18 + $0x6a0] ss:$16 sps:$4 sm:$0xff]  }
 0x158   : > { %2690 = vmatpush1.bf16.msra.mxu0 %v4005_v7  ;;  %2854 = vmatpush1.bf16.msra.mxu1 %v4008_v8  ;;  %v4099_v7 = vld [vmem:[%s4850_s18 + $0x6a8] ss:$16 sps:$4 sm:$0xff]   ;;  %v4104_v8 = vld [vmem:[%s4850_s18 + $0x6c4] ss:$16 sps:$4 sm:$0xff]  }
 0x159   : > { %2691 = vmatprep.subr.bf16.mxu0 %v4013_v9  ;;  %2855 = vmatprep.subr.bf16.mxu1 %v4016_v10  ;;  %v4107_v9 = vld [vmem:[%s4850_s18 + $0x6cc] ss:$16 sps:$4 sm:$0xff]   ;;  %v4102_v10 = vld [vmem:[%s4850_s18 + $0x6c0] ss:$16 sps:$4 sm:$0xff]  }
 0x15c   : > { %2692 = vmatpush1.bf16.msra.mxu0 %v4011_v11  ;;  %2856 = vmatpush1.bf16.msra.mxu1 %v4014_v12  ;;  %v4105_v11 = vld [vmem:[%s4850_s18 + $0x6c8] ss:$16 sps:$4 sm:$0xff]   ;;  %v4110_v12 = vld [vmem:[%s4850_s18 + $0x6e4] ss:$16 sps:$4 sm:$0xff]  }
 0x15d   : > { %2693 = vmatprep.subr.bf16.mxu0 %v4019_v13  ;;  %2857 = vmatprep.subr.bf16.mxu1 %v4022_v14  ;;  %v4113_v13 = vld [vmem:[%s4850_s18 + $0x6ec] ss:$16 sps:$4 sm:$0xff]   ;;  %v4108_v14 = vld [vmem:[%s4850_s18 + $0x6e0] ss:$16 sps:$4 sm:$0xff]  }
 0x160   : > { %2694 = vmatpush1.bf16.msra.mxu0 %v4017_v15  ;;  %2858 = vmatpush1.bf16.msra.mxu1 %v4020_v16  ;;  %v4111_v15 = vld [vmem:[%s4850_s18 + $0x6e8] ss:$16 sps:$4 sm:$0xff]   ;;  %v4116_v16 = vld [vmem:[%s4850_s18 + $0x704] ss:$16 sps:$4 sm:$0xff]  }
 0x161   : > { %2695 = vmatprep.subr.bf16.mxu0 %v4025_v17  ;;  %2859 = vmatprep.subr.bf16.mxu1 %v4028_v18  ;;  %v4119_v17 = vld [vmem:[%s4850_s18 + $0x70c] ss:$16 sps:$4 sm:$0xff]   ;;  %v4114_v18 = vld [vmem:[%s4850_s18 + $0x700] ss:$16 sps:$4 sm:$0xff]  }
 0x164   : > { %2696 = vmatpush1.bf16.msra.mxu0 %v4023_v19  ;;  %2860 = vmatpush1.bf16.msra.mxu1 %v4026_v20  ;;  %v4117_v19 = vld [vmem:[%s4850_s18 + $0x708] ss:$16 sps:$4 sm:$0xff]   ;;  %v4122_v20 = vld [vmem:[%s4850_s18 + $0x724] ss:$16 sps:$4 sm:$0xff]  }
 0x165   : > { %2697 = vmatprep.subr.bf16.mxu0 %v4031_v21  ;;  %2861 = vmatprep.subr.bf16.mxu1 %v4034_v22  ;;  %v4125_v21 = vld [vmem:[%s4850_s18 + $0x72c] ss:$16 sps:$4 sm:$0xff]   ;;  %v4120_v22 = vld [vmem:[%s4850_s18 + $0x720] ss:$16 sps:$4 sm:$0xff]  }
 0x168   : > { %2698 = vmatpush1.bf16.msra.mxu0 %v4029_v23  ;;  %2862 = vmatpush1.bf16.msra.mxu1 %v4032_v24  ;;  %v4123_v23 = vld [vmem:[%s4850_s18 + $0x728] ss:$16 sps:$4 sm:$0xff]   ;;  %v4128_v24 = vld [vmem:[%s4850_s18 + $0x744] ss:$16 sps:$4 sm:$0xff]  }
 0x169   : > { %2699 = vmatprep.subr.bf16.mxu0 %v4037_v25  ;;  %2863 = vmatprep.subr.bf16.mxu1 %v4040_v26  ;;  %v4131_v25 = vld [vmem:[%s4850_s18 + $0x74c] ss:$16 sps:$4 sm:$0xff]   ;;  %v4126_v26 = vld [vmem:[%s4850_s18 + $0x740] ss:$16 sps:$4 sm:$0xff]  }
 0x16c   : > { %2700 = vmatpush1.bf16.msra.mxu0 %v4035_v27  ;;  %2864 = vmatpush1.bf16.msra.mxu1 %v4038_v28  ;;  %v4129_v27 = vld [vmem:[%s4850_s18 + $0x748] ss:$16 sps:$4 sm:$0xff]   ;;  %v4134_v28 = vld [vmem:[%s4850_s18 + $0x764] ss:$16 sps:$4 sm:$0xff]  }
 0x16d   : > { %2701 = vmatprep.subr.bf16.mxu0 %v4043_v29  ;;  %2865 = vmatprep.subr.bf16.mxu1 %v4046_v30  ;;  %v4137_v29 = vld [vmem:[%s4850_s18 + $0x76c] ss:$16 sps:$4 sm:$0xff]   ;;  %v4132_v30 = vld [vmem:[%s4850_s18 + $0x760] ss:$16 sps:$4 sm:$0xff]  }
 0x170   : > { %2702 = vmatpush1.bf16.msra.mxu0 %v4041_v31  ;;  %2866 = vmatpush1.bf16.msra.mxu1 %v4044_v32  ;;  %v4135_v31 = vld [vmem:[%s4850_s18 + $0x768] ss:$16 sps:$4 sm:$0xff]   ;;  %v4140_v32 = vld [vmem:[%s4850_s18 + $0x784] ss:$16 sps:$4 sm:$0xff]  }
 0x171   : > { %2703 = vmatprep.subr.bf16.mxu0 %v4049_v33  ;;  %2867 = vmatprep.subr.bf16.mxu1 %v4052_v34  ;;  %v4143_v33 = vld [vmem:[%s4850_s18 + $0x78c] ss:$16 sps:$4 sm:$0xff]   ;;  %v4138_v34 = vld [vmem:[%s4850_s18 + $0x780] ss:$16 sps:$4 sm:$0xff]  }
 0x174   : > { %2704 = vmatpush1.bf16.msra.mxu0 %v4047_v35  ;;  %2868 = vmatpush1.bf16.msra.mxu1 %v4050_v36  ;;  %v4141_v35 = vld [vmem:[%s4850_s18 + $0x788] ss:$16 sps:$4 sm:$0xff]   ;;  %v4146_v36 = vld [vmem:[%s4850_s18 + $0x7a4] ss:$16 sps:$4 sm:$0xff]  }
 0x175   : > { %2705 = vmatprep.subr.bf16.mxu0 %v4055_v37  ;;  %2869 = vmatprep.subr.bf16.mxu1 %v4058_v39  ;;  %v4149_v37 = vld [vmem:[%s4850_s18 + $0x7ac] ss:$16 sps:$4 sm:$0xff]   ;;  %v4144_v39 = vld [vmem:[%s4850_s18 + $0x7a0] ss:$16 sps:$4 sm:$0xff]  }
 0x178   : > { %2706 = vmatpush1.bf16.msra.mxu0 %v4053_v40  ;;  %2870 = vmatpush1.bf16.msra.mxu1 %v4056_v41  ;;  %v4147_v40 = vld [vmem:[%s4850_s18 + $0x7a8] ss:$16 sps:$4 sm:$0xff]   ;;  %v4152_v41 = vld [vmem:[%s4850_s18 + $0x7c4] ss:$16 sps:$4 sm:$0xff]  }
 0x179   : > { %2707 = vmatprep.subr.bf16.mxu0 %v4061_v42  ;;  %2871 = vmatprep.subr.bf16.mxu1 %v4064_v45  ;;  %v4155_v42 = vld [vmem:[%s4850_s18 + $0x7cc] ss:$16 sps:$4 sm:$0xff]   ;;  %v4150_v45 = vld [vmem:[%s4850_s18 + $0x7c0] ss:$16 sps:$4 sm:$0xff]  }
 0x17c   : > { %2708 = vmatpush1.bf16.msra.mxu0 %v4059_v46  ;;  %2872 = vmatpush1.bf16.msra.mxu1 %v4062_v47  ;;  %v4153_v46 = vld [vmem:[%s4850_s18 + $0x7c8] ss:$16 sps:$4 sm:$0xff]   ;;  %v4158_v47 = vld [vmem:[%s4850_s18 + $0x7e4] ss:$16 sps:$4 sm:$0xff]  }
 0x17d   : > { %2718 = vmatprep.subr.bf16.mxu0 %v4068_v48  ;;  %2882 = vmatprep.subr.bf16.mxu1 %v4071_v49  ;;  %v4161_v48 = vld [vmem:[%s4850_s18 + $0x7ec] ss:$16 sps:$4 sm:$0xff]   ;;  %v4156_v49 = vld [vmem:[%s4850_s18 + $0x7e0] ss:$16 sps:$4 sm:$0xff]  }
 0x17f   : > { %2710 = vmatmul.mubr.bf16.vlgmr.msra.gmra.mrb[0].mxu0 %v4972_v44  ;;  %2874 = vmatmul.mubr.bf16.vlgmr.msra.gmra.mrb[0].mxu1 %v4972_v44 }
 0x180   : > { %2719 = vmatpush1.bf16.msra.mxu0 %v4066_v50  ;;  %2883 = vmatpush1.bf16.msra.mxu1 %v4069_v51  ;;  %v4159_v50 = vld [vmem:[%s4850_s18 + $0x7e8] ss:$16 sps:$4 sm:$0xff]  }
 0x181   : > { %2720 = vmatprep.subr.bf16.mxu0 %v4074_v38  ;;  %2884 = vmatprep.subr.bf16.mxu1 %v4077_v52  ;;  %v4162_v51 = vld [vmem:[%s4848_s20 + $0x40] sm:$0xff]   ;;  %v1304_v52 = vcombine.high %v4972_v44, %v4972_v44  ;;  %v4169_v44 = vld [vmem:[%s4848_s20 + $0x88] sm:$0xff]  }
 0x182   : > { %2750 = vmatprep.mubr.bf16.mxu0 %v1306_v55  ;;  %2914 = vmatprep.mubr.bf16.mxu1 %v1306_v55  ;;  %v4163_v38 = vld [vmem:[%s4848_s20 + $0xc0] sm:$0xff]   ;;  %v4166_v55 = vld [vmem:[%s4848_s20 + $0x48] sm:$0xff]  }
 0x184   : > { %2721 = vmatpush1.bf16.msra.mxu0 %v4072_v53  ;;  %2885 = vmatpush1.bf16.msra.mxu1 %v4075_v54  ;;  %v4164_v53 = vld [vmem:[%s4848_s20] sm:$0xff]  }
 0x185   : > { %2722 = vmatprep.subr.bf16.mxu0 %v4080_v56  ;;  %2886 = vmatprep.subr.bf16.mxu1 %v4083_v57  ;;  %v4165_v54 = vld [vmem:[%s4848_s20 + $0x80] sm:$0xff]   ;;  %v4167_v56 = vld [vmem:[%s4848_s20 + $0xc8] sm:$0xff]  }
 0x186   : > { %v4168_v57 = vld [vmem:[%s4848_s20 + $0x8] sm:$0xff]  }
 0x188   : > { %2723 = vmatpush1.bf16.msra.mxu0 %v4078_v58  ;;  %2887 = vmatpush1.bf16.msra.mxu1 %v4081_v43  ;;  %v4170_v58 = vld [vmem:[%s4848_s20 + $0x50] sm:$0xff]  }
 0x189   : > { %2724 = vmatprep.subr.bf16.mxu0 %v4086_v59  ;;  %2888 = vmatprep.subr.bf16.mxu1 %v4089_v60  ;;  %v4171_v43 = vld [vmem:[%s4848_s20 + $0xd0] sm:$0xff]  }
 0x18a   : > { %v4172_v59 = vld [vmem:[%s4848_s20 + $0x10] sm:$0xff]  }
 0x18b   : > { %v4173_v60 = vld [vmem:[%s4848_s20 + $0x90] sm:$0xff]  }
 0x18c   : > { %2725 = vmatpush1.bf16.msra.mxu0 %v4084_v61  ;;  %2889 = vmatpush1.bf16.msra.mxu1 %v4087_v62  ;;  %v4174_v61 = vld [vmem:[%s4848_s20 + $0x58] sm:$0xff]  }
 0x18d   : > { %2726 = vmatprep.subr.bf16.mxu0 %v4092_v63  ;;  %2890 = vmatprep.subr.bf16.mxu1 %v4095_v0  ;;  %v4175_v62 = vld [vmem:[%s4848_s20 + $0xd8] sm:$0xff]  }
 0x18e   : > { %v4176_v63 = vld [vmem:[%s4848_s20 + $0x18] sm:$0xff]  }
 0x18f   : > { %v4177_v0 = vld [vmem:[%s4848_s20 + $0x98] sm:$0xff]  }
 0x190   : > { %2727 = vmatpush1.bf16.msra.mxu0 %v4090_v2  ;;  %2891 = vmatpush1.bf16.msra.mxu1 %v4093_v3  ;;  %v4178_v2 = vld [vmem:[%s4848_s20 + $0x60] sm:$0xff]  }
 0x191   : > { %2728 = vmatprep.subr.bf16.mxu0 %v4098_v4  ;;  %2892 = vmatprep.subr.bf16.mxu1 %v4101_v5  ;;  %v4179_v3 = vld [vmem:[%s4848_s20 + $0xe0] sm:$0xff]  }
 0x192   : > { %v4180_v4 = vld [vmem:[%s4848_s20 + $0x20] sm:$0xff]  }
 0x193   : > { %v4181_v5 = vld [vmem:[%s4848_s20 + $0xa0] sm:$0xff]  }
 0x194   : > { %2729 = vmatpush1.bf16.msra.mxu0 %v4096_v6  ;;  %2893 = vmatpush1.bf16.msra.mxu1 %v4099_v7  ;;  %v4182_v6 = vld [vmem:[%s4848_s20 + $0x68] sm:$0xff]  }
 0x195   : > { %2730 = vmatprep.subr.bf16.mxu0 %v4104_v8  ;;  %2894 = vmatprep.subr.bf16.mxu1 %v4107_v9  ;;  %v4183_v7 = vld [vmem:[%s4848_s20 + $0xe8] sm:$0xff]  }
 0x196   : > { %v4184_v8 = vld [vmem:[%s4848_s20 + $0x28] sm:$0xff]  }
 0x197   : > { %v4185_v9 = vld [vmem:[%s4848_s20 + $0xa8] sm:$0xff]  }
 0x198   : > { %2731 = vmatpush1.bf16.msra.mxu0 %v4102_v10  ;;  %2895 = vmatpush1.bf16.msra.mxu1 %v4105_v11  ;;  %v4186_v10 = vld [vmem:[%s4848_s20 + $0x70] sm:$0xff]  }
 0x199   : > { %2732 = vmatprep.subr.bf16.mxu0 %v4110_v12  ;;  %2896 = vmatprep.subr.bf16.mxu1 %v4113_v13  ;;  %v4187_v11 = vld [vmem:[%s4848_s20 + $0xf0] sm:$0xff]  }
 0x19a   : > { %v4188_v12 = vld [vmem:[%s4848_s20 + $0x30] sm:$0xff]  }
 0x19b   : > { %v4189_v13 = vld [vmem:[%s4848_s20 + $0xb0] sm:$0xff]  }
 0x19c   : > { %2733 = vmatpush1.bf16.msra.mxu0 %v4108_v14  ;;  %2897 = vmatpush1.bf16.msra.mxu1 %v4111_v15  ;;  %v4190_v14 = vld [vmem:[%s4848_s20 + $0x78] sm:$0xff]  }
 0x19d   : > { %2734 = vmatprep.subr.bf16.mxu0 %v4116_v16  ;;  %2898 = vmatprep.subr.bf16.mxu1 %v4119_v17  ;;  %v4191_v15 = vld [vmem:[%s4848_s20 + $0xf8] sm:$0xff]  }
 0x19e   : > { %v4192_v16 = vld [vmem:[%s4848_s20 + $0x38] sm:$0xff]  }
 0x19f   : > { %v4193_v17 = vld [vmem:[%s4848_s20 + $0xb8] sm:$0xff]  }
 0x1a0   : > { %2735 = vmatpush1.bf16.msra.mxu0 %v4114_v18  ;;  %2899 = vmatpush1.bf16.msra.mxu1 %v4117_v19  ;;  %v1239_v18 = vsub.s32 0, %v4926_v1  ;;  %v1247_v19 = vsub.s32 2, %v4926_v1 }
 0x1a1   : > { %2736 = vmatprep.subr.bf16.mxu0 %v4122_v20  ;;  %2900 = vmatprep.subr.bf16.mxu1 %v4125_v21  ;;  %v1235_v20 = vld [vmem:[%s775_s14] sm:$0xf]  ;;  %v1243_v21 = vsub.s32 1, %v4926_v1 }
 0x1a4   : > { %2737 = vmatpush1.bf16.msra.mxu0 %v4120_v22  ;;  %2901 = vmatpush1.bf16.msra.mxu1 %v4123_v23  ;;  %v1251_v22 = vsub.s32 3, %v4926_v1  ;;  %v1240_v23 = vrot.slane %v1235_v20, %v1239_v18 }
 0x1a5   : > { %2738 = vmatprep.subr.bf16.mxu0 %v4128_v24  ;;  %2902 = vmatprep.subr.bf16.mxu1 %v4131_v25  ;;  %v1248_v24 = vrot.slane %v1235_v20, %v1247_v19  ;;  %v1244_v25 = vrot.slane %v1235_v20, %v1243_v21 }
 0x1a8   : > { %2739 = vmatpush1.bf16.msra.mxu0 %v4126_v26  ;;  %2903 = vmatpush1.bf16.msra.mxu1 %v4129_v27  ;;  %v1252_v26 = vrot.slane %v1235_v20, %v1251_v22 }
 0x1a9   : > { %2740 = vmatprep.subr.bf16.mxu0 %v4134_v28  ;;  %2904 = vmatprep.subr.bf16.mxu1 %v4137_v29 }
 0x1ac   : > { %2741 = vmatpush1.bf16.msra.mxu0 %v4132_v30  ;;  %2905 = vmatpush1.bf16.msra.mxu1 %v4135_v31 }
 0x1ad   : > { %2742 = vmatprep.subr.bf16.mxu0 %v4140_v32  ;;  %2906 = vmatprep.subr.bf16.mxu1 %v4143_v33 }
 0x1b0   : > { %2743 = vmatpush1.bf16.msra.mxu0 %v4138_v34  ;;  %2907 = vmatpush1.bf16.msra.mxu1 %v4141_v35 }
 0x1b1   : > { %2744 = vmatprep.subr.bf16.mxu0 %v4146_v36  ;;  %2908 = vmatprep.subr.bf16.mxu1 %v4149_v37 }
 0x1b4   : > { %2745 = vmatpush1.bf16.msra.mxu0 %v4144_v39  ;;  %2909 = vmatpush1.bf16.msra.mxu1 %v4147_v40 }
 0x1b5   : > { %2746 = vmatprep.subr.bf16.mxu0 %v4152_v41  ;;  %2910 = vmatprep.subr.bf16.mxu1 %v4155_v42 }
 0x1b8   : > { %2747 = vmatpush1.bf16.msra.mxu0 %v4150_v45  ;;  %2911 = vmatpush1.bf16.msra.mxu1 %v4153_v46 }
 0x1b9   : > { %2748 = vmatprep.subr.bf16.mxu0 %v4158_v47  ;;  %2912 = vmatprep.subr.bf16.mxu1 %v4161_v48 }
 0x1bc   : > { %2749 = vmatpush1.bf16.msra.mxu0 %v4156_v49  ;;  %2913 = vmatpush1.bf16.msra.mxu1 %v4159_v50 }
 0x1bd   : > { %3671 = vmatprep.subr.bf16.mxu0 %v4162_v51  ;;  %3693 = vmatprep.subr.bf16.mxu1 %v4163_v38 }
 0x1bf   : > { %2751 = vmatmul.mubr.bf16.vlgmr.msra.gmra.mrb[0].mxu0 %v1304_v52  ;;  %2915 = vmatmul.mubr.bf16.vlgmr.msra.gmra.mrb[0].mxu1 %v1304_v52 }
 0x1c0   : > { %3672 = vmatpush3.bf16.msra.mxu0 %v4164_v53  ;;  %3694 = vmatpush3.bf16.msra.mxu1 %v4165_v54 }
 0x1c1   : > { %3673 = vmatprep.subr.bf16.mxu0 %v4166_v55  ;;  %3695 = vmatprep.subr.bf16.mxu1 %v4167_v56 }
 0x1c4   : > { %3674 = vmatpush3.bf16.msra.mxu0 %v4168_v57  ;;  %3696 = vmatpush3.bf16.msra.mxu1 %v4169_v44 }
 0x1c5   : > { %3675 = vmatprep.subr.bf16.mxu0 %v4170_v58  ;;  %3697 = vmatprep.subr.bf16.mxu1 %v4171_v43  ;;  %v3664_v58 = vld [vmem:[%s5256_s4] ss:$0 sm:$0xff] (!%p3374_p10) }
 0x1c8   : > { %3676 = vmatpush3.bf16.msra.mxu0 %v4172_v59  ;;  %3698 = vmatpush3.bf16.msra.mxu1 %v4173_v60 }
 0x1c9   : > { %3677 = vmatprep.subr.bf16.mxu0 %v4174_v61  ;;  %3699 = vmatprep.subr.bf16.mxu1 %v4175_v62 }
 0x1cc   : > { %3678 = vmatpush3.bf16.msra.mxu0 %v4176_v63  ;;  %3700 = vmatpush3.bf16.msra.mxu1 %v4177_v0 }
 0x1cd   : > { %3679 = vmatprep.subr.bf16.mxu0 %v4178_v2  ;;  %3701 = vmatprep.subr.bf16.mxu1 %v4179_v3 }
 0x1d0   : > { %3680 = vmatpush3.bf16.msra.mxu0 %v4180_v4  ;;  %3702 = vmatpush3.bf16.msra.mxu1 %v4181_v5 }
 0x1d1   : > { %3681 = vmatprep.subr.bf16.mxu0 %v4182_v6  ;;  %3703 = vmatprep.subr.bf16.mxu1 %v4183_v7 }
 0x1d4   : > { %3682 = vmatpush3.bf16.msra.mxu0 %v4184_v8  ;;  %3704 = vmatpush3.bf16.msra.mxu1 %v4185_v9 }
 0x1d5   : > { %3683 = vmatprep.subr.bf16.mxu0 %v4186_v10  ;;  %3705 = vmatprep.subr.bf16.mxu1 %v4187_v11 }
 0x1d8   : > { %3684 = vmatpush3.bf16.msra.mxu0 %v4188_v12  ;;  %3706 = vmatpush3.bf16.msra.mxu1 %v4189_v13 }
 0x1d9   : > { %3685 = vmatprep.subr.bf16.mxu0 %v4190_v14  ;;  %3707 = vmatprep.subr.bf16.mxu1 %v4191_v15 }
 0x1dc   : > { %3686 = vmatpush3.bf16.msra.mxu0 %v4192_v16  ;;  %3708 = vmatpush3.bf16.msra.mxu1 %v4193_v17 }
 0x292   : > { %v2752_v27 = vpop.f32.mrb[0].mxu0  ;;  %v2916_v28 = vpop.f32.mrb[0].mxu1 }
 0x293   : > { %v3715_v29 = vadd.f32 %v2752_v27, %v1240_v23  ;;  %v3717_v30 = vadd.f32 %v2916_v28, %v1248_v24  ;;  %v2754_v31 = vpop.f32.mrb[1].mxu0  ;;  %v2918_v32 = vpop.f32.mrb[1].mxu1 }
 0x294   : > { %v3716_v33 = vadd.f32 %v2754_v31, %v1244_v25  ;;  %v3718_v34 = vadd.f32 %v2918_v32, %v1252_v26  ;;  %v2756_v35 = vpop.f32.mrb[2].mxu0  ;;  %v2920_v36 = vpop.f32.mrb[2].mxu1 }
 0x295   : > { %v2923_v37 = vmax.f32 %v3715_v29, 0.0  ;;  %v2925_v39 = vmax.f32 %v3717_v30, 0.0  ;;  %v2757_v40 = vpop.f32.mrb[3].mxu0  ;;  %v2921_v41 = vpop.f32.mrb[3].mxu1 }
 0x296   : > { %v2924_v42 = vmax.f32 %v3716_v33, 0.0  ;;  %v2926_v1 = vmax.f32 %v3718_v34, 0.0 }
 0x297   : > { %v2931_v47 = vpack.c.bf16 %v2923_v37, %v2923_v37  ;;  %v2933_v48 = vpack.c.bf16 %v2925_v39, %v2925_v39 }
 0x298   : > { %v2932_v45 = vpack.c.bf16 %v2924_v42, %v2924_v42  ;;  %v2934_v46 = vpack.c.bf16 %v2926_v1, %v2926_v1 }
 0x29a   : > { %3223 = vmatprep.mubr.bf16.mxu0 %v2932_v45  ;;  %3263 = vmatprep.mubr.bf16.mxu1 %v2934_v46 }
 0x29b   : > { %3224 = vmatmul.mubr.bf16.vlgmr.msra.gmra.mrb[4].mxu0 %v2931_v47  ;;  %3264 = vmatmul.mubr.bf16.vlgmr.msra.gmra.mrb[4].mxu1 %v2933_v48 }
 0x36c   : > { %3273 = sbr.rel (%p3374_p10) target bundleno = 887 (0x377), region = 71 }
 0x36e   : > { %v3687_v49 = vpop.f32.mrb[4].mxu0  ;;  %v3709_v50 = vpop.f32.mrb[4].mxu1 }
 0x36f   : > { %v3688_v51 = vpop.f32.mrb[5].mxu0  ;;  %v3710_v38 = vpop.f32.mrb[5].mxu1 }
 0x370   : > { %v3689_v52 = vadd.f32 %v3688_v51, %v3687_v49  ;;  %v3711_v53 = vadd.f32 %v3710_v38, %v3709_v50  ;;  %v3690_v54 = vpop.f32.mrb[6].mxu0  ;;  %v3712_v55 = vpop.f32.mrb[6].mxu1 }
 0x371   : > { %v3691_v56 = vpop.f32.mrb[7].mxu0  ;;  %v3713_v57 = vpop.f32.mrb[7].mxu1 }
 0x372   : > { %v3266_v44 = vadd.f32 %v3711_v53, %v3689_v52 }
 0x374   : > { %v3281_v43 = vadd.f32 %v3664_v58, %v3266_v44 }
 0x376   : > { %3282 = vst [vmem:[#allocation4] sm:$0x3] %v3281_v43 }
 0x377 PF: > { %p3665_p11 = scmp.le.s32.totalorder %s4298_s21, 0 }
 0x379   : > { %3286 = sbr.rel (%p3665_p11) target bundleno = 897 (0x381), region = 75 }
 0x37d   : > { %v3287_v59 = vld [vmem:[#allocation4] sm:$0x3] (!%p3665_p11) }
 0x37e   : > { %v3288_v60 = vadd.f32 (!%p3665_p11), %v3287_v59, %v3266_v44 }
 0x380   : > { %3289 = vst [vmem:[#allocation4] sm:$0x3] %v3288_v60 }
 0x381 PF: > { %p3747_p12 = scmp.eq.s32.totalorder %s4298_s21, 3  ;;  %s4251_s20 = smov [#allocation4]  }
 0x382   : > { %s3297_s23 = sshll.u32 %s4251_s20, 4  ;;  %s3298_s23 = int_to_ptr.vmem [resolvable:$true] %s3297_s23 }
 0x383   : > { %s4194_s24 = scalar_lea.vmem %s3298_s23, 32  ;;  %p4201_p2 = scmp.lt.s32.totalorder %s3298_s23, %s3298_s23 }
 0x384   : > { %p4195_p13 = scmp.ne.s32.totalorder %s3298_s23, %s4194_s24  ;;  %p4202_p3 = scmp.lt.s32.totalorder %s4194_s24, %s4194_s24 }
 0x386   : > { %p4196_p0 = pnand %p4195_p13, %p3747_p12  ;;  %p4203_p4 = por %p4202_p3, %p4201_p2 }
 0x388   : > { %p4197_p1 = pneg %p4196_p0 }
 0x38a   : > { %p4204_p5 = pnand %p4203_p4, %p4197_p1 }
 0x38c   : > { %4207 = shalt.err (!%p4204_p5)
}
 0x38d   : > { %s4208_s28 = scalar_lea.hbm %s5257_s5, 32 }
 0x38e   : > { %p4209_p6 = scmp.ne.s32.totalorder %s5257_s5, %s4208_s28  ;;  %p4214_p9 = scmp.lt.u32.totalorder %s4208_s28, %s5257_s5 }
 0x390   : > { %p4210_p7 = pnand %p4209_p6, %p3747_p12 }
 0x392   : > { %p4211_p8 = pneg %p4210_p7 }
 0x394   : > { %p4216_p10 = pnand %p4214_p9, %p4211_p8 }
 0x396   : > { %4219 = shalt.err (!%p4216_p10)
}
 0x397   : > { %3744 = dma.vmem_to_hbm [thread:$0]  (%p3747_p12), %s3298_s23, 32, %s5257_s5, [#allocation5]  }
 0x398   : > { %4233 = dma.done.wait (%p3747_p12), [#allocation5], 32  }
 0x399   : > { %4235 = vsyncadd (%p3747_p12), [#allocation5], 4294967264 }
 0x39a PF: > { %p13_p11 = scmp.ge.s32.totalorder %s4301_s22, 6   ;;  %s5258_s18 = smov %s4242_s19 }
 0x39b   : > { %s5259_s19 = smov %s4310_s25  ;;  %s5260_s20 = smov %s4301_s22 }
 0x39c   :  { %15 = sbr.rel (!%p13_p11) target bundleno = 2 (0x2), region = 113 }
 0x3a3   :  { %3310 = vsyncpa [#allocation5], 1 }
 0x3a4   :  { %3312 = vsyncpa [#allocation5 + $0x1], 1 }

// kernel: san_forward.8
= control target key start
LH: loop header
LB: loop body
LE: loop exit
PB: predicated region body
PF: predicated region fallthrough
CT: control target
= control target key end

     0   :  { %8 = vsyncpa [#allocation3], 0  ;;  %s2369_s12 = smov [#allocation2]   ;;  %s2497_s0 = inlined_call_operand.vmem [shape: bf16[4,2,2,1024], index: 0, kind: input, shape index: {}]   ;;  %s2498_s1 = inlined_call_operand.hbm [shape: bf16[512,1024], index: 1, kind: input, shape index: {}]   ;;  %s2499_s2 = inlined_call_operand.vmem [shape: f32[1,1024], index: 2, kind: input, shape index: {}]   ;;  %s2500_s3 = inlined_call_operand.vmem [shape: bf16[8,1024], index: 3, kind: output, shape index: {}]  }
   0x1   :  { %s16_s13 = sshll.u32 %s2369_s12, 4  ;;  %s2345_s16 = scalar_lea.hbm %s2498_s1, 32768  ;;  %s17_s13 = int_to_ptr.vmem [resolvable:$true] %s16_s13 }
   0x2   :  { %p2346_p0 = scmp.ne.s32.totalorder %s2498_s1, %s2345_s16  ;;  %p2349_p1 = scmp.lt.u32.totalorder %s2345_s16, %s2498_s1 }
   0x4   :  { %p2351_p2 = pnand %p2349_p1, %p2346_p0 }
   0x6   :  { %2354 = shalt.err (!%p2351_p2)
}
   0x7   :  { %s2355_s21 = scalar_lea.vmem %s17_s13, 32768  ;;  %p2360_p4 = scmp.lt.s32.totalorder %s17_s13, %s17_s13 }
   0x8   :  { %p2356_p3 = scmp.ne.s32.totalorder %s17_s13, %s2355_s21  ;;  %p2361_p5 = scmp.lt.s32.totalorder %s2355_s21, %s2355_s21 }
   0xa   :  { %p2362_p6 = por %p2361_p5, %p2360_p4 }
   0xc   :  { %p2363_p7 = pnand %p2362_p6, %p2356_p3 }
   0xe   :  { %2366 = shalt.err (!%p2363_p7)
}
   0xf   :  { %s2370_s22 = smov 512   ;;  %s2371_s23 = smov 32  }
  0x10   :  { %22 = dma.hbm_to_vmem [thread:$0]  %s2498_s1, 32768, %s17_s13, [#allocation3], %s2370_s22, %s2370_s22, %s2371_s23  }
  0x11   :  { %2367 = dma.done.wait [#allocation3], 32768  }
  0x12   :  { %2368 = vsyncadd [#allocation3], 4294934528  ;;  %v56_v0 = vld [vmem:[#allocation2] sm:$0xff]  ;;  %v57_v2 = vld [vmem:[#allocation2 + $0x8] sm:$0xff]  ;;  %v314_v50 = vlaneseq  ;;  %v2372_v51 = vmov 1966171168  }
  0x13   :  { %v60_v1 = vld [vmem:[#allocation2 + $0x20] sm:$0xff]  ;;  %v61_v4 = vld [vmem:[#allocation2 + $0x28] sm:$0xff]  ;;  %v361_v52 = vunpack.c.l.s4 %v2372_v51  ;;  %v30_v63 = vld [vmem:[%s2497_s0 + $0x10] sm:$0xff] }
  0x14   :  { %v2054_v3 = vcombine.high %v56_v0, %v60_v1  ;;  %v2053_v5 = vcombine.low %v56_v0, %v60_v1  ;;  %v64_v6 = vld [vmem:[#allocation2 + $0x40] sm:$0xff]  ;;  %v2056_v8 = vcombine.high %v57_v2, %v61_v4  ;;  %v2055_v9 = vcombine.low %v57_v2, %v61_v4  ;;  %v65_v11 = vld [vmem:[#allocation2 + $0x48] sm:$0xff]  ;;  %v31_v0 = vld [vmem:[%s2497_s0 + $0x18] sm:$0xff] }
  0x15   :  { %v68_v7 = vld [vmem:[#allocation2 + $0x60] sm:$0xff]  ;;  %v69_v12 = vld [vmem:[#allocation2 + $0x68] sm:$0xff]  ;;  %v34_v4 = vld [vmem:[%s2497_s0 + $0x30] sm:$0xff] }
  0x16   :  { %v2062_v10 = vcombine.high %v64_v6, %v68_v7  ;;  %v72_v13 = vld [vmem:[#allocation2 + $0x80] sm:$0xff]  ;;  %1676 = vmatprep.subr.bf16.mxu0 %v2054_v3  ;;  %v2064_v14 = vcombine.high %v65_v11, %v69_v12  ;;  %v73_v16 = vld [vmem:[#allocation2 + $0x88] sm:$0xff]  ;;  %1758 = vmatprep.subr.bf16.mxu1 %v2056_v8  ;;  %v2061_v18 = vcombine.low %v64_v6, %v68_v7  ;;  %v2429_v7 = vshrl.u32 %v314_v50, 7 }
  0x17   :  { %v76_v15 = vld [vmem:[#allocation2 + $0xa0] sm:$0xff]  ;;  %v77_v17 = vld [vmem:[#allocation2 + $0xa8] sm:$0xff]  ;;  %1677 = vmatpush1.bf16.msra.mxu0 %v2053_v5  ;;  %1759 = vmatpush1.bf16.msra.mxu1 %v2055_v9  ;;  %v2063_v19 = vcombine.low %v65_v11, %v69_v12  ;;  %v35_v5 = vld [vmem:[%s2497_s0 + $0x38] sm:$0xff]  ;;  %v37_v6 = vmax.bf16 %v31_v0, %v30_v63  ;;  %v362_v8 = vunpack.c.0.s8 %v361_v52 }
  0x18   :  { %1678 = vmatprep.subr.bf16.mxu0 %v2062_v10  ;;  %v2070_v20 = vcombine.high %v72_v13, %v76_v15  ;;  %1760 = vmatprep.subr.bf16.mxu1 %v2064_v14  ;;  %v2072_v21 = vcombine.high %v73_v16, %v77_v17  ;;  %v80_v22 = vld [vmem:[#allocation2 + $0xc0] sm:$0xff]  ;;  %v81_v24 = vld [vmem:[#allocation2 + $0xc8] sm:$0xff]  ;;  %v2069_v26 = vcombine.low %v72_v13, %v76_v15 }
  0x19   :  { %v84_v23 = vld [vmem:[#allocation2 + $0xe0] sm:$0xff]  ;;  %v85_v25 = vld [vmem:[#allocation2 + $0xe8] sm:$0xff]  ;;  %v2071_v27 = vcombine.low %v73_v16, %v77_v17  ;;  %v39_v11 = vmax.bf16 %v35_v5, %v34_v4  ;;  %v45_v15 = vrot.slane %v37_v6, 4 }
  0x1a   :  { %v2078_v28 = vcombine.high %v80_v22, %v84_v23  ;;  %v2080_v29 = vcombine.high %v81_v24, %v85_v25  ;;  %v88_v30 = vld [vmem:[#allocation2 + $0x100] sm:$0xff]  ;;  %v89_v32 = vld [vmem:[#allocation2 + $0x108] sm:$0xff]  ;;  %v2077_v34 = vcombine.low %v80_v22, %v84_v23  ;;  %v2079_v35 = vcombine.low %v81_v24, %v85_v25 }
  0x1b   :  { %1679 = vmatpush1.bf16.msra.mxu0 %v2061_v18  ;;  %1761 = vmatpush1.bf16.msra.mxu1 %v2063_v19  ;;  %v92_v31 = vld [vmem:[#allocation2 + $0x120] sm:$0xff]  ;;  %v93_v33 = vld [vmem:[#allocation2 + $0x128] sm:$0xff]  ;;  %v53_v24 = vmax.bf16 %v45_v15, %v37_v6  ;;  %v2432_v25 = vsub.s32 %v362_v8, %v2429_v7 }
  0x1c   :  { %1680 = vmatprep.subr.bf16.mxu0 %v2070_v20  ;;  %1762 = vmatprep.subr.bf16.mxu1 %v2072_v21  ;;  %v2086_v36 = vcombine.high %v88_v30, %v92_v31  ;;  %v2088_v37 = vcombine.high %v89_v32, %v93_v33  ;;  %v96_v38 = vld [vmem:[#allocation2 + $0x140] sm:$0xff]  ;;  %v97_v40 = vld [vmem:[#allocation2 + $0x148] sm:$0xff]  ;;  %v2085_v42 = vcombine.low %v88_v30, %v92_v31  ;;  %v47_v20 = vrot.slane %v39_v11, 4 }
  0x1d   :  { %v100_v39 = vld [vmem:[#allocation2 + $0x160] sm:$0xff]  ;;  %v101_v41 = vld [vmem:[#allocation2 + $0x168] sm:$0xff]  ;;  %v2087_v43 = vcombine.low %v89_v32, %v93_v33 }
  0x1e   :  { %v2094_v44 = vcombine.high %v96_v38, %v100_v39  ;;  %v2096_v45 = vcombine.high %v97_v40, %v101_v41  ;;  %v104_v46 = vld [vmem:[#allocation2 + $0x180] sm:$0xff]  ;;  %v105_v48 = vld [vmem:[#allocation2 + $0x188] sm:$0xff]  ;;  %v2093_v53 = vcombine.low %v96_v38, %v100_v39  ;;  %v2095_v56 = vcombine.low %v97_v40, %v101_v41 }
  0x1f   :  { %1681 = vmatpush1.bf16.msra.mxu0 %v2069_v26  ;;  %1763 = vmatpush1.bf16.msra.mxu1 %v2071_v27  ;;  %v108_v47 = vld [vmem:[#allocation2 + $0x1a0] sm:$0xff]  ;;  %v109_v49 = vld [vmem:[#allocation2 + $0x1a8] sm:$0xff] }
  0x20   :  { %1682 = vmatprep.subr.bf16.mxu0 %v2078_v28  ;;  %1764 = vmatprep.subr.bf16.mxu1 %v2080_v29  ;;  %v112_v54 = vld [vmem:[#allocation2 + $0x1c0] sm:$0xff]  ;;  %v2102_v57 = vcombine.high %v104_v46, %v108_v47  ;;  %v113_v58 = vld [vmem:[#allocation2 + $0x1c8] sm:$0xff]  ;;  %v2104_v62 = vcombine.high %v105_v48, %v109_v49  ;;  %v2101_v9 = vcombine.low %v104_v46, %v108_v47 }
  0x21   :  { %v116_v55 = vld [vmem:[#allocation2 + $0x1e0] sm:$0xff]  ;;  %v117_v59 = vld [vmem:[#allocation2 + $0x1e8] sm:$0xff]  ;;  %v2103_v13 = vcombine.low %v105_v48, %v109_v49  ;;  %v55_v28 = vmax.bf16 %v47_v20, %v39_v11 }
  0x22   :  { %v28_v60 = vld [vmem:[%s2497_s0] sm:$0xff]  ;;  %v29_v61 = vld [vmem:[%s2497_s0 + $0x8] sm:$0xff]  ;;  %v2110_v14 = vcombine.high %v112_v54, %v116_v55  ;;  %v2112_v16 = vcombine.high %v113_v58, %v117_v59  ;;  %v2109_v26 = vcombine.low %v112_v54, %v116_v55  ;;  %v2111_v29 = vcombine.low %v113_v58, %v117_v59 }
  0x23   :  { %1683 = vmatpush1.bf16.msra.mxu0 %v2077_v34  ;;  %1765 = vmatpush1.bf16.msra.mxu1 %v2079_v35  ;;  %v32_v1 = vld [vmem:[%s2497_s0 + $0x20] sm:$0xff]  ;;  %v36_v2 = vmax.bf16 %v29_v61, %v28_v60  ;;  %v33_v3 = vld [vmem:[%s2497_s0 + $0x28] sm:$0xff] }
  0x24   :  { %1684 = vmatprep.subr.bf16.mxu0 %v2086_v36  ;;  %1766 = vmatprep.subr.bf16.mxu1 %v2088_v37  ;;  %v38_v10 = vmax.bf16 %v33_v3, %v32_v1  ;;  %v120_v17 = vld [vmem:[#allocation2 + $0x200] sm:$0xff]  ;;  %v121_v22 = vld [vmem:[#allocation2 + $0x208] sm:$0xff] }
  0x25   :  { %v44_v12 = vrot.slane %v36_v2, 4  ;;  %v124_v18 = vld [vmem:[#allocation2 + $0x220] sm:$0xff]  ;;  %v125_v23 = vld [vmem:[#allocation2 + $0x228] sm:$0xff] }
  0x26   :  { %v46_v19 = vrot.slane %v38_v10, 4  ;;  %v2118_v30 = vcombine.high %v120_v17, %v124_v18  ;;  %v2120_v32 = vcombine.high %v121_v22, %v125_v23  ;;  %v128_v33 = vld [vmem:[#allocation2 + $0x240] sm:$0xff]  ;;  %v129_v36 = vld [vmem:[#allocation2 + $0x248] sm:$0xff]  ;;  %v2117_v39 = vcombine.low %v120_v17, %v124_v18 }
  0x27   :  { %1685 = vmatpush1.bf16.msra.mxu0 %v2085_v42  ;;  %1767 = vmatpush1.bf16.msra.mxu1 %v2087_v43  ;;  %v52_v21 = vmax.bf16 %v44_v12, %v36_v2  ;;  %v132_v34 = vld [vmem:[#allocation2 + $0x260] sm:$0xff]  ;;  %v133_v37 = vld [vmem:[#allocation2 + $0x268] sm:$0xff]  ;;  %v2119_v41 = vcombine.low %v121_v22, %v125_v23 }
  0x28   :  { %1686 = vmatprep.subr.bf16.mxu0 %v2094_v44  ;;  %1768 = vmatprep.subr.bf16.mxu1 %v2096_v45  ;;  %v54_v27 = vmax.bf16 %v46_v19, %v38_v10  ;;  %v2126_v42 = vcombine.high %v128_v33, %v132_v34  ;;  %v2128_v43 = vcombine.high %v129_v36, %v133_v37  ;;  %v136_v44 = vld [vmem:[#allocation2 + $0x280] sm:$0xff]  ;;  %v137_v47 = vld [vmem:[#allocation2 + $0x288] sm:$0xff] }
  0x29   :  { %v358_v31 = vcombine.low %v52_v21, %v53_v24  ;;  %v140_v45 = vld [vmem:[#allocation2 + $0x2a0] sm:$0xff]  ;;  %v141_v48 = vld [vmem:[#allocation2 + $0x2a8] sm:$0xff]  ;;  %v2125_v49 = vcombine.low %v128_v33, %v132_v34  ;;  %v2127_v51 = vcombine.low %v129_v36, %v133_v37 }
  0x2a   :  { %v359_v35 = vcombine.low %v54_v27, %v55_v28  ;;  %v2134_v52 = vcombine.high %v136_v44, %v140_v45  ;;  %v144_v54 = vld [vmem:[#allocation2 + $0x2c0] sm:$0xff]  ;;  %v2133_v58 = vcombine.low %v136_v44, %v140_v45  ;;  %v2135_v59 = vcombine.low %v137_v47, %v141_v48  ;;  %v153_v0 = vld [vmem:[#allocation2 + $0x308] sm:$0xff] }
  0x2b   :  { %1687 = vmatpush1.bf16.msra.mxu0 %v2093_v53  ;;  %1769 = vmatpush1.bf16.msra.mxu1 %v2095_v56  ;;  %v2435_v38 = vrot.slane %v358_v31, %v2432_v25  ;;  %v2136_v53 = vcombine.high %v137_v47, %v141_v48  ;;  %v148_v55 = vld [vmem:[#allocation2 + $0x2e0] sm:$0xff]  ;;  %v145_v56 = vld [vmem:[#allocation2 + $0x2c8] sm:$0xff] }
  0x2c   :  { %1688 = vmatprep.subr.bf16.mxu0 %v2102_v57  ;;  %1770 = vmatprep.subr.bf16.mxu1 %v2104_v62  ;;  %v2438_v40 = vrot.slane %v359_v35, %v2432_v25  ;;  %v149_v57 = vld [vmem:[#allocation2 + $0x2e8] sm:$0xff]  ;;  %v2142_v60 = vcombine.high %v144_v54, %v148_v55  ;;  %v152_v62 = vld [vmem:[#allocation2 + $0x300] sm:$0xff]  ;;  %v2141_v2 = vcombine.low %v144_v54, %v148_v55 }
  0x2d   :  { %v2144_v61 = vcombine.high %v145_v56, %v149_v57  ;;  %v156_v63 = vld [vmem:[#allocation2 + $0x320] sm:$0xff]  ;;  %v157_v1 = vld [vmem:[#allocation2 + $0x328] sm:$0xff]  ;;  %v2143_v3 = vcombine.low %v145_v56, %v149_v57 }
  0x2e   :  { %v375_v46 = vcombine.high %v2435_v38, %v2438_v40  ;;  %v2150_v4 = vcombine.high %v152_v62, %v156_v63  ;;  %v2152_v5 = vcombine.high %v153_v0, %v157_v1  ;;  %v160_v6 = vld [vmem:[#allocation2 + $0x340] sm:$0xff]  ;;  %v165_v10 = vld [vmem:[#allocation2 + $0x368] sm:$0xff]  ;;  %v2149_v11 = vcombine.low %v152_v62, %v156_v63 }
  0x2f   :  { %1689 = vmatpush1.bf16.msra.mxu0 %v2101_v9  ;;  %1771 = vmatpush1.bf16.msra.mxu1 %v2103_v13  ;;  %v164_v8 = vld [vmem:[#allocation2 + $0x360] sm:$0xff]  ;;  %v161_v9 = vld [vmem:[#allocation2 + $0x348] sm:$0xff]  ;;  %v2151_v12 = vcombine.low %v153_v0, %v157_v1  ;;  %v374_v36 = vcombine.low %v2435_v38, %v2438_v40 }
  0x30   :  { %1690 = vmatprep.subr.bf16.mxu0 %v2110_v14  ;;  %1772 = vmatprep.subr.bf16.mxu1 %v2112_v16  ;;  %v2443_v50 = vrot.slane %v375_v46, %v2432_v25  ;;  %v2158_v13 = vcombine.high %v160_v6, %v164_v8  ;;  %v2160_v14 = vcombine.high %v161_v9, %v165_v10  ;;  %v168_v15 = vld [vmem:[#allocation2 + $0x380] sm:$0xff]  ;;  %v169_v17 = vld [vmem:[#allocation2 + $0x388] sm:$0xff] }
  0x31   :  { %v172_v16 = vld [vmem:[#allocation2 + $0x3a0] sm:$0xff]  ;;  %v173_v18 = vld [vmem:[#allocation2 + $0x3a8] sm:$0xff]  ;;  %v2157_v19 = vcombine.low %v160_v6, %v164_v8  ;;  %v2159_v20 = vcombine.low %v161_v9, %v165_v10  ;;  %v2450_v45 = vrot.slane %v374_v36, %v2432_v25 }
  0x32   :  { %1708 = vmatprep.mubr.bf16.mxu0 %v2443_v50  ;;  %1790 = vmatprep.mubr.bf16.mxu1 %v2443_v50  ;;  %v2166_v21 = vcombine.high %v168_v15, %v172_v16  ;;  %v2168_v22 = vcombine.high %v169_v17, %v173_v18  ;;  %v176_v23 = vld [vmem:[#allocation2 + $0x3c0] sm:$0xff]  ;;  %v181_v27 = vld [vmem:[#allocation2 + $0x3e8] sm:$0xff]  ;;  %v2165_v28 = vcombine.low %v168_v15, %v172_v16 }
  0x33   :  { %1691 = vmatpush1.bf16.msra.mxu0 %v2109_v26  ;;  %1773 = vmatpush1.bf16.msra.mxu1 %v2111_v29  ;;  %v180_v24 = vld [vmem:[#allocation2 + $0x3e0] sm:$0xff]  ;;  %v177_v26 = vld [vmem:[#allocation2 + $0x3c8] sm:$0xff]  ;;  %v2167_v29 = vcombine.low %v169_v17, %v173_v18 }
  0x34   :  { %1692 = vmatprep.subr.bf16.mxu0 %v2118_v30  ;;  %1774 = vmatprep.subr.bf16.mxu1 %v2120_v32  ;;  %v2174_v30 = vcombine.high %v176_v23, %v180_v24  ;;  %v2176_v31 = vcombine.high %v177_v26, %v181_v27  ;;  %v184_v32 = vld [vmem:[#allocation2 + $0x400] sm:$0xff]  ;;  %v185_v34 = vld [vmem:[#allocation2 + $0x408] sm:$0xff]  ;;  %v2173_v37 = vcombine.low %v176_v23, %v180_v24 }
  0x35   :  { %v188_v33 = vld [vmem:[#allocation2 + $0x420] sm:$0xff]  ;;  %v189_v35 = vld [vmem:[#allocation2 + $0x428] sm:$0xff] }
  0x36   :  { %v196_v44 = vld [vmem:[#allocation2 + $0x460] sm:$0xff]  ;;  %v193_v46 = vld [vmem:[#allocation2 + $0x448] sm:$0xff]  ;;  %v2181_v48 = vcombine.low %v184_v32, %v188_v33  ;;  %v2183_v38 = vcombine.low %v185_v34, %v189_v35 }
  0x37   :  { %1693 = vmatpush1.bf16.msra.mxu0 %v2117_v39  ;;  %1775 = vmatpush1.bf16.msra.mxu1 %v2119_v41  ;;  %v2175_v39 = vcombine.low %v177_v26, %v181_v27  ;;  %v2182_v41 = vcombine.high %v184_v32, %v188_v33  ;;  %v197_v47 = vld [vmem:[#allocation2 + $0x468] sm:$0xff] }
  0x38   :  { %1694 = vmatprep.subr.bf16.mxu0 %v2126_v42  ;;  %1776 = vmatprep.subr.bf16.mxu1 %v2128_v43  ;;  %v2184_v42 = vcombine.high %v185_v34, %v189_v35  ;;  %v192_v43 = vld [vmem:[#allocation2 + $0x440] sm:$0xff]  ;;  %v201_v25 = vld [vmem:[#allocation2 + $0x488] sm:$0xff]  ;;  %v2191_v56 = vcombine.low %v193_v46, %v197_v47 }
  0x39   :  { %v2190_v40 = vcombine.high %v192_v43, %v196_v44  ;;  %v205_v54 = vld [vmem:[#allocation2 + $0x4a8] sm:$0xff]  ;;  %v2189_v55 = vcombine.low %v192_v43, %v196_v44 }
  0x3a   :  { %v213_v62 = vld [vmem:[#allocation2 + $0x4e8] sm:$0xff]  ;;  %v2199_v0 = vcombine.low %v201_v25, %v205_v54 }
  0x3b   :  { %1695 = vmatpush1.bf16.msra.mxu0 %v2125_v49  ;;  %1777 = vmatpush1.bf16.msra.mxu1 %v2127_v51  ;;  %v2192_v49 = vcombine.high %v193_v46, %v197_v47  ;;  %v200_v51 = vld [vmem:[#allocation2 + $0x480] sm:$0xff]  ;;  %v221_v6 = vld [vmem:[#allocation2 + $0x528] sm:$0xff] }
  0x3c   :  { %1696 = vmatprep.subr.bf16.mxu0 %v2134_v52  ;;  %1778 = vmatprep.subr.bf16.mxu1 %v2136_v53  ;;  %v204_v52 = vld [vmem:[#allocation2 + $0x4a0] sm:$0xff]  ;;  %v2454_v53 = vcombine.high %v2443_v50, %v2443_v50  ;;  %v229_v15 = vld [vmem:[#allocation2 + $0x568] sm:$0xff] }
  0x3d   :  { %v2198_v57 = vcombine.high %v200_v51, %v204_v52  ;;  %v2197_v63 = vcombine.low %v200_v51, %v204_v52  ;;  %v237_v23 = vld [vmem:[#allocation2 + $0x5a8] sm:$0xff] }
  0x3e   :  { %v245_v32 = vld [vmem:[#allocation2 + $0x5e8] sm:$0xff] }
  0x3f   :  { %1697 = vmatpush1.bf16.msra.mxu0 %v2133_v58  ;;  %1779 = vmatpush1.bf16.msra.mxu1 %v2135_v59  ;;  %v2200_v58 = vcombine.high %v201_v25, %v205_v54  ;;  %v208_v59 = vld [vmem:[#allocation2 + $0x4c0] sm:$0xff] }
  0x40   :  { %1698 = vmatprep.subr.bf16.mxu0 %v2142_v60  ;;  %1780 = vmatprep.subr.bf16.mxu1 %v2144_v61  ;;  %v212_v60 = vld [vmem:[#allocation2 + $0x4e0] sm:$0xff]  ;;  %v209_v61 = vld [vmem:[#allocation2 + $0x4c8] sm:$0xff] }
  0x41   :  { %v2206_v1 = vcombine.high %v208_v59, %v212_v60  ;;  %v2205_v8 = vcombine.low %v208_v59, %v212_v60  ;;  %v2207_v9 = vcombine.low %v209_v61, %v213_v62 }
  0x43   :  { %1699 = vmatpush1.bf16.msra.mxu0 %v2141_v2  ;;  %1781 = vmatpush1.bf16.msra.mxu1 %v2143_v3  ;;  %v2208_v2 = vcombine.high %v209_v61, %v213_v62  ;;  %v216_v3 = vld [vmem:[#allocation2 + $0x500] sm:$0xff] }
  0x44   :  { %1700 = vmatprep.subr.bf16.mxu0 %v2150_v4  ;;  %1782 = vmatprep.subr.bf16.mxu1 %v2152_v5  ;;  %v220_v4 = vld [vmem:[#allocation2 + $0x520] sm:$0xff]  ;;  %v217_v5 = vld [vmem:[#allocation2 + $0x508] sm:$0xff] }
  0x45   :  { %v2214_v10 = vcombine.high %v216_v3, %v220_v4  ;;  %v2213_v16 = vcombine.low %v216_v3, %v220_v4  ;;  %v2215_v17 = vcombine.low %v217_v5, %v221_v6 }
  0x47   :  { %1701 = vmatpush1.bf16.msra.mxu0 %v2149_v11  ;;  %1783 = vmatpush1.bf16.msra.mxu1 %v2151_v12  ;;  %v2216_v11 = vcombine.high %v217_v5, %v221_v6  ;;  %v224_v12 = vld [vmem:[#allocation2 + $0x540] sm:$0xff] }
  0x48   :  { %1702 = vmatprep.subr.bf16.mxu0 %v2158_v13  ;;  %1784 = vmatprep.subr.bf16.mxu1 %v2160_v14  ;;  %v228_v13 = vld [vmem:[#allocation2 + $0x560] sm:$0xff]  ;;  %v225_v14 = vld [vmem:[#allocation2 + $0x548] sm:$0xff] }
  0x49   :  { %v2222_v18 = vcombine.high %v224_v12, %v228_v13  ;;  %v2221_v24 = vcombine.low %v224_v12, %v228_v13  ;;  %v2223_v26 = vcombine.low %v225_v14, %v229_v15 }
  0x4b   :  { %1703 = vmatpush1.bf16.msra.mxu0 %v2157_v19  ;;  %1785 = vmatpush1.bf16.msra.mxu1 %v2159_v20  ;;  %v2224_v19 = vcombine.high %v225_v14, %v229_v15  ;;  %v232_v20 = vld [vmem:[#allocation2 + $0x580] sm:$0xff] }
  0x4c   :  { %1704 = vmatprep.subr.bf16.mxu0 %v2166_v21  ;;  %1786 = vmatprep.subr.bf16.mxu1 %v2168_v22  ;;  %v236_v21 = vld [vmem:[#allocation2 + $0x5a0] sm:$0xff]  ;;  %v233_v22 = vld [vmem:[#allocation2 + $0x588] sm:$0xff] }
  0x4d   :  { %v2230_v27 = vcombine.high %v232_v20, %v236_v21  ;;  %v2229_v33 = vcombine.low %v232_v20, %v236_v21  ;;  %v2231_v34 = vcombine.low %v233_v22, %v237_v23 }
  0x4f   :  { %1705 = vmatpush1.bf16.msra.mxu0 %v2165_v28  ;;  %1787 = vmatpush1.bf16.msra.mxu1 %v2167_v29  ;;  %v2232_v28 = vcombine.high %v233_v22, %v237_v23  ;;  %v240_v29 = vld [vmem:[#allocation2 + $0x5c0] sm:$0xff] }
  0x50   :  { %1706 = vmatprep.subr.bf16.mxu0 %v2174_v30  ;;  %1788 = vmatprep.subr.bf16.mxu1 %v2176_v31  ;;  %v244_v30 = vld [vmem:[#allocation2 + $0x5e0] sm:$0xff]  ;;  %v241_v31 = vld [vmem:[#allocation2 + $0x5c8] sm:$0xff] }
  0x51   :  { %v2238_v35 = vcombine.high %v240_v29, %v244_v30  ;;  %v2240_v36 = vcombine.high %v241_v31, %v245_v32  ;;  %v2237_v43 = vcombine.low %v240_v29, %v244_v30  ;;  %v2239_v44 = vcombine.low %v241_v31, %v245_v32 }
  0x53   :  { %1707 = vmatpush1.bf16.msra.mxu0 %v2173_v37  ;;  %1789 = vmatpush1.bf16.msra.mxu1 %v2175_v39  ;;  %v248_v37 = vld [vmem:[#allocation2 + $0x600] sm:$0xff] }
  0x54   :  { %1717 = vmatprep.subr.bf16.mxu0 %v2182_v41  ;;  %1799 = vmatprep.subr.bf16.mxu1 %v2184_v42  ;;  %v252_v39 = vld [vmem:[#allocation2 + $0x620] sm:$0xff]  ;;  %v249_v41 = vld [vmem:[#allocation2 + $0x608] sm:$0xff] }
  0x55   :  { %v253_v42 = vld [vmem:[#allocation2 + $0x628] sm:$0xff]  ;;  %v2246_v46 = vcombine.high %v248_v37, %v252_v39  ;;  %v2245_v51 = vcombine.low %v248_v37, %v252_v39 }
  0x56   :  { %1709 = vmatmul.mubr.bf16.vlgmr.msra.gmra.mrb[0].mxu0 %v2450_v45  ;;  %1791 = vmatmul.mubr.bf16.vlgmr.msra.gmra.mrb[0].mxu1 %v2450_v45  ;;  %v2248_v47 = vcombine.high %v249_v41, %v253_v42  ;;  %v2247_v52 = vcombine.low %v249_v41, %v253_v42 }
  0x57   :  { %1718 = vmatpush1.bf16.msra.mxu0 %v2181_v48  ;;  %1800 = vmatpush1.bf16.msra.mxu1 %v2183_v38  ;;  %v256_v48 = vld [vmem:[#allocation2 + $0x640] sm:$0xff] }
  0x58   :  { %1719 = vmatprep.subr.bf16.mxu0 %v2190_v40  ;;  %1801 = vmatprep.subr.bf16.mxu1 %v2192_v49  ;;  %v260_v38 = vld [vmem:[#allocation2 + $0x660] sm:$0xff]  ;;  %v257_v40 = vld [vmem:[#allocation2 + $0x648] sm:$0xff] }
  0x59   :  { %1749 = vmatprep.mubr.bf16.mxu0 %v2454_v53  ;;  %1831 = vmatprep.mubr.bf16.mxu1 %v2454_v53  ;;  %v261_v49 = vld [vmem:[#allocation2 + $0x668] sm:$0xff]  ;;  %v2254_v25 = vcombine.high %v256_v48, %v260_v38  ;;  %v2253_v59 = vcombine.low %v256_v48, %v260_v38 }
  0x5a   :  { %v2256_v54 = vcombine.high %v257_v40, %v261_v49  ;;  %v2255_v60 = vcombine.low %v257_v40, %v261_v49 }
  0x5b   :  { %1720 = vmatpush1.bf16.msra.mxu0 %v2189_v55  ;;  %1802 = vmatpush1.bf16.msra.mxu1 %v2191_v56  ;;  %v264_v55 = vld [vmem:[#allocation2 + $0x680] sm:$0xff] }
  0x5c   :  { %1721 = vmatprep.subr.bf16.mxu0 %v2198_v57  ;;  %1803 = vmatprep.subr.bf16.mxu1 %v2200_v58  ;;  %v268_v56 = vld [vmem:[#allocation2 + $0x6a0] sm:$0xff]  ;;  %v265_v57 = vld [vmem:[#allocation2 + $0x688] sm:$0xff] }
  0x5d   :  { %v269_v58 = vld [vmem:[#allocation2 + $0x6a8] sm:$0xff]  ;;  %v2262_v61 = vcombine.high %v264_v55, %v268_v56  ;;  %v2261_v3 = vcombine.low %v264_v55, %v268_v56  ;;  %v71_v55 = vld [vmem:[#allocation2 + $0x78] sm:$0xff] }
  0x5e   :  { %v2264_v62 = vcombine.high %v265_v57, %v269_v58  ;;  %v2263_v4 = vcombine.low %v265_v57, %v269_v58 }
  0x5f   :  { %1722 = vmatpush1.bf16.msra.mxu0 %v2197_v63  ;;  %1804 = vmatpush1.bf16.msra.mxu1 %v2199_v0  ;;  %v272_v63 = vld [vmem:[#allocation2 + $0x6c0] sm:$0xff] }
  0x60   :  { %1723 = vmatprep.subr.bf16.mxu0 %v2206_v1  ;;  %1805 = vmatprep.subr.bf16.mxu1 %v2208_v2  ;;  %v276_v0 = vld [vmem:[#allocation2 + $0x6e0] sm:$0xff]  ;;  %v273_v1 = vld [vmem:[#allocation2 + $0x6c8] sm:$0xff] }
  0x61   :  { %v277_v2 = vld [vmem:[#allocation2 + $0x6e8] sm:$0xff]  ;;  %v2270_v5 = vcombine.high %v272_v63, %v276_v0  ;;  %v2269_v12 = vcombine.low %v272_v63, %v276_v0  ;;  %v79_v63 = vld [vmem:[#allocation2 + $0xb8] sm:$0xff] }
  0x62   :  { %v2272_v6 = vcombine.high %v273_v1, %v277_v2  ;;  %v2271_v13 = vcombine.low %v273_v1, %v277_v2 }
  0x63   :  { %1724 = vmatpush1.bf16.msra.mxu0 %v2205_v8  ;;  %1806 = vmatpush1.bf16.msra.mxu1 %v2207_v9  ;;  %v280_v8 = vld [vmem:[#allocation2 + $0x700] sm:$0xff] }
  0x64   :  { %1725 = vmatprep.subr.bf16.mxu0 %v2214_v10  ;;  %1807 = vmatprep.subr.bf16.mxu1 %v2216_v11  ;;  %v284_v9 = vld [vmem:[#allocation2 + $0x720] sm:$0xff]  ;;  %v281_v10 = vld [vmem:[#allocation2 + $0x708] sm:$0xff] }
  0x65   :  { %v285_v11 = vld [vmem:[#allocation2 + $0x728] sm:$0xff]  ;;  %v2278_v14 = vcombine.high %v280_v8, %v284_v9  ;;  %v2277_v20 = vcombine.low %v280_v8, %v284_v9  ;;  %v87_v8 = vld [vmem:[#allocation2 + $0xf8] sm:$0xff] }
  0x66   :  { %v2280_v15 = vcombine.high %v281_v10, %v285_v11  ;;  %v2279_v21 = vcombine.low %v281_v10, %v285_v11 }
  0x67   :  { %1726 = vmatpush1.bf16.msra.mxu0 %v2213_v16  ;;  %1808 = vmatpush1.bf16.msra.mxu1 %v2215_v17  ;;  %v288_v16 = vld [vmem:[#allocation2 + $0x740] sm:$0xff] }
  0x68   :  { %1727 = vmatprep.subr.bf16.mxu0 %v2222_v18  ;;  %1809 = vmatprep.subr.bf16.mxu1 %v2224_v19  ;;  %v292_v17 = vld [vmem:[#allocation2 + $0x760] sm:$0xff]  ;;  %v289_v18 = vld [vmem:[#allocation2 + $0x748] sm:$0xff] }
  0x69   :  { %v293_v19 = vld [vmem:[#allocation2 + $0x768] sm:$0xff]  ;;  %v2286_v22 = vcombine.high %v288_v16, %v292_v17  ;;  %v2285_v29 = vcombine.low %v288_v16, %v292_v17  ;;  %v95_v16 = vld [vmem:[#allocation2 + $0x138] sm:$0xff] }
  0x6a   :  { %v2288_v23 = vcombine.high %v289_v18, %v293_v19  ;;  %v2287_v30 = vcombine.low %v289_v18, %v293_v19 }
  0x6b   :  { %1728 = vmatpush1.bf16.msra.mxu0 %v2221_v24  ;;  %1810 = vmatpush1.bf16.msra.mxu1 %v2223_v26  ;;  %v296_v24 = vld [vmem:[#allocation2 + $0x780] sm:$0xff] }
  0x6c   :  { %1729 = vmatprep.subr.bf16.mxu0 %v2230_v27  ;;  %1811 = vmatprep.subr.bf16.mxu1 %v2232_v28  ;;  %v300_v26 = vld [vmem:[#allocation2 + $0x7a0] sm:$0xff]  ;;  %v297_v27 = vld [vmem:[#allocation2 + $0x788] sm:$0xff] }
  0x6d   :  { %v301_v28 = vld [vmem:[#allocation2 + $0x7a8] sm:$0xff]  ;;  %v2294_v31 = vcombine.high %v296_v24, %v300_v26  ;;  %v2293_v37 = vcombine.low %v296_v24, %v300_v26 }
  0x6e   :  { %v2296_v32 = vcombine.high %v297_v27, %v301_v28  ;;  %v2295_v39 = vcombine.low %v297_v27, %v301_v28 }
  0x6f   :  { %1730 = vmatpush1.bf16.msra.mxu0 %v2229_v33  ;;  %1812 = vmatpush1.bf16.msra.mxu1 %v2231_v34  ;;  %v304_v33 = vld [vmem:[#allocation2 + $0x7c0] sm:$0xff] }
  0x70   :  { %1731 = vmatprep.subr.bf16.mxu0 %v2238_v35  ;;  %1813 = vmatprep.subr.bf16.mxu1 %v2240_v36  ;;  %v308_v34 = vld [vmem:[#allocation2 + $0x7e0] sm:$0xff]  ;;  %v305_v35 = vld [vmem:[#allocation2 + $0x7c8] sm:$0xff] }
  0x71   :  { %v309_v36 = vld [vmem:[#allocation2 + $0x7e8] sm:$0xff]  ;;  %v2302_v41 = vcombine.high %v304_v33, %v308_v34  ;;  %v2301_v48 = vcombine.low %v304_v33, %v308_v34 }
  0x72   :  { %v2304_v42 = vcombine.high %v305_v35, %v309_v36  ;;  %v2303_v38 = vcombine.low %v305_v35, %v309_v36 }
  0x73   :  { %1732 = vmatpush1.bf16.msra.mxu0 %v2237_v43  ;;  %1814 = vmatpush1.bf16.msra.mxu1 %v2239_v44  ;;  %v58_v43 = vld [vmem:[#allocation2 + $0x10] sm:$0xff] }
  0x74   :  { %1733 = vmatprep.subr.bf16.mxu0 %v2246_v46  ;;  %1815 = vmatprep.subr.bf16.mxu1 %v2248_v47  ;;  %v62_v44 = vld [vmem:[#allocation2 + $0x30] sm:$0xff]  ;;  %v59_v46 = vld [vmem:[#allocation2 + $0x18] sm:$0xff] }
  0x75   :  { %v63_v47 = vld [vmem:[#allocation2 + $0x38] sm:$0xff]  ;;  %v2058_v40 = vcombine.high %v58_v43, %v62_v44  ;;  %v2057_v56 = vcombine.low %v58_v43, %v62_v44 }
  0x76   :  { %v2060_v49 = vcombine.high %v59_v46, %v63_v47  ;;  %v2059_v57 = vcombine.low %v59_v46, %v63_v47 }
  0x77   :  { %1734 = vmatpush1.bf16.msra.mxu0 %v2245_v51  ;;  %1816 = vmatpush1.bf16.msra.mxu1 %v2247_v52  ;;  %v66_v51 = vld [vmem:[#allocation2 + $0x50] sm:$0xff] }
  0x78   :  { %1735 = vmatprep.subr.bf16.mxu0 %v2254_v25  ;;  %1817 = vmatprep.subr.bf16.mxu1 %v2256_v54  ;;  %v70_v52 = vld [vmem:[#allocation2 + $0x70] sm:$0xff]  ;;  %v2462_v25 = vcombine.high %v2450_v45, %v2450_v45  ;;  %v67_v54 = vld [vmem:[#allocation2 + $0x58] sm:$0xff] }
  0x79   :  { %v2066_v58 = vcombine.high %v66_v51, %v70_v52  ;;  %v2065_v0 = vcombine.low %v66_v51, %v70_v52  ;;  %v2067_v1 = vcombine.low %v67_v54, %v71_v55 }
  0x7b   :  { %1736 = vmatpush1.bf16.msra.mxu0 %v2253_v59  ;;  %1818 = vmatpush1.bf16.msra.mxu1 %v2255_v60  ;;  %v2068_v59 = vcombine.high %v67_v54, %v71_v55  ;;  %v74_v60 = vld [vmem:[#allocation2 + $0x90] sm:$0xff] }
  0x7c   :  { %1737 = vmatprep.subr.bf16.mxu0 %v2262_v61  ;;  %1819 = vmatprep.subr.bf16.mxu1 %v2264_v62  ;;  %v78_v61 = vld [vmem:[#allocation2 + $0xb0] sm:$0xff]  ;;  %v75_v62 = vld [vmem:[#allocation2 + $0x98] sm:$0xff] }
  0x7d   :  { %v2074_v2 = vcombine.high %v74_v60, %v78_v61  ;;  %v2073_v9 = vcombine.low %v74_v60, %v78_v61  ;;  %v2075_v10 = vcombine.low %v75_v62, %v79_v63 }
  0x7f   :  { %1738 = vmatpush1.bf16.msra.mxu0 %v2261_v3  ;;  %1820 = vmatpush1.bf16.msra.mxu1 %v2263_v4  ;;  %v2076_v3 = vcombine.high %v75_v62, %v79_v63  ;;  %v82_v4 = vld [vmem:[#allocation2 + $0xd0] sm:$0xff] }
  0x80   :  { %1739 = vmatprep.subr.bf16.mxu0 %v2270_v5  ;;  %1821 = vmatprep.subr.bf16.mxu1 %v2272_v6  ;;  %v86_v5 = vld [vmem:[#allocation2 + $0xf0] sm:$0xff]  ;;  %v83_v6 = vld [vmem:[#allocation2 + $0xd8] sm:$0xff] }
  0x81   :  { %v2082_v11 = vcombine.high %v82_v4, %v86_v5  ;;  %v2081_v17 = vcombine.low %v82_v4, %v86_v5  ;;  %v2083_v18 = vcombine.low %v83_v6, %v87_v8 }
  0x83   :  { %1740 = vmatpush1.bf16.msra.mxu0 %v2269_v12  ;;  %1822 = vmatpush1.bf16.msra.mxu1 %v2271_v13  ;;  %v2084_v12 = vcombine.high %v83_v6, %v87_v8  ;;  %v90_v13 = vld [vmem:[#allocation2 + $0x110] sm:$0xff] }
  0x84   :  { %1741 = vmatprep.subr.bf16.mxu0 %v2278_v14  ;;  %1823 = vmatprep.subr.bf16.mxu1 %v2280_v15  ;;  %v94_v14 = vld [vmem:[#allocation2 + $0x130] sm:$0xff]  ;;  %v91_v15 = vld [vmem:[#allocation2 + $0x118] sm:$0xff] }
  0x85   :  { %v2090_v19 = vcombine.high %v90_v13, %v94_v14  ;;  %v2089_v24 = vcombine.low %v90_v13, %v94_v14  ;;  %v2091_v26 = vcombine.low %v91_v15, %v95_v16 }
  0x87   :  { %1742 = vmatpush1.bf16.msra.mxu0 %v2277_v20  ;;  %1824 = vmatpush1.bf16.msra.mxu1 %v2279_v21  ;;  %v98_v20 = vld [vmem:[#allocation2 + $0x150] sm:$0xff] }
  0x88   :  { %1743 = vmatprep.subr.bf16.mxu0 %v2286_v22  ;;  %1825 = vmatprep.subr.bf16.mxu1 %v2288_v23  ;;  %v102_v21 = vld [vmem:[#allocation2 + $0x170] sm:$0xff]  ;;  %v99_v22 = vld [vmem:[#allocation2 + $0x158] sm:$0xff] }
  0x89   :  { %v103_v23 = vld [vmem:[#allocation2 + $0x178] sm:$0xff]  ;;  %v2098_v27 = vcombine.high %v98_v20, %v102_v21  ;;  %v2097_v33 = vcombine.low %v98_v20, %v102_v21 }
  0x8a   :  { %v2100_v28 = vcombine.high %v99_v22, %v103_v23  ;;  %v2099_v34 = vcombine.low %v99_v22, %v103_v23 }
  0x8b   :  { %1744 = vmatpush1.bf16.msra.mxu0 %v2285_v29  ;;  %1826 = vmatpush1.bf16.msra.mxu1 %v2287_v30  ;;  %v106_v29 = vld [vmem:[#allocation2 + $0x190] sm:$0xff] }
  0x8c   :  { %1745 = vmatprep.subr.bf16.mxu0 %v2294_v31  ;;  %1827 = vmatprep.subr.bf16.mxu1 %v2296_v32  ;;  %v110_v30 = vld [vmem:[#allocation2 + $0x1b0] sm:$0xff]  ;;  %v107_v31 = vld [vmem:[#allocation2 + $0x198] sm:$0xff] }
  0x8d   :  { %v111_v32 = vld [vmem:[#allocation2 + $0x1b8] sm:$0xff]  ;;  %v2106_v35 = vcombine.high %v106_v29, %v110_v30  ;;  %v2105_v43 = vcombine.low %v106_v29, %v110_v30 }
  0x8e   :  { %v2108_v36 = vcombine.high %v107_v31, %v111_v32  ;;  %v2107_v44 = vcombine.low %v107_v31, %v111_v32 }
  0x8f   :  { %1746 = vmatpush1.bf16.msra.mxu0 %v2293_v37  ;;  %1828 = vmatpush1.bf16.msra.mxu1 %v2295_v39  ;;  %v114_v37 = vld [vmem:[#allocation2 + $0x1d0] sm:$0xff] }
  0x90   :  { %1747 = vmatprep.subr.bf16.mxu0 %v2302_v41  ;;  %1829 = vmatprep.subr.bf16.mxu1 %v2304_v42  ;;  %v118_v39 = vld [vmem:[#allocation2 + $0x1f0] sm:$0xff]  ;;  %v115_v41 = vld [vmem:[#allocation2 + $0x1d8] sm:$0xff] }
  0x91   :  { %v119_v42 = vld [vmem:[#allocation2 + $0x1f8] sm:$0xff]  ;;  %v2114_v46 = vcombine.high %v114_v37, %v118_v39  ;;  %v2113_v51 = vcombine.low %v114_v37, %v118_v39 }
  0x92   :  { %v2116_v47 = vcombine.high %v115_v41, %v119_v42  ;;  %v2115_v52 = vcombine.low %v115_v41, %v119_v42 }
  0x93   :  { %1748 = vmatpush1.bf16.msra.mxu0 %v2301_v48  ;;  %1830 = vmatpush1.bf16.msra.mxu1 %v2303_v38  ;;  %v122_v48 = vld [vmem:[#allocation2 + $0x210] sm:$0xff] }
  0x94   :  { %1840 = vmatprep.subr.bf16.mxu0 %v2058_v40  ;;  %1922 = vmatprep.subr.bf16.mxu1 %v2060_v49  ;;  %v126_v38 = vld [vmem:[#allocation2 + $0x230] sm:$0xff]  ;;  %v123_v40 = vld [vmem:[#allocation2 + $0x218] sm:$0xff] }
  0x95   :  { %v127_v49 = vld [vmem:[#allocation2 + $0x238] sm:$0xff]  ;;  %v2122_v54 = vcombine.high %v122_v48, %v126_v38  ;;  %v2121_v60 = vcombine.low %v122_v48, %v126_v38 }
  0x96   :  { %1750 = vmatmul.mubr.bf16.vlgmr.msra.gmra.mrb[0].mxu0 %v2462_v25  ;;  %1832 = vmatmul.mubr.bf16.vlgmr.msra.gmra.mrb[0].mxu1 %v2462_v25  ;;  %v2124_v55 = vcombine.high %v123_v40, %v127_v49  ;;  %v2123_v61 = vcombine.low %v123_v40, %v127_v49 }
  0x97   :  { %1841 = vmatpush1.bf16.msra.mxu0 %v2057_v56  ;;  %1923 = vmatpush1.bf16.msra.mxu1 %v2059_v57  ;;  %v130_v56 = vld [vmem:[#allocation2 + $0x250] sm:$0xff] }
  0x98   :  { %1842 = vmatprep.subr.bf16.mxu0 %v2066_v58  ;;  %1924 = vmatprep.subr.bf16.mxu1 %v2068_v59  ;;  %v134_v57 = vld [vmem:[#allocation2 + $0x270] sm:$0xff]  ;;  %v131_v58 = vld [vmem:[#allocation2 + $0x258] sm:$0xff] }
  0x99   :  { %1872 = vmatprep.mubr.bf16.mxu0 %v2443_v50  ;;  %1954 = vmatprep.mubr.bf16.mxu1 %v2443_v50  ;;  %v2092_v50 = vcombine.high %v91_v15, %v95_v16  ;;  %v135_v59 = vld [vmem:[#allocation2 + $0x278] sm:$0xff]  ;;  %v2130_v62 = vcombine.high %v130_v56, %v134_v57  ;;  %v2129_v4 = vcombine.low %v130_v56, %v134_v57 }
  0x9a   :  { %v2132_v63 = vcombine.high %v131_v58, %v135_v59  ;;  %v2131_v5 = vcombine.low %v131_v58, %v135_v59 }
  0x9b   :  { %1843 = vmatpush1.bf16.msra.mxu0 %v2065_v0  ;;  %1925 = vmatpush1.bf16.msra.mxu1 %v2067_v1  ;;  %v138_v0 = vld [vmem:[#allocation2 + $0x290] sm:$0xff] }
  0x9c   :  { %1844 = vmatprep.subr.bf16.mxu0 %v2074_v2  ;;  %1926 = vmatprep.subr.bf16.mxu1 %v2076_v3  ;;  %v142_v1 = vld [vmem:[#allocation2 + $0x2b0] sm:$0xff]  ;;  %v139_v2 = vld [vmem:[#allocation2 + $0x298] sm:$0xff] }
  0x9d   :  { %v143_v3 = vld [vmem:[#allocation2 + $0x2b8] sm:$0xff]  ;;  %v2138_v6 = vcombine.high %v138_v0, %v142_v1  ;;  %v2137_v13 = vcombine.low %v138_v0, %v142_v1 }
  0x9e   :  { %v2140_v8 = vcombine.high %v139_v2, %v143_v3  ;;  %v2139_v14 = vcombine.low %v139_v2, %v143_v3 }
  0x9f   :  { %1845 = vmatpush1.bf16.msra.mxu0 %v2073_v9  ;;  %1927 = vmatpush1.bf16.msra.mxu1 %v2075_v10  ;;  %v146_v9 = vld [vmem:[#allocation2 + $0x2d0] sm:$0xff] }
  0xa0   :  { %1846 = vmatprep.subr.bf16.mxu0 %v2082_v11  ;;  %1928 = vmatprep.subr.bf16.mxu1 %v2084_v12  ;;  %v150_v10 = vld [vmem:[#allocation2 + $0x2f0] sm:$0xff]  ;;  %v147_v11 = vld [vmem:[#allocation2 + $0x2d8] sm:$0xff] }
  0xa1   :  { %v151_v12 = vld [vmem:[#allocation2 + $0x2f8] sm:$0xff]  ;;  %v2146_v15 = vcombine.high %v146_v9, %v150_v10  ;;  %v2145_v20 = vcombine.low %v146_v9, %v150_v10 }
  0xa2   :  { %v2148_v16 = vcombine.high %v147_v11, %v151_v12  ;;  %v2147_v21 = vcombine.low %v147_v11, %v151_v12 }
  0xa3   :  { %1847 = vmatpush1.bf16.msra.mxu0 %v2081_v17  ;;  %1929 = vmatpush1.bf16.msra.mxu1 %v2083_v18  ;;  %v154_v17 = vld [vmem:[#allocation2 + $0x310] sm:$0xff] }
  0xa4   :  { %1848 = vmatprep.subr.bf16.mxu0 %v2090_v19  ;;  %1930 = vmatprep.subr.bf16.mxu1 %v2092_v50  ;;  %v158_v18 = vld [vmem:[#allocation2 + $0x330] sm:$0xff]  ;;  %v155_v19 = vld [vmem:[#allocation2 + $0x318] sm:$0xff] }
  0xa5   :  { %v159_v50 = vld [vmem:[#allocation2 + $0x338] sm:$0xff]  ;;  %v2154_v22 = vcombine.high %v154_v17, %v158_v18  ;;  %v2153_v29 = vcombine.low %v154_v17, %v158_v18 }
  0xa6   :  { %v2156_v23 = vcombine.high %v155_v19, %v159_v50  ;;  %v2155_v30 = vcombine.low %v155_v19, %v159_v50  ;;  %v218_v50 = vld [vmem:[#allocation2 + $0x510] sm:$0xff] }
  0xa7   :  { %1849 = vmatpush1.bf16.msra.mxu0 %v2089_v24  ;;  %1931 = vmatpush1.bf16.msra.mxu1 %v2091_v26  ;;  %v162_v24 = vld [vmem:[#allocation2 + $0x350] sm:$0xff] }
  0xa8   :  { %1850 = vmatprep.subr.bf16.mxu0 %v2098_v27  ;;  %1932 = vmatprep.subr.bf16.mxu1 %v2100_v28  ;;  %v166_v26 = vld [vmem:[#allocation2 + $0x370] sm:$0xff]  ;;  %v163_v27 = vld [vmem:[#allocation2 + $0x358] sm:$0xff] }
  0xa9   :  { %v167_v28 = vld [vmem:[#allocation2 + $0x378] sm:$0xff]  ;;  %v2162_v31 = vcombine.high %v162_v24, %v166_v26  ;;  %v2161_v37 = vcombine.low %v162_v24, %v166_v26 }
  0xaa   :  { %v2164_v32 = vcombine.high %v163_v27, %v167_v28  ;;  %v2163_v39 = vcombine.low %v163_v27, %v167_v28  ;;  %v226_v27 = vld [vmem:[#allocation2 + $0x550] sm:$0xff] }
  0xab   :  { %1851 = vmatpush1.bf16.msra.mxu0 %v2097_v33  ;;  %1933 = vmatpush1.bf16.msra.mxu1 %v2099_v34  ;;  %v170_v33 = vld [vmem:[#allocation2 + $0x390] sm:$0xff] }
  0xac   :  { %1852 = vmatprep.subr.bf16.mxu0 %v2106_v35  ;;  %1934 = vmatprep.subr.bf16.mxu1 %v2108_v36  ;;  %v174_v34 = vld [vmem:[#allocation2 + $0x3b0] sm:$0xff]  ;;  %v171_v35 = vld [vmem:[#allocation2 + $0x398] sm:$0xff] }
  0xad   :  { %v175_v36 = vld [vmem:[#allocation2 + $0x3b8] sm:$0xff]  ;;  %v2170_v41 = vcombine.high %v170_v33, %v174_v34  ;;  %v2169_v48 = vcombine.low %v170_v33, %v174_v34  ;;  %v230_v28 = vld [vmem:[#allocation2 + $0x570] sm:$0xff] }
  0xae   :  { %v2172_v42 = vcombine.high %v171_v35, %v175_v36  ;;  %v2171_v38 = vcombine.low %v171_v35, %v175_v36  ;;  %v2226_v33 = vcombine.high %v226_v27, %v230_v28  ;;  %v234_v35 = vld [vmem:[#allocation2 + $0x590] sm:$0xff] }
  0xaf   :  { %1853 = vmatpush1.bf16.msra.mxu0 %v2105_v43  ;;  %1935 = vmatpush1.bf16.msra.mxu1 %v2107_v44  ;;  %v178_v43 = vld [vmem:[#allocation2 + $0x3d0] sm:$0xff] }
  0xb0   :  { %1854 = vmatprep.subr.bf16.mxu0 %v2114_v46  ;;  %1936 = vmatprep.subr.bf16.mxu1 %v2116_v47  ;;  %v182_v44 = vld [vmem:[#allocation2 + $0x3f0] sm:$0xff]  ;;  %v179_v46 = vld [vmem:[#allocation2 + $0x3d8] sm:$0xff] }
  0xb1   :  { %v183_v47 = vld [vmem:[#allocation2 + $0x3f8] sm:$0xff]  ;;  %v2178_v40 = vcombine.high %v178_v43, %v182_v44  ;;  %v2177_v56 = vcombine.low %v178_v43, %v182_v44  ;;  %v238_v36 = vld [vmem:[#allocation2 + $0x5b0] sm:$0xff] }
  0xb2   :  { %v2180_v49 = vcombine.high %v179_v46, %v183_v47  ;;  %v2179_v57 = vcombine.low %v179_v46, %v183_v47  ;;  %v2234_v43 = vcombine.high %v234_v35, %v238_v36  ;;  %v242_v46 = vld [vmem:[#allocation2 + $0x5d0] sm:$0xff] }
  0xb3   :  { %1855 = vmatpush1.bf16.msra.mxu0 %v2113_v51  ;;  %1937 = vmatpush1.bf16.msra.mxu1 %v2115_v52  ;;  %v186_v51 = vld [vmem:[#allocation2 + $0x410] sm:$0xff] }
  0xb4   :  { %1856 = vmatprep.subr.bf16.mxu0 %v2122_v54  ;;  %1938 = vmatprep.subr.bf16.mxu1 %v2124_v55  ;;  %v190_v52 = vld [vmem:[#allocation2 + $0x430] sm:$0xff]  ;;  %v187_v54 = vld [vmem:[#allocation2 + $0x418] sm:$0xff] }
  0xb5   :  { %v191_v55 = vld [vmem:[#allocation2 + $0x438] sm:$0xff]  ;;  %v2186_v58 = vcombine.high %v186_v51, %v190_v52  ;;  %v2185_v0 = vcombine.low %v186_v51, %v190_v52  ;;  %v246_v47 = vld [vmem:[#allocation2 + $0x5f0] sm:$0xff] }
  0xb6   :  { %v2188_v59 = vcombine.high %v187_v54, %v191_v55  ;;  %v2187_v1 = vcombine.low %v187_v54, %v191_v55  ;;  %v2242_v51 = vcombine.high %v242_v46, %v246_v47  ;;  %v250_v54 = vld [vmem:[#allocation2 + $0x610] sm:$0xff] }
  0xb7   :  { %1857 = vmatpush1.bf16.msra.mxu0 %v2121_v60  ;;  %1939 = vmatpush1.bf16.msra.mxu1 %v2123_v61  ;;  %v194_v60 = vld [vmem:[#allocation2 + $0x450] sm:$0xff] }
  0xb8   :  { %1858 = vmatprep.subr.bf16.mxu0 %v2130_v62  ;;  %1940 = vmatprep.subr.bf16.mxu1 %v2132_v63  ;;  %v198_v61 = vld [vmem:[#allocation2 + $0x470] sm:$0xff]  ;;  %v195_v62 = vld [vmem:[#allocation2 + $0x458] sm:$0xff] }
  0xb9   :  { %v199_v63 = vld [vmem:[#allocation2 + $0x478] sm:$0xff]  ;;  %v2194_v2 = vcombine.high %v194_v60, %v198_v61  ;;  %v2193_v9 = vcombine.low %v194_v60, %v198_v61  ;;  %v254_v55 = vld [vmem:[#allocation2 + $0x630] sm:$0xff] }
  0xba   :  { %v2196_v3 = vcombine.high %v195_v62, %v199_v63  ;;  %v2195_v10 = vcombine.low %v195_v62, %v199_v63  ;;  %v2250_v60 = vcombine.high %v250_v54, %v254_v55  ;;  %v258_v62 = vld [vmem:[#allocation2 + $0x650] sm:$0xff] }
  0xbb   :  { %1859 = vmatpush1.bf16.msra.mxu0 %v2129_v4  ;;  %1941 = vmatpush1.bf16.msra.mxu1 %v2131_v5  ;;  %v202_v4 = vld [vmem:[#allocation2 + $0x490] sm:$0xff] }
  0xbc   :  { %1860 = vmatprep.subr.bf16.mxu0 %v2138_v6  ;;  %1942 = vmatprep.subr.bf16.mxu1 %v2140_v8  ;;  %v206_v5 = vld [vmem:[#allocation2 + $0x4b0] sm:$0xff]  ;;  %v203_v6 = vld [vmem:[#allocation2 + $0x498] sm:$0xff] }
  0xbd   :  { %v207_v8 = vld [vmem:[#allocation2 + $0x4b8] sm:$0xff]  ;;  %v2202_v11 = vcombine.high %v202_v4, %v206_v5  ;;  %v2201_v17 = vcombine.low %v202_v4, %v206_v5  ;;  %v262_v63 = vld [vmem:[#allocation2 + $0x670] sm:$0xff] }
  0xbe   :  { %v2204_v12 = vcombine.high %v203_v6, %v207_v8  ;;  %v2258_v4 = vcombine.high %v258_v62, %v262_v63 }
  0xbf   :  { %1861 = vmatpush1.bf16.msra.mxu0 %v2137_v13  ;;  %1943 = vmatpush1.bf16.msra.mxu1 %v2139_v14  ;;  %v210_v13 = vld [vmem:[#allocation2 + $0x4d0] sm:$0xff] }
  0xc0   :  { %1862 = vmatprep.subr.bf16.mxu0 %v2146_v15  ;;  %1944 = vmatprep.subr.bf16.mxu1 %v2148_v16  ;;  %v214_v14 = vld [vmem:[#allocation2 + $0x4f0] sm:$0xff]  ;;  %v211_v15 = vld [vmem:[#allocation2 + $0x4d8] sm:$0xff] }
  0xc1   :  { %v215_v16 = vld [vmem:[#allocation2 + $0x4f8] sm:$0xff]  ;;  %v2210_v18 = vcombine.high %v210_v13, %v214_v14 }
  0xc2   :  { %v2212_v19 = vcombine.high %v211_v15, %v215_v16  ;;  %v2211_v24 = vcombine.low %v211_v15, %v215_v16  ;;  %v274_v15 = vld [vmem:[#allocation2 + $0x6d0] sm:$0xff] }
  0xc3   :  { %1863 = vmatpush1.bf16.msra.mxu0 %v2145_v20  ;;  %1945 = vmatpush1.bf16.msra.mxu1 %v2147_v21  ;;  %v222_v20 = vld [vmem:[#allocation2 + $0x530] sm:$0xff]  ;;  %v219_v21 = vld [vmem:[#allocation2 + $0x518] sm:$0xff] }
  0xc4   :  { %1864 = vmatprep.subr.bf16.mxu0 %v2154_v22  ;;  %1946 = vmatprep.subr.bf16.mxu1 %v2156_v23  ;;  %v223_v22 = vld [vmem:[#allocation2 + $0x538] sm:$0xff]  ;;  %v2209_v23 = vcombine.low %v210_v13, %v214_v14  ;;  %v2218_v26 = vcombine.high %v218_v50, %v222_v20  ;;  %v278_v16 = vld [vmem:[#allocation2 + $0x6f0] sm:$0xff] }
  0xc7   :  { %1865 = vmatpush1.bf16.msra.mxu0 %v2153_v29  ;;  %1947 = vmatpush1.bf16.msra.mxu1 %v2155_v30  ;;  %v227_v29 = vld [vmem:[#allocation2 + $0x558] sm:$0xff] }
  0xc8   :  { %1866 = vmatprep.subr.bf16.mxu0 %v2162_v31  ;;  %1948 = vmatprep.subr.bf16.mxu1 %v2164_v32  ;;  %v231_v30 = vld [vmem:[#allocation2 + $0x578] sm:$0xff]  ;;  %v2217_v31 = vcombine.low %v218_v50, %v222_v20  ;;  %v2219_v32 = vcombine.low %v219_v21, %v223_v22  ;;  %v2274_v50 = vcombine.high %v274_v15, %v278_v16 }
  0xc9   :  { %v2228_v34 = vcombine.high %v227_v29, %v231_v30 }
  0xcb   :  { %1867 = vmatpush1.bf16.msra.mxu0 %v2161_v37  ;;  %1949 = vmatpush1.bf16.msra.mxu1 %v2163_v39  ;;  %v235_v37 = vld [vmem:[#allocation2 + $0x598] sm:$0xff] }
  0xcc   :  { %1868 = vmatprep.subr.bf16.mxu0 %v2170_v41  ;;  %1950 = vmatprep.subr.bf16.mxu1 %v2172_v42  ;;  %v239_v39 = vld [vmem:[#allocation2 + $0x5b8] sm:$0xff]  ;;  %v2225_v41 = vcombine.low %v226_v27, %v230_v28  ;;  %v2227_v42 = vcombine.low %v227_v29, %v231_v30  ;;  %v290_v29 = vld [vmem:[#allocation2 + $0x750] sm:$0xff] }
  0xcd   :  { %v2236_v44 = vcombine.high %v235_v37, %v239_v39  ;;  %v294_v30 = vld [vmem:[#allocation2 + $0x770] sm:$0xff] }
  0xcf   :  { %1869 = vmatpush1.bf16.msra.mxu0 %v2169_v48  ;;  %1951 = vmatpush1.bf16.msra.mxu1 %v2171_v38  ;;  %v243_v48 = vld [vmem:[#allocation2 + $0x5d8] sm:$0xff] }
  0xd0   :  { %1870 = vmatprep.subr.bf16.mxu0 %v2178_v40  ;;  %1952 = vmatprep.subr.bf16.mxu1 %v2180_v49  ;;  %v247_v38 = vld [vmem:[#allocation2 + $0x5f8] sm:$0xff]  ;;  %v2233_v40 = vcombine.low %v234_v35, %v238_v36  ;;  %v2235_v49 = vcombine.low %v235_v37, %v239_v39  ;;  %v2290_v35 = vcombine.high %v290_v29, %v294_v30  ;;  %v298_v37 = vld [vmem:[#allocation2 + $0x790] sm:$0xff] }
  0xd1   :  { %v2244_v52 = vcombine.high %v243_v48, %v247_v38  ;;  %v302_v39 = vld [vmem:[#allocation2 + $0x7b0] sm:$0xff] }
  0xd3   :  { %1871 = vmatpush1.bf16.msra.mxu0 %v2177_v56  ;;  %1953 = vmatpush1.bf16.msra.mxu1 %v2179_v57  ;;  %v251_v56 = vld [vmem:[#allocation2 + $0x618] sm:$0xff] }
  0xd4   :  { %1881 = vmatprep.subr.bf16.mxu0 %v2186_v58  ;;  %1963 = vmatprep.subr.bf16.mxu1 %v2188_v59  ;;  %v255_v57 = vld [vmem:[#allocation2 + $0x638] sm:$0xff]  ;;  %v2241_v58 = vcombine.low %v242_v46, %v246_v47  ;;  %v2243_v59 = vcombine.low %v243_v48, %v247_v38  ;;  %v2298_v46 = vcombine.high %v298_v37, %v302_v39  ;;  %v306_v48 = vld [vmem:[#allocation2 + $0x7d0] sm:$0xff] }
  0xd5   :  { %v2252_v61 = vcombine.high %v251_v56, %v255_v57  ;;  %v310_v38 = vld [vmem:[#allocation2 + $0x7f0] sm:$0xff] }
  0xd6   :  { %1873 = vmatmul.mubr.bf16.vlgmr.msra.gmra.mrb[4].mxu0 %v2450_v45  ;;  %1955 = vmatmul.mubr.bf16.vlgmr.msra.gmra.mrb[4].mxu1 %v2450_v45  ;;  %v2203_v45 = vcombine.low %v203_v6, %v207_v8  ;;  %v266_v6 = vld [vmem:[#allocation2 + $0x690] sm:$0xff] }
  0xd7   :  { %1882 = vmatpush1.bf16.msra.mxu0 %v2185_v0  ;;  %1964 = vmatpush1.bf16.msra.mxu1 %v2187_v1  ;;  %v259_v0 = vld [vmem:[#allocation2 + $0x658] sm:$0xff]  ;;  %v270_v8 = vld [vmem:[#allocation2 + $0x6b0] sm:$0xff] }
  0xd8   :  { %1883 = vmatprep.subr.bf16.mxu0 %v2194_v2  ;;  %1965 = vmatprep.subr.bf16.mxu1 %v2196_v3  ;;  %v263_v1 = vld [vmem:[#allocation2 + $0x678] sm:$0xff]  ;;  %v2249_v2 = vcombine.low %v250_v54, %v254_v55  ;;  %v2251_v3 = vcombine.low %v251_v56, %v255_v57  ;;  %v2266_v13 = vcombine.high %v266_v6, %v270_v8 }
  0xd9   :  { %1913 = vmatprep.mubr.bf16.mxu0 %v2454_v53  ;;  %1995 = vmatprep.mubr.bf16.mxu1 %v2454_v53  ;;  %v2220_v53 = vcombine.high %v219_v21, %v223_v22  ;;  %v2260_v5 = vcombine.high %v259_v0, %v263_v1  ;;  %v282_v21 = vld [vmem:[#allocation2 + $0x710] sm:$0xff]  ;;  %v2306_v54 = vcombine.high %v306_v48, %v310_v38 }
  0xda   :  { %v286_v22 = vld [vmem:[#allocation2 + $0x730] sm:$0xff]  ;;  %v2305_v56 = vcombine.low %v306_v48, %v310_v38 }
  0xdb   :  { %1884 = vmatpush1.bf16.msra.mxu0 %v2193_v9  ;;  %1966 = vmatpush1.bf16.msra.mxu1 %v2195_v10  ;;  %v267_v9 = vld [vmem:[#allocation2 + $0x698] sm:$0xff]  ;;  %v2282_v27 = vcombine.high %v282_v21, %v286_v22 }
  0xdc   :  { %1885 = vmatprep.subr.bf16.mxu0 %v2202_v11  ;;  %1967 = vmatprep.subr.bf16.mxu1 %v2204_v12  ;;  %v271_v10 = vld [vmem:[#allocation2 + $0x6b8] sm:$0xff]  ;;  %v2257_v11 = vcombine.low %v258_v62, %v262_v63  ;;  %v2259_v12 = vcombine.low %v259_v0, %v263_v1  ;;  %v328_v62 = vsub.s32 3, %v2429_v7 }
  0xdd   :  { %v2268_v14 = vcombine.high %v267_v9, %v271_v10 }
  0xdf   :  { %1886 = vmatpush1.bf16.msra.mxu0 %v2201_v17  ;;  %1968 = vmatpush1.bf16.msra.mxu1 %v2203_v45  ;;  %v275_v17 = vld [vmem:[#allocation2 + $0x6d8] sm:$0xff] }
  0xe0   :  { %1887 = vmatprep.subr.bf16.mxu0 %v2210_v18  ;;  %1969 = vmatprep.subr.bf16.mxu1 %v2212_v19  ;;  %v279_v45 = vld [vmem:[#allocation2 + $0x6f8] sm:$0xff]  ;;  %v2265_v18 = vcombine.low %v266_v6, %v270_v8  ;;  %v2267_v19 = vcombine.low %v267_v9, %v271_v10 }
  0xe1   :  { %v2276_v20 = vcombine.high %v275_v17, %v279_v45 }
  0xe3   :  { %1888 = vmatpush1.bf16.msra.mxu0 %v2209_v23  ;;  %1970 = vmatpush1.bf16.msra.mxu1 %v2211_v24  ;;  %v283_v23 = vld [vmem:[#allocation2 + $0x718] sm:$0xff] }
  0xe4   :  { %1889 = vmatprep.subr.bf16.mxu0 %v2218_v26  ;;  %1971 = vmatprep.subr.bf16.mxu1 %v2220_v53  ;;  %v287_v24 = vld [vmem:[#allocation2 + $0x738] sm:$0xff]  ;;  %v2273_v26 = vcombine.low %v274_v15, %v278_v16  ;;  %v2275_v53 = vcombine.low %v275_v17, %v279_v45 }
  0xe5   :  { %v2284_v28 = vcombine.high %v283_v23, %v287_v24 }
  0xe7   :  { %1890 = vmatpush1.bf16.msra.mxu0 %v2217_v31  ;;  %1972 = vmatpush1.bf16.msra.mxu1 %v2219_v32  ;;  %v291_v31 = vld [vmem:[#allocation2 + $0x758] sm:$0xff] }
  0xe8   :  { %1891 = vmatprep.subr.bf16.mxu0 %v2226_v33  ;;  %1973 = vmatprep.subr.bf16.mxu1 %v2228_v34  ;;  %v295_v32 = vld [vmem:[#allocation2 + $0x778] sm:$0xff]  ;;  %v2281_v33 = vcombine.low %v282_v21, %v286_v22  ;;  %v2283_v34 = vcombine.low %v283_v23, %v287_v24  ;;  %v336_v21 = vsub.s32 5, %v2429_v7  ;;  %v344_v22 = vsub.s32 7, %v2429_v7 }
  0xe9   :  { %v2292_v36 = vcombine.high %v291_v31, %v295_v32 }
  0xeb   :  { %1892 = vmatpush1.bf16.msra.mxu0 %v2225_v41  ;;  %1974 = vmatpush1.bf16.msra.mxu1 %v2227_v42  ;;  %v299_v41 = vld [vmem:[#allocation2 + $0x798] sm:$0xff] }
  0xec   :  { %1893 = vmatprep.subr.bf16.mxu0 %v2234_v43  ;;  %1975 = vmatprep.subr.bf16.mxu1 %v2236_v44  ;;  %v303_v42 = vld [vmem:[#allocation2 + $0x7b8] sm:$0xff]  ;;  %v2289_v43 = vcombine.low %v290_v29, %v294_v30  ;;  %v2291_v44 = vcombine.low %v291_v31, %v295_v32 }
  0xed   :  { %v2300_v47 = vcombine.high %v299_v41, %v303_v42 }
  0xef   :  { %1894 = vmatpush1.bf16.msra.mxu0 %v2233_v40  ;;  %1976 = vmatpush1.bf16.msra.mxu1 %v2235_v49  ;;  %v307_v40 = vld [vmem:[#allocation2 + $0x7d8] sm:$0xff] }
  0xf0   :  { %1895 = vmatprep.subr.bf16.mxu0 %v2242_v51  ;;  %1977 = vmatprep.subr.bf16.mxu1 %v2244_v52  ;;  %v311_v49 = vld [vmem:[#allocation2 + $0x7f8] sm:$0xff]  ;;  %v2297_v51 = vcombine.low %v298_v37, %v302_v39  ;;  %v2299_v52 = vcombine.low %v299_v41, %v303_v42 }
  0xf1   :  { %v2308_v55 = vcombine.high %v307_v40, %v311_v49  ;;  %v2307_v57 = vcombine.low %v307_v40, %v311_v49 }
  0xf3   :  { %1896 = vmatpush1.bf16.msra.mxu0 %v2241_v58  ;;  %1978 = vmatpush1.bf16.msra.mxu1 %v2243_v59  ;;  %v316_v58 = vsub.s32 0, %v2429_v7  ;;  %v312_v59 = vld [vmem:[%s2499_s2] sm:$0xff] }
  0xf4   :  { %1897 = vmatprep.subr.bf16.mxu0 %v2250_v60  ;;  %1979 = vmatprep.subr.bf16.mxu1 %v2252_v61  ;;  %v324_v60 = vsub.s32 2, %v2429_v7  ;;  %v320_v61 = vsub.s32 1, %v2429_v7 }
  0xf5   :  { %v317_v63 = vrot.slane %v312_v59, %v316_v58 }
  0xf6   :  { %v325_v0 = vrot.slane %v312_v59, %v324_v60  ;;  %v321_v1 = vrot.slane %v312_v59, %v320_v61 }
  0xf7   :  { %1898 = vmatpush1.bf16.msra.mxu0 %v2249_v2  ;;  %1980 = vmatpush1.bf16.msra.mxu1 %v2251_v3  ;;  %v329_v2 = vrot.slane %v312_v59, %v328_v62 }
  0xf8   :  { %1899 = vmatprep.subr.bf16.mxu0 %v2258_v4  ;;  %1981 = vmatprep.subr.bf16.mxu1 %v2260_v5 }
  0xfb   :  { %1900 = vmatpush1.bf16.msra.mxu0 %v2257_v11  ;;  %1982 = vmatpush1.bf16.msra.mxu1 %v2259_v12 }
  0xfc   :  { %1901 = vmatprep.subr.bf16.mxu0 %v2266_v13  ;;  %1983 = vmatprep.subr.bf16.mxu1 %v2268_v14 }
  0xff   :  { %1902 = vmatpush1.bf16.msra.mxu0 %v2265_v18  ;;  %1984 = vmatpush1.bf16.msra.mxu1 %v2267_v19 }
 0x100   :  { %1903 = vmatprep.subr.bf16.mxu0 %v2274_v50  ;;  %1985 = vmatprep.subr.bf16.mxu1 %v2276_v20  ;;  %v332_v50 = vsub.s32 4, %v2429_v7  ;;  %v340_v20 = vsub.s32 6, %v2429_v7 }
 0x102   :  { %v333_v23 = vrot.slane %v312_v59, %v332_v50  ;;  %v341_v24 = vrot.slane %v312_v59, %v340_v20 }
 0x103   :  { %1904 = vmatpush1.bf16.msra.mxu0 %v2273_v26  ;;  %1986 = vmatpush1.bf16.msra.mxu1 %v2275_v53  ;;  %v337_v26 = vrot.slane %v312_v59, %v336_v21  ;;  %v345_v53 = vrot.slane %v312_v59, %v344_v22 }
 0x104   :  { %1905 = vmatprep.subr.bf16.mxu0 %v2282_v27  ;;  %1987 = vmatprep.subr.bf16.mxu1 %v2284_v28 }
 0x107   :  { %1906 = vmatpush1.bf16.msra.mxu0 %v2281_v33  ;;  %1988 = vmatpush1.bf16.msra.mxu1 %v2283_v34 }
 0x108   :  { %1907 = vmatprep.subr.bf16.mxu0 %v2290_v35  ;;  %1989 = vmatprep.subr.bf16.mxu1 %v2292_v36 }
 0x10b   :  { %1908 = vmatpush1.bf16.msra.mxu0 %v2289_v43  ;;  %1990 = vmatpush1.bf16.msra.mxu1 %v2291_v44 }
 0x10c   :  { %1909 = vmatprep.subr.bf16.mxu0 %v2298_v46  ;;  %1991 = vmatprep.subr.bf16.mxu1 %v2300_v47 }
 0x10f   :  { %1910 = vmatpush1.bf16.msra.mxu0 %v2297_v51  ;;  %1992 = vmatpush1.bf16.msra.mxu1 %v2299_v52 }
 0x110   :  { %1911 = vmatprep.subr.bf16.mxu0 %v2306_v54  ;;  %1993 = vmatprep.subr.bf16.mxu1 %v2308_v55 }
 0x113   :  { %1912 = vmatpush1.bf16.msra.mxu0 %v2305_v56  ;;  %1994 = vmatpush1.bf16.msra.mxu1 %v2307_v57 }
 0x116   :  { %1914 = vmatmul.mubr.bf16.vlgmr.msra.gmra.mrb[4].mxu0 %v2462_v25  ;;  %1996 = vmatmul.mubr.bf16.vlgmr.msra.gmra.mrb[4].mxu1 %v2462_v25 }
 0x169   :  { %v1751_v3 = vpop.f32.mrb[0].mxu0  ;;  %v1833_v5 = vpop.f32.mrb[0].mxu1 }
 0x16a   :  { %v2317_v4 = vadd.f32 %v1751_v3, %v317_v63  ;;  %v1753_v25 = vpop.f32.mrb[1].mxu0  ;;  %v2319_v6 = vadd.f32 %v1833_v5, %v325_v0  ;;  %v1835_v9 = vpop.f32.mrb[1].mxu1 }
 0x16b   :  { %v2318_v8 = vadd.f32 %v1753_v25, %v321_v1  ;;  %v1755_v10 = vpop.f32.mrb[2].mxu0  ;;  %v2320_v12 = vadd.f32 %v1835_v9, %v329_v2  ;;  %v1837_v13 = vpop.f32.mrb[2].mxu1 }
 0x16c   :  { %v2004_v11 = vmax.f32 %v2317_v4, 0.0  ;;  %v1756_v14 = vpop.f32.mrb[3].mxu0  ;;  %v2006_v15 = vmax.f32 %v2319_v6, 0.0  ;;  %v1838_v17 = vpop.f32.mrb[3].mxu1 }
 0x16d   :  { %v2005_v16 = vmax.f32 %v2318_v8, 0.0  ;;  %v2007_v45 = vmax.f32 %v2320_v12, 0.0 }
 0x16f   :  { %v2313_v18 = vpack.c.bf16 %v2005_v16, %v2004_v11  ;;  %v2314_v19 = vpack.c.bf16 %v2007_v45, %v2006_v15 }
 0x171   :  { %2044 = vst [vmem:[%s2500_s3] sm:$0xff] %v2313_v18  ;;  %2045 = vst [vmem:[%s2500_s3 + $0x8] sm:$0xff] %v2314_v19 }
 0x1e9   :  { %v1915_v27 = vpop.f32.mrb[4].mxu0  ;;  %v1997_v29 = vpop.f32.mrb[4].mxu1 }
 0x1ea   :  { %v2321_v28 = vadd.f32 %v1915_v27, %v333_v23  ;;  %v1917_v30 = vpop.f32.mrb[5].mxu0  ;;  %v2323_v31 = vadd.f32 %v1997_v29, %v341_v24  ;;  %v1999_v33 = vpop.f32.mrb[5].mxu1 }
 0x1eb   :  { %v2322_v32 = vadd.f32 %v1917_v30, %v337_v26  ;;  %v1919_v34 = vpop.f32.mrb[6].mxu0  ;;  %v2324_v36 = vadd.f32 %v1999_v33, %v345_v53  ;;  %v2001_v37 = vpop.f32.mrb[6].mxu1 }
 0x1ec   :  { %v2008_v35 = vmax.f32 %v2321_v28, 0.0  ;;  %v1920_v39 = vpop.f32.mrb[7].mxu0  ;;  %v2010_v41 = vmax.f32 %v2323_v31, 0.0  ;;  %v2002_v43 = vpop.f32.mrb[7].mxu1 }
 0x1ed   :  { %v2009_v42 = vmax.f32 %v2322_v32, 0.0  ;;  %v2011_v7 = vmax.f32 %v2324_v36, 0.0 }
 0x1ef   :  { %v2315_v44 = vpack.c.bf16 %v2009_v42, %v2008_v35  ;;  %v2316_v46 = vpack.c.bf16 %v2011_v7, %v2010_v41 }
 0x1f1   :  { %2046 = vst [vmem:[%s2500_s3 + $0x10] sm:$0xff] %v2315_v44  ;;  %2047 = vst [vmem:[%s2500_s3 + $0x18] sm:$0xff] %v2316_v46 }
 0x1f2   :  { %2052 = vsyncpa [#allocation3], 1 }

</bundles_post_ra>
